<compile_context>
chip_gen: v6e
topology: v6e:2x2x1
jax: 0.10.0
libtpu: 0.0.40
codegen_flags: <defaults>
</compile_context>

<pallas_src>
import jax
import jax.numpy as jnp
from jax.experimental import pallas as pl
from jax.experimental.pallas import tpu as pltpu


# ----------------------------- geometry constants ---------------------------
W = 32            # image width; also the lane-slab row stride used throughout
K = 5             # conv kernel size
CIN1P = 8         # conv1 input channels: 3 zero-padded -> 8 (sublane tile)
OC1P = 8          # conv1 output channels: 6 zero-padded -> 8
OC2 = 16          # conv2 output channels (already a multiple of 8)

# Slab widths (lane extents) per stage, derived backwards from the 25 fc1 taps
# so every access below is an in-bounds, unit-stride lane slice.
LP2 = 4 * (4 * W + 4) + 1                  # 529: pooled conv2 slab
L2 = LP2 + 2 * (W + 1)                     # 595: conv2 + relu slab
LP1 = L2 + 2 * ((K - 1) * W + (K - 1))     # 859: pooled conv1 slab
L1 = LP1 + (W + 1)                         # 892: conv1 + relu slab
assert L1 + (K - 1) * W + (K - 1) == W * W  # conv1 reads exactly the 1024-px input


# ------------------------------ fused kernel --------------------------------

def _lenet_fused_kernel(x_ref, w1_ref, b1_ref, w2_ref, b2_ref,
                        fc1w_ref, fc1b_ref, fc2w_ref, fc2b_ref,
                        fc3w_ref, fc3b_ref, o_ref):
    """Whole LeNet forward for one sample; everything lives in VMEM/vregs."""
    xin = x_ref[0]                                        # (8, 1024) bf16

    # ---- conv1 (5x5, 3->6) + bias + ReLU, slab form -------------------------
    acc = jnp.zeros((OC1P, L1), jnp.float32)
    for ky in range(K):
        for kx in range(K):
            d = ky * W + kx
            acc = acc + jnp.dot(w1_ref[ky * K + kx], xin[:, d:d + L1],
                                preferred_element_type=jnp.float32)
    h1 = jnp.maximum(acc + b1_ref[...], 0.0)              # (8, 892) f32

    # ---- 2x2 max-pool: valid results land at stride-2 lane positions --------
    p1 = jnp.maximum(jnp.maximum(h1[:, 0:LP1], h1[:, 1:1 + LP1]),
                     jnp.maximum(h1[:, W:W + LP1], h1[:, W + 1:W + 1 + LP1]))
    p1 = p1.astype(jnp.bfloat16)                          # (8, 859)

    # ---- conv2 (5x5, 6->16) + bias + ReLU ------------------------------------
    acc = jnp.zeros((OC2, L2), jnp.float32)
    for ky in range(K):
        for kx in range(K):
            d = 2 * (ky * W + kx)
            acc = acc + jnp.dot(w2_ref[ky * K + kx], p1[:, d:d + L2],
                                preferred_element_type=jnp.float32)
    h2 = jnp.maximum(acc + b2_ref[...], 0.0)              # (16, 595) f32

    # ---- 2x2 max-pool: valid results land at stride-4 lane positions --------
    p2 = jnp.maximum(jnp.maximum(h2[:, 0:LP2], h2[:, 2:2 + LP2]),
                     jnp.maximum(h2[:, 2 * W:2 * W + LP2],
                                 h2[:, 2 * W + 2:2 * W + 2 + LP2]))  # (16, 529)

    # ---- flatten: gather the 25 valid taps (fc1 weight was re-laid to match) -
    cols = [p2[:, 4 * (a * W + b):4 * (a * W + b) + 1]
            for a in range(5) for b in range(5)]
    feat = jnp.concatenate(cols, axis=0).astype(jnp.bfloat16)        # (400, 1)

    # ---- fc1 -> relu -> fc2 -> relu -> fc3 -----------------------------------
    z = jnp.dot(fc1w_ref[...], feat, preferred_element_type=jnp.float32)
    z = jnp.maximum(z + fc1b_ref[...], 0.0).astype(jnp.bfloat16)     # (120, 1)
    z = jnp.dot(fc2w_ref[...], z, preferred_element_type=jnp.float32)
    z = jnp.maximum(z + fc2b_ref[...], 0.0).astype(jnp.bfloat16)     # (84, 1)
    z = jnp.dot(fc3w_ref[...], z, preferred_element_type=jnp.float32)
    z = z + fc3b_ref[...]                                            # (10, 1) f32

    o_ref[0] = z.astype(o_ref.dtype)


# --------------------------- parameter preparation ---------------------------

def init_params(key):
    """Deterministic parameter init matching the nn.Module's shapes (PyTorch layout)."""
    ks = jax.random.split(key, 10)

    def u(k, shape, fan_in):
        bound = 1.0 / jnp.sqrt(fan_in)
        return jax.random.uniform(k, shape, jnp.float32, -bound, bound)

    return {
        "conv1_w": u(ks[0], (6, 3, 5, 5), 3 * 5 * 5),
        "conv1_b": u(ks[1], (6,), 3 * 5 * 5),
        "conv2_w": u(ks[2], (16, 6, 5, 5), 6 * 5 * 5),
        "conv2_b": u(ks[3], (16,), 6 * 5 * 5),
        "fc1_w": u(ks[4], (120, 400), 400),
        "fc1_b": u(ks[5], (120,), 400),
        "fc2_w": u(ks[6], (84, 120), 120),
        "fc2_b": u(ks[7], (84,), 120),
        "fc3_w": u(ks[8], (10, 84), 84),
        "fc3_b": u(ks[9], (10,), 84),
    }


def prepare_params(params):
    """One-time (outside jit) weight re-layout / padding / bf16 cast."""
    f32, bf16 = jnp.float32, jnp.bfloat16

    # conv weights -> (K*K, OC_pad, CI_pad); piece k = ky*5+kx matches the
    # in-kernel shift d = ky*W + kx.
    w1 = jnp.transpose(params["conv1_w"], (2, 3, 0, 1)).reshape(K * K, 6, 3)
    w1 = jnp.pad(w1, ((0, 0), (0, OC1P - 6), (0, CIN1P - 3))).astype(bf16)
    b1 = jnp.pad(params["conv1_b"], (0, OC1P - 6)).reshape(OC1P, 1).astype(f32)

    w2 = jnp.transpose(params["conv2_w"], (2, 3, 0, 1)).reshape(K * K, OC2, 6)
    w2 = jnp.pad(w2, ((0, 0), (0, 0), (0, OC1P - 6))).astype(bf16)
    b2 = params["conv2_b"].reshape(OC2, 1).astype(f32)

    # fc1: PyTorch flatten order is (c, h, w); the kernel builds features in
    # (h, w, c) order, so permute the 400 input columns accordingly.
    fc1_w = params["fc1_w"].reshape(120, OC2, 5, 5)
    fc1_w = jnp.transpose(fc1_w, (0, 2, 3, 1)).reshape(120, 400).astype(bf16)

    return {
        "w1": w1, "b1": b1, "w2": w2, "b2": b2,
        "fc1_w": fc1_w,
        "fc1_b": params["fc1_b"].reshape(120, 1).astype(f32),
        "fc2_w": params["fc2_w"].astype(bf16),
        "fc2_b": params["fc2_b"].reshape(84, 1).astype(f32),
        "fc3_w": params["fc3_w"].astype(bf16),
        "fc3_b": params["fc3_b"].reshape(10, 1).astype(f32),
    }


# ------------------------------- forward pass --------------------------------

def net_forward(x_nchw, prep):
    """Forward pass of Net. x_nchw: (B, 3, 32, 32) f32 -> (B, 10) f32."""
    B = x_nchw.shape[0]
    # NCHW -> per-sample (C, H*W) slab: pure reshape (no transpose), pad the
    # channel dim to a sublane tile, bf16 to halve the input DMA.
    x = x_nchw.reshape(B, 3, W * W)
    x = jnp.pad(x, ((0, 0), (0, CIN1P - 3), (0, 0))).astype(jnp.bfloat16)

    out = pl.pallas_call(
        _lenet_fused_kernel,
        out_shape=jax.ShapeDtypeStruct((B, 10, 1), jnp.float32),
        grid=(B,),
        in_specs=[
            pl.BlockSpec((1, CIN1P, W * W), lambda i: (i, 0, 0)),      # x slab
            pl.BlockSpec((K * K, OC1P, CIN1P), lambda i: (0, 0, 0)),   # conv1 w
            pl.BlockSpec((OC1P, 1), lambda i: (0, 0)),                 # conv1 b
            pl.BlockSpec((K * K, OC2, OC1P), lambda i: (0, 0, 0)),     # conv2 w
            pl.BlockSpec((OC2, 1), lambda i: (0, 0)),                  # conv2 b
            pl.BlockSpec((120, 400), lambda i: (0, 0)),                # fc1 w
            pl.BlockSpec((120, 1), lambda i: (0, 0)),                  # fc1 b
            pl.BlockSpec((84, 120), lambda i: (0, 0)),                 # fc2 w
            pl.BlockSpec((84, 1), lambda i: (0, 0)),                   # fc2 b
            pl.BlockSpec((10, 84), lambda i: (0, 0)),                  # fc3 w
            pl.BlockSpec((10, 1), lambda i: (0, 0)),                   # fc3 b
        ],
        out_specs=pl.BlockSpec((1, 10, 1), lambda i: (i, 0, 0)),
        compiler_params=pltpu.CompilerParams(
            dimension_semantics=("parallel",),
            vmem_limit_bytes=32 * 1024 * 1024,
        ),
    )(x, prep["w1"], prep["b1"], prep["w2"], prep["b2"],
      prep["fc1_w"], prep["fc1_b"], prep["fc2_w"], prep["fc2_b"],
      prep["fc3_w"], prep["fc3_b"])

    return out[:, :, 0]


if __name__ == "__main__":
    key = jax.random.PRNGKey(0)
    k_x, k_p = jax.random.split(key)

    # CIFAR-10 shaped input (the fc sizes require 3x32x32); small batch = 2.
    x = jax.random.normal(k_x, (2, 3, 32, 32), dtype=jnp.float32)
    params = init_params(k_p)
    prep = prepare_params(params)          # one-time layout prep, outside jit

    fwd = jax.jit(net_forward)
    out = jax.block_until_ready(fwd(x, prep))

    assert out.shape == (2, 10) and out.dtype == jnp.float32
    print("KERNEL_OK")
</pallas_src>

<mosaic_0001>
module attributes {stable_mosaic.version = 11 : i64} {
  func.func @_lenet_fused_kernel(%arg0: i32, %arg1: memref<1x8x1024xbf16, #tpu.memory_space<vmem>>, %arg2: memref<25x8x8xbf16, #tpu.memory_space<vmem>>, %arg3: memref<8x1xf32, #tpu.memory_space<vmem>>, %arg4: memref<25x16x8xbf16, #tpu.memory_space<vmem>>, %arg5: memref<16x1xf32, #tpu.memory_space<vmem>>, %arg6: memref<120x400xbf16, #tpu.memory_space<vmem>>, %arg7: memref<120x1xf32, #tpu.memory_space<vmem>>, %arg8: memref<84x120xbf16, #tpu.memory_space<vmem>>, %arg9: memref<84x1xf32, #tpu.memory_space<vmem>>, %arg10: memref<10x84xbf16, #tpu.memory_space<vmem>>, %arg11: memref<10x1xf32, #tpu.memory_space<vmem>>, %arg12: memref<1x10x1xf32, #tpu.memory_space<vmem>>) attributes {dimension_semantics = [#tpu.dimension_semantics<parallel>], iteration_bounds = array<i64: 2>, scalar_prefetch = 0 : i64, scratch_operands = 0 : i64, tpu.core_type = #tpu.core_type<tc>, window_params = [{transform_indices = @transform_0, window_bounds = array<i64: 1, 8, 1024>}, {pipeline_mode = #tpu.pipeline_mode<synchronous>, transform_indices = @transform_1, window_bounds = array<i64: 25, 8, 8>}, {pipeline_mode = #tpu.pipeline_mode<synchronous>, transform_indices = @transform_2, window_bounds = array<i64: 8, 1>}, {pipeline_mode = #tpu.pipeline_mode<synchronous>, transform_indices = @transform_3, window_bounds = array<i64: 25, 16, 8>}, {pipeline_mode = #tpu.pipeline_mode<synchronous>, transform_indices = @transform_4, window_bounds = array<i64: 16, 1>}, {pipeline_mode = #tpu.pipeline_mode<synchronous>, transform_indices = @transform_5, window_bounds = array<i64: 120, 400>}, {pipeline_mode = #tpu.pipeline_mode<synchronous>, transform_indices = @transform_6, window_bounds = array<i64: 120, 1>}, {pipeline_mode = #tpu.pipeline_mode<synchronous>, transform_indices = @transform_7, window_bounds = array<i64: 84, 120>}, {pipeline_mode = #tpu.pipeline_mode<synchronous>, transform_indices = @transform_8, window_bounds = array<i64: 84, 1>}, {pipeline_mode = #tpu.pipeline_mode<synchronous>, transform_indices = @transform_9, window_bounds = array<i64: 10, 84>}, {pipeline_mode = #tpu.pipeline_mode<synchronous>, transform_indices = @transform_10, window_bounds = array<i64: 10, 1>}, {transform_indices = @transform_11, window_bounds = array<i64: 1, 10, 1>}]} {
    %c0 = arith.constant 0 : index
    %c0_0 = arith.constant 0 : index
    %c0_1 = arith.constant 0 : index
    %0 = vector.load %arg1[%c0, %c0_0, %c0_1] : memref<1x8x1024xbf16, #tpu.memory_space<vmem>>, vector<1x8x1024xbf16>
    %1 = vector.shape_cast %0 : vector<1x8x1024xbf16> to vector<8x1024xbf16>
    %cst = arith.constant 0.000000e+00 : f32
    %2 = vector.broadcast %cst : f32 to vector<8x892xf32>
    %c0_2 = arith.constant 0 : index
    %c0_3 = arith.constant 0 : index
    %c0_4 = arith.constant 0 : index
    %3 = vector.load %arg2[%c0_2, %c0_3, %c0_4] : memref<25x8x8xbf16, #tpu.memory_space<vmem>>, vector<1x8x8xbf16>
    %4 = vector.shape_cast %3 : vector<1x8x8xbf16> to vector<8x8xbf16>
    %5 = vector.extract_strided_slice %1 {offsets = [0, 0], sizes = [8, 892], strides = [1, 1]} : vector<8x1024xbf16> to vector<8x892xbf16>
    %cst_5 = arith.constant dense<0.000000e+00> : vector<8x892xf32>
    %6 = tpu.matmul %4, %5, %cst_5 {dimension_numbers = #tpu.dot_dimension_numbers<[1], [0], [0], [1], [0, 0, 1, 1], [], []>} : vector<8x8xbf16>, vector<8x892xbf16>, vector<8x892xf32> -> vector<8x892xf32>
    %7 = arith.addf %2, %6 : vector<8x892xf32>
    %c1 = arith.constant 1 : index
    %c0_6 = arith.constant 0 : index
    %c0_7 = arith.constant 0 : index
    %8 = vector.load %arg2[%c1, %c0_6, %c0_7] : memref<25x8x8xbf16, #tpu.memory_space<vmem>>, vector<1x8x8xbf16>
    %9 = vector.shape_cast %8 : vector<1x8x8xbf16> to vector<8x8xbf16>
    %10 = vector.extract_strided_slice %1 {offsets = [0, 1], sizes = [8, 892], strides = [1, 1]} : vector<8x1024xbf16> to vector<8x892xbf16>
    %cst_8 = arith.constant dense<0.000000e+00> : vector<8x892xf32>
    %11 = tpu.matmul %9, %10, %cst_8 {dimension_numbers = #tpu.dot_dimension_numbers<[1], [0], [0], [1], [0, 0, 1, 1], [], []>} : vector<8x8xbf16>, vector<8x892xbf16>, vector<8x892xf32> -> vector<8x892xf32>
    %12 = arith.addf %7, %11 : vector<8x892xf32>
    %c2 = arith.constant 2 : index
    %c0_9 = arith.constant 0 : index
    %c0_10 = arith.constant 0 : index
    %13 = vector.load %arg2[%c2, %c0_9, %c0_10] : memref<25x8x8xbf16, #tpu.memory_space<vmem>>, vector<1x8x8xbf16>
    %14 = vector.shape_cast %13 : vector<1x8x8xbf16> to vector<8x8xbf16>
    %15 = vector.extract_strided_slice %1 {offsets = [0, 2], sizes = [8, 892], strides = [1, 1]} : vector<8x1024xbf16> to vector<8x892xbf16>
    %cst_11 = arith.constant dense<0.000000e+00> : vector<8x892xf32>
    %16 = tpu.matmul %14, %15, %cst_11 {dimension_numbers = #tpu.dot_dimension_numbers<[1], [0], [0], [1], [0, 0, 1, 1], [], []>} : vector<8x8xbf16>, vector<8x892xbf16>, vector<8x892xf32> -> vector<8x892xf32>
    %17 = arith.addf %12, %16 : vector<8x892xf32>
    %c3 = arith.constant 3 : index
    %c0_12 = arith.constant 0 : index
    %c0_13 = arith.constant 0 : index
    %18 = vector.load %arg2[%c3, %c0_12, %c0_13] : memref<25x8x8xbf16, #tpu.memory_space<vmem>>, vector<1x8x8xbf16>
    %19 = vector.shape_cast %18 : vector<1x8x8xbf16> to vector<8x8xbf16>
    %20 = vector.extract_strided_slice %1 {offsets = [0, 3], sizes = [8, 892], strides = [1, 1]} : vector<8x1024xbf16> to vector<8x892xbf16>
    %cst_14 = arith.constant dense<0.000000e+00> : vector<8x892xf32>
    %21 = tpu.matmul %19, %20, %cst_14 {dimension_numbers = #tpu.dot_dimension_numbers<[1], [0], [0], [1], [0, 0, 1, 1], [], []>} : vector<8x8xbf16>, vector<8x892xbf16>, vector<8x892xf32> -> vector<8x892xf32>
    %22 = arith.addf %17, %21 : vector<8x892xf32>
    %c4 = arith.constant 4 : index
    %c0_15 = arith.constant 0 : index
    %c0_16 = arith.constant 0 : index
    %23 = vector.load %arg2[%c4, %c0_15, %c0_16] : memref<25x8x8xbf16, #tpu.memory_space<vmem>>, vector<1x8x8xbf16>
    %24 = vector.shape_cast %23 : vector<1x8x8xbf16> to vector<8x8xbf16>
    %25 = vector.extract_strided_slice %1 {offsets = [0, 4], sizes = [8, 892], strides = [1, 1]} : vector<8x1024xbf16> to vector<8x892xbf16>
    %cst_17 = arith.constant dense<0.000000e+00> : vector<8x892xf32>
    %26 = tpu.matmul %24, %25, %cst_17 {dimension_numbers = #tpu.dot_dimension_numbers<[1], [0], [0], [1], [0, 0, 1, 1], [], []>} : vector<8x8xbf16>, vector<8x892xbf16>, vector<8x892xf32> -> vector<8x892xf32>
    %27 = arith.addf %22, %26 : vector<8x892xf32>
    %c5 = arith.constant 5 : index
    %c0_18 = arith.constant 0 : index
    %c0_19 = arith.constant 0 : index
    %28 = vector.load %arg2[%c5, %c0_18, %c0_19] : memref<25x8x8xbf16, #tpu.memory_space<vmem>>, vector<1x8x8xbf16>
    %29 = vector.shape_cast %28 : vector<1x8x8xbf16> to vector<8x8xbf16>
    %30 = vector.extract_strided_slice %1 {offsets = [0, 32], sizes = [8, 892], strides = [1, 1]} : vector<8x1024xbf16> to vector<8x892xbf16>
    %cst_20 = arith.constant dense<0.000000e+00> : vector<8x892xf32>
    %31 = tpu.matmul %29, %30, %cst_20 {dimension_numbers = #tpu.dot_dimension_numbers<[1], [0], [0], [1], [0, 0, 1, 1], [], []>} : vector<8x8xbf16>, vector<8x892xbf16>, vector<8x892xf32> -> vector<8x892xf32>
    %32 = arith.addf %27, %31 : vector<8x892xf32>
    %c6 = arith.constant 6 : index
    %c0_21 = arith.constant 0 : index
    %c0_22 = arith.constant 0 : index
    %33 = vector.load %arg2[%c6, %c0_21, %c0_22] : memref<25x8x8xbf16, #tpu.memory_space<vmem>>, vector<1x8x8xbf16>
    %34 = vector.shape_cast %33 : vector<1x8x8xbf16> to vector<8x8xbf16>
    %35 = vector.extract_strided_slice %1 {offsets = [0, 33], sizes = [8, 892], strides = [1, 1]} : vector<8x1024xbf16> to vector<8x892xbf16>
    %cst_23 = arith.constant dense<0.000000e+00> : vector<8x892xf32>
    %36 = tpu.matmul %34, %35, %cst_23 {dimension_numbers = #tpu.dot_dimension_numbers<[1], [0], [0], [1], [0, 0, 1, 1], [], []>} : vector<8x8xbf16>, vector<8x892xbf16>, vector<8x892xf32> -> vector<8x892xf32>
    %37 = arith.addf %32, %36 : vector<8x892xf32>
    %c7 = arith.constant 7 : index
    %c0_24 = arith.constant 0 : index
    %c0_25 = arith.constant 0 : index
    %38 = vector.load %arg2[%c7, %c0_24, %c0_25] : memref<25x8x8xbf16, #tpu.memory_space<vmem>>, vector<1x8x8xbf16>
    %39 = vector.shape_cast %38 : vector<1x8x8xbf16> to vector<8x8xbf16>
    %40 = vector.extract_strided_slice %1 {offsets = [0, 34], sizes = [8, 892], strides = [1, 1]} : vector<8x1024xbf16> to vector<8x892xbf16>
    %cst_26 = arith.constant dense<0.000000e+00> : vector<8x892xf32>
    %41 = tpu.matmul %39, %40, %cst_26 {dimension_numbers = #tpu.dot_dimension_numbers<[1], [0], [0], [1], [0, 0, 1, 1], [], []>} : vector<8x8xbf16>, vector<8x892xbf16>, vector<8x892xf32> -> vector<8x892xf32>
    %42 = arith.addf %37, %41 : vector<8x892xf32>
    %c8 = arith.constant 8 : index
    %c0_27 = arith.constant 0 : index
    %c0_28 = arith.constant 0 : index
    %43 = vector.load %arg2[%c8, %c0_27, %c0_28] : memref<25x8x8xbf16, #tpu.memory_space<vmem>>, vector<1x8x8xbf16>
    %44 = vector.shape_cast %43 : vector<1x8x8xbf16> to vector<8x8xbf16>
    %45 = vector.extract_strided_slice %1 {offsets = [0, 35], sizes = [8, 892], strides = [1, 1]} : vector<8x1024xbf16> to vector<8x892xbf16>
    %cst_29 = arith.constant dense<0.000000e+00> : vector<8x892xf32>
    %46 = tpu.matmul %44, %45, %cst_29 {dimension_numbers = #tpu.dot_dimension_numbers<[1], [0], [0], [1], [0, 0, 1, 1], [], []>} : vector<8x8xbf16>, vector<8x892xbf16>, vector<8x892xf32> -> vector<8x892xf32>
    %47 = arith.addf %42, %46 : vector<8x892xf32>
    %c9 = arith.constant 9 : index
    %c0_30 = arith.constant 0 : index
    %c0_31 = arith.constant 0 : index
    %48 = vector.load %arg2[%c9, %c0_30, %c0_31] : memref<25x8x8xbf16, #tpu.memory_space<vmem>>, vector<1x8x8xbf16>
    %49 = vector.shape_cast %48 : vector<1x8x8xbf16> to vector<8x8xbf16>
    %50 = vector.extract_strided_slice %1 {offsets = [0, 36], sizes = [8, 892], strides = [1, 1]} : vector<8x1024xbf16> to vector<8x892xbf16>
    %cst_32 = arith.constant dense<0.000000e+00> : vector<8x892xf32>
    %51 = tpu.matmul %49, %50, %cst_32 {dimension_numbers = #tpu.dot_dimension_numbers<[1], [0], [0], [1], [0, 0, 1, 1], [], []>} : vector<8x8xbf16>, vector<8x892xbf16>, vector<8x892xf32> -> vector<8x892xf32>
    %52 = arith.addf %47, %51 : vector<8x892xf32>
    %c10 = arith.constant 10 : index
    %c0_33 = arith.constant 0 : index
    %c0_34 = arith.constant 0 : index
    %53 = vector.load %arg2[%c10, %c0_33, %c0_34] : memref<25x8x8xbf16, #tpu.memory_space<vmem>>, vector<1x8x8xbf16>
    %54 = vector.shape_cast %53 : vector<1x8x8xbf16> to vector<8x8xbf16>
    %55 = vector.extract_strided_slice %1 {offsets = [0, 64], sizes = [8, 892], strides = [1, 1]} : vector<8x1024xbf16> to vector<8x892xbf16>
    %cst_35 = arith.constant dense<0.000000e+00> : vector<8x892xf32>
    %56 = tpu.matmul %54, %55, %cst_35 {dimension_numbers = #tpu.dot_dimension_numbers<[1], [0], [0], [1], [0, 0, 1, 1], [], []>} : vector<8x8xbf16>, vector<8x892xbf16>, vector<8x892xf32> -> vector<8x892xf32>
    %57 = arith.addf %52, %56 : vector<8x892xf32>
    %c11 = arith.constant 11 : index
    %c0_36 = arith.constant 0 : index
    %c0_37 = arith.constant 0 : index
    %58 = vector.load %arg2[%c11, %c0_36, %c0_37] : memref<25x8x8xbf16, #tpu.memory_space<vmem>>, vector<1x8x8xbf16>
    %59 = vector.shape_cast %58 : vector<1x8x8xbf16> to vector<8x8xbf16>
    %60 = vector.extract_strided_slice %1 {offsets = [0, 65], sizes = [8, 892], strides = [1, 1]} : vector<8x1024xbf16> to vector<8x892xbf16>
    %cst_38 = arith.constant dense<0.000000e+00> : vector<8x892xf32>
    %61 = tpu.matmul %59, %60, %cst_38 {dimension_numbers = #tpu.dot_dimension_numbers<[1], [0], [0], [1], [0, 0, 1, 1], [], []>} : vector<8x8xbf16>, vector<8x892xbf16>, vector<8x892xf32> -> vector<8x892xf32>
    %62 = arith.addf %57, %61 : vector<8x892xf32>
    %c12 = arith.constant 12 : index
    %c0_39 = arith.constant 0 : index
    %c0_40 = arith.constant 0 : index
    %63 = vector.load %arg2[%c12, %c0_39, %c0_40] : memref<25x8x8xbf16, #tpu.memory_space<vmem>>, vector<1x8x8xbf16>
    %64 = vector.shape_cast %63 : vector<1x8x8xbf16> to vector<8x8xbf16>
    %65 = vector.extract_strided_slice %1 {offsets = [0, 66], sizes = [8, 892], strides = [1, 1]} : vector<8x1024xbf16> to vector<8x892xbf16>
    %cst_41 = arith.constant dense<0.000000e+00> : vector<8x892xf32>
    %66 = tpu.matmul %64, %65, %cst_41 {dimension_numbers = #tpu.dot_dimension_numbers<[1], [0], [0], [1], [0, 0, 1, 1], [], []>} : vector<8x8xbf16>, vector<8x892xbf16>, vector<8x892xf32> -> vector<8x892xf32>
    %67 = arith.addf %62, %66 : vector<8x892xf32>
    %c13 = arith.constant 13 : index
    %c0_42 = arith.constant 0 : index
    %c0_43 = arith.constant 0 : index
    %68 = vector.load %arg2[%c13, %c0_42, %c0_43] : memref<25x8x8xbf16, #tpu.memory_space<vmem>>, vector<1x8x8xbf16>
    %69 = vector.shape_cast %68 : vector<1x8x8xbf16> to vector<8x8xbf16>
    %70 = vector.extract_strided_slice %1 {offsets = [0, 67], sizes = [8, 892], strides = [1, 1]} : vector<8x1024xbf16> to vector<8x892xbf16>
    %cst_44 = arith.constant dense<0.000000e+00> : vector<8x892xf32>
    %71 = tpu.matmul %69, %70, %cst_44 {dimension_numbers = #tpu.dot_dimension_numbers<[1], [0], [0], [1], [0, 0, 1, 1], [], []>} : vector<8x8xbf16>, vector<8x892xbf16>, vector<8x892xf32> -> vector<8x892xf32>
    %72 = arith.addf %67, %71 : vector<8x892xf32>
    %c14 = arith.constant 14 : index
    %c0_45 = arith.constant 0 : index
    %c0_46 = arith.constant 0 : index
    %73 = vector.load %arg2[%c14, %c0_45, %c0_46] : memref<25x8x8xbf16, #tpu.memory_space<vmem>>, vector<1x8x8xbf16>
    %74 = vector.shape_cast %73 : vector<1x8x8xbf16> to vector<8x8xbf16>
    %75 = vector.extract_strided_slice %1 {offsets = [0, 68], sizes = [8, 892], strides = [1, 1]} : vector<8x1024xbf16> to vector<8x892xbf16>
    %cst_47 = arith.constant dense<0.000000e+00> : vector<8x892xf32>
    %76 = tpu.matmul %74, %75, %cst_47 {dimension_numbers = #tpu.dot_dimension_numbers<[1], [0], [0], [1], [0, 0, 1, 1], [], []>} : vector<8x8xbf16>, vector<8x892xbf16>, vector<8x892xf32> -> vector<8x892xf32>
    %77 = arith.addf %72, %76 : vector<8x892xf32>
    %c15 = arith.constant 15 : index
    %c0_48 = arith.constant 0 : index
    %c0_49 = arith.constant 0 : index
    %78 = vector.load %arg2[%c15, %c0_48, %c0_49] : memref<25x8x8xbf16, #tpu.memory_space<vmem>>, vector<1x8x8xbf16>
    %79 = vector.shape_cast %78 : vector<1x8x8xbf16> to vector<8x8xbf16>
    %80 = vector.extract_strided_slice %1 {offsets = [0, 96], sizes = [8, 892], strides = [1, 1]} : vector<8x1024xbf16> to vector<8x892xbf16>
    %cst_50 = arith.constant dense<0.000000e+00> : vector<8x892xf32>
    %81 = tpu.matmul %79, %80, %cst_50 {dimension_numbers = #tpu.dot_dimension_numbers<[1], [0], [0], [1], [0, 0, 1, 1], [], []>} : vector<8x8xbf16>, vector<8x892xbf16>, vector<8x892xf32> -> vector<8x892xf32>
    %82 = arith.addf %77, %81 : vector<8x892xf32>
    %c16 = arith.constant 16 : index
    %c0_51 = arith.constant 0 : index
    %c0_52 = arith.constant 0 : index
    %83 = vector.load %arg2[%c16, %c0_51, %c0_52] : memref<25x8x8xbf16, #tpu.memory_space<vmem>>, vector<1x8x8xbf16>
    %84 = vector.shape_cast %83 : vector<1x8x8xbf16> to vector<8x8xbf16>
    %85 = vector.extract_strided_slice %1 {offsets = [0, 97], sizes = [8, 892], strides = [1, 1]} : vector<8x1024xbf16> to vector<8x892xbf16>
    %cst_53 = arith.constant dense<0.000000e+00> : vector<8x892xf32>
    %86 = tpu.matmul %84, %85, %cst_53 {dimension_numbers = #tpu.dot_dimension_numbers<[1], [0], [0], [1], [0, 0, 1, 1], [], []>} : vector<8x8xbf16>, vector<8x892xbf16>, vector<8x892xf32> -> vector<8x892xf32>
    %87 = arith.addf %82, %86 : vector<8x892xf32>
    %c17 = arith.constant 17 : index
    %c0_54 = arith.constant 0 : index
    %c0_55 = arith.constant 0 : index
    %88 = vector.load %arg2[%c17, %c0_54, %c0_55] : memref<25x8x8xbf16, #tpu.memory_space<vmem>>, vector<1x8x8xbf16>
    %89 = vector.shape_cast %88 : vector<1x8x8xbf16> to vector<8x8xbf16>
    %90 = vector.extract_strided_slice %1 {offsets = [0, 98], sizes = [8, 892], strides = [1, 1]} : vector<8x1024xbf16> to vector<8x892xbf16>
    %cst_56 = arith.constant dense<0.000000e+00> : vector<8x892xf32>
    %91 = tpu.matmul %89, %90, %cst_56 {dimension_numbers = #tpu.dot_dimension_numbers<[1], [0], [0], [1], [0, 0, 1, 1], [], []>} : vector<8x8xbf16>, vector<8x892xbf16>, vector<8x892xf32> -> vector<8x892xf32>
    %92 = arith.addf %87, %91 : vector<8x892xf32>
    %c18 = arith.constant 18 : index
    %c0_57 = arith.constant 0 : index
    %c0_58 = arith.constant 0 : index
    %93 = vector.load %arg2[%c18, %c0_57, %c0_58] : memref<25x8x8xbf16, #tpu.memory_space<vmem>>, vector<1x8x8xbf16>
    %94 = vector.shape_cast %93 : vector<1x8x8xbf16> to vector<8x8xbf16>
    %95 = vector.extract_strided_slice %1 {offsets = [0, 99], sizes = [8, 892], strides = [1, 1]} : vector<8x1024xbf16> to vector<8x892xbf16>
    %cst_59 = arith.constant dense<0.000000e+00> : vector<8x892xf32>
    %96 = tpu.matmul %94, %95, %cst_59 {dimension_numbers = #tpu.dot_dimension_numbers<[1], [0], [0], [1], [0, 0, 1, 1], [], []>} : vector<8x8xbf16>, vector<8x892xbf16>, vector<8x892xf32> -> vector<8x892xf32>
    %97 = arith.addf %92, %96 : vector<8x892xf32>
    %c19 = arith.constant 19 : index
    %c0_60 = arith.constant 0 : index
    %c0_61 = arith.constant 0 : index
    %98 = vector.load %arg2[%c19, %c0_60, %c0_61] : memref<25x8x8xbf16, #tpu.memory_space<vmem>>, vector<1x8x8xbf16>
    %99 = vector.shape_cast %98 : vector<1x8x8xbf16> to vector<8x8xbf16>
    %100 = vector.extract_strided_slice %1 {offsets = [0, 100], sizes = [8, 892], strides = [1, 1]} : vector<8x1024xbf16> to vector<8x892xbf16>
    %cst_62 = arith.constant dense<0.000000e+00> : vector<8x892xf32>
    %101 = tpu.matmul %99, %100, %cst_62 {dimension_numbers = #tpu.dot_dimension_numbers<[1], [0], [0], [1], [0, 0, 1, 1], [], []>} : vector<8x8xbf16>, vector<8x892xbf16>, vector<8x892xf32> -> vector<8x892xf32>
    %102 = arith.addf %97, %101 : vector<8x892xf32>
    %c20 = arith.constant 20 : index
    %c0_63 = arith.constant 0 : index
    %c0_64 = arith.constant 0 : index
    %103 = vector.load %arg2[%c20, %c0_63, %c0_64] : memref<25x8x8xbf16, #tpu.memory_space<vmem>>, vector<1x8x8xbf16>
    %104 = vector.shape_cast %103 : vector<1x8x8xbf16> to vector<8x8xbf16>
    %105 = vector.extract_strided_slice %1 {offsets = [0, 128], sizes = [8, 892], strides = [1, 1]} : vector<8x1024xbf16> to vector<8x892xbf16>
    %cst_65 = arith.constant dense<0.000000e+00> : vector<8x892xf32>
    %106 = tpu.matmul %104, %105, %cst_65 {dimension_numbers = #tpu.dot_dimension_numbers<[1], [0], [0], [1], [0, 0, 1, 1], [], []>} : vector<8x8xbf16>, vector<8x892xbf16>, vector<8x892xf32> -> vector<8x892xf32>
    %107 = arith.addf %102, %106 : vector<8x892xf32>
    %c21 = arith.constant 21 : index
    %c0_66 = arith.constant 0 : index
    %c0_67 = arith.constant 0 : index
    %108 = vector.load %arg2[%c21, %c0_66, %c0_67] : memref<25x8x8xbf16, #tpu.memory_space<vmem>>, vector<1x8x8xbf16>
    %109 = vector.shape_cast %108 : vector<1x8x8xbf16> to vector<8x8xbf16>
    %110 = vector.extract_strided_slice %1 {offsets = [0, 129], sizes = [8, 892], strides = [1, 1]} : vector<8x1024xbf16> to vector<8x892xbf16>
    %cst_68 = arith.constant dense<0.000000e+00> : vector<8x892xf32>
    %111 = tpu.matmul %109, %110, %cst_68 {dimension_numbers = #tpu.dot_dimension_numbers<[1], [0], [0], [1], [0, 0, 1, 1], [], []>} : vector<8x8xbf16>, vector<8x892xbf16>, vector<8x892xf32> -> vector<8x892xf32>
    %112 = arith.addf %107, %111 : vector<8x892xf32>
    %c22 = arith.constant 22 : index
    %c0_69 = arith.constant 0 : index
    %c0_70 = arith.constant 0 : index
    %113 = vector.load %arg2[%c22, %c0_69, %c0_70] : memref<25x8x8xbf16, #tpu.memory_space<vmem>>, vector<1x8x8xbf16>
    %114 = vector.shape_cast %113 : vector<1x8x8xbf16> to vector<8x8xbf16>
    %115 = vector.extract_strided_slice %1 {offsets = [0, 130], sizes = [8, 892], strides = [1, 1]} : vector<8x1024xbf16> to vector<8x892xbf16>
    %cst_71 = arith.constant dense<0.000000e+00> : vector<8x892xf32>
    %116 = tpu.matmul %114, %115, %cst_71 {dimension_numbers = #tpu.dot_dimension_numbers<[1], [0], [0], [1], [0, 0, 1, 1], [], []>} : vector<8x8xbf16>, vector<8x892xbf16>, vector<8x892xf32> -> vector<8x892xf32>
    %117 = arith.addf %112, %116 : vector<8x892xf32>
    %c23 = arith.constant 23 : index
    %c0_72 = arith.constant 0 : index
    %c0_73 = arith.constant 0 : index
    %118 = vector.load %arg2[%c23, %c0_72, %c0_73] : memref<25x8x8xbf16, #tpu.memory_space<vmem>>, vector<1x8x8xbf16>
    %119 = vector.shape_cast %118 : vector<1x8x8xbf16> to vector<8x8xbf16>
    %120 = vector.extract_strided_slice %1 {offsets = [0, 131], sizes = [8, 892], strides = [1, 1]} : vector<8x1024xbf16> to vector<8x892xbf16>
    %cst_74 = arith.constant dense<0.000000e+00> : vector<8x892xf32>
    %121 = tpu.matmul %119, %120, %cst_74 {dimension_numbers = #tpu.dot_dimension_numbers<[1], [0], [0], [1], [0, 0, 1, 1], [], []>} : vector<8x8xbf16>, vector<8x892xbf16>, vector<8x892xf32> -> vector<8x892xf32>
    %122 = arith.addf %117, %121 : vector<8x892xf32>
    %c24 = arith.constant 24 : index
    %c0_75 = arith.constant 0 : index
    %c0_76 = arith.constant 0 : index
    %123 = vector.load %arg2[%c24, %c0_75, %c0_76] : memref<25x8x8xbf16, #tpu.memory_space<vmem>>, vector<1x8x8xbf16>
    %124 = vector.shape_cast %123 : vector<1x8x8xbf16> to vector<8x8xbf16>
    %125 = vector.extract_strided_slice %1 {offsets = [0, 132], sizes = [8, 892], strides = [1, 1]} : vector<8x1024xbf16> to vector<8x892xbf16>
    %cst_77 = arith.constant dense<0.000000e+00> : vector<8x892xf32>
    %126 = tpu.matmul %124, %125, %cst_77 {dimension_numbers = #tpu.dot_dimension_numbers<[1], [0], [0], [1], [0, 0, 1, 1], [], []>} : vector<8x8xbf16>, vector<8x892xbf16>, vector<8x892xf32> -> vector<8x892xf32>
    %127 = arith.addf %122, %126 : vector<8x892xf32>
    %c0_78 = arith.constant 0 : index
    %c0_79 = arith.constant 0 : index
    %128 = vector.load %arg3[%c0_78, %c0_79] : memref<8x1xf32, #tpu.memory_space<vmem>>, vector<8x1xf32>
    %129 = vector.broadcast %128 : vector<8x1xf32> to vector<8x892xf32>
    %130 = arith.addf %127, %129 : vector<8x892xf32>
    %cst_80 = arith.constant 0.000000e+00 : f32
    %131 = vector.broadcast %cst_80 : f32 to vector<8x892xf32>
    %132 = arith.maximumf %130, %131 : vector<8x892xf32>
    %133 = vector.extract_strided_slice %132 {offsets = [0, 0], sizes = [8, 859], strides = [1, 1]} : vector<8x892xf32> to vector<8x859xf32>
    %134 = vector.extract_strided_slice %132 {offsets = [0, 1], sizes = [8, 859], strides = [1, 1]} : vector<8x892xf32> to vector<8x859xf32>
    %135 = arith.maximumf %133, %134 : vector<8x859xf32>
    %136 = vector.extract_strided_slice %132 {offsets = [0, 32], sizes = [8, 859], strides = [1, 1]} : vector<8x892xf32> to vector<8x859xf32>
    %137 = vector.extract_strided_slice %132 {offsets = [0, 33], sizes = [8, 859], strides = [1, 1]} : vector<8x892xf32> to vector<8x859xf32>
    %138 = arith.maximumf %136, %137 : vector<8x859xf32>
    %139 = arith.maximumf %135, %138 : vector<8x859xf32>
    %140 = arith.truncf %139 : vector<8x859xf32> to vector<8x859xbf16>
    %cst_81 = arith.constant 0.000000e+00 : f32
    %141 = vector.broadcast %cst_81 : f32 to vector<16x595xf32>
    %c0_82 = arith.constant 0 : index
    %c0_83 = arith.constant 0 : index
    %c0_84 = arith.constant 0 : index
    %142 = vector.load %arg4[%c0_82, %c0_83, %c0_84] : memref<25x16x8xbf16, #tpu.memory_space<vmem>>, vector<1x16x8xbf16>
    %143 = vector.shape_cast %142 : vector<1x16x8xbf16> to vector<16x8xbf16>
    %144 = vector.extract_strided_slice %140 {offsets = [0, 0], sizes = [8, 595], strides = [1, 1]} : vector<8x859xbf16> to vector<8x595xbf16>
    %cst_85 = arith.constant dense<0.000000e+00> : vector<16x595xf32>
    %145 = tpu.matmul %143, %144, %cst_85 {dimension_numbers = #tpu.dot_dimension_numbers<[1], [0], [0], [1], [0, 0, 1, 1], [], []>} : vector<16x8xbf16>, vector<8x595xbf16>, vector<16x595xf32> -> vector<16x595xf32>
    %146 = arith.addf %141, %145 : vector<16x595xf32>
    %c1_86 = arith.constant 1 : index
    %c0_87 = arith.constant 0 : index
    %c0_88 = arith.constant 0 : index
    %147 = vector.load %arg4[%c1_86, %c0_87, %c0_88] : memref<25x16x8xbf16, #tpu.memory_space<vmem>>, vector<1x16x8xbf16>
    %148 = vector.shape_cast %147 : vector<1x16x8xbf16> to vector<16x8xbf16>
    %149 = vector.extract_strided_slice %140 {offsets = [0, 2], sizes = [8, 595], strides = [1, 1]} : vector<8x859xbf16> to vector<8x595xbf16>
    %cst_89 = arith.constant dense<0.000000e+00> : vector<16x595xf32>
    %150 = tpu.matmul %148, %149, %cst_89 {dimension_numbers = #tpu.dot_dimension_numbers<[1], [0], [0], [1], [0, 0, 1, 1], [], []>} : vector<16x8xbf16>, vector<8x595xbf16>, vector<16x595xf32> -> vector<16x595xf32>
    %151 = arith.addf %146, %150 : vector<16x595xf32>
    %c2_90 = arith.constant 2 : index
    %c0_91 = arith.constant 0 : index
    %c0_92 = arith.constant 0 : index
    %152 = vector.load %arg4[%c2_90, %c0_91, %c0_92] : memref<25x16x8xbf16, #tpu.memory_space<vmem>>, vector<1x16x8xbf16>
    %153 = vector.shape_cast %152 : vector<1x16x8xbf16> to vector<16x8xbf16>
    %154 = vector.extract_strided_slice %140 {offsets = [0, 4], sizes = [8, 595], strides = [1, 1]} : vector<8x859xbf16> to vector<8x595xbf16>
    %cst_93 = arith.constant dense<0.000000e+00> : vector<16x595xf32>
    %155 = tpu.matmul %153, %154, %cst_93 {dimension_numbers = #tpu.dot_dimension_numbers<[1], [0], [0], [1], [0, 0, 1, 1], [], []>} : vector<16x8xbf16>, vector<8x595xbf16>, vector<16x595xf32> -> vector<16x595xf32>
    %156 = arith.addf %151, %155 : vector<16x595xf32>
    %c3_94 = arith.constant 3 : index
    %c0_95 = arith.constant 0 : index
    %c0_96 = arith.constant 0 : index
    %157 = vector.load %arg4[%c3_94, %c0_95, %c0_96] : memref<25x16x8xbf16, #tpu.memory_space<vmem>>, vector<1x16x8xbf16>
    %158 = vector.shape_cast %157 : vector<1x16x8xbf16> to vector<16x8xbf16>
    %159 = vector.extract_strided_slice %140 {offsets = [0, 6], sizes = [8, 595], strides = [1, 1]} : vector<8x859xbf16> to vector<8x595xbf16>
    %cst_97 = arith.constant dense<0.000000e+00> : vector<16x595xf32>
    %160 = tpu.matmul %158, %159, %cst_97 {dimension_numbers = #tpu.dot_dimension_numbers<[1], [0], [0], [1], [0, 0, 1, 1], [], []>} : vector<16x8xbf16>, vector<8x595xbf16>, vector<16x595xf32> -> vector<16x595xf32>
    %161 = arith.addf %156, %160 : vector<16x595xf32>
    %c4_98 = arith.constant 4 : index
    %c0_99 = arith.constant 0 : index
    %c0_100 = arith.constant 0 : index
    %162 = vector.load %arg4[%c4_98, %c0_99, %c0_100] : memref<25x16x8xbf16, #tpu.memory_space<vmem>>, vector<1x16x8xbf16>
    %163 = vector.shape_cast %162 : vector<1x16x8xbf16> to vector<16x8xbf16>
    %164 = vector.extract_strided_slice %140 {offsets = [0, 8], sizes = [8, 595], strides = [1, 1]} : vector<8x859xbf16> to vector<8x595xbf16>
    %cst_101 = arith.constant dense<0.000000e+00> : vector<16x595xf32>
    %165 = tpu.matmul %163, %164, %cst_101 {dimension_numbers = #tpu.dot_dimension_numbers<[1], [0], [0], [1], [0, 0, 1, 1], [], []>} : vector<16x8xbf16>, vector<8x595xbf16>, vector<16x595xf32> -> vector<16x595xf32>
    %166 = arith.addf %161, %165 : vector<16x595xf32>
    %c5_102 = arith.constant 5 : index
    %c0_103 = arith.constant 0 : index
    %c0_104 = arith.constant 0 : index
    %167 = vector.load %arg4[%c5_102, %c0_103, %c0_104] : memref<25x16x8xbf16, #tpu.memory_space<vmem>>, vector<1x16x8xbf16>
    %168 = vector.shape_cast %167 : vector<1x16x8xbf16> to vector<16x8xbf16>
    %169 = vector.extract_strided_slice %140 {offsets = [0, 64], sizes = [8, 595], strides = [1, 1]} : vector<8x859xbf16> to vector<8x595xbf16>
    %cst_105 = arith.constant dense<0.000000e+00> : vector<16x595xf32>
    %170 = tpu.matmul %168, %169, %cst_105 {dimension_numbers = #tpu.dot_dimension_numbers<[1], [0], [0], [1], [0, 0, 1, 1], [], []>} : vector<16x8xbf16>, vector<8x595xbf16>, vector<16x595xf32> -> vector<16x595xf32>
    %171 = arith.addf %166, %170 : vector<16x595xf32>
    %c6_106 = arith.constant 6 : index
    %c0_107 = arith.constant 0 : index
    %c0_108 = arith.constant 0 : index
    %172 = vector.load %arg4[%c6_106, %c0_107, %c0_108] : memref<25x16x8xbf16, #tpu.memory_space<vmem>>, vector<1x16x8xbf16>
    %173 = vector.shape_cast %172 : vector<1x16x8xbf16> to vector<16x8xbf16>
    %174 = vector.extract_strided_slice %140 {offsets = [0, 66], sizes = [8, 595], strides = [1, 1]} : vector<8x859xbf16> to vector<8x595xbf16>
    %cst_109 = arith.constant dense<0.000000e+00> : vector<16x595xf32>
    %175 = tpu.matmul %173, %174, %cst_109 {dimension_numbers = #tpu.dot_dimension_numbers<[1], [0], [0], [1], [0, 0, 1, 1], [], []>} : vector<16x8xbf16>, vector<8x595xbf16>, vector<16x595xf32> -> vector<16x595xf32>
    %176 = arith.addf %171, %175 : vector<16x595xf32>
    %c7_110 = arith.constant 7 : index
    %c0_111 = arith.constant 0 : index
    %c0_112 = arith.constant 0 : index
    %177 = vector.load %arg4[%c7_110, %c0_111, %c0_112] : memref<25x16x8xbf16, #tpu.memory_space<vmem>>, vector<1x16x8xbf16>
    %178 = vector.shape_cast %177 : vector<1x16x8xbf16> to vector<16x8xbf16>
    %179 = vector.extract_strided_slice %140 {offsets = [0, 68], sizes = [8, 595], strides = [1, 1]} : vector<8x859xbf16> to vector<8x595xbf16>
    %cst_113 = arith.constant dense<0.000000e+00> : vector<16x595xf32>
    %180 = tpu.matmul %178, %179, %cst_113 {dimension_numbers = #tpu.dot_dimension_numbers<[1], [0], [0], [1], [0, 0, 1, 1], [], []>} : vector<16x8xbf16>, vector<8x595xbf16>, vector<16x595xf32> -> vector<16x595xf32>
    %181 = arith.addf %176, %180 : vector<16x595xf32>
    %c8_114 = arith.constant 8 : index
    %c0_115 = arith.constant 0 : index
    %c0_116 = arith.constant 0 : index
    %182 = vector.load %arg4[%c8_114, %c0_115, %c0_116] : memref<25x16x8xbf16, #tpu.memory_space<vmem>>, vector<1x16x8xbf16>
    %183 = vector.shape_cast %182 : vector<1x16x8xbf16> to vector<16x8xbf16>
    %184 = vector.extract_strided_slice %140 {offsets = [0, 70], sizes = [8, 595], strides = [1, 1]} : vector<8x859xbf16> to vector<8x595xbf16>
    %cst_117 = arith.constant dense<0.000000e+00> : vector<16x595xf32>
    %185 = tpu.matmul %183, %184, %cst_117 {dimension_numbers = #tpu.dot_dimension_numbers<[1], [0], [0], [1], [0, 0, 1, 1], [], []>} : vector<16x8xbf16>, vector<8x595xbf16>, vector<16x595xf32> -> vector<16x595xf32>
    %186 = arith.addf %181, %185 : vector<16x595xf32>
    %c9_118 = arith.constant 9 : index
    %c0_119 = arith.constant 0 : index
    %c0_120 = arith.constant 0 : index
    %187 = vector.load %arg4[%c9_118, %c0_119, %c0_120] : memref<25x16x8xbf16, #tpu.memory_space<vmem>>, vector<1x16x8xbf16>
    %188 = vector.shape_cast %187 : vector<1x16x8xbf16> to vector<16x8xbf16>
    %189 = vector.extract_strided_slice %140 {offsets = [0, 72], sizes = [8, 595], strides = [1, 1]} : vector<8x859xbf16> to vector<8x595xbf16>
    %cst_121 = arith.constant dense<0.000000e+00> : vector<16x595xf32>
    %190 = tpu.matmul %188, %189, %cst_121 {dimension_numbers = #tpu.dot_dimension_numbers<[1], [0], [0], [1], [0, 0, 1, 1], [], []>} : vector<16x8xbf16>, vector<8x595xbf16>, vector<16x595xf32> -> vector<16x595xf32>
    %191 = arith.addf %186, %190 : vector<16x595xf32>
    %c10_122 = arith.constant 10 : index
    %c0_123 = arith.constant 0 : index
    %c0_124 = arith.constant 0 : index
    %192 = vector.load %arg4[%c10_122, %c0_123, %c0_124] : memref<25x16x8xbf16, #tpu.memory_space<vmem>>, vector<1x16x8xbf16>
    %193 = vector.shape_cast %192 : vector<1x16x8xbf16> to vector<16x8xbf16>
    %194 = vector.extract_strided_slice %140 {offsets = [0, 128], sizes = [8, 595], strides = [1, 1]} : vector<8x859xbf16> to vector<8x595xbf16>
    %cst_125 = arith.constant dense<0.000000e+00> : vector<16x595xf32>
    %195 = tpu.matmul %193, %194, %cst_125 {dimension_numbers = #tpu.dot_dimension_numbers<[1], [0], [0], [1], [0, 0, 1, 1], [], []>} : vector<16x8xbf16>, vector<8x595xbf16>, vector<16x595xf32> -> vector<16x595xf32>
    %196 = arith.addf %191, %195 : vector<16x595xf32>
    %c11_126 = arith.constant 11 : index
    %c0_127 = arith.constant 0 : index
    %c0_128 = arith.constant 0 : index
    %197 = vector.load %arg4[%c11_126, %c0_127, %c0_128] : memref<25x16x8xbf16, #tpu.memory_space<vmem>>, vector<1x16x8xbf16>
    %198 = vector.shape_cast %197 : vector<1x16x8xbf16> to vector<16x8xbf16>
    %199 = vector.extract_strided_slice %140 {offsets = [0, 130], sizes = [8, 595], strides = [1, 1]} : vector<8x859xbf16> to vector<8x595xbf16>
    %cst_129 = arith.constant dense<0.000000e+00> : vector<16x595xf32>
    %200 = tpu.matmul %198, %199, %cst_129 {dimension_numbers = #tpu.dot_dimension_numbers<[1], [0], [0], [1], [0, 0, 1, 1], [], []>} : vector<16x8xbf16>, vector<8x595xbf16>, vector<16x595xf32> -> vector<16x595xf32>
    %201 = arith.addf %196, %200 : vector<16x595xf32>
    %c12_130 = arith.constant 12 : index
    %c0_131 = arith.constant 0 : index
    %c0_132 = arith.constant 0 : index
    %202 = vector.load %arg4[%c12_130, %c0_131, %c0_132] : memref<25x16x8xbf16, #tpu.memory_space<vmem>>, vector<1x16x8xbf16>
    %203 = vector.shape_cast %202 : vector<1x16x8xbf16> to vector<16x8xbf16>
    %204 = vector.extract_strided_slice %140 {offsets = [0, 132], sizes = [8, 595], strides = [1, 1]} : vector<8x859xbf16> to vector<8x595xbf16>
    %cst_133 = arith.constant dense<0.000000e+00> : vector<16x595xf32>
    %205 = tpu.matmul %203, %204, %cst_133 {dimension_numbers = #tpu.dot_dimension_numbers<[1], [0], [0], [1], [0, 0, 1, 1], [], []>} : vector<16x8xbf16>, vector<8x595xbf16>, vector<16x595xf32> -> vector<16x595xf32>
    %206 = arith.addf %201, %205 : vector<16x595xf32>
    %c13_134 = arith.constant 13 : index
    %c0_135 = arith.constant 0 : index
    %c0_136 = arith.constant 0 : index
    %207 = vector.load %arg4[%c13_134, %c0_135, %c0_136] : memref<25x16x8xbf16, #tpu.memory_space<vmem>>, vector<1x16x8xbf16>
    %208 = vector.shape_cast %207 : vector<1x16x8xbf16> to vector<16x8xbf16>
    %209 = vector.extract_strided_slice %140 {offsets = [0, 134], sizes = [8, 595], strides = [1, 1]} : vector<8x859xbf16> to vector<8x595xbf16>
    %cst_137 = arith.constant dense<0.000000e+00> : vector<16x595xf32>
    %210 = tpu.matmul %208, %209, %cst_137 {dimension_numbers = #tpu.dot_dimension_numbers<[1], [0], [0], [1], [0, 0, 1, 1], [], []>} : vector<16x8xbf16>, vector<8x595xbf16>, vector<16x595xf32> -> vector<16x595xf32>
    %211 = arith.addf %206, %210 : vector<16x595xf32>
    %c14_138 = arith.constant 14 : index
    %c0_139 = arith.constant 0 : index
    %c0_140 = arith.constant 0 : index
    %212 = vector.load %arg4[%c14_138, %c0_139, %c0_140] : memref<25x16x8xbf16, #tpu.memory_space<vmem>>, vector<1x16x8xbf16>
    %213 = vector.shape_cast %212 : vector<1x16x8xbf16> to vector<16x8xbf16>
    %214 = vector.extract_strided_slice %140 {offsets = [0, 136], sizes = [8, 595], strides = [1, 1]} : vector<8x859xbf16> to vector<8x595xbf16>
    %cst_141 = arith.constant dense<0.000000e+00> : vector<16x595xf32>
    %215 = tpu.matmul %213, %214, %cst_141 {dimension_numbers = #tpu.dot_dimension_numbers<[1], [0], [0], [1], [0, 0, 1, 1], [], []>} : vector<16x8xbf16>, vector<8x595xbf16>, vector<16x595xf32> -> vector<16x595xf32>
    %216 = arith.addf %211, %215 : vector<16x595xf32>
    %c15_142 = arith.constant 15 : index
    %c0_143 = arith.constant 0 : index
    %c0_144 = arith.constant 0 : index
    %217 = vector.load %arg4[%c15_142, %c0_143, %c0_144] : memref<25x16x8xbf16, #tpu.memory_space<vmem>>, vector<1x16x8xbf16>
    %218 = vector.shape_cast %217 : vector<1x16x8xbf16> to vector<16x8xbf16>
    %219 = vector.extract_strided_slice %140 {offsets = [0, 192], sizes = [8, 595], strides = [1, 1]} : vector<8x859xbf16> to vector<8x595xbf16>
    %cst_145 = arith.constant dense<0.000000e+00> : vector<16x595xf32>
    %220 = tpu.matmul %218, %219, %cst_145 {dimension_numbers = #tpu.dot_dimension_numbers<[1], [0], [0], [1], [0, 0, 1, 1], [], []>} : vector<16x8xbf16>, vector<8x595xbf16>, vector<16x595xf32> -> vector<16x595xf32>
    %221 = arith.addf %216, %220 : vector<16x595xf32>
    %c16_146 = arith.constant 16 : index
    %c0_147 = arith.constant 0 : index
    %c0_148 = arith.constant 0 : index
    %222 = vector.load %arg4[%c16_146, %c0_147, %c0_148] : memref<25x16x8xbf16, #tpu.memory_space<vmem>>, vector<1x16x8xbf16>
    %223 = vector.shape_cast %222 : vector<1x16x8xbf16> to vector<16x8xbf16>
    %224 = vector.extract_strided_slice %140 {offsets = [0, 194], sizes = [8, 595], strides = [1, 1]} : vector<8x859xbf16> to vector<8x595xbf16>
    %cst_149 = arith.constant dense<0.000000e+00> : vector<16x595xf32>
    %225 = tpu.matmul %223, %224, %cst_149 {dimension_numbers = #tpu.dot_dimension_numbers<[1], [0], [0], [1], [0, 0, 1, 1], [], []>} : vector<16x8xbf16>, vector<8x595xbf16>, vector<16x595xf32> -> vector<16x595xf32>
    %226 = arith.addf %221, %225 : vector<16x595xf32>
    %c17_150 = arith.constant 17 : index
    %c0_151 = arith.constant 0 : index
    %c0_152 = arith.constant 0 : index
    %227 = vector.load %arg4[%c17_150, %c0_151, %c0_152] : memref<25x16x8xbf16, #tpu.memory_space<vmem>>, vector<1x16x8xbf16>
    %228 = vector.shape_cast %227 : vector<1x16x8xbf16> to vector<16x8xbf16>
    %229 = vector.extract_strided_slice %140 {offsets = [0, 196], sizes = [8, 595], strides = [1, 1]} : vector<8x859xbf16> to vector<8x595xbf16>
    %cst_153 = arith.constant dense<0.000000e+00> : vector<16x595xf32>
    %230 = tpu.matmul %228, %229, %cst_153 {dimension_numbers = #tpu.dot_dimension_numbers<[1], [0], [0], [1], [0, 0, 1, 1], [], []>} : vector<16x8xbf16>, vector<8x595xbf16>, vector<16x595xf32> -> vector<16x595xf32>
    %231 = arith.addf %226, %230 : vector<16x595xf32>
    %c18_154 = arith.constant 18 : index
    %c0_155 = arith.constant 0 : index
    %c0_156 = arith.constant 0 : index
    %232 = vector.load %arg4[%c18_154, %c0_155, %c0_156] : memref<25x16x8xbf16, #tpu.memory_space<vmem>>, vector<1x16x8xbf16>
    %233 = vector.shape_cast %232 : vector<1x16x8xbf16> to vector<16x8xbf16>
    %234 = vector.extract_strided_slice %140 {offsets = [0, 198], sizes = [8, 595], strides = [1, 1]} : vector<8x859xbf16> to vector<8x595xbf16>
    %cst_157 = arith.constant dense<0.000000e+00> : vector<16x595xf32>
    %235 = tpu.matmul %233, %234, %cst_157 {dimension_numbers = #tpu.dot_dimension_numbers<[1], [0], [0], [1], [0, 0, 1, 1], [], []>} : vector<16x8xbf16>, vector<8x595xbf16>, vector<16x595xf32> -> vector<16x595xf32>
    %236 = arith.addf %231, %235 : vector<16x595xf32>
    %c19_158 = arith.constant 19 : index
    %c0_159 = arith.constant 0 : index
    %c0_160 = arith.constant 0 : index
    %237 = vector.load %arg4[%c19_158, %c0_159, %c0_160] : memref<25x16x8xbf16, #tpu.memory_space<vmem>>, vector<1x16x8xbf16>
    %238 = vector.shape_cast %237 : vector<1x16x8xbf16> to vector<16x8xbf16>
    %239 = vector.extract_strided_slice %140 {offsets = [0, 200], sizes = [8, 595], strides = [1, 1]} : vector<8x859xbf16> to vector<8x595xbf16>
    %cst_161 = arith.constant dense<0.000000e+00> : vector<16x595xf32>
    %240 = tpu.matmul %238, %239, %cst_161 {dimension_numbers = #tpu.dot_dimension_numbers<[1], [0], [0], [1], [0, 0, 1, 1], [], []>} : vector<16x8xbf16>, vector<8x595xbf16>, vector<16x595xf32> -> vector<16x595xf32>
    %241 = arith.addf %236, %240 : vector<16x595xf32>
    %c20_162 = arith.constant 20 : index
    %c0_163 = arith.constant 0 : index
    %c0_164 = arith.constant 0 : index
    %242 = vector.load %arg4[%c20_162, %c0_163, %c0_164] : memref<25x16x8xbf16, #tpu.memory_space<vmem>>, vector<1x16x8xbf16>
    %243 = vector.shape_cast %242 : vector<1x16x8xbf16> to vector<16x8xbf16>
    %244 = vector.extract_strided_slice %140 {offsets = [0, 256], sizes = [8, 595], strides = [1, 1]} : vector<8x859xbf16> to vector<8x595xbf16>
    %cst_165 = arith.constant dense<0.000000e+00> : vector<16x595xf32>
    %245 = tpu.matmul %243, %244, %cst_165 {dimension_numbers = #tpu.dot_dimension_numbers<[1], [0], [0], [1], [0, 0, 1, 1], [], []>} : vector<16x8xbf16>, vector<8x595xbf16>, vector<16x595xf32> -> vector<16x595xf32>
    %246 = arith.addf %241, %245 : vector<16x595xf32>
    %c21_166 = arith.constant 21 : index
    %c0_167 = arith.constant 0 : index
    %c0_168 = arith.constant 0 : index
    %247 = vector.load %arg4[%c21_166, %c0_167, %c0_168] : memref<25x16x8xbf16, #tpu.memory_space<vmem>>, vector<1x16x8xbf16>
    %248 = vector.shape_cast %247 : vector<1x16x8xbf16> to vector<16x8xbf16>
    %249 = vector.extract_strided_slice %140 {offsets = [0, 258], sizes = [8, 595], strides = [1, 1]} : vector<8x859xbf16> to vector<8x595xbf16>
    %cst_169 = arith.constant dense<0.000000e+00> : vector<16x595xf32>
    %250 = tpu.matmul %248, %249, %cst_169 {dimension_numbers = #tpu.dot_dimension_numbers<[1], [0], [0], [1], [0, 0, 1, 1], [], []>} : vector<16x8xbf16>, vector<8x595xbf16>, vector<16x595xf32> -> vector<16x595xf32>
    %251 = arith.addf %246, %250 : vector<16x595xf32>
    %c22_170 = arith.constant 22 : index
    %c0_171 = arith.constant 0 : index
    %c0_172 = arith.constant 0 : index
    %252 = vector.load %arg4[%c22_170, %c0_171, %c0_172] : memref<25x16x8xbf16, #tpu.memory_space<vmem>>, vector<1x16x8xbf16>
    %253 = vector.shape_cast %252 : vector<1x16x8xbf16> to vector<16x8xbf16>
    %254 = vector.extract_strided_slice %140 {offsets = [0, 260], sizes = [8, 595], strides = [1, 1]} : vector<8x859xbf16> to vector<8x595xbf16>
    %cst_173 = arith.constant dense<0.000000e+00> : vector<16x595xf32>
    %255 = tpu.matmul %253, %254, %cst_173 {dimension_numbers = #tpu.dot_dimension_numbers<[1], [0], [0], [1], [0, 0, 1, 1], [], []>} : vector<16x8xbf16>, vector<8x595xbf16>, vector<16x595xf32> -> vector<16x595xf32>
    %256 = arith.addf %251, %255 : vector<16x595xf32>
    %c23_174 = arith.constant 23 : index
    %c0_175 = arith.constant 0 : index
    %c0_176 = arith.constant 0 : index
    %257 = vector.load %arg4[%c23_174, %c0_175, %c0_176] : memref<25x16x8xbf16, #tpu.memory_space<vmem>>, vector<1x16x8xbf16>
    %258 = vector.shape_cast %257 : vector<1x16x8xbf16> to vector<16x8xbf16>
    %259 = vector.extract_strided_slice %140 {offsets = [0, 262], sizes = [8, 595], strides = [1, 1]} : vector<8x859xbf16> to vector<8x595xbf16>
    %cst_177 = arith.constant dense<0.000000e+00> : vector<16x595xf32>
    %260 = tpu.matmul %258, %259, %cst_177 {dimension_numbers = #tpu.dot_dimension_numbers<[1], [0], [0], [1], [0, 0, 1, 1], [], []>} : vector<16x8xbf16>, vector<8x595xbf16>, vector<16x595xf32> -> vector<16x595xf32>
    %261 = arith.addf %256, %260 : vector<16x595xf32>
    %c24_178 = arith.constant 24 : index
    %c0_179 = arith.constant 0 : index
    %c0_180 = arith.constant 0 : index
    %262 = vector.load %arg4[%c24_178, %c0_179, %c0_180] : memref<25x16x8xbf16, #tpu.memory_space<vmem>>, vector<1x16x8xbf16>
    %263 = vector.shape_cast %262 : vector<1x16x8xbf16> to vector<16x8xbf16>
    %264 = vector.extract_strided_slice %140 {offsets = [0, 264], sizes = [8, 595], strides = [1, 1]} : vector<8x859xbf16> to vector<8x595xbf16>
    %cst_181 = arith.constant dense<0.000000e+00> : vector<16x595xf32>
    %265 = tpu.matmul %263, %264, %cst_181 {dimension_numbers = #tpu.dot_dimension_numbers<[1], [0], [0], [1], [0, 0, 1, 1], [], []>} : vector<16x8xbf16>, vector<8x595xbf16>, vector<16x595xf32> -> vector<16x595xf32>
    %266 = arith.addf %261, %265 : vector<16x595xf32>
    %c0_182 = arith.constant 0 : index
    %c0_183 = arith.constant 0 : index
    %267 = vector.load %arg5[%c0_182, %c0_183] : memref<16x1xf32, #tpu.memory_space<vmem>>, vector<16x1xf32>
    %268 = vector.broadcast %267 : vector<16x1xf32> to vector<16x595xf32>
    %269 = arith.addf %266, %268 : vector<16x595xf32>
    %cst_184 = arith.constant 0.000000e+00 : f32
    %270 = vector.broadcast %cst_184 : f32 to vector<16x595xf32>
    %271 = arith.maximumf %269, %270 : vector<16x595xf32>
    %272 = vector.extract_strided_slice %271 {offsets = [0, 0], sizes = [16, 529], strides = [1, 1]} : vector<16x595xf32> to vector<16x529xf32>
    %273 = vector.extract_strided_slice %271 {offsets = [0, 2], sizes = [16, 529], strides = [1, 1]} : vector<16x595xf32> to vector<16x529xf32>
    %274 = arith.maximumf %272, %273 : vector<16x529xf32>
    %275 = vector.extract_strided_slice %271 {offsets = [0, 64], sizes = [16, 529], strides = [1, 1]} : vector<16x595xf32> to vector<16x529xf32>
    %276 = vector.extract_strided_slice %271 {offsets = [0, 66], sizes = [16, 529], strides = [1, 1]} : vector<16x595xf32> to vector<16x529xf32>
    %277 = arith.maximumf %275, %276 : vector<16x529xf32>
    %278 = arith.maximumf %274, %277 : vector<16x529xf32>
    %279 = vector.extract_strided_slice %278 {offsets = [0, 0], sizes = [16, 1], strides = [1, 1]} : vector<16x529xf32> to vector<16x1xf32>
    %280 = vector.extract_strided_slice %278 {offsets = [0, 4], sizes = [16, 1], strides = [1, 1]} : vector<16x529xf32> to vector<16x1xf32>
    %281 = vector.extract_strided_slice %278 {offsets = [0, 8], sizes = [16, 1], strides = [1, 1]} : vector<16x529xf32> to vector<16x1xf32>
    %282 = vector.extract_strided_slice %278 {offsets = [0, 12], sizes = [16, 1], strides = [1, 1]} : vector<16x529xf32> to vector<16x1xf32>
    %283 = vector.extract_strided_slice %278 {offsets = [0, 16], sizes = [16, 1], strides = [1, 1]} : vector<16x529xf32> to vector<16x1xf32>
    %284 = vector.extract_strided_slice %278 {offsets = [0, 128], sizes = [16, 1], strides = [1, 1]} : vector<16x529xf32> to vector<16x1xf32>
    %285 = vector.extract_strided_slice %278 {offsets = [0, 132], sizes = [16, 1], strides = [1, 1]} : vector<16x529xf32> to vector<16x1xf32>
    %286 = vector.extract_strided_slice %278 {offsets = [0, 136], sizes = [16, 1], strides = [1, 1]} : vector<16x529xf32> to vector<16x1xf32>
    %287 = vector.extract_strided_slice %278 {offsets = [0, 140], sizes = [16, 1], strides = [1, 1]} : vector<16x529xf32> to vector<16x1xf32>
    %288 = vector.extract_strided_slice %278 {offsets = [0, 144], sizes = [16, 1], strides = [1, 1]} : vector<16x529xf32> to vector<16x1xf32>
    %289 = vector.extract_strided_slice %278 {offsets = [0, 256], sizes = [16, 1], strides = [1, 1]} : vector<16x529xf32> to vector<16x1xf32>
    %290 = vector.extract_strided_slice %278 {offsets = [0, 260], sizes = [16, 1], strides = [1, 1]} : vector<16x529xf32> to vector<16x1xf32>
    %291 = vector.extract_strided_slice %278 {offsets = [0, 264], sizes = [16, 1], strides = [1, 1]} : vector<16x529xf32> to vector<16x1xf32>
    %292 = vector.extract_strided_slice %278 {offsets = [0, 268], sizes = [16, 1], strides = [1, 1]} : vector<16x529xf32> to vector<16x1xf32>
    %293 = vector.extract_strided_slice %278 {offsets = [0, 272], sizes = [16, 1], strides = [1, 1]} : vector<16x529xf32> to vector<16x1xf32>
    %294 = vector.extract_strided_slice %278 {offsets = [0, 384], sizes = [16, 1], strides = [1, 1]} : vector<16x529xf32> to vector<16x1xf32>
    %295 = vector.extract_strided_slice %278 {offsets = [0, 388], sizes = [16, 1], strides = [1, 1]} : vector<16x529xf32> to vector<16x1xf32>
    %296 = vector.extract_strided_slice %278 {offsets = [0, 392], sizes = [16, 1], strides = [1, 1]} : vector<16x529xf32> to vector<16x1xf32>
    %297 = vector.extract_strided_slice %278 {offsets = [0, 396], sizes = [16, 1], strides = [1, 1]} : vector<16x529xf32> to vector<16x1xf32>
    %298 = vector.extract_strided_slice %278 {offsets = [0, 400], sizes = [16, 1], strides = [1, 1]} : vector<16x529xf32> to vector<16x1xf32>
    %299 = vector.extract_strided_slice %278 {offsets = [0, 512], sizes = [16, 1], strides = [1, 1]} : vector<16x529xf32> to vector<16x1xf32>
    %300 = vector.extract_strided_slice %278 {offsets = [0, 516], sizes = [16, 1], strides = [1, 1]} : vector<16x529xf32> to vector<16x1xf32>
    %301 = vector.extract_strided_slice %278 {offsets = [0, 520], sizes = [16, 1], strides = [1, 1]} : vector<16x529xf32> to vector<16x1xf32>
    %302 = vector.extract_strided_slice %278 {offsets = [0, 524], sizes = [16, 1], strides = [1, 1]} : vector<16x529xf32> to vector<16x1xf32>
    %303 = vector.extract_strided_slice %278 {offsets = [0, 528], sizes = [16, 1], strides = [1, 1]} : vector<16x529xf32> to vector<16x1xf32>
    %304 = tpu.concatenate %279, %280, %281, %282, %283, %284, %285, %286, %287, %288, %289, %290, %291, %292, %293, %294 in 0 : vector<16x1xf32>, vector<16x1xf32>, vector<16x1xf32>, vector<16x1xf32>, vector<16x1xf32>, vector<16x1xf32>, vector<16x1xf32>, vector<16x1xf32>, vector<16x1xf32>, vector<16x1xf32>, vector<16x1xf32>, vector<16x1xf32>, vector<16x1xf32>, vector<16x1xf32>, vector<16x1xf32>, vector<16x1xf32> -> vector<256x1xf32>
    %305 = tpu.concatenate %295, %296, %297, %298, %299, %300, %301, %302, %303 in 0 : vector<16x1xf32>, vector<16x1xf32>, vector<16x1xf32>, vector<16x1xf32>, vector<16x1xf32>, vector<16x1xf32>, vector<16x1xf32>, vector<16x1xf32>, vector<16x1xf32> -> vector<144x1xf32>
    %306 = tpu.concatenate %304, %305 in 0 : vector<256x1xf32>, vector<144x1xf32> -> vector<400x1xf32>
    %307 = arith.truncf %306 : vector<400x1xf32> to vector<400x1xbf16>
    %c0_185 = arith.constant 0 : index
    %c0_186 = arith.constant 0 : index
    %308 = vector.load %arg6[%c0_185, %c0_186] : memref<120x400xbf16, #tpu.memory_space<vmem>>, vector<120x400xbf16>
    %cst_187 = arith.constant dense<0.000000e+00> : vector<120x1xf32>
    %309 = tpu.matmul %308, %307, %cst_187 {dimension_numbers = #tpu.dot_dimension_numbers<[1], [0], [0], [1], [0, 0, 1, 1], [], []>} : vector<120x400xbf16>, vector<400x1xbf16>, vector<120x1xf32> -> vector<120x1xf32>
    %c0_188 = arith.constant 0 : index
    %c0_189 = arith.constant 0 : index
    %310 = vector.load %arg7[%c0_188, %c0_189] : memref<120x1xf32, #tpu.memory_space<vmem>>, vector<120x1xf32>
    %311 = arith.addf %309, %310 : vector<120x1xf32>
    %cst_190 = arith.constant 0.000000e+00 : f32
    %312 = vector.broadcast %cst_190 : f32 to vector<120x1xf32>
    %313 = arith.maximumf %311, %312 : vector<120x1xf32>
    %314 = arith.truncf %313 : vector<120x1xf32> to vector<120x1xbf16>
    %c0_191 = arith.constant 0 : index
    %c0_192 = arith.constant 0 : index
    %315 = vector.load %arg8[%c0_191, %c0_192] : memref<84x120xbf16, #tpu.memory_space<vmem>>, vector<84x120xbf16>
    %cst_193 = arith.constant dense<0.000000e+00> : vector<84x1xf32>
    %316 = tpu.matmul %315, %314, %cst_193 {dimension_numbers = #tpu.dot_dimension_numbers<[1], [0], [0], [1], [0, 0, 1, 1], [], []>} : vector<84x120xbf16>, vector<120x1xbf16>, vector<84x1xf32> -> vector<84x1xf32>
    %c0_194 = arith.constant 0 : index
    %c0_195 = arith.constant 0 : index
    %317 = vector.load %arg9[%c0_194, %c0_195] : memref<84x1xf32, #tpu.memory_space<vmem>>, vector<84x1xf32>
    %318 = arith.addf %316, %317 : vector<84x1xf32>
    %cst_196 = arith.constant 0.000000e+00 : f32
    %319 = vector.broadcast %cst_196 : f32 to vector<84x1xf32>
    %320 = arith.maximumf %318, %319 : vector<84x1xf32>
    %321 = arith.truncf %320 : vector<84x1xf32> to vector<84x1xbf16>
    %c0_197 = arith.constant 0 : index
    %c0_198 = arith.constant 0 : index
    %322 = vector.load %arg10[%c0_197, %c0_198] : memref<10x84xbf16, #tpu.memory_space<vmem>>, vector<10x84xbf16>
    %cst_199 = arith.constant dense<0.000000e+00> : vector<10x1xf32>
    %323 = tpu.matmul %322, %321, %cst_199 {dimension_numbers = #tpu.dot_dimension_numbers<[1], [0], [0], [1], [0, 0, 1, 1], [], []>} : vector<10x84xbf16>, vector<84x1xbf16>, vector<10x1xf32> -> vector<10x1xf32>
    %c0_200 = arith.constant 0 : index
    %c0_201 = arith.constant 0 : index
    %324 = vector.load %arg11[%c0_200, %c0_201] : memref<10x1xf32, #tpu.memory_space<vmem>>, vector<10x1xf32>
    %325 = arith.addf %323, %324 : vector<10x1xf32>
    %c0_202 = arith.constant 0 : index
    %c0_203 = arith.constant 0 : index
    %c0_204 = arith.constant 0 : index
    %326 = vector.load %arg12[%c0_202, %c0_203, %c0_204] : memref<1x10x1xf32, #tpu.memory_space<vmem>>, vector<1x10x1xf32>
    %327 = vector.shape_cast %326 : vector<1x10x1xf32> to vector<10x1xf32>
    %328 = vector.shape_cast %325 : vector<10x1xf32> to vector<1x10x1xf32>
    tpu.vector_store %arg12[%c0_202, %c0_203, %c0_204], %328 {strides = array<i32>} : memref<1x10x1xf32, #tpu.memory_space<vmem>>, vector<1x10x1xf32>,
    return
  }
  func.func @transform_0(%arg0: i32) -> (i32, i32, i32) {
    %c0_i32 = arith.constant 0 : i32
    %c0_i32_0 = arith.constant 0 : i32
    %c0_i32_1 = arith.constant 0 : i32
    return %arg0, %c0_i32, %c0_i32_0 : i32, i32, i32
  }
  func.func @transform_1(%arg0: i32) -> (i32, i32, i32) {
    %c0_i32 = arith.constant 0 : i32
    %c0_i32_0 = arith.constant 0 : i32
    %c0_i32_1 = arith.constant 0 : i32
    %c0_i32_2 = arith.constant 0 : i32
    return %c0_i32, %c0_i32_0, %c0_i32_1 : i32, i32, i32
  }
  func.func @transform_2(%arg0: i32) -> (i32, i32) {
    %c0_i32 = arith.constant 0 : i32
    %c0_i32_0 = arith.constant 0 : i32
    %c0_i32_1 = arith.constant 0 : i32
    return %c0_i32, %c0_i32_0 : i32, i32
  }
  func.func @transform_3(%arg0: i32) -> (i32, i32, i32) {
    %c0_i32 = arith.constant 0 : i32
    %c0_i32_0 = arith.constant 0 : i32
    %c0_i32_1 = arith.constant 0 : i32
    %c0_i32_2 = arith.constant 0 : i32
    return %c0_i32, %c0_i32_0, %c0_i32_1 : i32, i32, i32
  }
  func.func @transform_4(%arg0: i32) -> (i32, i32) {
    %c0_i32 = arith.constant 0 : i32
    %c0_i32_0 = arith.constant 0 : i32
    %c0_i32_1 = arith.constant 0 : i32
    return %c0_i32, %c0_i32_0 : i32, i32
  }
  func.func @transform_5(%arg0: i32) -> (i32, i32) {
    %c0_i32 = arith.constant 0 : i32
    %c0_i32_0 = arith.constant 0 : i32
    %c0_i32_1 = arith.constant 0 : i32
    return %c0_i32, %c0_i32_0 : i32, i32
  }
  func.func @transform_6(%arg0: i32) -> (i32, i32) {
    %c0_i32 = arith.constant 0 : i32
    %c0_i32_0 = arith.constant 0 : i32
    %c0_i32_1 = arith.constant 0 : i32
    return %c0_i32, %c0_i32_0 : i32, i32
  }
  func.func @transform_7(%arg0: i32) -> (i32, i32) {
    %c0_i32 = arith.constant 0 : i32
    %c0_i32_0 = arith.constant 0 : i32
    %c0_i32_1 = arith.constant 0 : i32
    return %c0_i32, %c0_i32_0 : i32, i32
  }
  func.func @transform_8(%arg0: i32) -> (i32, i32) {
    %c0_i32 = arith.constant 0 : i32
    %c0_i32_0 = arith.constant 0 : i32
    %c0_i32_1 = arith.constant 0 : i32
    return %c0_i32, %c0_i32_0 : i32, i32
  }
  func.func @transform_9(%arg0: i32) -> (i32, i32) {
    %c0_i32 = arith.constant 0 : i32
    %c0_i32_0 = arith.constant 0 : i32
    %c0_i32_1 = arith.constant 0 : i32
    return %c0_i32, %c0_i32_0 : i32, i32
  }
  func.func @transform_10(%arg0: i32) -> (i32, i32) {
    %c0_i32 = arith.constant 0 : i32
    %c0_i32_0 = arith.constant 0 : i32
    %c0_i32_1 = arith.constant 0 : i32
    return %c0_i32, %c0_i32_0 : i32, i32
  }
  func.func @transform_11(%arg0: i32) -> (i32, i32, i32) {
    %c0_i32 = arith.constant 0 : i32
    %c0_i32_0 = arith.constant 0 : i32
    %c0_i32_1 = arith.constant 0 : i32
    return %arg0, %c0_i32, %c0_i32_0 : i32, i32, i32
  }
}

</mosaic_0001>

<bundles_post_ra>
// kernel: net_forward.1
= control target key start
LH: loop header
LB: loop body
LE: loop exit
PB: predicated region body
PF: predicated region fallthrough
CT: control target
= control target key end

     0   :  { %s12359_s17 = smov 0   ;;  %s15238_s0 = inlined_call_operand.vmem [shape: bf16[2,8,1024], index: 0, kind: input, shape index: {}]   ;;  %s15239_s1 = inlined_call_operand.vmem [shape: bf16[25,8,8], index: 1, kind: input, shape index: {}]   ;;  %s15240_s2 = inlined_call_operand.vmem [shape: f32[8,1], index: 2, kind: input, shape index: {}]   ;;  %s15241_s3 = inlined_call_operand.vmem [shape: bf16[25,16,8], index: 3, kind: input, shape index: {}]   ;;  %s15242_s4 = inlined_call_operand.vmem [shape: f32[16,1], index: 4, kind: input, shape index: {}]   ;;  %s15243_s5 = inlined_call_operand.vmem [shape: bf16[120,400], index: 5, kind: input, shape index: {}]   ;;  %s15244_s6 = inlined_call_operand.vmem [shape: f32[120,1], index: 6, kind: input, shape index: {}]   ;;  %s15245_s7 = inlined_call_operand.vmem [shape: bf16[84,120], index: 7, kind: input, shape index: {}]   ;;  %s15246_s8 = inlined_call_operand.vmem [shape: f32[84,1], index: 8, kind: input, shape index: {}]   ;;  %s15247_s9 = inlined_call_operand.vmem [shape: bf16[10,84], index: 9, kind: input, shape index: {}]   ;;  %s15248_s10 = inlined_call_operand.vmem [shape: f32[10,1], index: 10, kind: input, shape index: {}]   ;;  %s15249_s11 = inlined_call_operand.vmem [shape: f32[2,10,1], index: 11, kind: output, shape index: {}]  }
   0x1 LB: > { %s10925_s18 = sadd.s32 4294967295, %s12268_s17   ;;  %p10929_p0 = scmp.ge.s32.totalorder %s12268_s17, 1  ;;  %s12268_s17 = sphi %s12359_s17, %s21_s17  }
   0x2   : > { %p337_p1 = scmp.lt.s32.totalorder %s12268_s17, 3 }
   0x4   : > { %p338_p2 = pnand %p10929_p0, %p337_p1 }
   0x6   : > { %341 = sbr.rel (%p338_p2) target bundleno = 2898 (0xb52), region = 64 }
   0xb   : > { %p377_p3 = scmp.lt.s32.totalorder %s10925_s18, 1  ;;  %v15259_v0 = vmov 0   ;;  %s12271_s23 = smov 127   ;;  %vm427_vm0 = vcmask 1039360   ;;  %vm438_vm1 = vcmask 1043456   ;;  %vm434_vm2 = vcmask 64512  }
   0xc   : > { %492 = vmatprep.mubr.bf16.mxu0 %v15259_v0  ;;  %533 = vmatprep.mubr.bf16.mxu1 %v15259_v0  ;;  %s12272_s24 = smov 126   ;;  %s12273_s25 = smov 125   ;;  %v10934_v22 = vld [vmem:[%s15239_s1 + $0x4] sm:$0xf]  ;;  %v15250_v30 = vmov 0.0   ;;  %vm12281_vm3 = vmmov 0  }
   0xd   : > { %s15304_s18 = smov (!%p377_p3, %s10925_s18), 1  ;;  %11964 = vset.pattern.permute.xlu0 %v15259_v0  ;;  %11995 = vset.pattern.permute.xlu1 %v15259_v0  ;;  %s12274_s26 = smov 124   ;;  %vm826_vm4 = vcmask 1031168   ;;  %v392_v41 = vld [vmem:[%s15239_s1] sm:$0xf]  ;;  %vm1043_vm5 = vcmask 1022976  }
   0xe   : > { %s11395_s19 = sshll.u32 %s15304_s18, 5  ;;  %s12275_s27 = smov 96   ;;  %v10956_v60 = vld [vmem:[%s15239_s1 + $0x8] sm:$0xf]  ;;  %vm1260_vm6 = vcmask 1014784   ;;  %vm1481_vm7 = vcmask 785408  }
   0xf   : > { %s381_s22 = scalar_lea.vmem %s15238_s0, %s11395_s19  ;;  %s12276_s28 = smov 95   ;;  %vm1701_vm8 = vcmask 777216   ;;  %vm1921_vm9 = vcmask 769024   ;;  %vm2141_vm10 = vcmask 760832   ;;  %vm2361_vm11 = vcmask 752640  }
  0x10   : > { %v389_v1 = vld [vmem:[%s381_s22 + $0x8] sm:$0xff]  ;;  %v388_v2 = vld [vmem:[%s381_s22] sm:$0xff]  ;;  %v390_v5 = vld [vmem:[%s381_s22 + $0x10] sm:$0xff]  ;;  %s12277_s29 = smov 94   ;;  %s12278_s30 = smov 93   ;;  %vm2581_vm12 = vcmask 523264  }
  0x11   : > { %v12377_v3 = vcombine.low %v389_v1, %v389_v1  ;;  %v12379_v4 = vcombine.low %v388_v2, %v388_v2  ;;  %v12383_v6 = vcombine.high %v388_v2, %v388_v2  ;;  %v12387_v7 = vcombine.high %v389_v1, %v389_v1  ;;  %v391_v8 = vld [vmem:[%s381_s22 + $0x18] sm:$0xff]  ;;  %s12279_s12 = smov 92   ;;  %s12282_s15 = smov 64  }
  0x12   : > { %v12393_v9 = vcombine.high %v390_v5, %v390_v5  ;;  %v12395_v10 = vcombine.low %v390_v5, %v390_v5  ;;  %v12401_v11 = vcombine.low %v391_v8, %v391_v8  ;;  %v12459_v12 = vcombine.high %v391_v8, %v391_v8  ;;  %s12283_s20 = smov 63   ;;  %s12286_s16 = smov 60  }
  0x13   : > { %417 = vrot.lane.b32.xlu1 %v12377_v3, %s12271_s23  ;;  %413 = vrot.lane.b32.xlu0 %v12379_v4, %s12271_s23  ;;  %v627_v35 = vsel %vm438_vm1, %v12379_v4, 0  ;;  %v633_v38 = vsel %vm438_vm1, %v12377_v3, 0  ;;  %s12287_s21 = smov 32   ;;  %s12289_s14 = smov 30   ;;  %vm2801_vm13 = vcmask 515072   ;;  %vm3021_vm14 = vcmask 506880  }
  0x14   : > { %v639_v42 = vsel %vm438_vm1, %v12395_v10, 0  ;;  %v645_v46 = vsel %vm438_vm1, %v12401_v11, 0  ;;  %vm3241_vm15 = vcmask 498688   ;;  %s12295_s19 = smov 56   ;;  %s12298_s22 = smov 112  }
  0x15   : > { %s11396_s13 = sshll.u32 %s15304_s18, 4 }
  0x17   : > { %419 = vrot.lane.b32.xlu1 %v12387_v7, %s12271_s23  ;;  %415 = vrot.lane.b32.xlu0 %v12383_v6, %s12271_s23 }
  0x1b   : > { %423 = vrot.lane.b32.xlu1 %v12393_v9, %s12271_s23  ;;  %421 = vrot.lane.b32.xlu0 %v12395_v10, %s12271_s23 }
  0x1f   : > { %812 = vrot.lane.b32.xlu1 %v12379_v4, %s12272_s24  ;;  %425 = vrot.lane.b32.xlu0 %v12401_v11, %s12271_s23 }
  0x23   : > { %816 = vrot.lane.b32.xlu1 %v12377_v3, %s12272_s24  ;;  %814 = vrot.lane.b32.xlu0 %v12383_v6, %s12272_s24 }
  0x27   : > { %820 = vrot.lane.b32.xlu1 %v12395_v10, %s12272_s24  ;;  %818 = vrot.lane.b32.xlu0 %v12387_v7, %s12272_s24 }
  0x2b   : > { %824 = vrot.lane.b32.xlu1 %v12401_v11, %s12272_s24  ;;  %822 = vrot.lane.b32.xlu0 %v12393_v9, %s12272_s24 }
  0x2f   : > { %1031 = vrot.lane.b32.xlu1 %v12383_v6, %s12273_s25  ;;  %1029 = vrot.lane.b32.xlu0 %v12379_v4, %s12273_s25 }
  0x33   : > { %1035 = vrot.lane.b32.xlu1 %v12387_v7, %s12273_s25  ;;  %1033 = vrot.lane.b32.xlu0 %v12377_v3, %s12273_s25 }
  0x37   : > { %1039 = vrot.lane.b32.xlu1 %v12393_v9, %s12273_s25  ;;  %1037 = vrot.lane.b32.xlu0 %v12395_v10, %s12273_s25 }
  0x3b   : > { %1246 = vrot.lane.b32.xlu1 %v12379_v4, %s12274_s26  ;;  %1041 = vrot.lane.b32.xlu0 %v12401_v11, %s12273_s25 }
  0x3f   : > { %1250 = vrot.lane.b32.xlu1 %v12377_v3, %s12274_s26  ;;  %1248 = vrot.lane.b32.xlu0 %v12383_v6, %s12274_s26 }
  0x43   : > { %1254 = vrot.lane.b32.xlu1 %v12395_v10, %s12274_s26  ;;  %1252 = vrot.lane.b32.xlu0 %v12387_v7, %s12274_s26 }
  0x47   : > { %1258 = vrot.lane.b32.xlu1 %v12401_v11, %s12274_s26  ;;  %1256 = vrot.lane.b32.xlu0 %v12393_v9, %s12274_s26 }
  0x4b   : > { %1467 = vrot.lane.b32.xlu1 %v12383_v6, %s12275_s27  ;;  %1465 = vrot.lane.b32.xlu0 %v12379_v4, %s12275_s27 }
  0x4f   : > { %1471 = vrot.lane.b32.xlu1 %v12387_v7, %s12275_s27  ;;  %1469 = vrot.lane.b32.xlu0 %v12377_v3, %s12275_s27 }
  0x53   : > { %1475 = vrot.lane.b32.xlu1 %v12393_v9, %s12275_s27  ;;  %1473 = vrot.lane.b32.xlu0 %v12395_v10, %s12275_s27 }
  0x57   : > { %1479 = vrot.lane.b32.xlu1 %v12459_v12, %s12275_s27  ;;  %1477 = vrot.lane.b32.xlu0 %v12401_v11, %s12275_s27 }
  0x5b   : > { %1687 = vrot.lane.b32.xlu1 %v12383_v6, %s12276_s28  ;;  %1685 = vrot.lane.b32.xlu0 %v12379_v4, %s12276_s28 }
  0x5f   : > { %1691 = vrot.lane.b32.xlu1 %v12387_v7, %s12276_s28  ;;  %1689 = vrot.lane.b32.xlu0 %v12377_v3, %s12276_s28 }
  0x63   : > { %1695 = vrot.lane.b32.xlu1 %v12393_v9, %s12276_s28  ;;  %1693 = vrot.lane.b32.xlu0 %v12395_v10, %s12276_s28 }
  0x67   : > { %1699 = vrot.lane.b32.xlu1 %v12459_v12, %s12276_s28  ;;  %1697 = vrot.lane.b32.xlu0 %v12401_v11, %s12276_s28  ;;  %s12284_s28 = smov 62  }
  0x6b   : > { %1907 = vrot.lane.b32.xlu1 %v12383_v6, %s12277_s29  ;;  %1905 = vrot.lane.b32.xlu0 %v12379_v4, %s12277_s29 }
  0x6f   : > { %1911 = vrot.lane.b32.xlu1 %v12387_v7, %s12277_s29  ;;  %1909 = vrot.lane.b32.xlu0 %v12377_v3, %s12277_s29 }
  0x73   : > { %1915 = vrot.lane.b32.xlu1 %v12393_v9, %s12277_s29  ;;  %1913 = vrot.lane.b32.xlu0 %v12395_v10, %s12277_s29 }
  0x77   : > { %1919 = vrot.lane.b32.xlu1 %v12459_v12, %s12277_s29  ;;  %1917 = vrot.lane.b32.xlu0 %v12401_v11, %s12277_s29 }
  0x7b   : > { %2127 = vrot.lane.b32.xlu1 %v12383_v6, %s12278_s30  ;;  %2125 = vrot.lane.b32.xlu0 %v12379_v4, %s12278_s30 }
  0x7f   : > { %2131 = vrot.lane.b32.xlu1 %v12387_v7, %s12278_s30  ;;  %2129 = vrot.lane.b32.xlu0 %v12377_v3, %s12278_s30 }
  0x83   : > { %2135 = vrot.lane.b32.xlu1 %v12393_v9, %s12278_s30  ;;  %2133 = vrot.lane.b32.xlu0 %v12395_v10, %s12278_s30 }
  0x85   : > { %v418_v13 = vpop.permute.xlu1 %417  ;;  %v414_v14 = vpop.permute.xlu0 %413 }
  0x87   : > { %2139 = vrot.lane.b32.xlu1 %v12459_v12, %s12278_s30  ;;  %2137 = vrot.lane.b32.xlu0 %v12401_v11, %s12278_s30  ;;  %s12288_s30 = smov 31  }
  0x89   : > { %v420_v15 = vpop.permute.xlu1 %419  ;;  %v416_v16 = vpop.permute.xlu0 %415 }
  0x8a   : > { %v12490_v17 = vsel %vm427_vm0, %v416_v16, %v418_v13  ;;  %v428_v18 = vsel %vm427_vm0, %v414_v14, %v416_v16  ;;  %v12504_v23 = vsel %vm427_vm0, %v418_v13, %v420_v15 }
  0x8b   : > { %2347 = vrot.lane.b32.xlu1 %v12383_v6, %s12279_s12  ;;  %2345 = vrot.lane.b32.xlu0 %v12379_v4, %s12279_s12  ;;  %v440_v19 = vsel %vm438_vm1, %v428_v18, 0  ;;  %v446_v25 = vsel %vm438_vm1, %v12504_v23, 0 }
  0x8c   : > { %10942 = vmatprep.subr.msk.bf16.mxu0 %vm438_vm1, %v12490_v17 }
  0x8d   : > { %475 = vmatpush1.bf16.msra.mxu0 %v440_v19  ;;  %v424_v20 = vpop.permute.xlu1 %423  ;;  %v422_v21 = vpop.permute.xlu0 %421 }
  0x8e   : > { %v12507_v24 = vsel %vm427_vm0, %v420_v15, %v422_v21  ;;  %v12519_v26 = vsel %vm427_vm0, %v422_v21, %v424_v20 }
  0x8f   : > { %2351 = vrot.lane.b32.xlu1 %v12387_v7, %s12279_s12  ;;  %2349 = vrot.lane.b32.xlu0 %v12377_v3, %s12279_s12  ;;  %v452_v32 = vsel %vm438_vm1, %v12519_v26, 0 }
  0x90   : > { %10943 = vmatmul.mubr.msk.bf16.vlgmr.msra.gmra.mxu0 %vm434_vm2, %v10934_v22  ;;  %10944 = vmatprep.subr.msk.bf16.mxu1 %vm438_vm1, %v12507_v24 }
  0x91   : > { %516 = vmatpush1.bf16.msra.mxu1 %v446_v25  ;;  %v813_v27 = vpop.permute.xlu1 %812  ;;  %v12521_v28 = vpop.permute.xlu0 %425  ;;  %574 = vmatprep.mubr.bf16.mxu0 %v15259_v0 }
  0x92   : > { %v12526_v29 = vsel %vm427_vm0, %v424_v20, %v12521_v28  ;;  %11582 = vmatprep.subr.bf16.mxu1 %v15250_v30  ;;  %v458_v31 = vsel %vm438_vm1, %v12521_v28, 0 }
  0x93   : > { %2355 = vrot.lane.b32.xlu1 %v12393_v9, %s12279_s12  ;;  %2353 = vrot.lane.b32.xlu0 %v12395_v10, %s12279_s12 }
  0x94   : > { %10945 = vmatmul.mubr.msk.bf16.vlgmr.msra.gmra.mxu1 %vm434_vm2, %v10934_v22  ;;  %10946 = vmatprep.subr.msk.bf16.mxu0 %vm438_vm1, %v12526_v29 }
  0x95   : > { %557 = vmatpush1.bf16.msra.mxu0 %v452_v32  ;;  %v817_v33 = vpop.permute.xlu1 %816  ;;  %11583 = vmatpush3.bf16.msra.mxu1 %v458_v31  ;;  %v815_v34 = vpop.permute.xlu0 %814  ;;  %v10964_v31 = vld [vmem:[%s15239_s1 + $0xc] sm:$0xf] }
  0x96   : > { %11584 = vmatprep.mubr.msk.bf16.mxu1 %vm12281_vm3, %v15250_v30  ;;  %10949 = vmatprep.subr.msk.bf16.mxu0 %vm438_vm1, %v12383_v6  ;;  %v12577_v43 = vsel %vm826_vm4, %v815_v34, %v817_v33  ;;  %v827_v47 = vsel %vm826_vm4, %v813_v27, %v815_v34 }
  0x97   : > { %2359 = vrot.lane.b32.xlu1 %v12459_v12, %s12279_s12  ;;  %2357 = vrot.lane.b32.xlu0 %v12401_v11, %s12279_s12  ;;  %v837_v51 = vsel %vm438_vm1, %v827_v47, 0  ;;  %s12285_s12 = smov 61  }
  0x98   : > { %10947 = vmatmul.mubr.msk.bf16.vlgmr.msra.gmra.mxu0 %vm434_vm2, %v10934_v22  ;;  %10951 = vmatprep.subr.msk.bf16.mxu1 %vm438_vm1, %v12387_v7 }
  0x99   : > { %v821_v36 = vpop.permute.xlu1 %820  ;;  %v819_v37 = vpop.permute.xlu0 %818  ;;  %662 = vmatpush1.bf16.msra.mxu0 %v627_v35  ;;  %679 = vmatprep.mubr.bf16.mxu0 %v15259_v0 }
  0x9a   : > { %10953 = vmatprep.subr.msk.bf16.mxu0 %vm438_vm1, %v12393_v9  ;;  %v12591_v48 = vsel %vm826_vm4, %v819_v37, %v821_v36  ;;  %v12600_v52 = vsel %vm826_vm4, %v817_v33, %v819_v37 }
  0x9b   : > { %2567 = vrot.lane.b32.xlu1 %v12383_v6, %s12282_s15  ;;  %2565 = vrot.lane.b32.xlu0 %v12379_v4, %s12282_s15  ;;  %v843_v56 = vsel %vm438_vm1, %v12600_v52, 0 }
  0x9c   : > { %11585 = vmatmul.mubr.msk.bf16.vlgmr.msra.gmra.mxu1 %vm434_vm2, %v10934_v22 }
  0x9d   : > { %v12563_v39 = vpop.permute.xlu1 %824  ;;  %v823_v40 = vpop.permute.xlu0 %822  ;;  %703 = vmatpush1.bf16.msra.mxu1 %v633_v38  ;;  %720 = vmatprep.mubr.bf16.mxu1 %v15259_v0 }
  0x9e   : > { %11588 = vmatprep.subr.bf16.mxu1 %v15250_v30  ;;  %v12608_v53 = vsel %vm826_vm4, %v823_v40, %v12563_v39  ;;  %v12617_v57 = vsel %vm826_vm4, %v821_v36, %v823_v40  ;;  %v855_v2 = vsel %vm438_vm1, %v12563_v39, 0 }
  0x9f   : > { %2571 = vrot.lane.b32.xlu1 %v12387_v7, %s12282_s15  ;;  %2569 = vrot.lane.b32.xlu0 %v12377_v3, %s12282_s15  ;;  %v849_v61 = vsel %vm438_vm1, %v12617_v57, 0 }
  0xa0   : > { %10950 = vmatmul.mubr.msk.bf16.vlgmr.msra.gmra.mxu0 %vm434_vm2, %v392_v41 }
  0xa1   : > { %v1032_v44 = vpop.permute.xlu1 %1031  ;;  %v1030_v45 = vpop.permute.xlu0 %1029  ;;  %744 = vmatpush1.bf16.msra.mxu0 %v639_v42  ;;  %761 = vmatprep.mubr.bf16.mxu0 %v15259_v0 }
  0xa2   : > { %10957 = vmatprep.subr.msk.bf16.mxu0 %vm438_vm1, %v12577_v43  ;;  %v1044_v5 = vsel %vm1043_vm5, %v1030_v45, %v1032_v44 }
  0xa3   : > { %2575 = vrot.lane.b32.xlu1 %v12393_v9, %s12282_s15  ;;  %2573 = vrot.lane.b32.xlu0 %v12395_v10, %s12282_s15  ;;  %v1054_v15 = vsel %vm438_vm1, %v1044_v5, 0 }
  0xa4   : > { %10952 = vmatmul.mubr.msk.bf16.vlgmr.msra.gmra.mxu1 %vm434_vm2, %v392_v41 }
  0xa5   : > { %v1036_v49 = vpop.permute.xlu1 %1035  ;;  %v1034_v50 = vpop.permute.xlu0 %1033  ;;  %11589 = vmatpush3.bf16.msra.mxu1 %v645_v46  ;;  %11590 = vmatprep.mubr.msk.bf16.mxu1 %vm12281_vm3, %v15250_v30 }
  0xa6   : > { %10959 = vmatprep.subr.msk.bf16.mxu1 %vm438_vm1, %v12591_v48  ;;  %v12638_v62 = vsel %vm1043_vm5, %v1032_v44, %v1034_v50  ;;  %v12663_v16 = vsel %vm1043_vm5, %v1034_v50, %v1036_v49 }
  0xa7   : > { %2579 = vrot.lane.b32.xlu1 %v12459_v12, %s12282_s15  ;;  %2577 = vrot.lane.b32.xlu0 %v12401_v11, %s12282_s15  ;;  %v1060_v21 = vsel %vm438_vm1, %v12663_v16, 0 }
  0xa8   : > { %10954 = vmatmul.mubr.msk.bf16.vlgmr.msra.gmra.mxu0 %vm434_vm2, %v392_v41 }
  0xa9   : > { %872 = vmatpush1.bf16.msra.mxu0 %v837_v51  ;;  %v1040_v54 = vpop.permute.xlu1 %1039  ;;  %v1038_v55 = vpop.permute.xlu0 %1037  ;;  %889 = vmatprep.mubr.bf16.mxu0 %v15259_v0 }
  0xaa   : > { %10961 = vmatprep.subr.msk.bf16.mxu0 %vm438_vm1, %v12608_v53  ;;  %v12652_v8 = vsel %vm1043_vm5, %v1036_v49, %v1038_v55  ;;  %v12682_v22 = vsel %vm1043_vm5, %v1038_v55, %v1040_v54  ;;  %v10972_v55 = vld [vmem:[%s15239_s1 + $0x10] sm:$0xf] }
  0xab   : > { %2787 = vrot.lane.b32.xlu1 %v12383_v6, %s12283_s20  ;;  %2785 = vrot.lane.b32.xlu0 %v12379_v4, %s12283_s20  ;;  %v1066_v32 = vsel %vm438_vm1, %v12682_v22, 0 }
  0xac   : > { %11591 = vmatmul.mubr.msk.bf16.vlgmr.msra.gmra.mxu1 %vm434_vm2, %v392_v41 }
  0xad   : > { %913 = vmatpush1.bf16.msra.mxu1 %v843_v56  ;;  %v1247_v58 = vpop.permute.xlu1 %1246  ;;  %v12624_v59 = vpop.permute.xlu0 %1041  ;;  %930 = vmatprep.mubr.bf16.mxu1 %v15259_v0 }
  0xae   : > { %11594 = vmatprep.subr.bf16.mxu1 %v15250_v30  ;;  %v12671_v18 = vsel %vm1043_vm5, %v1040_v54, %v12624_v59  ;;  %v1072_v36 = vsel %vm438_vm1, %v12624_v59, 0 }
  0xaf   : > { %2791 = vrot.lane.b32.xlu1 %v12387_v7, %s12283_s20  ;;  %2789 = vrot.lane.b32.xlu0 %v12377_v3, %s12283_s20 }
  0xb0   : > { %10958 = vmatmul.mubr.msk.bf16.vlgmr.msra.gmra.mxu0 %vm434_vm2, %v10956_v60 }
  0xb1   : > { %954 = vmatpush1.bf16.msra.mxu0 %v849_v61  ;;  %v1251_v63 = vpop.permute.xlu1 %1250  ;;  %v1249_v1 = vpop.permute.xlu0 %1248  ;;  %971 = vmatprep.mubr.bf16.mxu0 %v15259_v0 }
  0xb2   : > { %10965 = vmatprep.subr.msk.bf16.mxu0 %vm438_vm1, %v12638_v62  ;;  %v12701_v33 = vsel %vm1260_vm6, %v1249_v1, %v1251_v63  ;;  %v1261_v37 = vsel %vm1260_vm6, %v1247_v58, %v1249_v1 }
  0xb3   : > { %2795 = vrot.lane.b32.xlu1 %v12393_v9, %s12283_s20  ;;  %2793 = vrot.lane.b32.xlu0 %v12395_v10, %s12283_s20  ;;  %v1271_v42 = vsel %vm438_vm1, %v1261_v37, 0 }
  0xb4   : > { %10960 = vmatmul.mubr.msk.bf16.vlgmr.msra.gmra.mxu1 %vm434_vm2, %v10956_v60 }
  0xb5   : > { %v12655_v13 = vpop.permute.xlu1 %1254  ;;  %11595 = vmatpush3.bf16.msra.mxu1 %v855_v2  ;;  %v1253_v14 = vpop.permute.xlu0 %1252  ;;  %11596 = vmatprep.mubr.msk.bf16.mxu1 %vm12281_vm3, %v15250_v30 }
  0xb6   : > { %10967 = vmatprep.subr.msk.bf16.mxu1 %vm438_vm1, %v12652_v8  ;;  %v12716_v38 = vsel %vm1260_vm6, %v1253_v14, %v12655_v13  ;;  %v12727_v44 = vsel %vm1260_vm6, %v1251_v63, %v1253_v14 }
  0xb7   : > { %2799 = vrot.lane.b32.xlu1 %v12459_v12, %s12283_s20  ;;  %2797 = vrot.lane.b32.xlu0 %v12401_v11, %s12283_s20  ;;  %v1277_v49 = vsel %vm438_vm1, %v12727_v44, 0 }
  0xb8   : > { %10962 = vmatmul.mubr.msk.bf16.vlgmr.msra.gmra.mxu0 %vm434_vm2, %v10956_v60 }
  0xb9   : > { %1089 = vmatpush1.bf16.msra.mxu0 %v1054_v15  ;;  %v12674_v19 = vpop.permute.xlu1 %1258  ;;  %v1257_v20 = vpop.permute.xlu0 %1256  ;;  %1106 = vmatprep.mubr.bf16.mxu0 %v15259_v0 }
  0xba   : > { %10969 = vmatprep.subr.msk.bf16.mxu0 %vm438_vm1, %v12671_v18  ;;  %v12735_v45 = vsel %vm1260_vm6, %v1257_v20, %v12674_v19  ;;  %v12749_v50 = vsel %vm1260_vm6, %v12655_v13, %v1257_v20  ;;  %v1289_v63 = vsel %vm438_vm1, %v12674_v19, 0 }
  0xbb   : > { %3007 = vrot.lane.b32.xlu1 %v12383_v6, %s12284_s28  ;;  %3005 = vrot.lane.b32.xlu0 %v12379_v4, %s12284_s28  ;;  %15263 = vst [vmem:[#allocation2_spill] sm:$0xff] %v12735_v45  ;;  %v1283_v56 = vsel %vm438_vm1, %v12749_v50, 0 }
  0xbc   : > { %11597 = vmatmul.mubr.msk.bf16.vlgmr.msra.gmra.mxu1 %vm434_vm2, %v10956_v60 }
  0xbd   : > { %1130 = vmatpush1.bf16.msra.mxu1 %v1060_v21  ;;  %v1468_v25 = vpop.permute.xlu1 %1467  ;;  %v1466_v27 = vpop.permute.xlu0 %1465  ;;  %1147 = vmatprep.mubr.bf16.mxu1 %v15259_v0 }
  0xbe   : > { %11600 = vmatprep.subr.bf16.mxu1 %v15250_v30  ;;  %v1482_v1 = vsel %vm1481_vm7, %v1466_v27, %v1468_v25 }
  0xbf   : > { %3011 = vrot.lane.b32.xlu1 %v12387_v7, %s12284_s28  ;;  %3009 = vrot.lane.b32.xlu0 %v12377_v3, %s12284_s28  ;;  %v1493_v14 = vsel %vm438_vm1, %v1482_v1, 0 }
  0xc0   : > { %10966 = vmatmul.mubr.msk.bf16.vlgmr.msra.gmra.mxu0 %vm434_vm2, %v10964_v31 }
  0xc1   : > { %1171 = vmatpush1.bf16.msra.mxu0 %v1066_v32  ;;  %v1472_v34 = vpop.permute.xlu1 %1471  ;;  %v1470_v35 = vpop.permute.xlu0 %1469  ;;  %1188 = vmatprep.mubr.bf16.mxu0 %v15259_v0 }
  0xc2   : > { %10973 = vmatprep.subr.msk.bf16.mxu0 %vm438_vm1, %v12701_v33  ;;  %v1483_v58 = vsel %vm1481_vm7, %v1468_v25, %v1470_v35  ;;  %v1484_v15 = vsel %vm1481_vm7, %v1470_v35, %v1472_v34  ;;  %v10980_v35 = vld [vmem:[%s15239_s1 + $0x14] sm:$0xf] }
  0xc3   : > { %3015 = vrot.lane.b32.xlu1 %v12393_v9, %s12284_s28  ;;  %3013 = vrot.lane.b32.xlu0 %v12395_v10, %s12284_s28  ;;  %v1499_v27 = vsel %vm438_vm1, %v1484_v15, 0  ;;  %v10989_v15 = vld [vmem:[%s15239_s1 + $0x18] sm:$0xf] }
  0xc4   : > { %10968 = vmatmul.mubr.msk.bf16.vlgmr.msra.gmra.mxu1 %vm434_vm2, %v10964_v31 }
  0xc5   : > { %v12719_v40 = vpop.permute.xlu1 %1475  ;;  %11601 = vmatpush3.bf16.msra.mxu1 %v1072_v36  ;;  %v1474_v41 = vpop.permute.xlu0 %1473  ;;  %11602 = vmatprep.mubr.msk.bf16.mxu1 %vm12281_vm3, %v15250_v30 }
  0xc6   : > { %10975 = vmatprep.subr.msk.bf16.mxu1 %vm438_vm1, %v12716_v38  ;;  %v1485_v2 = vsel %vm1481_vm7, %v1472_v34, %v1474_v41 }
  0xc7   : > { %3019 = vrot.lane.b32.xlu1 %v12459_v12, %s12284_s28  ;;  %3017 = vrot.lane.b32.xlu0 %v12401_v11, %s12284_s28 }
  0xc8   : > { %10970 = vmatmul.mubr.msk.bf16.vlgmr.msra.gmra.mxu0 %vm434_vm2, %v10964_v31 }
  0xc9   : > { %1306 = vmatpush1.bf16.msra.mxu0 %v1271_v42  ;;  %v12738_v46 = vpop.permute.xlu1 %1479  ;;  %v12740_v47 = vpop.permute.xlu0 %1477  ;;  %1323 = vmatprep.mubr.bf16.mxu0 %v15259_v0 }
  0xca   : > { %10977 = vmatprep.subr.msk.bf16.mxu0 %vm438_vm1, %v12735_v45  ;;  %v1487_v20 = vsel %vm1481_vm7, %v12719_v40, %v12740_v47  ;;  %v1488_v37 = vsel %vm1481_vm7, %v12740_v47, %v12738_v46 }
  0xcb   : > { %3227 = vrot.lane.b32.xlu1 %v12383_v6, %s12285_s12  ;;  %3225 = vrot.lane.b32.xlu0 %v12379_v4, %s12285_s12 }
  0xcc   : > { %11603 = vmatmul.mubr.msk.bf16.vlgmr.msra.gmra.mxu1 %vm434_vm2, %v10964_v31  ;;  %v1486_v31 = vsel %vm1481_vm7, %v1474_v41, %v12719_v40 }
  0xcd   : > { %1347 = vmatpush1.bf16.msra.mxu1 %v1277_v49  ;;  %v12756_v51 = vpop.permute.xlu1 %1687  ;;  %v1686_v54 = vpop.permute.xlu0 %1685  ;;  %1364 = vmatprep.mubr.bf16.mxu1 %v15259_v0  ;;  %v1505_v36 = vsel %vm438_vm1, %v1486_v31, 0  ;;  %v1511_v49 = vsel %vm438_vm1, %v1488_v37, 0 }
  0xce   : > { %11606 = vmatprep.subr.bf16.mxu1 %v15250_v30  ;;  %v1702_v46 = vsel %vm1701_vm8, %v1686_v54, %v12756_v51 }
  0xcf   : > { %3231 = vrot.lane.b32.xlu1 %v12387_v7, %s12285_s12  ;;  %3229 = vrot.lane.b32.xlu0 %v12377_v3, %s12285_s12 }
  0xd0   : > { %10974 = vmatmul.mubr.msk.bf16.vlgmr.msra.gmra.mxu0 %vm434_vm2, %v10972_v55 }
  0xd1   : > { %1388 = vmatpush1.bf16.msra.mxu0 %v1283_v56  ;;  %v12771_v60 = vpop.permute.xlu1 %1691  ;;  %v1690_v61 = vpop.permute.xlu0 %1689  ;;  %1405 = vmatprep.mubr.bf16.mxu0 %v15259_v0 }
  0xd2   : > { %10982 = vmatprep.subr.msk.bf16.mxu0 %vm438_vm1, %v1483_v58  ;;  %v1703_v40 = vsel %vm1701_vm8, %v12756_v51, %v1690_v61  ;;  %v1713_v51 = vsel %vm438_vm1, %v1702_v46, 0  ;;  %v1704_v54 = vsel %vm1701_vm8, %v1690_v61, %v12771_v60 }
  0xd3   : > { %3235 = vrot.lane.b32.xlu1 %v12393_v9, %s12285_s12  ;;  %3233 = vrot.lane.b32.xlu0 %v12395_v10, %s12285_s12 }
  0xd4   : > { %10976 = vmatmul.mubr.msk.bf16.vlgmr.msra.gmra.mxu1 %vm434_vm2, %v10972_v55 }
  0xd5   : > { %v12784_v5 = vpop.permute.xlu1 %1695  ;;  %11607 = vmatpush3.bf16.msra.mxu1 %v1289_v63  ;;  %v1694_v13 = vpop.permute.xlu0 %1693  ;;  %11608 = vmatprep.mubr.msk.bf16.mxu1 %vm12281_vm3, %v15250_v30 }
  0xd6   : > { %10984 = vmatprep.subr.msk.bf16.mxu1 %vm438_vm1, %v1485_v2  ;;  %v1705_v47 = vsel %vm1701_vm8, %v12771_v60, %v1694_v13  ;;  %v1719_v60 = vsel %vm438_vm1, %v1704_v54, 0  ;;  %v1706_v61 = vsel %vm1701_vm8, %v1694_v13, %v12784_v5  ;;  %v10997_v54 = vld [vmem:[%s15239_s1 + $0x1c] sm:$0xf] }
  0xd7   : > { %3239 = vrot.lane.b32.xlu1 %v12459_v12, %s12285_s12  ;;  %3237 = vrot.lane.b32.xlu0 %v12401_v11, %s12285_s12 }
  0xd8   : > { %10978 = vmatmul.mubr.msk.bf16.vlgmr.msra.gmra.mxu0 %vm434_vm2, %v10972_v55 }
  0xd9   : > { %1528 = vmatpush1.bf16.msra.mxu0 %v1493_v14  ;;  %v12799_v21 = vpop.permute.xlu1 %1699  ;;  %v12801_v25 = vpop.permute.xlu0 %1697  ;;  %1545 = vmatprep.mubr.bf16.mxu0 %v15259_v0 }
  0xda   : > { %10986 = vmatprep.subr.msk.bf16.mxu0 %vm438_vm1, %v1487_v20  ;;  %v1707_v58 = vsel %vm1701_vm8, %v12784_v5, %v12801_v25  ;;  %v1725_v5 = vsel %vm438_vm1, %v1706_v61, 0  ;;  %v1708_v13 = vsel %vm1701_vm8, %v12801_v25, %v12799_v21  ;;  %vm3461_vm8 = vcmask 490496  }
  0xdb   : > { %3447 = vrot.lane.b32.xlu1 %v12383_v6, %s12286_s16  ;;  %3445 = vrot.lane.b32.xlu0 %v12379_v4, %s12286_s16 }
  0xdc   : > { %11609 = vmatmul.mubr.msk.bf16.vlgmr.msra.gmra.mxu1 %vm434_vm2, %v10972_v55 }
  0xdd   : > { %1569 = vmatpush1.bf16.msra.mxu1 %v1499_v27  ;;  %v12813_v32 = vpop.permute.xlu1 %1907  ;;  %v12815_v34 = vpop.permute.xlu0 %1905  ;;  %1586 = vmatprep.mubr.bf16.mxu1 %v15259_v0 }
  0xde   : > { %11612 = vmatprep.subr.bf16.mxu1 %v15250_v30  ;;  %v1922_v21 = vsel %vm1921_vm9, %v12815_v34, %v12813_v32 }
  0xdf   : > { %3451 = vrot.lane.b32.xlu1 %v12387_v7, %s12286_s16  ;;  %3449 = vrot.lane.b32.xlu0 %v12377_v3, %s12286_s16 }
  0xe0   : > { %10983 = vmatmul.mubr.msk.bf16.vlgmr.msra.gmra.mxu0 %vm434_vm2, %v10980_v35 }
  0xe1   : > { %1610 = vmatpush1.bf16.msra.mxu0 %v1505_v36  ;;  %v12833_v41 = vpop.permute.xlu1 %1911  ;;  %v1910_v42 = vpop.permute.xlu0 %1909  ;;  %1627 = vmatprep.mubr.bf16.mxu0 %v15259_v0 }
  0xe2   : > { %10990 = vmatprep.subr.msk.bf16.mxu0 %vm438_vm1, %v1703_v40  ;;  %v1923_v20 = vsel %vm1921_vm9, %v12813_v32, %v1910_v42  ;;  %v1933_v32 = vsel %vm438_vm1, %v1922_v21, 0  ;;  %v1924_v34 = vsel %vm1921_vm9, %v1910_v42, %v12833_v41 }
  0xe3   : > { %3455 = vrot.lane.b32.xlu1 %v12393_v9, %s12286_s16  ;;  %3453 = vrot.lane.b32.xlu0 %v12395_v10, %s12286_s16 }
  0xe4   : > { %10985 = vmatmul.mubr.msk.bf16.vlgmr.msra.gmra.mxu1 %vm434_vm2, %v10980_v35 }
  0xe5   : > { %11613 = vmatpush3.bf16.msra.mxu1 %v1511_v49  ;;  %v12847_v55 = vpop.permute.xlu1 %1915  ;;  %v1914_v56 = vpop.permute.xlu0 %1913  ;;  %11614 = vmatprep.mubr.msk.bf16.mxu1 %vm12281_vm3, %v15250_v30 }
  0xe6   : > { %10992 = vmatprep.subr.msk.bf16.mxu1 %vm438_vm1, %v1705_v47  ;;  %v1925_v25 = vsel %vm1921_vm9, %v12833_v41, %v1914_v56  ;;  %v1939_v41 = vsel %vm438_vm1, %v1924_v34, 0  ;;  %v1926_v42 = vsel %vm1921_vm9, %v1914_v56, %v12847_v55  ;;  %v11005_v34 = vld [vmem:[%s15239_s1 + $0x20] sm:$0xf] }
  0xe7   : > { %3459 = vrot.lane.b32.xlu1 %v12459_v12, %s12286_s16  ;;  %3457 = vrot.lane.b32.xlu0 %v12401_v11, %s12286_s16 }
  0xe8   : > { %10987 = vmatmul.mubr.msk.bf16.vlgmr.msra.gmra.mxu0 %vm434_vm2, %v10980_v35 }
  0xe9   : > { %1748 = vmatpush1.bf16.msra.mxu0 %v1713_v51  ;;  %v12863_v63 = vpop.permute.xlu1 %1919  ;;  %v12865_v1 = vpop.permute.xlu0 %1917  ;;  %1765 = vmatprep.mubr.bf16.mxu0 %v15259_v0 }
  0xea   : > { %10994 = vmatprep.subr.msk.bf16.mxu0 %vm438_vm1, %v1707_v58  ;;  %v1927_v40 = vsel %vm1921_vm9, %v12847_v55, %v12865_v1  ;;  %v1945_v55 = vsel %vm438_vm1, %v1926_v42, 0  ;;  %v1928_v56 = vsel %vm1921_vm9, %v12865_v1, %v12863_v63  ;;  %vm3681_vm9 = vcmask 261120  }
  0xeb   : > { %3667 = vrot.lane.b32.xlu1 %v12383_v6, %s12287_s21  ;;  %3665 = vrot.lane.b32.xlu0 %v12379_v4, %s12287_s21 }
  0xec   : > { %11615 = vmatmul.mubr.msk.bf16.vlgmr.msra.gmra.mxu1 %vm434_vm2, %v10980_v35  ;;  %v1731_v35 = vsel %vm438_vm1, %v1708_v13, 0 }
  0xed   : > { %1789 = vmatpush1.bf16.msra.mxu1 %v1719_v60  ;;  %v12877_v2 = vpop.permute.xlu1 %2127  ;;  %v12879_v14 = vpop.permute.xlu0 %2125  ;;  %1806 = vmatprep.mubr.bf16.mxu1 %v15259_v0 }
  0xee   : > { %11618 = vmatprep.subr.bf16.mxu1 %v15250_v30  ;;  %v2142_v63 = vsel %vm2141_vm10, %v12879_v14, %v12877_v2 }
  0xef   : > { %3671 = vrot.lane.b32.xlu1 %v12387_v7, %s12287_s21  ;;  %3669 = vrot.lane.b32.xlu0 %v12377_v3, %s12287_s21 }
  0xf0   : > { %10991 = vmatmul.mubr.msk.bf16.vlgmr.msra.gmra.mxu0 %vm434_vm2, %v10989_v15 }
  0xf1   : > { %1830 = vmatpush1.bf16.msra.mxu0 %v1725_v5  ;;  %v12897_v27 = vpop.permute.xlu1 %2131  ;;  %v2130_v31 = vpop.permute.xlu0 %2129  ;;  %1847 = vmatprep.mubr.bf16.mxu0 %v15259_v0 }
  0xf2   : > { %10998 = vmatprep.subr.msk.bf16.mxu0 %vm438_vm1, %v1923_v20  ;;  %v2143_v58 = vsel %vm2141_vm10, %v12877_v2, %v2130_v31  ;;  %v2153_v2 = vsel %vm438_vm1, %v2142_v63, 0  ;;  %v2144_v14 = vsel %vm2141_vm10, %v2130_v31, %v12897_v27 }
  0xf3   : > { %3675 = vrot.lane.b32.xlu1 %v12393_v9, %s12287_s21  ;;  %3673 = vrot.lane.b32.xlu0 %v12395_v10, %s12287_s21 }
  0xf4   : > { %10993 = vmatmul.mubr.msk.bf16.vlgmr.msra.gmra.mxu1 %vm434_vm2, %v10989_v15 }
  0xf5   : > { %11619 = vmatpush3.bf16.msra.mxu1 %v1731_v35  ;;  %v12912_v36 = vpop.permute.xlu1 %2135  ;;  %v2134_v37 = vpop.permute.xlu0 %2133  ;;  %11620 = vmatprep.mubr.msk.bf16.mxu1 %vm12281_vm3, %v15250_v30 }
  0xf6   : > { %11000 = vmatprep.subr.msk.bf16.mxu1 %vm438_vm1, %v1925_v25  ;;  %v2145_v1 = vsel %vm2141_vm10, %v12897_v27, %v2134_v37  ;;  %v2159_v27 = vsel %vm438_vm1, %v2144_v14, 0  ;;  %v2146_v31 = vsel %vm2141_vm10, %v2134_v37, %v12912_v36  ;;  %v11013_v14 = vld [vmem:[%s15239_s1 + $0x24] sm:$0xf] }
  0xf7   : > { %3679 = vrot.lane.b32.xlu1 %v12459_v12, %s12287_s21  ;;  %3677 = vrot.lane.b32.xlu0 %v12401_v11, %s12287_s21  ;;  %s12290_s21 = smov 29  }
  0xf8   : > { %10995 = vmatmul.mubr.msk.bf16.vlgmr.msra.gmra.mxu0 %vm434_vm2, %v10989_v15 }
  0xf9   : > { %1968 = vmatpush1.bf16.msra.mxu0 %v1933_v32  ;;  %v12928_v49 = vpop.permute.xlu1 %2139  ;;  %v12930_v46 = vpop.permute.xlu0 %2137  ;;  %1985 = vmatprep.mubr.bf16.mxu0 %v15259_v0 }
  0xfa   : > { %11002 = vmatprep.subr.msk.bf16.mxu0 %vm438_vm1, %v1927_v40  ;;  %v2147_v20 = vsel %vm2141_vm10, %v12912_v36, %v12930_v46  ;;  %v2165_v36 = vsel %vm438_vm1, %v2146_v31, 0  ;;  %v2148_v37 = vsel %vm2141_vm10, %v12930_v46, %v12928_v49  ;;  %vm3901_vm10 = vcmask 252928  }
  0xfb   : > { %3887 = vrot.lane.b32.xlu1 %v12383_v6, %s12288_s30  ;;  %3885 = vrot.lane.b32.xlu0 %v12379_v4, %s12288_s30 }
  0xfc   : > { %11621 = vmatmul.mubr.msk.bf16.vlgmr.msra.gmra.mxu1 %vm434_vm2, %v10989_v15  ;;  %v1951_v15 = vsel %vm438_vm1, %v1928_v56, 0 }
  0xfd   : > { %2009 = vmatpush1.bf16.msra.mxu1 %v1939_v41  ;;  %v12942_v47 = vpop.permute.xlu1 %2347  ;;  %v12944_v51 = vpop.permute.xlu0 %2345  ;;  %2026 = vmatprep.mubr.bf16.mxu1 %v15259_v0 }
  0xfe   : > { %11624 = vmatprep.subr.bf16.mxu1 %v15250_v30  ;;  %v2362_v49 = vsel %vm2361_vm11, %v12944_v51, %v12942_v47 }
  0xff   : > { %3891 = vrot.lane.b32.xlu1 %v12387_v7, %s12288_s30  ;;  %3889 = vrot.lane.b32.xlu0 %v12377_v3, %s12288_s30 }
 0x100   : > { %10999 = vmatmul.mubr.msk.bf16.vlgmr.msra.gmra.mxu0 %vm434_vm2, %v10997_v54 }
 0x101   : > { %2050 = vmatpush1.bf16.msra.mxu0 %v1945_v55  ;;  %v12962_v60 = vpop.permute.xlu1 %2351  ;;  %v2350_v61 = vpop.permute.xlu0 %2349  ;;  %2067 = vmatprep.mubr.bf16.mxu0 %v15259_v0 }
 0x102   : > { %11006 = vmatprep.subr.msk.bf16.mxu0 %vm438_vm1, %v2143_v58  ;;  %v2363_v40 = vsel %vm2361_vm11, %v12942_v47, %v2350_v61  ;;  %v2373_v47 = vsel %vm438_vm1, %v2362_v49, 0  ;;  %v2364_v51 = vsel %vm2361_vm11, %v2350_v61, %v12962_v60 }
 0x103   : > { %3895 = vrot.lane.b32.xlu1 %v12393_v9, %s12288_s30  ;;  %3893 = vrot.lane.b32.xlu0 %v12395_v10, %s12288_s30 }
 0x104   : > { %11001 = vmatmul.mubr.msk.bf16.vlgmr.msra.gmra.mxu1 %vm434_vm2, %v10997_v54 }
 0x105   : > { %11625 = vmatpush3.bf16.msra.mxu1 %v1951_v15  ;;  %v12977_v5 = vpop.permute.xlu1 %2355  ;;  %v2354_v13 = vpop.permute.xlu0 %2353  ;;  %11626 = vmatprep.mubr.msk.bf16.mxu1 %vm12281_vm3, %v15250_v30 }
 0x106   : > { %11008 = vmatprep.subr.msk.bf16.mxu1 %vm438_vm1, %v2145_v1  ;;  %v2365_v46 = vsel %vm2361_vm11, %v12962_v60, %v2354_v13  ;;  %v2379_v60 = vsel %vm438_vm1, %v2364_v51, 0  ;;  %v2366_v61 = vsel %vm2361_vm11, %v2354_v13, %v12977_v5  ;;  %v11021_v51 = vld [vmem:[%s15239_s1 + $0x28] sm:$0xf] }
 0x107   : > { %3899 = vrot.lane.b32.xlu1 %v12459_v12, %s12288_s30  ;;  %3897 = vrot.lane.b32.xlu0 %v12401_v11, %s12288_s30  ;;  %s12291_s30 = smov 28  }
 0x108   : > { %11003 = vmatmul.mubr.msk.bf16.vlgmr.msra.gmra.mxu0 %vm434_vm2, %v10997_v54 }
 0x109   : > { %2188 = vmatpush1.bf16.msra.mxu0 %v2153_v2  ;;  %v12993_v35 = vpop.permute.xlu1 %2359  ;;  %v12995_v21 = vpop.permute.xlu0 %2357  ;;  %2205 = vmatprep.mubr.bf16.mxu0 %v15259_v0 }
 0x10a   : > { %11010 = vmatprep.subr.msk.bf16.mxu0 %vm438_vm1, %v2147_v20  ;;  %v2367_v58 = vsel %vm2361_vm11, %v12977_v5, %v12995_v21  ;;  %v2385_v5 = vsel %vm438_vm1, %v2366_v61, 0  ;;  %v2368_v13 = vsel %vm2361_vm11, %v12995_v21, %v12993_v35  ;;  %vm4121_vm11 = vcmask 244736  }
 0x10b   : > { %4107 = vrot.lane.b32.xlu1 %v12383_v6, %s12289_s14  ;;  %4105 = vrot.lane.b32.xlu0 %v12379_v4, %s12289_s14 }
 0x10c   : > { %11627 = vmatmul.mubr.msk.bf16.vlgmr.msra.gmra.mxu1 %vm434_vm2, %v10997_v54  ;;  %v2171_v54 = vsel %vm438_vm1, %v2148_v37, 0 }
 0x10d   : > { %2229 = vmatpush1.bf16.msra.mxu1 %v2159_v27  ;;  %v13007_v25 = vpop.permute.xlu1 %2567  ;;  %v13009_v32 = vpop.permute.xlu0 %2565  ;;  %2246 = vmatprep.mubr.bf16.mxu1 %v15259_v0 }
 0x10e   : > { %11630 = vmatprep.subr.bf16.mxu1 %v15250_v30  ;;  %v2582_v35 = vsel %vm2581_vm12, %v13009_v32, %v13007_v25 }
 0x10f   : > { %4111 = vrot.lane.b32.xlu1 %v12387_v7, %s12289_s14  ;;  %4109 = vrot.lane.b32.xlu0 %v12377_v3, %s12289_s14 }
 0x110   : > { %11007 = vmatmul.mubr.msk.bf16.vlgmr.msra.gmra.mxu0 %vm434_vm2, %v11005_v34 }
 0x111   : > { %2270 = vmatpush1.bf16.msra.mxu0 %v2165_v36  ;;  %v13027_v41 = vpop.permute.xlu1 %2571  ;;  %v2570_v42 = vpop.permute.xlu0 %2569  ;;  %2287 = vmatprep.mubr.bf16.mxu0 %v15259_v0 }
 0x112   : > { %11014 = vmatprep.subr.msk.bf16.mxu0 %vm438_vm1, %v2363_v40  ;;  %v2583_v20 = vsel %vm2581_vm12, %v13007_v25, %v2570_v42  ;;  %v2593_v25 = vsel %vm438_vm1, %v2582_v35, 0  ;;  %v2584_v32 = vsel %vm2581_vm12, %v2570_v42, %v13027_v41 }
 0x113   : > { %4115 = vrot.lane.b32.xlu1 %v12393_v9, %s12289_s14  ;;  %4113 = vrot.lane.b32.xlu0 %v12395_v10, %s12289_s14 }
 0x114   : > { %11009 = vmatmul.mubr.msk.bf16.vlgmr.msra.gmra.mxu1 %vm434_vm2, %v11005_v34 }
 0x115   : > { %11631 = vmatpush3.bf16.msra.mxu1 %v2171_v54  ;;  %v13042_v55 = vpop.permute.xlu1 %2575  ;;  %v2574_v56 = vpop.permute.xlu0 %2573  ;;  %11632 = vmatprep.mubr.msk.bf16.mxu1 %vm12281_vm3, %v15250_v30 }
 0x116   : > { %11016 = vmatprep.subr.msk.bf16.mxu1 %vm438_vm1, %v2365_v46  ;;  %v2585_v21 = vsel %vm2581_vm12, %v13027_v41, %v2574_v56  ;;  %v2599_v41 = vsel %vm438_vm1, %v2584_v32, 0  ;;  %v2586_v42 = vsel %vm2581_vm12, %v2574_v56, %v13042_v55 }
 0x117   : > { %4119 = vrot.lane.b32.xlu1 %v12459_v12, %s12289_s14  ;;  %4117 = vrot.lane.b32.xlu0 %v12401_v11, %s12289_s14  ;;  %s12294_s14 = smov 58  }
 0x118   : > { %11011 = vmatmul.mubr.msk.bf16.vlgmr.msra.gmra.mxu0 %vm434_vm2, %v11005_v34 }
 0x119   : > { %2408 = vmatpush1.bf16.msra.mxu0 %v2373_v47  ;;  %v13058_v15 = vpop.permute.xlu1 %2579  ;;  %v13060_v63 = vpop.permute.xlu0 %2577  ;;  %2425 = vmatprep.mubr.bf16.mxu0 %v15259_v0 }
 0x11a   : > { %11018 = vmatprep.subr.msk.bf16.mxu0 %vm438_vm1, %v2367_v58  ;;  %v2587_v40 = vsel %vm2581_vm12, %v13042_v55, %v13060_v63  ;;  %v2605_v55 = vsel %vm438_vm1, %v2586_v42, 0 }
 0x11b   : > { %4327 = vrot.lane.b32.xlu1 %v12383_v6, %s12290_s21  ;;  %4325 = vrot.lane.b32.xlu0 %v12379_v4, %s12290_s21 }
 0x11c   : > { %11633 = vmatmul.mubr.msk.bf16.vlgmr.msra.gmra.mxu1 %vm434_vm2, %v11005_v34  ;;  %v2391_v34 = vsel %vm438_vm1, %v2368_v13, 0 }
 0x11d   : > { %2449 = vmatpush1.bf16.msra.mxu1 %v2379_v60  ;;  %v13072_v1 = vpop.permute.xlu1 %2787  ;;  %v13074_v2 = vpop.permute.xlu0 %2785  ;;  %2466 = vmatprep.mubr.bf16.mxu1 %v15259_v0 }
 0x11e   : > { %11636 = vmatprep.subr.bf16.mxu1 %v15250_v30 }
 0x11f   : > { %4331 = vrot.lane.b32.xlu1 %v12387_v7, %s12290_s21  ;;  %4329 = vrot.lane.b32.xlu0 %v12377_v3, %s12290_s21 }
 0x120   : > { %11015 = vmatmul.mubr.msk.bf16.vlgmr.msra.gmra.mxu0 %vm434_vm2, %v11013_v14 }
 0x121   : > { %2490 = vmatpush1.bf16.msra.mxu0 %v2385_v5  ;;  %v13092_v27 = vpop.permute.xlu1 %2791  ;;  %v2790_v31 = vpop.permute.xlu0 %2789  ;;  %2507 = vmatprep.mubr.bf16.mxu0 %v15259_v0 }
 0x122   : > { %11022 = vmatprep.subr.msk.bf16.mxu0 %vm438_vm1, %v2583_v20  ;;  %v2803_v56 = vsel %vm2801_vm13, %v13072_v1, %v2790_v31 }
 0x123   : > { %4335 = vrot.lane.b32.xlu1 %v12393_v9, %s12290_s21  ;;  %4333 = vrot.lane.b32.xlu0 %v12395_v10, %s12290_s21 }
 0x124   : > { %11017 = vmatmul.mubr.msk.bf16.vlgmr.msra.gmra.mxu1 %vm434_vm2, %v11013_v14 }
 0x125   : > { %11637 = vmatpush3.bf16.msra.mxu1 %v2391_v34  ;;  %v13107_v36 = vpop.permute.xlu1 %2795  ;;  %v2794_v37 = vpop.permute.xlu0 %2793  ;;  %11638 = vmatprep.mubr.msk.bf16.mxu1 %vm12281_vm3, %v15250_v30 }
 0x126   : > { %11024 = vmatprep.subr.msk.bf16.mxu1 %vm438_vm1, %v2585_v21 }
 0x127   : > { %4339 = vrot.lane.b32.xlu1 %v12459_v12, %s12290_s21  ;;  %4337 = vrot.lane.b32.xlu0 %v12401_v11, %s12290_s21  ;;  %s386_s21 = scalar_lea.vmem %s15249_s11, %s11396_s13 }
 0x128   : > { %11019 = vmatmul.mubr.msk.bf16.vlgmr.msra.gmra.mxu0 %vm434_vm2, %v11013_v14 }
 0x129   : > { %2628 = vmatpush1.bf16.msra.mxu0 %v2593_v25  ;;  %v13123_v54 = vpop.permute.xlu1 %2799  ;;  %v13125_v49 = vpop.permute.xlu0 %2797  ;;  %2645 = vmatprep.mubr.bf16.mxu0 %v15259_v0  ;;  %v11029_v25 = vld [vmem:[%s15239_s1 + $0x2c] sm:$0xf] }
 0x12a   : > { %11026 = vmatprep.subr.msk.bf16.mxu0 %vm438_vm1, %v2587_v40 }
 0x12b   : > { %4547 = vrot.lane.b32.xlu1 %v12383_v6, %s12291_s30  ;;  %4545 = vrot.lane.b32.xlu0 %v12379_v4, %s12291_s30  ;;  %v2588_v4 = vsel %vm2581_vm12, %v13060_v63, %v13058_v15  ;;  %v2802_v15 = vsel %vm2801_vm13, %v13074_v2, %v13072_v1  ;;  %v2805_v63 = vsel %vm2801_vm13, %v13092_v27, %v2794_v37 }
 0x12c   : > { %11639 = vmatmul.mubr.msk.bf16.vlgmr.msra.gmra.mxu1 %vm434_vm2, %v11013_v14  ;;  %v2611_v61 = vsel %vm438_vm1, %v2588_v4, 0  ;;  %v2813_v13 = vsel %vm438_vm1, %v2802_v15, 0  ;;  %v2804_v1 = vsel %vm2801_vm13, %v2790_v31, %v13092_v27  ;;  %v2807_v2 = vsel %vm2801_vm13, %v13107_v36, %v13125_v49 }
 0x12d   : > { %2669 = vmatpush1.bf16.msra.mxu1 %v2599_v41  ;;  %v13137_v46 = vpop.permute.xlu1 %3007  ;;  %v3006_v47 = vpop.permute.xlu0 %3005  ;;  %2686 = vmatprep.mubr.bf16.mxu1 %v15259_v0  ;;  %v2819_v35 = vsel %vm438_vm1, %v2804_v1, 0  ;;  %v2806_v27 = vsel %vm2801_vm13, %v2794_v37, %v13107_v36  ;;  %v2808_v37 = vsel %vm2801_vm13, %v13125_v49, %v13123_v54  ;;  %vm4341_vm13 = vcmask 236544  }
 0x12e   : > { %11642 = vmatprep.subr.bf16.mxu1 %v15250_v30  ;;  %v2825_v36 = vsel %vm438_vm1, %v2806_v27, 0  ;;  %v2831_v42 = vsel %vm438_vm1, %v2808_v37, 0  ;;  %v3022_v54 = vsel %vm3021_vm14, %v3006_v47, %v13137_v46 }
 0x12f   : > { %4551 = vrot.lane.b32.xlu1 %v12387_v7, %s12291_s30  ;;  %4549 = vrot.lane.b32.xlu0 %v12377_v3, %s12291_s30  ;;  %v3033_v4 = vsel %vm438_vm1, %v3022_v54, 0 }
 0x130   : > { %11023 = vmatmul.mubr.msk.bf16.vlgmr.msra.gmra.mxu0 %vm434_vm2, %v11021_v51 }
 0x131   : > { %2710 = vmatpush1.bf16.msra.mxu0 %v2605_v55  ;;  %v3012_v58 = vpop.permute.xlu1 %3011  ;;  %v3010_v60 = vpop.permute.xlu0 %3009  ;;  %2727 = vmatprep.mubr.bf16.mxu0 %v15259_v0 }
 0x132   : > { %11030 = vmatprep.subr.msk.bf16.mxu0 %vm438_vm1, %v2803_v56  ;;  %v3023_v32 = vsel %vm3021_vm14, %v13137_v46, %v3010_v60  ;;  %v3024_v56 = vsel %vm3021_vm14, %v3010_v60, %v3012_v58 }
 0x133   : > { %4555 = vrot.lane.b32.xlu1 %v12393_v9, %s12291_s30  ;;  %4553 = vrot.lane.b32.xlu0 %v12395_v10, %s12291_s30  ;;  %v3039_v15 = vsel %vm438_vm1, %v3024_v56, 0 }
 0x134   : > { %11025 = vmatmul.mubr.msk.bf16.vlgmr.msra.gmra.mxu1 %vm434_vm2, %v11021_v51 }
 0x135   : > { %11643 = vmatpush3.bf16.msra.mxu1 %v2611_v61  ;;  %v3016_v14 = vpop.permute.xlu1 %3015  ;;  %v3014_v5 = vpop.permute.xlu0 %3013  ;;  %11644 = vmatprep.mubr.msk.bf16.mxu1 %vm12281_vm3, %v15250_v30 }
 0x136   : > { %11032 = vmatprep.subr.msk.bf16.mxu1 %vm438_vm1, %v2805_v63  ;;  %v3025_v49 = vsel %vm3021_vm14, %v3012_v58, %v3014_v5  ;;  %v3026_v63 = vsel %vm3021_vm14, %v3014_v5, %v3016_v14 }
 0x137   : > { %4559 = vrot.lane.b32.xlu1 %v12459_v12, %s12291_s30  ;;  %4557 = vrot.lane.b32.xlu0 %v12401_v11, %s12291_s30  ;;  %v3045_v1 = vsel %vm438_vm1, %v3026_v63, 0 }
 0x138   : > { %11027 = vmatmul.mubr.msk.bf16.vlgmr.msra.gmra.mxu0 %vm434_vm2, %v11021_v51 }
 0x139   : > { %2848 = vmatpush1.bf16.msra.mxu0 %v2813_v13  ;;  %v3020_v20 = vpop.permute.xlu1 %3019  ;;  %v3018_v34 = vpop.permute.xlu0 %3017  ;;  %2865 = vmatprep.mubr.bf16.mxu0 %v15259_v0  ;;  %v11037_v13 = vld [vmem:[%s15239_s1 + $0x30] sm:$0xf] }
 0x13a   : > { %11034 = vmatprep.subr.msk.bf16.mxu0 %vm438_vm1, %v2807_v2  ;;  %v3027_v61 = vsel %vm3021_vm14, %v3016_v14, %v3018_v34  ;;  %v3028_v14 = vsel %vm3021_vm14, %v3018_v34, %v3020_v20 }
 0x13b   : > { %5127 = vrot.lane.b32.xlu1 %v12459_v12, %s12272_s24  ;;  %4943 = vrot.lane.b32.xlu0 %v12459_v12, %s12271_s23 }
 0x13c   : > { %11645 = vmatmul.mubr.msk.bf16.vlgmr.msra.gmra.mxu1 %vm434_vm2, %v11021_v51 }
 0x13d   : > { %2889 = vmatpush1.bf16.msra.mxu1 %v2819_v35  ;;  %v3228_v31 = vpop.permute.xlu1 %3227  ;;  %v3226_v21 = vpop.permute.xlu0 %3225  ;;  %2906 = vmatprep.mubr.bf16.mxu1 %v15259_v0 }
 0x13e   : > { %11648 = vmatprep.subr.bf16.mxu1 %v15250_v30  ;;  %v3242_v37 = vsel %vm3241_vm15, %v3226_v21, %v3228_v31 }
 0x13f   : > { %5495 = vrot.lane.b32.xlu1 %v12459_v12, %s12274_s26  ;;  %5311 = vrot.lane.b32.xlu0 %v12459_v12, %s12273_s25 }
 0x140   : > { %11031 = vmatmul.mubr.msk.bf16.vlgmr.msra.gmra.mxu0 %vm434_vm2, %v11029_v25 }
 0x141   : > { %2930 = vmatpush1.bf16.msra.mxu0 %v2825_v36  ;;  %v3232_v40 = vpop.permute.xlu1 %3231  ;;  %v3230_v41 = vpop.permute.xlu0 %3229  ;;  %2947 = vmatprep.mubr.bf16.mxu0 %v15259_v0  ;;  %v3051_v36 = vsel %vm438_vm1, %v3028_v14, 0 }
 0x142   : > { %11038 = vmatprep.subr.msk.bf16.mxu0 %vm438_vm1, %v3023_v32  ;;  %v3243_v5 = vsel %vm3241_vm15, %v3228_v31, %v3230_v41  ;;  %v3244_v31 = vsel %vm3241_vm15, %v3230_v41, %v3232_v40 }
 0x144   : > { %11033 = vmatmul.mubr.msk.bf16.vlgmr.msra.gmra.mxu1 %vm434_vm2, %v11029_v25 }
 0x145   : > { %11649 = vmatpush3.bf16.msra.mxu1 %v2831_v42  ;;  %v3236_v51 = vpop.permute.xlu1 %3235  ;;  %v3234_v55 = vpop.permute.xlu0 %3233  ;;  %11650 = vmatprep.mubr.msk.bf16.mxu1 %vm12281_vm3, %v15250_v30 }
 0x146   : > { %11040 = vmatprep.subr.msk.bf16.mxu1 %vm438_vm1, %v3025_v49  ;;  %v3245_v20 = vsel %vm3241_vm15, %v3232_v40, %v3234_v55  ;;  %v3253_v49 = vsel %vm438_vm1, %v3242_v37, 0  ;;  %v3246_v40 = vsel %vm3241_vm15, %v3234_v55, %v3236_v51 }
 0x148   : > { %11035 = vmatmul.mubr.msk.bf16.vlgmr.msra.gmra.mxu0 %vm434_vm2, %v11029_v25 }
 0x149   : > { %3068 = vmatpush1.bf16.msra.mxu0 %v3033_v4  ;;  %v13222_v46 = vpop.permute.xlu1 %3239  ;;  %v13224_v47 = vpop.permute.xlu0 %3237  ;;  %3085 = vmatprep.mubr.bf16.mxu0 %v15259_v0 }
 0x14a   : > { %11042 = vmatprep.subr.msk.bf16.mxu0 %vm438_vm1, %v3027_v61  ;;  %v3247_v21 = vsel %vm3241_vm15, %v3236_v51, %v13224_v47  ;;  %v3265_v51 = vsel %vm438_vm1, %v3246_v40, 0  ;;  %v3248_v55 = vsel %vm3241_vm15, %v13224_v47, %v13222_v46  ;;  %vm4561_vm15 = vcmask 228352  }
 0x14b   : > { %v3271_v46 = vsel %vm438_vm1, %v3248_v55, 0 }
 0x14c   : > { %11651 = vmatmul.mubr.msk.bf16.vlgmr.msra.gmra.mxu1 %vm434_vm2, %v11029_v25 }
 0x14d   : > { %3109 = vmatpush1.bf16.msra.mxu1 %v3039_v15  ;;  %v13231_v58 = vpop.permute.xlu1 %3447  ;;  %v13233_v60 = vpop.permute.xlu0 %3445  ;;  %3126 = vmatprep.mubr.bf16.mxu1 %v15259_v0 }
 0x14e   : > { %11654 = vmatprep.subr.bf16.mxu1 %v15250_v30  ;;  %v3462_v47 = vsel %vm3461_vm8, %v13233_v60, %v13231_v58 }
 0x150   : > { %v494_v2 = vpop.f32.mrf.mxu0  ;;  %11039 = vmatmul.mubr.msk.bf16.vlgmr.msra.gmra.mxu0 %vm434_vm2, %v11037_v13 }
 0x151   : > { %3150 = vmatpush1.bf16.msra.mxu0 %v3045_v1  ;;  %v13244_v35 = vpop.permute.xlu1 %3451  ;;  %v13246_v27 = vpop.permute.xlu0 %3449  ;;  %3167 = vmatprep.mubr.bf16.mxu0 %v15259_v0 }
 0x152   : > { %v496_v25 = vpop.f32.mrf.mxu0  ;;  %11046 = vmatprep.subr.msk.bf16.mxu0 %vm438_vm1, %v3243_v5 }
 0x154   : > { %v498_v34 = vpop.f32.mrf.mxu0  ;;  %v535_v32 = vpop.f32.mrf.mxu1  ;;  %11041 = vmatmul.mubr.msk.bf16.vlgmr.msra.gmra.mxu1 %vm434_vm2, %v11037_v13 }
 0x155   : > { %11655 = vmatpush3.bf16.msra.mxu1 %v3051_v36  ;;  %v13254_v42 = vpop.permute.xlu1 %3455  ;;  %v13256_v54 = vpop.permute.xlu0 %3453  ;;  %11656 = vmatprep.mubr.msk.bf16.mxu1 %vm12281_vm3, %v15250_v30  ;;  %v3259_v36 = vsel %vm438_vm1, %v3244_v31, 0 }
 0x156   : > { %v499_v4 = vpop.f32.mrf.mxu0  ;;  %v537_v56 = vpop.f32.mrf.mxu1  ;;  %11048 = vmatprep.subr.msk.bf16.mxu1 %vm438_vm1, %v3245_v20 }
 0x158   : > { %v539_v61 = vpop.f32.mrf.mxu1  ;;  %v576_v15 = vpop.f32.mrf.mxu0  ;;  %11043 = vmatmul.mubr.msk.bf16.vlgmr.msra.gmra.mxu0 %vm434_vm2, %v11037_v13 }
 0x159   : > { %3288 = vmatpush1.bf16.msra.mxu0 %v3253_v49  ;;  %v13266_v63 = vpop.permute.xlu1 %3459  ;;  %v13268_v1 = vpop.permute.xlu0 %3457  ;;  %3305 = vmatprep.mubr.bf16.mxu0 %v15259_v0  ;;  %v11045_v49 = vld [vmem:[%s15239_s1 + $0x34] sm:$0xf] }
 0x15a   : > { %v540_v14 = vpop.f32.mrf.mxu1  ;;  %v13271_v5 = vpop.f32.mrf.mxu0  ;;  %11050 = vmatprep.subr.msk.bf16.mxu0 %vm438_vm1, %v3247_v21 }
 0x15c   : > { %v580_v41 = vpop.f32.mrf.mxu0  ;;  %v617_v37 = vpop.f32.mrf.mxu1  ;;  %11657 = vmatmul.mubr.msk.bf16.vlgmr.msra.gmra.mxu1 %vm434_vm2, %v11037_v13  ;;  %v3463_v13 = vsel %vm3461_vm8, %v13231_v58, %v13246_v27  ;;  %v3473_v58 = vsel %vm438_vm1, %v3462_v47, 0 }
 0x15d   : > { %3329 = vmatpush1.bf16.msra.mxu1 %v3259_v36  ;;  %v13277_v20 = vpop.permute.xlu1 %3667  ;;  %v13279_v34 = vpop.permute.xlu0 %3665  ;;  %3346 = vmatprep.mubr.bf16.mxu1 %v15259_v0 }
 0x15e   : > { %v581_v4 = vpop.f32.mrf.mxu0  ;;  %v11586_v31 = vpop.f32.mrf.mxu1  ;;  %11660 = vmatprep.subr.bf16.mxu1 %v15250_v30 }
 0x160   : > { %v620_v21 = vpop.f32.mrf.mxu1  ;;  %v681_v61 = vpop.f32.mrf.mxu0  ;;  %11047 = vmatmul.mubr.msk.bf16.vlgmr.msra.gmra.mxu0 %vm434_vm2, %v11045_v49 }
 0x161   : > { %v682_v14 = vadd.f32 %v681_v61, %v494_v2  ;;  %3370 = vmatpush1.bf16.msra.mxu0 %v3265_v51  ;;  %v13294_v36 = vpop.permute.xlu1 %3671  ;;  %v13296_v41 = vpop.permute.xlu0 %3669  ;;  %3387 = vmatprep.mubr.bf16.mxu0 %v15259_v0  ;;  %v3465_v2 = vsel %vm3461_vm8, %v13244_v35, %v13256_v54 }
 0x162   : > { %v11587_v40 = vpop.f32.mrf.mxu1  ;;  %v683_v4 = vpop.f32.mrf.mxu0  ;;  %11054 = vmatprep.subr.msk.bf16.mxu0 %vm438_vm1, %v3463_v13  ;;  %v3464_v13 = vsel %vm3461_vm8, %v13246_v27, %v13244_v35  ;;  %v3466_v27 = vsel %vm3461_vm8, %v13256_v54, %v13254_v42 }
 0x163   : > { %v684_v31 = vadd.f32 %v683_v4, %v496_v25  ;;  %v3479_v35 = vsel %vm438_vm1, %v3464_v13, 0  ;;  %v11053_v13 = vld [vmem:[%s15239_s1 + $0x38] sm:$0xf] }
 0x164   : > { %v685_v51 = vpop.f32.mrf.mxu0  ;;  %v722_v21 = vpop.f32.mrf.mxu1  ;;  %11049 = vmatmul.mubr.msk.bf16.vlgmr.msra.gmra.mxu1 %vm434_vm2, %v11045_v49 }
 0x165   : > { %v723_v61 = vadd.f32 %v722_v21, %v535_v32  ;;  %11661 = vmatpush3.bf16.msra.mxu1 %v3271_v46  ;;  %v13308_v40 = vpop.permute.xlu1 %3675  ;;  %v13310_v55 = vpop.permute.xlu0 %3673  ;;  %11662 = vmatprep.mubr.msk.bf16.mxu1 %vm12281_vm3, %v15250_v30  ;;  %v3467_v32 = vsel %vm3461_vm8, %v13254_v42, %v13268_v1 }
 0x166   : > { %v724_v60 = vpop.f32.mrf.mxu1  ;;  %v686_v25 = vpop.f32.mrf.mxu0  ;;  %11056 = vmatprep.subr.msk.bf16.mxu1 %vm438_vm1, %v3465_v2 }
 0x167   : > { %v725_v4 = vadd.f32 %v724_v60, %v537_v56 }
 0x168   : > { %v726_v46 = vpop.f32.mrf.mxu1  ;;  %v763_v51 = vpop.f32.mrf.mxu0  ;;  %11051 = vmatmul.mubr.msk.bf16.vlgmr.msra.gmra.mxu0 %vm434_vm2, %v11045_v49 }
 0x169   : > { %v764_v21 = vadd.f32 %v763_v51, %v576_v15  ;;  %3508 = vmatpush1.bf16.msra.mxu0 %v3473_v58  ;;  %v13323_v47 = vpop.permute.xlu1 %3679  ;;  %v13325_v25 = vpop.permute.xlu0 %3677  ;;  %3525 = vmatprep.mubr.bf16.mxu0 %v15259_v0 }
 0x16a   : > { %v727_v2 = vpop.f32.mrf.mxu1  ;;  %v765_v30 = vpop.f32.mrf.mxu0  ;;  %11058 = vmatprep.subr.msk.bf16.mxu0 %vm438_vm1, %v3467_v32 }
 0x16b   : > { %v766_v56 = vadd.f32 %v765_v30, %v13271_v5  ;;  %v3485_v30 = vsel %vm438_vm1, %v3466_v27, 0  ;;  %v15264_v5 = vmov 0.0  }
 0x16c   : > { %v767_v15 = vpop.f32.mrf.mxu0  ;;  %v804_v58 = vpop.f32.mrf.mxu1  ;;  %11663 = vmatmul.mubr.msk.bf16.vlgmr.msra.gmra.mxu1 %vm434_vm2, %v11045_v49  ;;  %v3683_v49 = vsel %vm3681_vm9, %v13277_v20, %v13296_v41 }
 0x16d   : > { %v805_v60 = vadd.f32 %v804_v58, %v617_v37  ;;  %3549 = vmatpush1.bf16.msra.mxu1 %v3479_v35  ;;  %v13335_v46 = vpop.permute.xlu1 %3887  ;;  %v13337_v51 = vpop.permute.xlu0 %3885  ;;  %3566 = vmatprep.mubr.bf16.mxu1 %v15259_v0  ;;  %v3468_v37 = vsel %vm3461_vm8, %v13268_v1, %v13266_v63  ;;  %v3682_v1 = vsel %vm3681_vm9, %v13279_v34, %v13277_v20 }
 0x16e   : > { %v11592_v42 = vpop.f32.mrf.mxu1  ;;  %v768_v54 = vpop.f32.mrf.mxu0  ;;  %11666 = vmatprep.subr.bf16.mxu1 %v15264_v5  ;;  %v3491_v63 = vsel %vm438_vm1, %v3468_v37, 0  ;;  %v3693_v20 = vsel %vm438_vm1, %v3682_v1, 0 }
 0x170   : > { %v807_v32 = vpop.f32.mrf.mxu1  ;;  %v891_v2 = vpop.f32.mrf.mxu0  ;;  %11055 = vmatmul.mubr.msk.bf16.vlgmr.msra.gmra.mxu0 %vm434_vm2, %v11053_v13 }
 0x171   : > { %v1020_v35 = vadd.f32 %v891_v2, %v682_v14  ;;  %3590 = vmatpush1.bf16.msra.mxu0 %v3485_v30  ;;  %v13352_v15 = vpop.permute.xlu1 %3891  ;;  %v13354_v58 = vpop.permute.xlu0 %3889  ;;  %3607 = vmatprep.mubr.bf16.mxu0 %v15259_v0  ;;  %v3685_v14 = vsel %vm3681_vm9, %v13294_v36, %v13310_v55 }
 0x172   : > { %v11593_v27 = vpop.f32.mrf.mxu1  ;;  %v893_v42 = vpop.f32.mrf.mxu0  ;;  %11062 = vmatprep.subr.msk.bf16.mxu0 %vm438_vm1, %v3683_v49  ;;  %v3684_v49 = vsel %vm3681_vm9, %v13296_v41, %v13294_v36  ;;  %v3686_v41 = vsel %vm3681_vm9, %v13310_v55, %v13308_v40  ;;  %v3688_v55 = vsel %vm3681_vm9, %v13325_v25, %v13323_v47 }
 0x173   : > { %v1021_v54 = vadd.f32 %v893_v42, %v684_v31  ;;  %v3699_v36 = vsel %vm438_vm1, %v3684_v49, 0  ;;  %v11061_v49 = vld [vmem:[%s15239_s1 + $0x3c] sm:$0xf]  ;;  %v3711_v47 = vsel %vm438_vm1, %v3688_v55, 0 }
 0x174   : > { %v895_v30 = vpop.f32.mrf.mxu0  ;;  %v932_v32 = vpop.f32.mrf.mxu1  ;;  %11057 = vmatmul.mubr.msk.bf16.vlgmr.msra.gmra.mxu1 %vm434_vm2, %v11053_v13 }
 0x175   : > { %v1022_v2 = vadd.f32 %v932_v32, %v723_v61  ;;  %11667 = vmatpush3.bf16.msra.mxu1 %v3491_v63  ;;  %v13366_v27 = vpop.permute.xlu1 %3895  ;;  %v13368_v37 = vpop.permute.xlu0 %3893  ;;  %11668 = vmatprep.mubr.msk.bf16.mxu1 %vm12281_vm3, %v15264_v5  ;;  %v3687_v61 = vsel %vm3681_vm9, %v13308_v40, %v13325_v25  ;;  %v3902_v25 = vsel %vm3901_vm10, %v13337_v51, %v13335_v46  ;;  %vm7387_vm9 = vcmask 457728  }
 0x176   : > { %v934_v34 = vpop.f32.mrf.mxu1  ;;  %v896_v31 = vpop.f32.mrf.mxu0  ;;  %11064 = vmatprep.subr.msk.bf16.mxu1 %vm438_vm1, %v3685_v14 }
 0x177   : > { %v1023_v42 = vadd.f32 %v934_v34, %v725_v4 }
 0x178   : > { %v936_v63 = vpop.f32.mrf.mxu1  ;;  %v973_v30 = vpop.f32.mrf.mxu0  ;;  %11059 = vmatmul.mubr.msk.bf16.vlgmr.msra.gmra.mxu0 %vm434_vm2, %v11053_v13 }
 0x179   : > { %v1024_v32 = vadd.f32 %v973_v30, %v764_v21  ;;  %3728 = vmatpush1.bf16.msra.mxu0 %v3693_v20  ;;  %v13381_v1 = vpop.permute.xlu1 %3899  ;;  %v13383_v31 = vpop.permute.xlu0 %3897  ;;  %3745 = vmatprep.mubr.bf16.mxu0 %v15259_v0 }
 0x17a   : > { %v937_v14 = vpop.f32.mrf.mxu1  ;;  %v975_v45 = vpop.f32.mrf.mxu0  ;;  %11066 = vmatprep.subr.msk.bf16.mxu0 %vm438_vm1, %v3687_v61 }
 0x17b   : > { %v1025_v4 = vadd.f32 %v975_v45, %v766_v56  ;;  %v3705_v45 = vsel %vm438_vm1, %v3686_v41, 0  ;;  %v3903_v56 = vsel %vm3901_vm10, %v13335_v46, %v13354_v58  ;;  %v3913_v46 = vsel %vm438_vm1, %v3902_v25, 0 }
 0x17c   : > { %v977_v21 = vpop.f32.mrf.mxu0  ;;  %v1014_v20 = vpop.f32.mrf.mxu1  ;;  %11669 = vmatmul.mubr.msk.bf16.vlgmr.msra.gmra.mxu1 %vm434_vm2, %v11053_v13 }
 0x17d   : > { %v1026_v34 = vadd.f32 %v1014_v20, %v805_v60  ;;  %3769 = vmatpush1.bf16.msra.mxu1 %v3699_v36  ;;  %v13392_v63 = vpop.permute.xlu1 %4107  ;;  %v13394_v30 = vpop.permute.xlu0 %4105  ;;  %3786 = vmatprep.mubr.bf16.mxu1 %v15259_v0 }
 0x17e   : > { %v11598_v61 = vpop.f32.mrf.mxu1  ;;  %v978_v40 = vpop.f32.mrf.mxu0  ;;  %11672 = vmatprep.subr.bf16.mxu1 %v15264_v5 }
 0x180   : > { %v1017_v60 = vpop.f32.mrf.mxu1  ;;  %v1108_v13 = vpop.f32.mrf.mxu0  ;;  %11063 = vmatmul.mubr.msk.bf16.vlgmr.msra.gmra.mxu0 %vm434_vm2, %v11061_v49 }
 0x181   : > { %v1237_v14 = vadd.f32 %v1108_v13, %v1020_v35  ;;  %3810 = vmatpush1.bf16.msra.mxu0 %v3705_v45  ;;  %v13409_v36 = vpop.permute.xlu1 %4111  ;;  %v13411_v21 = vpop.permute.xlu0 %4109  ;;  %3827 = vmatprep.mubr.bf16.mxu0 %v15259_v0  ;;  %v3905_v35 = vsel %vm3901_vm10, %v13352_v15, %v13368_v37 }
 0x182   : > { %v11599_v41 = vpop.f32.mrf.mxu1  ;;  %v1110_v20 = vpop.f32.mrf.mxu0  ;;  %11070 = vmatprep.subr.msk.bf16.mxu0 %vm438_vm1, %v3903_v56  ;;  %v3904_v56 = vsel %vm3901_vm10, %v13354_v58, %v13352_v15  ;;  %v3906_v15 = vsel %vm3901_vm10, %v13368_v37, %v13366_v27 }
 0x183   : > { %v1238_v61 = vadd.f32 %v1110_v20, %v1021_v54  ;;  %v3925_v37 = vsel %vm438_vm1, %v3906_v15, 0 }
 0x184   : > { %v1112_v40 = vpop.f32.mrf.mxu0  ;;  %v1149_v45 = vpop.f32.mrf.mxu1  ;;  %11065 = vmatmul.mubr.msk.bf16.vlgmr.msra.gmra.mxu1 %vm434_vm2, %v11061_v49 }
 0x185   : > { %v1239_v60 = vadd.f32 %v1149_v45, %v1022_v2  ;;  %11673 = vmatpush3.bf16.msra.mxu1 %v3711_v47  ;;  %v13423_v13 = vpop.permute.xlu1 %4115  ;;  %v13425_v55 = vpop.permute.xlu0 %4113  ;;  %11674 = vmatprep.mubr.msk.bf16.mxu1 %vm12281_vm3, %v15264_v5  ;;  %v3907_v2 = vsel %vm3901_vm10, %v13366_v27, %v13383_v31 }
 0x186   : > { %v1151_v51 = vpop.f32.mrf.mxu1  ;;  %v1113_v54 = vpop.f32.mrf.mxu0  ;;  %11072 = vmatprep.subr.msk.bf16.mxu1 %vm438_vm1, %v3905_v35 }
 0x187   : > { %v1240_v41 = vadd.f32 %v1151_v51, %v1023_v42  ;;  %v3919_v54 = vsel %vm438_vm1, %v3904_v56, 0  ;;  %v11069_v56 = vld [vmem:[%s15239_s1 + $0x40] sm:$0xf] }
 0x188   : > { %v1153_v20 = vpop.f32.mrf.mxu1  ;;  %v1190_v47 = vpop.f32.mrf.mxu0  ;;  %11067 = vmatmul.mubr.msk.bf16.vlgmr.msra.gmra.mxu0 %vm434_vm2, %v11061_v49 }
 0x189   : > { %v1241_v40 = vadd.f32 %v1190_v47, %v1024_v32  ;;  %3948 = vmatpush1.bf16.msra.mxu0 %v3913_v46  ;;  %v13438_v25 = vpop.permute.xlu0 %4117  ;;  %3965 = vmatprep.mubr.bf16.mxu0 %v15259_v0  ;;  %v13446_v58 = vpop.permute.xlu1 %4119 }
 0x18a   : > { %v1154_v35 = vpop.f32.mrf.mxu1  ;;  %v1192_v45 = vpop.f32.mrf.mxu0  ;;  %11074 = vmatprep.subr.msk.bf16.mxu0 %vm438_vm1, %v3907_v2 }
 0x18b   : > { %v1242_v42 = vadd.f32 %v1192_v45, %v1025_v4  ;;  %v3908_v4 = vsel %vm3901_vm10, %v13383_v31, %v13381_v1  ;;  %v4122_v31 = vsel %vm4121_vm11, %v13394_v30, %v13392_v63 }
 0x18c   : > { %v1194_v32 = vpop.f32.mrf.mxu0  ;;  %v1231_v46 = vpop.f32.mrf.mxu1  ;;  %11675 = vmatmul.mubr.msk.bf16.vlgmr.msra.gmra.mxu1 %vm434_vm2, %v11061_v49  ;;  %v3931_v1 = vsel %vm438_vm1, %v3908_v4, 0  ;;  %v4133_v4 = vsel %vm438_vm1, %v4122_v31, 0 }
 0x18d   : > { %v1243_v51 = vadd.f32 %v1231_v46, %v1026_v34  ;;  %3989 = vmatpush1.bf16.msra.mxu1 %v3919_v54  ;;  %v13449_v20 = vpop.permute.xlu0 %4325  ;;  %4006 = vmatprep.mubr.bf16.mxu1 %v15259_v0  ;;  %v4123_v34 = vsel %vm4121_vm11, %v13392_v63, %v13411_v21  ;;  %v13464_v35 = vpop.permute.xlu1 %4327  ;;  %v4124_v63 = vsel %vm4121_vm11, %v13411_v21, %v13409_v36 }
 0x18e   : > { %v11604_v2 = vpop.f32.mrf.mxu1  ;;  %v1195_v27 = vpop.f32.mrf.mxu0  ;;  %11678 = vmatprep.subr.bf16.mxu1 %v15264_v5  ;;  %v4126_v21 = vsel %vm4121_vm11, %v13425_v55, %v13423_v13 }
 0x190   : > { %v1234_v49 = vpop.f32.mrf.mxu1  ;;  %v1325_v47 = vpop.f32.mrf.mxu0  ;;  %11071 = vmatmul.mubr.msk.bf16.vlgmr.msra.gmra.mxu0 %vm434_vm2, %v11069_v56 }
 0x191   : > { %v1454_v45 = vadd.f32 %v1325_v47, %v1237_v14  ;;  %4030 = vmatpush1.bf16.msra.mxu0 %v3925_v37  ;;  %v13466_v54 = vpop.permute.xlu0 %4329  ;;  %4047 = vmatprep.mubr.bf16.mxu0 %v15259_v0  ;;  %v4125_v14 = vsel %vm4121_vm11, %v13409_v36, %v13425_v55  ;;  %v4332_v30 = vpop.permute.xlu1 %4331  ;;  %v4139_v36 = vsel %vm438_vm1, %v4124_v63, 0  ;;  %v4128_v55 = vsel %vm4121_vm11, %v13438_v25, %v13446_v58 }
 0x192   : > { %v11605_v15 = vpop.f32.mrf.mxu1  ;;  %v1327_v32 = vpop.f32.mrf.mxu0  ;;  %11078 = vmatprep.subr.msk.bf16.mxu0 %vm438_vm1, %v4123_v34 }
 0x193   : > { %v1455_v46 = vadd.f32 %v1327_v32, %v1238_v61 }
 0x194   : > { %v1329_v2 = vpop.f32.mrf.mxu0  ;;  %v1366_v27 = vpop.f32.mrf.mxu1  ;;  %11073 = vmatmul.mubr.msk.bf16.vlgmr.msra.gmra.mxu1 %vm434_vm2, %v11069_v56 }
 0x195   : > { %v1456_v37 = vadd.f32 %v1366_v27, %v1239_v60  ;;  %11679 = vmatpush3.bf16.msra.mxu1 %v3931_v1  ;;  %11680 = vmatprep.mubr.msk.bf16.mxu1 %vm12281_vm3, %v15264_v5  ;;  %v13485_v47 = vpop.permute.xlu0 %4333  ;;  %v4127_v60 = vsel %vm4121_vm11, %v13423_v13, %v13438_v25  ;;  %v4145_v13 = vsel %vm438_vm1, %v4126_v21, 0  ;;  %v4342_v25 = vsel %vm4341_vm13, %v13449_v20, %v13464_v35 }
 0x196   : > { %v1368_v34 = vpop.f32.mrf.mxu1  ;;  %v1330_v49 = vpop.f32.mrf.mxu0  ;;  %11080 = vmatprep.subr.msk.bf16.mxu1 %vm438_vm1, %v4125_v14  ;;  %v4344_v20 = vsel %vm4341_vm13, %v13466_v54, %v4332_v30 }
 0x197   : > { %v1457_v61 = vadd.f32 %v1368_v34, %v1240_v41  ;;  %v11077_v49 = vld [vmem:[%s15239_s1 + $0x44] sm:$0xf] }
 0x198   : > { %v1370_v15 = vpop.f32.mrf.mxu1  ;;  %v1407_v32 = vpop.f32.mrf.mxu0  ;;  %11075 = vmatmul.mubr.msk.bf16.vlgmr.msra.gmra.mxu0 %vm434_vm2, %v11069_v56 }
 0x199   : > { %v1458_v1 = vadd.f32 %v1407_v32, %v1241_v40  ;;  %4168 = vmatpush1.bf16.msra.mxu0 %v4133_v4  ;;  %4185 = vmatprep.mubr.bf16.mxu0 %v15259_v0  ;;  %v4336_v40 = vpop.permute.xlu1 %4335  ;;  %v13498_v4 = vpop.permute.xlu0 %4337 }
 0x19a   : > { %v1371_v31 = vpop.f32.mrf.mxu1  ;;  %v1409_v14 = vpop.f32.mrf.mxu0  ;;  %11082 = vmatprep.subr.msk.bf16.mxu0 %vm438_vm1, %v4127_v60 }
 0x19b   : > { %v1459_v41 = vadd.f32 %v1409_v14, %v1242_v42  ;;  %v4343_v42 = vsel %vm4341_vm13, %v13464_v35, %v13466_v54  ;;  %v4151_v14 = vsel %vm438_vm1, %v4128_v55, 0  ;;  %v4346_v54 = vsel %vm4341_vm13, %v13485_v47, %v4336_v40 }
 0x19c   : > { %v1411_v2 = vpop.f32.mrf.mxu0  ;;  %v1448_v27 = vpop.f32.mrf.mxu1  ;;  %11681 = vmatmul.mubr.msk.bf16.vlgmr.msra.gmra.mxu1 %vm434_vm2, %v11069_v56 }
 0x19d   : > { %v1460_v34 = vadd.f32 %v1448_v27, %v1243_v51  ;;  %4209 = vmatpush1.bf16.msra.mxu1 %v4139_v36  ;;  %4226 = vmatprep.mubr.bf16.mxu1 %v15259_v0  ;;  %v4340_v58 = vpop.permute.xlu1 %4339  ;;  %v4546_v36 = vpop.permute.xlu0 %4545  ;;  %v4345_v2 = vsel %vm4341_vm13, %v4332_v30, %v13485_v47 }
 0x19e   : > { %v11610_v63 = vpop.f32.mrf.mxu1  ;;  %v1412_v60 = vpop.f32.mrf.mxu0  ;;  %11684 = vmatprep.subr.bf16.mxu1 %v15264_v5  ;;  %v4348_v47 = vsel %vm4341_vm13, %v13498_v4, %v4340_v58 }
 0x19f   : > { %v4353_v60 = vsel %vm438_vm1, %v4342_v25, 0  ;;  %v4359_v25 = vsel %vm438_vm1, %v4344_v20, 0 }
 0x1a0   : > { %v1451_v51 = vpop.f32.mrf.mxu1  ;;  %v1547_v56 = vpop.f32.mrf.mxu0  ;;  %11079 = vmatmul.mubr.msk.bf16.vlgmr.msra.gmra.mxu0 %vm434_vm2, %v11077_v49 }
 0x1a1   : > { %v1676_v15 = vadd.f32 %v1547_v56, %v1454_v45  ;;  %4250 = vmatpush1.bf16.msra.mxu0 %v4145_v13  ;;  %4267 = vmatprep.mubr.bf16.mxu0 %v15259_v0  ;;  %v4550_v56 = vpop.permute.xlu0 %4549 }
 0x1a2   : > { %v11611_v32 = vpop.f32.mrf.mxu1  ;;  %v1549_v31 = vpop.f32.mrf.mxu0  ;;  %11086 = vmatprep.subr.msk.bf16.mxu0 %vm438_vm1, %v4343_v42 }
 0x1a3   : > { %v1677_v21 = vadd.f32 %v1549_v31, %v1455_v46  ;;  %v4347_v46 = vsel %vm4341_vm13, %v4336_v40, %v13498_v4 }
 0x1a4   : > { %v1551_v45 = vpop.f32.mrf.mxu0  ;;  %v1588_v27 = vpop.f32.mrf.mxu1  ;;  %11081 = vmatmul.mubr.msk.bf16.vlgmr.msra.gmra.mxu1 %vm434_vm2, %v11077_v49 }
 0x1a5   : > { %v1678_v63 = vadd.f32 %v1588_v27, %v1456_v37  ;;  %11685 = vmatpush3.bf16.msra.mxu1 %v4151_v14  ;;  %11686 = vmatprep.mubr.msk.bf16.mxu1 %vm12281_vm3, %v15264_v5  ;;  %v4548_v37 = vpop.permute.xlu1 %4547  ;;  %v4554_v40 = vpop.permute.xlu0 %4553 }
 0x1a6   : > { %v1590_v13 = vpop.f32.mrf.mxu1  ;;  %v1552_v55 = vpop.f32.mrf.mxu0  ;;  %11088 = vmatprep.subr.msk.bf16.mxu1 %vm438_vm1, %v4345_v2  ;;  %v4562_v4 = vsel %vm4561_vm15, %v4546_v36, %v4548_v37 }
 0x1a7   : > { %v1679_v35 = vadd.f32 %v1590_v13, %v1457_v61  ;;  %v4365_v13 = vsel %vm438_vm1, %v4346_v54, 0 }
 0x1a8   : > { %v1592_v42 = vpop.f32.mrf.mxu1  ;;  %v1629_v51 = vpop.f32.mrf.mxu0  ;;  %11083 = vmatmul.mubr.msk.bf16.vlgmr.msra.gmra.mxu0 %vm434_vm2, %v11077_v49 }
 0x1a9   : > { %v1680_v32 = vadd.f32 %v1629_v51, %v1458_v1  ;;  %4388 = vmatpush1.bf16.msra.mxu0 %v4353_v60  ;;  %4405 = vmatprep.mubr.bf16.mxu0 %v15259_v0  ;;  %v11085_v1 = vld [vmem:[%s15239_s1 + $0x48] sm:$0xf]  ;;  %v4371_v51 = vsel %vm438_vm1, %v4348_v47, 0 }
 0x1aa   : > { %v1593_v31 = vpop.f32.mrf.mxu1  ;;  %v1631_v14 = vpop.f32.mrf.mxu0  ;;  %11090 = vmatprep.subr.msk.bf16.mxu0 %vm438_vm1, %v4347_v46 }
 0x1ab   : > { %v1681_v30 = vadd.f32 %v1631_v14, %v1459_v41  ;;  %v4552_v41 = vpop.permute.xlu1 %4551 }
 0x1ac   : > { %v1633_v61 = vpop.f32.mrf.mxu0  ;;  %v1670_v2 = vpop.f32.mrf.mxu1  ;;  %11687 = vmatmul.mubr.msk.bf16.vlgmr.msra.gmra.mxu1 %vm434_vm2, %v11077_v49  ;;  %v4565_v31 = vsel %vm4561_vm15, %v4552_v41, %v4554_v40  ;;  %v4564_v36 = vsel %vm4561_vm15, %v4550_v56, %v4552_v41 }
 0x1ad   : > { %v1682_v45 = vadd.f32 %v1670_v2, %v1460_v34  ;;  %4429 = vmatpush1.bf16.msra.mxu1 %v4359_v25  ;;  %4446 = vmatprep.mubr.bf16.mxu1 %v15259_v0  ;;  %v4563_v34 = vsel %vm4561_vm15, %v4548_v37, %v4550_v56  ;;  %v4573_v2 = vsel %vm438_vm1, %v4562_v4, 0 }
 0x1ae   : > { %v11616_v27 = vpop.f32.mrf.mxu1  ;;  %v1634_v60 = vpop.f32.mrf.mxu0  ;;  %11690 = vmatprep.subr.bf16.mxu1 %v15264_v5 }
 0x1af   : > { %v4556_v54 = vpop.permute.xlu1 %4555 }
 0x1b0   : > { %v1673_v49 = vpop.f32.mrf.mxu1  ;;  %v1767_v55 = vpop.f32.mrf.mxu0  ;;  %11087 = vmatmul.mubr.msk.bf16.vlgmr.msra.gmra.mxu0 %vm434_vm2, %v11085_v1 }
 0x1b1   : > { %v1896_v20 = vadd.f32 %v1767_v55, %v1676_v15  ;;  %4470 = vmatpush1.bf16.msra.mxu0 %v4365_v13  ;;  %4487 = vmatprep.mubr.bf16.mxu0 %v15259_v0  ;;  %v4558_v15 = vpop.permute.xlu0 %4557  ;;  %v4579_v55 = vsel %vm438_vm1, %v4564_v36, 0 }
 0x1b2   : > { %v11617_v46 = vpop.f32.mrf.mxu1  ;;  %v1769_v42 = vpop.f32.mrf.mxu0  ;;  %11094 = vmatprep.subr.msk.bf16.mxu0 %vm438_vm1, %v4563_v34  ;;  %v4567_v37 = vsel %vm4561_vm15, %v4556_v54, %v4558_v15 }
 0x1b3   : > { %v1897_v58 = vadd.f32 %v1769_v42, %v1677_v21  ;;  %v4566_v46 = vsel %vm4561_vm15, %v4554_v40, %v4556_v54  ;;  %v4560_v42 = vpop.permute.xlu1 %4559 }
 0x1b4   : > { %v1771_v14 = vpop.f32.mrf.mxu0  ;;  %v1808_v25 = vpop.f32.mrf.mxu1  ;;  %11089 = vmatmul.mubr.msk.bf16.vlgmr.msra.gmra.mxu1 %vm434_vm2, %v11085_v1 }
 0x1b5   : > { %v1898_v61 = vadd.f32 %v1808_v25, %v1678_v63  ;;  %11691 = vmatpush3.bf16.msra.mxu1 %v4371_v51  ;;  %11692 = vmatprep.mubr.msk.bf16.mxu1 %vm12281_vm3, %v15264_v5  ;;  %v4585_v14 = vsel %vm438_vm1, %v4566_v46, 0 }
 0x1b6   : > { %v1772_v27 = vpop.f32.mrf.mxu0  ;;  %v1810_v60 = vpop.f32.mrf.mxu1  ;;  %11096 = vmatprep.subr.msk.bf16.mxu1 %vm438_vm1, %v4565_v31 }
 0x1b7   : > { %v1899_v21 = vadd.f32 %v1810_v60, %v1679_v35 }
 0x1b8   : > { %v1812_v13 = vpop.f32.mrf.mxu1  ;;  %v1849_v47 = vpop.f32.mrf.mxu0  ;;  %11091 = vmatmul.mubr.msk.bf16.vlgmr.msra.gmra.mxu0 %vm434_vm2, %v11085_v1 }
 0x1b9   : > { %v1900_v63 = vadd.f32 %v1849_v47, %v1680_v32  ;;  %4608 = vmatpush1.bf16.msra.mxu0 %v4573_v2  ;;  %4625 = vmatprep.mubr.bf16.mxu0 %v15259_v0  ;;  %v11093_v32 = vld [vmem:[%s15239_s1 + $0x4c] sm:$0xf]  ;;  %v630_v13 = vsel %vm438_vm1, %v12383_v6, 0  ;;  %v636_v6 = vsel %vm438_vm1, %v12387_v7, 0 }
 0x1ba   : > { %v1813_v34 = vpop.f32.mrf.mxu1  ;;  %v1851_v49 = vpop.f32.mrf.mxu0  ;;  %11098 = vmatprep.subr.msk.bf16.mxu0 %vm438_vm1, %v4567_v37 }
 0x1bb   : > { %v1901_v56 = vadd.f32 %v1851_v49, %v1681_v30  ;;  %v4568_v30 = vsel %vm4561_vm15, %v4558_v15, %v4560_v42 }
 0x1bc   : > { %v1853_v35 = vpop.f32.mrf.mxu0  ;;  %v1890_v41 = vpop.f32.mrf.mxu1  ;;  %11693 = vmatmul.mubr.msk.bf16.vlgmr.msra.gmra.mxu1 %vm434_vm2, %v11085_v1  ;;  %v4591_v2 = vsel %vm438_vm1, %v4568_v30, 0 }
 0x1bd   : > { %v1902_v51 = vadd.f32 %v1890_v41, %v1682_v45  ;;  %4649 = vmatpush1.bf16.msra.mxu1 %v4579_v55  ;;  %4666 = vmatprep.mubr.bf16.mxu1 %v15259_v0  ;;  %v4944_v30 = vpop.permute.xlu0 %4943 }
 0x1be   : > { %v1854_v4 = vpop.f32.mrf.mxu0  ;;  %v11622_v31 = vpop.f32.mrf.mxu1  ;;  %11696 = vmatprep.subr.bf16.mxu1 %v15264_v5 }
 0x1bf   : > { %v4769_v4 = vsel %vm438_vm1, %v12459_v12, 0  ;;  %v5677_v12 = vld [vmem:[%s15240_s2] sm:$0xff] }
 0x1c0   : > { %v1893_v40 = vpop.f32.mrf.mxu1  ;;  %v1987_v25 = vpop.f32.mrf.mxu0  ;;  %11095 = vmatmul.mubr.msk.bf16.vlgmr.msra.gmra.mxu0 %vm434_vm2, %v11093_v32  ;;  %5680 = vperm.xlu0 %11964, %v5677_v12  }
 0x1c1   : > { %v2116_v45 = vadd.f32 %v1987_v25, %v1896_v20  ;;  %4690 = vmatpush1.bf16.msra.mxu0 %v4585_v14  ;;  %4707 = vmatprep.mubr.bf16.mxu0 %v15259_v0 }
 0x1c2   : > { %v11623_v1 = vpop.f32.mrf.mxu1  ;;  %v1989_v54 = vpop.f32.mrf.mxu0  ;;  %11102 = vmatprep.subr.msk.bf16.mxu0 %vm438_vm1, %v12377_v3 }
 0x1c3   : > { %v2117_v27 = vadd.f32 %v1989_v54, %v1897_v58  ;;  %v443_v1 = vsel %vm438_vm1, %v12490_v17, 0  ;;  %v449_v17 = vsel %vm438_vm1, %v12507_v24, 0  ;;  %v455_v24 = vsel %vm438_vm1, %v12526_v29, 0 }
 0x1c4   : > { %v1991_v60 = vpop.f32.mrf.mxu0  ;;  %v2028_v36 = vpop.f32.mrf.mxu1  ;;  %11097 = vmatmul.mubr.msk.bf16.vlgmr.msra.gmra.mxu1 %vm434_vm2, %v11093_v32 }
 0x1c5   : > { %v2118_v15 = vadd.f32 %v2028_v36, %v1898_v61  ;;  %11697 = vmatpush3.bf16.msra.mxu1 %v4591_v2  ;;  %11698 = vmatprep.mubr.msk.bf16.mxu1 %vm12281_vm3, %v15264_v5 }
 0x1c6   : > { %v1992_v20 = vpop.f32.mrf.mxu0  ;;  %v2030_v37 = vpop.f32.mrf.mxu1  ;;  %11104 = vmatprep.subr.msk.bf16.mxu1 %vm438_vm1, %v12395_v10 }
 0x1c7   : > { %v2119_v47 = vadd.f32 %v2030_v37, %v1899_v21 }
 0x1c8   : > { %v2032_v3 = vpop.f32.mrf.mxu1  ;;  %v2069_v58 = vpop.f32.mrf.mxu0  ;;  %11099 = vmatmul.mubr.msk.bf16.vlgmr.msra.gmra.mxu0 %vm434_vm2, %v11093_v32 }
 0x1c9   : > { %v2120_v34 = vadd.f32 %v2069_v58, %v1900_v63  ;;  %4786 = vmatpush1.bf16.msra.mxu0 %v630_v13  ;;  %4803 = vmatprep.mubr.bf16.mxu0 %v15259_v0  ;;  %v11101_v63 = vld [vmem:[%s15239_s1 + $0x50] sm:$0xf] }
 0x1ca   : > { %v2033_v61 = vpop.f32.mrf.mxu1  ;;  %v2071_v49 = vpop.f32.mrf.mxu0  ;;  %11106 = vmatprep.subr.msk.bf16.mxu0 %vm438_vm1, %v12401_v11  ;;  %v642_v11 = vsel %vm438_vm1, %v12393_v9, 0 }
 0x1cb   : > { %v2121_v55 = vadd.f32 %v2071_v49, %v1901_v56 }
 0x1cc   : > { %v2073_v46 = vpop.f32.mrf.mxu0  ;;  %v2110_v10 = vpop.f32.mrf.mxu1  ;;  %11699 = vmatmul.mubr.msk.bf16.vlgmr.msra.gmra.mxu1 %vm434_vm2, %v11093_v32 }
 0x1cd   : > { %v2122_v21 = vadd.f32 %v2110_v10, %v1902_v51  ;;  %4827 = vmatpush1.bf16.msra.mxu1 %v636_v6  ;;  %4844 = vmatprep.mubr.bf16.mxu1 %v15259_v0 }
 0x1ce   : > { %v2074_v35 = vpop.f32.mrf.mxu0  ;;  %v11628_v41 = vpop.f32.mrf.mxu1  ;;  %11702 = vmatprep.subr.bf16.mxu1 %v15264_v5 }
 0x1d0   : > { %v2113_v7 = vpop.f32.mrf.mxu1  ;;  %v2207_v56 = vpop.f32.mrf.mxu0  ;;  %11103 = vmatmul.mubr.msk.bf16.vlgmr.msra.gmra.mxu0 %vm434_vm2, %v11101_v63 }
 0x1d1   : > { %v2336_v42 = vadd.f32 %v2207_v56, %v2116_v45  ;;  %4868 = vmatpush1.bf16.msra.mxu0 %v642_v11  ;;  %4885 = vmatprep.mubr.bf16.mxu0 %v15259_v0  ;;  %v840_v56 = vsel %vm438_vm1, %v12577_v43, 0 }
 0x1d2   : > { %11110 = vmatprep.subr.msk.bf16.mxu0 %vm438_vm1, %v12504_v23  ;;  %v11629_v51 = vpop.f32.mrf.mxu1  ;;  %v2209_v32 = vpop.f32.mrf.mxu0 }
 0x1d3   : > { %v2337_v31 = vadd.f32 %v2209_v32, %v2117_v27 }
 0x1d4   : > { %v2211_v9 = vpop.f32.mrf.mxu0  ;;  %v2248_v14 = vpop.f32.mrf.mxu1  ;;  %11105 = vmatmul.mubr.msk.bf16.vlgmr.msra.gmra.mxu1 %vm434_vm2, %v11101_v63 }
 0x1d5   : > { %v2338_v40 = vadd.f32 %v2248_v14, %v2118_v15  ;;  %11703 = vmatpush3.bf16.msra.mxu1 %v4769_v4  ;;  %11704 = vmatprep.mubr.msk.bf16.mxu1 %vm12281_vm3, %v15264_v5  ;;  %v846_v14 = vsel %vm438_vm1, %v12591_v48, 0 }
 0x1d6   : > { %11112 = vmatprep.subr.msk.bf16.mxu1 %vm438_vm1, %v12519_v26  ;;  %v2212_v23 = vpop.f32.mrf.mxu0  ;;  %v2250_v25 = vpop.f32.mrf.mxu1  ;;  %v4945_v26 = vsel %vm427_vm0, %v12521_v28, %v4944_v30  ;;  %v11109_v28 = vld [vmem:[%s15239_s1 + $0x54] sm:$0xf] }
 0x1d7   : > { %v2339_v45 = vadd.f32 %v2250_v25, %v2119_v47 }
 0x1d8   : > { %v2252_v54 = vpop.f32.mrf.mxu1  ;;  %v2289_v2 = vpop.f32.mrf.mxu0  ;;  %11107 = vmatmul.mubr.msk.bf16.vlgmr.msra.gmra.mxu0 %vm434_vm2, %v11101_v63 }
 0x1d9   : > { %v2340_v27 = vadd.f32 %v2289_v2, %v2120_v34  ;;  %4970 = vmatpush1.bf16.msra.mxu0 %v443_v1  ;;  %4987 = vmatprep.mubr.bf16.mxu0 %v15259_v0 }
 0x1da   : > { %11114 = vmatprep.subr.msk.bf16.mxu0 %vm438_vm1, %v4945_v26  ;;  %v2253_v60 = vpop.f32.mrf.mxu1  ;;  %v2291_v36 = vpop.f32.mrf.mxu0 }
 0x1db   : > { %v2341_v15 = vadd.f32 %v2291_v36, %v2121_v55  ;;  %v4953_v55 = vsel %vm438_vm1, %v4944_v30, 0  ;;  %v5312_v60 = vpop.permute.xlu0 %5311 }
 0x1dc   : > { %v2293_v20 = vpop.f32.mrf.mxu0  ;;  %v2330_v37 = vpop.f32.mrf.mxu1  ;;  %11705 = vmatmul.mubr.msk.bf16.vlgmr.msra.gmra.mxu1 %vm434_vm2, %v11101_v63 }
 0x1dd   : > { %v2342_v13 = vadd.f32 %v2330_v37, %v2122_v21  ;;  %5011 = vmatpush1.bf16.msra.mxu1 %v449_v17  ;;  %5028 = vmatprep.mubr.bf16.mxu1 %v15259_v0  ;;  %v5128_v63 = vpop.permute.xlu1 %5127  ;;  %v1057_v37 = vsel %vm438_vm1, %v12638_v62, 0 }
 0x1de   : > { %v2294_v47 = vpop.f32.mrf.mxu0  ;;  %v11634_v3 = vpop.f32.mrf.mxu1  ;;  %11708 = vmatprep.subr.bf16.mxu1 %v15264_v5  ;;  %v5129_v51 = vsel %vm826_vm4, %v12563_v39, %v5128_v63  ;;  %v11117_v39 = vld [vmem:[%s15239_s1 + $0x58] sm:$0xf]  ;;  %v5137_v54 = vsel %vm438_vm1, %v5128_v63, 0  ;;  %v5321_v63 = vsel %vm438_vm1, %v5312_v60, 0 }
 0x1e0   : > { %v2333_v58 = vpop.f32.mrf.mxu1  ;;  %v2427_v34 = vpop.f32.mrf.mxu0  ;;  %11111 = vmatmul.mubr.msk.bf16.vlgmr.msra.gmra.mxu0 %vm434_vm2, %v11109_v28 }
 0x1e1   : > { %v2556_v61 = vadd.f32 %v2427_v34, %v2336_v42  ;;  %5052 = vmatpush1.bf16.msra.mxu0 %v455_v24  ;;  %5069 = vmatprep.mubr.bf16.mxu0 %v15259_v0  ;;  %v1063_v24 = vsel %vm438_vm1, %v12652_v8, 0 }
 0x1e2   : > { %11118 = vmatprep.subr.msk.bf16.mxu0 %vm438_vm1, %v12600_v52  ;;  %v11635_v49 = vpop.f32.mrf.mxu1  ;;  %v2429_v6 = vpop.f32.mrf.mxu0 }
 0x1e3   : > { %v2557_v46 = vadd.f32 %v2429_v6, %v2337_v31 }
 0x1e4   : > { %v2431_v10 = vpop.f32.mrf.mxu0  ;;  %v2468_v21 = vpop.f32.mrf.mxu1  ;;  %11113 = vmatmul.mubr.msk.bf16.vlgmr.msra.gmra.mxu1 %vm434_vm2, %v11109_v28 }
 0x1e5   : > { %v2558_v35 = vadd.f32 %v2468_v21, %v2338_v40  ;;  %11709 = vmatpush3.bf16.msra.mxu1 %v4953_v55  ;;  %11710 = vmatprep.mubr.msk.bf16.mxu1 %vm12281_vm3, %v15264_v5 }
 0x1e6   : > { %11120 = vmatprep.subr.msk.bf16.mxu1 %vm438_vm1, %v12617_v57  ;;  %v2432_v29 = vpop.f32.mrf.mxu0  ;;  %v2470_v52 = vpop.f32.mrf.mxu1 }
 0x1e7   : > { %v2559_v41 = vadd.f32 %v2470_v52, %v2339_v45  ;;  %v852_v45 = vsel %vm438_vm1, %v12608_v53, 0 }
 0x1e8   : > { %v2472_v11 = vpop.f32.mrf.mxu1  ;;  %v2509_v7 = vpop.f32.mrf.mxu0  ;;  %11115 = vmatmul.mubr.msk.bf16.vlgmr.msra.gmra.mxu0 %vm434_vm2, %v11109_v28 }
 0x1e9   : > { %v2560_v42 = vadd.f32 %v2509_v7, %v2340_v27  ;;  %5154 = vmatpush1.bf16.msra.mxu0 %v840_v56  ;;  %5171 = vmatprep.mubr.bf16.mxu0 %v15259_v0 }
 0x1ea   : > { %11122 = vmatprep.subr.msk.bf16.mxu0 %vm438_vm1, %v5129_v51  ;;  %v2473_v57 = vpop.f32.mrf.mxu1  ;;  %v2511_v32 = vpop.f32.mrf.mxu0  ;;  %v1274_v51 = vsel %vm438_vm1, %v12701_v33, 0 }
 0x1eb   : > { %v2561_v4 = vadd.f32 %v2511_v32, %v2341_v15 }
 0x1ec   : > { %v2513_v31 = vpop.f32.mrf.mxu0  ;;  %v2550_v9 = vpop.f32.mrf.mxu1  ;;  %11711 = vmatmul.mubr.msk.bf16.vlgmr.msra.gmra.mxu1 %vm434_vm2, %v11109_v28  ;;  %v5313_v28 = vsel %vm1043_vm5, %v12624_v59, %v5312_v60  ;;  %v11125_v59 = vld [vmem:[%s15239_s1 + $0x5c] sm:$0xf]  ;;  %vm6485_vm5 = vcmask 982016  }
 0x1ed   : > { %v2562_v43 = vadd.f32 %v2550_v9, %v2342_v13  ;;  %5195 = vmatpush1.bf16.msra.mxu1 %v846_v14  ;;  %5212 = vmatprep.mubr.bf16.mxu1 %v15259_v0 }
 0x1ee   : > { %v2514_v30 = vpop.f32.mrf.mxu0  ;;  %v11640_v40 = vpop.f32.mrf.mxu1  ;;  %11714 = vmatprep.subr.bf16.mxu1 %v15264_v5 }
 0x1f0   : > { %v2553_v23 = vpop.f32.mrf.mxu1  ;;  %v2647_v25 = vpop.f32.mrf.mxu0  ;;  %11119 = vmatmul.mubr.msk.bf16.vlgmr.msra.gmra.mxu0 %vm434_vm2, %v11117_v39 }
 0x1f1   : > { %v2776_v48 = vadd.f32 %v2647_v25, %v2556_v61  ;;  %5236 = vmatpush1.bf16.msra.mxu0 %v852_v45  ;;  %5253 = vmatprep.mubr.bf16.mxu0 %v15259_v0  ;;  %v15265_v25 = vld [vmem:[#allocation2_spill] sm:$0xff] }
 0x1f2   : > { %11126 = vmatprep.subr.msk.bf16.mxu0 %vm438_vm1, %v12663_v16  ;;  %v11641_v12 = vpop.f32.mrf.mxu1  ;;  %v2649_v1 = vpop.f32.mrf.mxu0  ;;  %v1286_v45 = vsel %vm438_vm1, %v15265_v25, 0 }
 0x1f3   : > { %v2777_v2 = vadd.f32 %v2649_v1, %v2557_v46  ;;  %v1069_v46 = vsel %vm438_vm1, %v12671_v18, 0 }
 0x1f4   : > { %v2651_v27 = vpop.f32.mrf.mxu0  ;;  %v2688_v26 = vpop.f32.mrf.mxu1  ;;  %11121 = vmatmul.mubr.msk.bf16.vlgmr.msra.gmra.mxu1 %vm434_vm2, %v11117_v39 }
 0x1f5   : > { %v2778_v36 = vadd.f32 %v2688_v26, %v2558_v35  ;;  %11715 = vmatpush3.bf16.msra.mxu1 %v5137_v54  ;;  %11716 = vmatprep.mubr.msk.bf16.mxu1 %vm12281_vm3, %v15264_v5 }
 0x1f6   : > { %11128 = vmatprep.subr.msk.bf16.mxu1 %vm438_vm1, %v12682_v22  ;;  %v2652_v53 = vpop.f32.mrf.mxu0  ;;  %v2690_v16 = vpop.f32.mrf.mxu1 }
 0x1f7   : > { %v2779_v15 = vadd.f32 %v2690_v16, %v2559_v41  ;;  %v5496_v41 = vpop.permute.xlu1 %5495 }
 0x1f8   : > { %v2692_v17 = vpop.f32.mrf.mxu1  ;;  %v2729_v20 = vpop.f32.mrf.mxu0  ;;  %11123 = vmatmul.mubr.msk.bf16.vlgmr.msra.gmra.mxu0 %vm434_vm2, %v11117_v39  ;;  %v5497_v32 = vsel %vm1260_vm6, %v12674_v19, %v5496_v41  ;;  %v11133_v19 = vld [vmem:[%s15239_s1 + $0x60] sm:$0xf]  ;;  %v5505_v1 = vsel %vm438_vm1, %v5496_v41, 0 }
 0x1f9   : > { %v2780_v13 = vadd.f32 %v2729_v20, %v2560_v42  ;;  %5338 = vmatpush1.bf16.msra.mxu0 %v1057_v37  ;;  %5355 = vmatprep.mubr.bf16.mxu0 %v15259_v0 }
 0x1fa   : > { %11130 = vmatprep.subr.msk.bf16.mxu0 %vm438_vm1, %v5313_v28  ;;  %v2693_v22 = vpop.f32.mrf.mxu1  ;;  %v2731_v47 = vpop.f32.mrf.mxu0 }
 0x1fb   : > { %v2781_v3 = vadd.f32 %v2731_v47, %v2561_v4 }
 0x1fc   : > { %v2733_v58 = vpop.f32.mrf.mxu0  ;;  %v2770_v34 = vpop.f32.mrf.mxu1  ;;  %11717 = vmatmul.mubr.msk.bf16.vlgmr.msra.gmra.mxu1 %vm434_vm2, %v11117_v39 }
 0x1fd   : > { %v2782_v62 = vadd.f32 %v2770_v34, %v2562_v43  ;;  %5379 = vmatpush1.bf16.msra.mxu1 %v1063_v24  ;;  %5396 = vmatprep.mubr.bf16.mxu1 %v15259_v0  ;;  %v1280_v43 = vsel %vm438_vm1, %v12716_v38, 0 }
 0x1fe   : > { %v2734_v61 = vpop.f32.mrf.mxu0  ;;  %v11646_v49 = vpop.f32.mrf.mxu1  ;;  %11720 = vmatprep.subr.bf16.mxu1 %v15264_v5 }
 0x200   : > { %v2773_v6 = vpop.f32.mrf.mxu1  ;;  %v2867_v55 = vpop.f32.mrf.mxu0  ;;  %11127 = vmatmul.mubr.msk.bf16.vlgmr.msra.gmra.mxu0 %vm434_vm2, %v11125_v59 }
 0x201   : > { %v2996_v8 = vadd.f32 %v2867_v55, %v2776_v48  ;;  %5420 = vmatpush1.bf16.msra.mxu0 %v1069_v46  ;;  %5437 = vmatprep.mubr.bf16.mxu0 %v15259_v0 }
 0x202   : > { %11134 = vmatprep.subr.msk.bf16.mxu0 %vm438_vm1, %v12727_v44  ;;  %v11647_v10 = vpop.f32.mrf.mxu1  ;;  %v2869_v21 = vpop.f32.mrf.mxu0 }
 0x203   : > { %v2997_v35 = vadd.f32 %v2869_v21, %v2777_v2 }
 0x204   : > { %v2871_v29 = vpop.f32.mrf.mxu0  ;;  %v2908_v52 = vpop.f32.mrf.mxu1  ;;  %11129 = vmatmul.mubr.msk.bf16.vlgmr.msra.gmra.mxu1 %vm434_vm2, %v11125_v59 }
 0x205   : > { %v2998_v11 = vadd.f32 %v2908_v52, %v2778_v36  ;;  %11721 = vmatpush3.bf16.msra.mxu1 %v5321_v63  ;;  %11722 = vmatprep.mubr.msk.bf16.mxu1 %vm12281_vm3, %v15264_v5 }
 0x206   : > { %11136 = vmatprep.subr.msk.bf16.mxu1 %vm438_vm1, %v12749_v50  ;;  %v2872_v18 = vpop.f32.mrf.mxu0  ;;  %v2910_v44 = vpop.f32.mrf.mxu1 }
 0x207   : > { %v2999_v7 = vadd.f32 %v2910_v44, %v2779_v15 }
 0x208   : > { %v2912_v56 = vpop.f32.mrf.mxu1  ;;  %v2949_v42 = vpop.f32.mrf.mxu0  ;;  %11131 = vmatmul.mubr.msk.bf16.vlgmr.msra.gmra.mxu0 %vm434_vm2, %v11125_v59 }
 0x209   : > { %v3000_v57 = vadd.f32 %v2949_v42, %v2780_v13  ;;  %5522 = vmatpush1.bf16.msra.mxu0 %v1274_v51  ;;  %5539 = vmatprep.mubr.bf16.mxu0 %v15259_v0 }
 0x20a   : > { %11138 = vmatprep.subr.msk.bf16.mxu0 %vm438_vm1, %v5497_v32  ;;  %v2913_v50 = vpop.f32.mrf.mxu1  ;;  %v2951_v4 = vpop.f32.mrf.mxu0 }
 0x20b   : > { %v3001_v31 = vadd.f32 %v2951_v4, %v2781_v3 }
 0x20c   : > { %v2953_v9 = vpop.f32.mrf.mxu0  ;;  %v2990_v14 = vpop.f32.mrf.mxu1  ;;  %11723 = vmatmul.mubr.msk.bf16.vlgmr.msra.gmra.mxu1 %vm434_vm2, %v11125_v59 }
 0x20d   : > { %v3002_v33 = vadd.f32 %v2990_v14, %v2782_v62  ;;  %5563 = vmatpush1.bf16.msra.mxu1 %v1280_v43  ;;  %5580 = vmatprep.mubr.bf16.mxu1 %v15259_v0 }
 0x20e   : > { %v2954_v39 = vpop.f32.mrf.mxu0  ;;  %v11652_v30 = vpop.f32.mrf.mxu1  ;;  %11726 = vmatprep.subr.bf16.mxu1 %v15264_v5 }
 0x210   : > { %v2993_v40 = vpop.f32.mrf.mxu1  ;;  %v3087_v23 = vpop.f32.mrf.mxu0  ;;  %11135 = vmatmul.mubr.msk.bf16.vlgmr.msra.gmra.mxu0 %vm434_vm2, %v11133_v19 }
 0x211   : > { %v3216_v38 = vadd.f32 %v3087_v23, %v2996_v8  ;;  %5604 = vmatpush1.bf16.msra.mxu0 %v1286_v45  ;;  %5621 = vmatprep.mubr.bf16.mxu0 %v15259_v0 }
 0x212   : > { %v11653_v48 = vpop.f32.mrf.mxu1  ;;  %v3089_v12 = vpop.f32.mrf.mxu0 }
 0x213   : > { %v3217_v54 = vadd.f32 %v3089_v12, %v2997_v35 }
 0x214   : > { %v3091_v2 = vpop.f32.mrf.mxu0  ;;  %v3128_v27 = vpop.f32.mrf.mxu1  ;;  %11137 = vmatmul.mubr.msk.bf16.vlgmr.msra.gmra.mxu1 %vm434_vm2, %v11133_v19 }
 0x215   : > { %v3218_v26 = vadd.f32 %v3128_v27, %v2998_v11  ;;  %11727 = vmatpush3.bf16.msra.mxu1 %v5505_v1  ;;  %11728 = vmatprep.mubr.msk.bf16.mxu1 %vm12281_vm3, %v15264_v5 }
 0x216   : > { %v3092_v60 = vpop.f32.mrf.mxu0  ;;  %v3130_v36 = vpop.f32.mrf.mxu1 }
 0x217   : > { %v3219_v53 = vadd.f32 %v3130_v36, %v2999_v7 }
 0x218   : > { %v3132_v16 = vpop.f32.mrf.mxu1  ;;  %v3169_v15 = vpop.f32.mrf.mxu0  ;;  %11139 = vmatmul.mubr.msk.bf16.vlgmr.msra.gmra.mxu0 %vm434_vm2, %v11133_v19 }
 0x219   : > { %v3220_v17 = vadd.f32 %v3169_v15, %v3000_v57  ;;  %5867 = vmatprep.mubr.bf16.mxu0 %v15259_v0 }
 0x21a   : > { %v3133_v20 = vpop.f32.mrf.mxu1  ;;  %v3171_v37 = vpop.f32.mrf.mxu0 }
 0x21b   : > { %v3221_v13 = vadd.f32 %v3171_v37, %v3001_v31 }
 0x21c   : > { %v3173_v28 = vpop.f32.mrf.mxu0  ;;  %v3210_v22 = vpop.f32.mrf.mxu1  ;;  %11729 = vmatmul.mubr.msk.bf16.vlgmr.msra.gmra.mxu1 %vm434_vm2, %v11133_v19 }
 0x21d   : > { %v3222_v47 = vadd.f32 %v3210_v22, %v3002_v33  ;;  %5910 = vmatprep.mubr.bf16.mxu1 %v15259_v0 }
 0x21e   : > { %v3174_v3 = vpop.f32.mrf.mxu0  ;;  %v11658_v58 = vpop.f32.mrf.mxu1 }
 0x220   : > { %v3213_v34 = vpop.f32.mrf.mxu1  ;;  %v3307_v24 = vpop.f32.mrf.mxu0 }
 0x221   : > { %v3436_v62 = vadd.f32 %v3307_v24, %v3216_v38 }
 0x222   : > { %v11659_v59 = vpop.f32.mrf.mxu1  ;;  %v3309_v61 = vpop.f32.mrf.mxu0 }
 0x223   : > { %v3437_v49 = vadd.f32 %v3309_v61, %v3217_v54 }
 0x224   : > { %v3311_v6 = vpop.f32.mrf.mxu0  ;;  %v3348_v55 = vpop.f32.mrf.mxu1 }
 0x225   : > { %v3438_v46 = vadd.f32 %v3348_v55, %v3218_v26 }
 0x226   : > { %v3312_v8 = vpop.f32.mrf.mxu0  ;;  %v3350_v10 = vpop.f32.mrf.mxu1 }
 0x227   : > { %v3439_v21 = vadd.f32 %v3350_v10, %v3219_v53 }
 0x228   : > { %v3352_v63 = vpop.f32.mrf.mxu1  ;;  %v3389_v35 = vpop.f32.mrf.mxu0 }
 0x229   : > { %v3440_v29 = vadd.f32 %v3389_v35, %v3220_v17 }
 0x22a   : > { %v3353_v52 = vpop.f32.mrf.mxu1  ;;  %v3391_v41 = vpop.f32.mrf.mxu0 }
 0x22b   : > { %v3441_v11 = vadd.f32 %v3391_v41, %v3221_v13 }
 0x22c   : > { %v3393_v18 = vpop.f32.mrf.mxu0  ;;  %v3430_v44 = vpop.f32.mrf.mxu1 }
 0x22d   : > { %v3442_v7 = vadd.f32 %v3430_v44, %v3222_v47 }
 0x22e   : > { %v3394_v56 = vpop.f32.mrf.mxu0  ;;  %v11664_v42 = vpop.f32.mrf.mxu1 }
 0x230   : > { %v3433_v51 = vpop.f32.mrf.mxu1  ;;  %v3527_v57 = vpop.f32.mrf.mxu0 }
 0x231   : > { %v3656_v32 = vadd.f32 %v3527_v57, %v3436_v62 }
 0x232   : > { %v11665_v50 = vpop.f32.mrf.mxu1  ;;  %v3529_v4 = vpop.f32.mrf.mxu0 }
 0x233   : > { %v3657_v31 = vadd.f32 %v3529_v4, %v3437_v49 }
 0x234   : > { %v3531_v9 = vpop.f32.mrf.mxu0  ;;  %v3568_v14 = vpop.f32.mrf.mxu1 }
 0x235   : > { %v3658_v43 = vadd.f32 %v3568_v14, %v3438_v46 }
 0x236   : > { %v3532_v33 = vpop.f32.mrf.mxu0  ;;  %v3570_v19 = vpop.f32.mrf.mxu1 }
 0x237   : > { %v3659_v39 = vadd.f32 %v3570_v19, %v3439_v21 }
 0x238   : > { %v3572_v30 = vpop.f32.mrf.mxu1  ;;  %v3609_v40 = vpop.f32.mrf.mxu0 }
 0x239   : > { %v3660_v23 = vadd.f32 %v3609_v40, %v3440_v29 }
 0x23a   : > { %v3573_v25 = vpop.f32.mrf.mxu1  ;;  %v3611_v45 = vpop.f32.mrf.mxu0 }
 0x23b   : > { %v3661_v38 = vadd.f32 %v3611_v45, %v3441_v11 }
 0x23c   : > { %v3613_v48 = vpop.f32.mrf.mxu0  ;;  %v3650_v12 = vpop.f32.mrf.mxu1 }
 0x23d   : > { %v3662_v1 = vadd.f32 %v3650_v12, %v3442_v7 }
 0x23e   : > { %v3614_v54 = vpop.f32.mrf.mxu0  ;;  %v11670_v2 = vpop.f32.mrf.mxu1 }
 0x240   : > { %v3653_v27 = vpop.f32.mrf.mxu1  ;;  %v3747_v26 = vpop.f32.mrf.mxu0 }
 0x241   : > { %v3876_v60 = vadd.f32 %v3747_v26, %v3656_v32 }
 0x242   : > { %v11671_v36 = vpop.f32.mrf.mxu1  ;;  %v3749_v53 = vpop.f32.mrf.mxu0 }
 0x243   : > { %v3877_v16 = vadd.f32 %v3749_v53, %v3657_v31 }
 0x244   : > { %v3751_v15 = vpop.f32.mrf.mxu0  ;;  %v3788_v17 = vpop.f32.mrf.mxu1 }
 0x245   : > { %v3878_v20 = vadd.f32 %v3788_v17, %v3658_v43 }
 0x246   : > { %v3752_v37 = vpop.f32.mrf.mxu0  ;;  %v3790_v13 = vpop.f32.mrf.mxu1 }
 0x247   : > { %v3879_v28 = vadd.f32 %v3790_v13, %v3659_v39 }
 0x248   : > { %v3792_v22 = vpop.f32.mrf.mxu1  ;;  %v3829_v47 = vpop.f32.mrf.mxu0 }
 0x249   : > { %v3880_v3 = vadd.f32 %v3829_v47, %v3660_v23 }
 0x24a   : > { %v3793_v58 = vpop.f32.mrf.mxu1  ;;  %v3831_v34 = vpop.f32.mrf.mxu0 }
 0x24b   : > { %v3881_v24 = vadd.f32 %v3831_v34, %v3661_v38 }
 0x24c   : > { %v3833_v62 = vpop.f32.mrf.mxu0  ;;  %v3870_v59 = vpop.f32.mrf.mxu1 }
 0x24d   : > { %v3882_v61 = vadd.f32 %v3870_v59, %v3662_v1 }
 0x24e   : > { %v3834_v49 = vpop.f32.mrf.mxu0  ;;  %v11676_v6 = vpop.f32.mrf.mxu1 }
 0x250   : > { %v3873_v55 = vpop.f32.mrf.mxu1  ;;  %v3967_v46 = vpop.f32.mrf.mxu0 }
 0x251   : > { %v4096_v8 = vadd.f32 %v3967_v46, %v3876_v60 }
 0x252   : > { %v11677_v10 = vpop.f32.mrf.mxu1  ;;  %v3969_v21 = vpop.f32.mrf.mxu0 }
 0x253   : > { %v4097_v63 = vadd.f32 %v3969_v21, %v3877_v16 }
 0x254   : > { %v3971_v35 = vpop.f32.mrf.mxu0  ;;  %v4008_v29 = vpop.f32.mrf.mxu1 }
 0x255   : > { %v4098_v52 = vadd.f32 %v4008_v29, %v3878_v20 }
 0x256   : > { %v3972_v41 = vpop.f32.mrf.mxu0  ;;  %v4010_v11 = vpop.f32.mrf.mxu1 }
 0x257   : > { %v4099_v18 = vadd.f32 %v4010_v11, %v3879_v28 }
 0x258   : > { %v4012_v44 = vpop.f32.mrf.mxu1  ;;  %v4049_v7 = vpop.f32.mrf.mxu0 }
 0x259   : > { %v4100_v56 = vadd.f32 %v4049_v7, %v3880_v3 }
 0x25a   : > { %v4013_v42 = vpop.f32.mrf.mxu1  ;;  %v4051_v51 = vpop.f32.mrf.mxu0 }
 0x25b   : > { %v4101_v57 = vadd.f32 %v4051_v51, %v3881_v24 }
 0x25c   : > { %v4053_v32 = vpop.f32.mrf.mxu0  ;;  %v4090_v50 = vpop.f32.mrf.mxu1 }
 0x25d   : > { %v4102_v4 = vadd.f32 %v4090_v50, %v3882_v61 }
 0x25e   : > { %v4054_v31 = vpop.f32.mrf.mxu0  ;;  %v11682_v9 = vpop.f32.mrf.mxu1 }
 0x260   : > { %v4093_v14 = vpop.f32.mrf.mxu1  ;;  %v4187_v43 = vpop.f32.mrf.mxu0 }
 0x261   : > { %v4316_v33 = vadd.f32 %v4187_v43, %v4096_v8 }
 0x262   : > { %v11683_v19 = vpop.f32.mrf.mxu1  ;;  %v4189_v39 = vpop.f32.mrf.mxu0 }
 0x263   : > { %v4317_v30 = vadd.f32 %v4189_v39, %v4097_v63 }
 0x264   : > { %v4191_v40 = vpop.f32.mrf.mxu0  ;;  %v4228_v23 = vpop.f32.mrf.mxu1 }
 0x265   : > { %v4318_v25 = vadd.f32 %v4228_v23, %v4098_v52 }
 0x266   : > { %v4192_v45 = vpop.f32.mrf.mxu0  ;;  %v4230_v38 = vpop.f32.mrf.mxu1 }
 0x267   : > { %v4319_v48 = vadd.f32 %v4230_v38, %v4099_v18 }
 0x268   : > { %v4232_v12 = vpop.f32.mrf.mxu1  ;;  %v4269_v1 = vpop.f32.mrf.mxu0 }
 0x269   : > { %v4320_v54 = vadd.f32 %v4269_v1, %v4100_v56 }
 0x26a   : > { %v4233_v2 = vpop.f32.mrf.mxu1  ;;  %v4271_v27 = vpop.f32.mrf.mxu0 }
 0x26b   : > { %v4321_v26 = vadd.f32 %v4271_v27, %v4101_v57 }
 0x26c   : > { %v4273_v60 = vpop.f32.mrf.mxu0  ;;  %v4310_v36 = vpop.f32.mrf.mxu1 }
 0x26d   : > { %v4322_v53 = vadd.f32 %v4310_v36, %v4102_v4 }
 0x26e   : > { %v4274_v16 = vpop.f32.mrf.mxu0  ;;  %v11688_v15 = vpop.f32.mrf.mxu1 }
 0x270   : > { %v4313_v17 = vpop.f32.mrf.mxu1  ;;  %v4407_v20 = vpop.f32.mrf.mxu0 }
 0x271   : > { %v4536_v37 = vadd.f32 %v4407_v20, %v4316_v33 }
 0x272   : > { %v11689_v13 = vpop.f32.mrf.mxu1  ;;  %v4409_v28 = vpop.f32.mrf.mxu0 }
 0x273   : > { %v4537_v22 = vadd.f32 %v4409_v28, %v4317_v30 }
 0x274   : > { %v4411_v47 = vpop.f32.mrf.mxu0  ;;  %v4448_v3 = vpop.f32.mrf.mxu1 }
 0x275   : > { %v4538_v58 = vadd.f32 %v4448_v3, %v4318_v25 }
 0x276   : > { %v4412_v34 = vpop.f32.mrf.mxu0  ;;  %v4450_v24 = vpop.f32.mrf.mxu1 }
 0x277   : > { %v4539_v62 = vadd.f32 %v4450_v24, %v4319_v48 }
 0x278   : > { %v4452_v59 = vpop.f32.mrf.mxu1  ;;  %v4489_v61 = vpop.f32.mrf.mxu0 }
 0x279   : > { %v4540_v49 = vadd.f32 %v4489_v61, %v4320_v54 }
 0x27a   : > { %v4453_v6 = vpop.f32.mrf.mxu1  ;;  %v4491_v55 = vpop.f32.mrf.mxu0 }
 0x27b   : > { %v4541_v46 = vadd.f32 %v4491_v55, %v4321_v26 }
 0x27c   : > { %v4493_v8 = vpop.f32.mrf.mxu0  ;;  %v4530_v10 = vpop.f32.mrf.mxu1 }
 0x27d   : > { %v4542_v21 = vadd.f32 %v4530_v10, %v4322_v53 }
 0x27e   : > { %v4494_v63 = vpop.f32.mrf.mxu0  ;;  %v11694_v35 = vpop.f32.mrf.mxu1 }
 0x280   : > { %v4533_v29 = vpop.f32.mrf.mxu1  ;;  %v4627_v52 = vpop.f32.mrf.mxu0 }
 0x281   : > { %v13720_v41 = vadd.f32 %v4627_v52, %v4536_v37 }
 0x282   : > { %v11695_v11 = vpop.f32.mrf.mxu1  ;;  %v4629_v18 = vpop.f32.mrf.mxu0 }
 0x283   : > { %v13722_v44 = vadd.f32 %v4629_v18, %v4537_v22 }
 0x284   : > { %v4631_v7 = vpop.f32.mrf.mxu0  ;;  %v4668_v56 = vpop.f32.mrf.mxu1 }
 0x285   : > { %v13724_v42 = vadd.f32 %v4668_v56, %v4538_v58 }
 0x286   : > { %v4632_v51 = vpop.f32.mrf.mxu0  ;;  %v4670_v57 = vpop.f32.mrf.mxu1 }
 0x287   : > { %v13726_v32 = vadd.f32 %v4670_v57, %v4539_v62 }
 0x288   : > { %v4672_v50 = vpop.f32.mrf.mxu1  ;;  %v4709_v4 = vpop.f32.mrf.mxu0 }
 0x289   : > { %v13728_v31 = vadd.f32 %v4709_v4, %v4540_v49 }
 0x28a   : > { %v4673_v9 = vpop.f32.mrf.mxu1  ;;  %v4711_v14 = vpop.f32.mrf.mxu0 }
 0x28b   : > { %v13730_v43 = vadd.f32 %v4711_v14, %v4541_v46 }
 0x28c   : > { %v4713_v33 = vpop.f32.mrf.mxu0  ;;  %v4750_v19 = vpop.f32.mrf.mxu1 }
 0x28d   : > { %v13732_v39 = vadd.f32 %v4750_v19, %v4542_v21 }
 0x28e   : > { %v4714_v30 = vpop.f32.mrf.mxu0  ;;  %v11700_v40 = vpop.f32.mrf.mxu1 }
 0x290   : > { %v4753_v23 = vpop.f32.mrf.mxu1  ;;  %v4805_v25 = vpop.f32.mrf.mxu0 }
 0x292   : > { %v11701_v45 = vpop.f32.mrf.mxu1  ;;  %v4807_v38 = vpop.f32.mrf.mxu0 }
 0x294   : > { %v4809_v48 = vpop.f32.mrf.mxu0  ;;  %v4846_v12 = vpop.f32.mrf.mxu1 }
 0x296   : > { %v4810_v1 = vpop.f32.mrf.mxu0  ;;  %v13734_v54 = vpop.f32.mrf.mxu1 }
 0x297   : > { %v4934_v1 = vadd.f32 %v4805_v25, %v13720_v41  ;;  %v5681_v41 = vpop.permute.xlu0 %5680 }
 0x298   : > { %v4850_v2 = vpop.f32.mrf.mxu1  ;;  %v13736_v27 = vpop.f32.mrf.mxu0 }
 0x299   : > { %v4938_v25 = vadd.f32 %v13736_v27, %v13728_v31 }
 0x29a   : > { %v4851_v26 = vpop.f32.mrf.mxu1  ;;  %v13738_v60 = vpop.f32.mrf.mxu0 }
 0x29c   : > { %v4891_v36 = vpop.f32.mrf.mxu0  ;;  %v13740_v53 = vpop.f32.mrf.mxu1 }
 0x29d   : > { %v4935_v36 = vadd.f32 %v4807_v38, %v13722_v44 }
 0x29e   : > { %v4892_v16 = vpop.f32.mrf.mxu0  ;;  %v11706_v15 = vpop.f32.mrf.mxu1 }
 0x2a0   : > { %v4931_v17 = vpop.f32.mrf.mxu1  ;;  %v4989_v20 = vpop.f32.mrf.mxu0 }
 0x2a1   : > { %v5118_v16 = vadd.f32 %v4989_v20, %v4934_v1 }
 0x2a2   : > { %v11707_v37 = vpop.f32.mrf.mxu1  ;;  %v4991_v13 = vpop.f32.mrf.mxu0 }
 0x2a3   : > { %v4936_v37 = vadd.f32 %v4846_v12, %v13724_v42  ;;  %v4939_v12 = vadd.f32 %v13738_v60, %v13730_v43 }
 0x2a4   : > { %v4993_v28 = vpop.f32.mrf.mxu0  ;;  %v5030_v22 = vpop.f32.mrf.mxu1 }
 0x2a5   : > { %v5119_v28 = vadd.f32 %v4991_v13, %v4935_v36 }
 0x2a6   : > { %v4994_v47 = vpop.f32.mrf.mxu0  ;;  %v5032_v3 = vpop.f32.mrf.mxu1 }
 0x2a8   : > { %v5034_v58 = vpop.f32.mrf.mxu1  ;;  %v5071_v34 = vpop.f32.mrf.mxu0 }
 0x2a9   : > { %v5122_v13 = vadd.f32 %v5071_v34, %v4938_v25 }
 0x2aa   : > { %v5035_v24 = vpop.f32.mrf.mxu1  ;;  %v13742_v62 = vpop.f32.mrf.mxu0 }
 0x2ab   : > { %v5123_v31 = vadd.f32 %v13742_v62, %v4939_v12 }
 0x2ac   : > { %v5075_v59 = vpop.f32.mrf.mxu0  ;;  %v13744_v61 = vpop.f32.mrf.mxu1 }
 0x2ad   : > { %v4937_v59 = vadd.f32 %v13734_v54, %v13726_v32 }
 0x2ae   : > { %v5076_v49 = vpop.f32.mrf.mxu0  ;;  %v11712_v6 = vpop.f32.mrf.mxu1 }
 0x2af   : > { %v5120_v49 = vadd.f32 %v5030_v22, %v4936_v37  ;;  %v5121_v20 = vadd.f32 %v5032_v3, %v4937_v59 }
 0x2b0   : > { %v5115_v55 = vpop.f32.mrf.mxu1  ;;  %v5173_v46 = vpop.f32.mrf.mxu0 }
 0x2b1   : > { %v5302_v47 = vadd.f32 %v5173_v46, %v5118_v16 }
 0x2b2   : > { %v11713_v8 = vpop.f32.mrf.mxu1  ;;  %v5175_v10 = vpop.f32.mrf.mxu0 }
 0x2b3   : > { %v5303_v6 = vadd.f32 %v5175_v10, %v5119_v28 }
 0x2b4   : > { %v5177_v21 = vpop.f32.mrf.mxu0  ;;  %v5214_v63 = vpop.f32.mrf.mxu1 }
 0x2b5   : > { %v5304_v8 = vadd.f32 %v5214_v63, %v5120_v49 }
 0x2b6   : > { %v5178_v35 = vpop.f32.mrf.mxu0  ;;  %v5216_v29 = vpop.f32.mrf.mxu1 }
 0x2b7   : > { %v5305_v32 = vadd.f32 %v5216_v29, %v5121_v20 }
 0x2b8   : > { %v5218_v52 = vpop.f32.mrf.mxu1  ;;  %v5255_v11 = vpop.f32.mrf.mxu0 }
 0x2b9   : > { %v4940_v52 = vadd.f32 %v13740_v53, %v13732_v39  ;;  %v5306_v27 = vadd.f32 %v5255_v11, %v5122_v13 }
 0x2ba   : > { %v5219_v18 = vpop.f32.mrf.mxu1  ;;  %v5257_v7 = vpop.f32.mrf.mxu0 }
 0x2bb   : > { %v5124_v43 = vadd.f32 %v13744_v61, %v4940_v52  ;;  %v5307_v60 = vadd.f32 %v5257_v7, %v5123_v31 }
 0x2bc   : > { %v5259_v56 = vpop.f32.mrf.mxu0  ;;  %v5296_v51 = vpop.f32.mrf.mxu1 }
 0x2be   : > { %v5260_v57 = vpop.f32.mrf.mxu0  ;;  %v11718_v50 = vpop.f32.mrf.mxu1 }
 0x2c0   : > { %v5299_v4 = vpop.f32.mrf.mxu1  ;;  %v5357_v9 = vpop.f32.mrf.mxu0 }
 0x2c1   : > { %v5486_v55 = vadd.f32 %v5357_v9, %v5302_v47 }
 0x2c2   : > { %v11719_v14 = vpop.f32.mrf.mxu1  ;;  %v5359_v33 = vpop.f32.mrf.mxu0 }
 0x2c3   : > { %v5487_v21 = vadd.f32 %v5359_v33, %v5303_v6 }
 0x2c4   : > { %v5361_v19 = vpop.f32.mrf.mxu0  ;;  %v5398_v30 = vpop.f32.mrf.mxu1 }
 0x2c5   : > { %v5488_v54 = vadd.f32 %v5398_v30, %v5304_v8  ;;  %v5308_v19 = vadd.f32 %v5296_v51, %v5124_v43 }
 0x2c6   : > { %v5362_v40 = vpop.f32.mrf.mxu0  ;;  %v5400_v23 = vpop.f32.mrf.mxu1 }
 0x2c7   : > { %v5489_v18 = vadd.f32 %v5400_v23, %v5305_v32 }
 0x2c8   : > { %v5402_v45 = vpop.f32.mrf.mxu1  ;;  %v5439_v48 = vpop.f32.mrf.mxu0 }
 0x2c9   : > { %v5490_v34 = vadd.f32 %v5439_v48, %v5306_v27 }
 0x2ca   : > { %v5403_v2 = vpop.f32.mrf.mxu1  ;;  %v5441_v26 = vpop.f32.mrf.mxu0 }
 0x2cb   : > { %v5491_v62 = vadd.f32 %v5441_v26, %v5307_v60 }
 0x2cc   : > { %v5443_v15 = vpop.f32.mrf.mxu0  ;;  %v5480_v17 = vpop.f32.mrf.mxu1 }
 0x2cd   : > { %v5492_v23 = vadd.f32 %v5480_v17, %v5308_v19 }
 0x2ce   : > { %v5444_v58 = vpop.f32.mrf.mxu0  ;;  %v11724_v24 = vpop.f32.mrf.mxu1 }
 0x2d0   : > { %v5483_v44 = vpop.f32.mrf.mxu1  ;;  %v5541_v38 = vpop.f32.mrf.mxu0 }
 0x2d1   : > { %v5670_v42 = vadd.f32 %v5541_v38, %v5486_v55 }
 0x2d2   : > { %v11725_v46 = vpop.f32.mrf.mxu1  ;;  %v5543_v35 = vpop.f32.mrf.mxu0 }
 0x2d3   : > { %v5671_v22 = vadd.f32 %v5543_v35, %v5487_v21  ;;  %v5683_v10 = vadd.f32 %v5681_v41, %v5670_v42 }
 0x2d4   : > { %v5545_v3 = vpop.f32.mrf.mxu0  ;;  %v5582_v63 = vpop.f32.mrf.mxu1 }
 0x2d5   : > { %v5684_v56 = vadd.f32 %v5681_v41, %v5671_v22  ;;  %v5672_v57 = vadd.f32 %v5582_v63, %v5488_v54  ;;  %v5690_v4 = vmax.f32 %v5683_v10, 0.0 }
 0x2d6   : > { %v5546_v50 = vpop.f32.mrf.mxu0  ;;  %v5584_v29 = vpop.f32.mrf.mxu1 }
 0x2d7   : > { %v5691_v9 = vmax.f32 %v5684_v56, 0.0  ;;  %v5685_v14 = vadd.f32 %v5681_v41, %v5672_v57  ;;  %v5673_v33 = vadd.f32 %v5584_v29, %v5489_v18 }
 0x2d8   : > { %v5586_v39 = vpop.f32.mrf.mxu1  ;;  %v5623_v53 = vpop.f32.mrf.mxu0 }
 0x2d9   : > { %v11965_v11 = vpack.i.bf16 %v5691_v9, %v5690_v4  ;;  %v5686_v30 = vadd.f32 %v5681_v41, %v5673_v33  ;;  %v5674_v40 = vadd.f32 %v5623_v53, %v5490_v34  ;;  %v5692_v2 = vmax.f32 %v5685_v14, 0.0 }
 0x2da   : > { %v5587_v45 = vpop.f32.mrf.mxu1  ;;  %v5625_v1 = vpop.f32.mrf.mxu0 }
 0x2db   : > { %v5693_v61 = vmax.f32 %v5686_v30, 0.0  ;;  %v5687_v7 = vadd.f32 %v5681_v41, %v5674_v40  ;;  %v5675_v48 = vadd.f32 %v5625_v1, %v5491_v62  ;;  %11966 = vrot.lane.b32.xlu1 %v11965_v11, %s12271_s23 }
 0x2dc   : > { %v5627_v36 = vpop.f32.mrf.mxu0  ;;  %v5664_v16 = vpop.f32.mrf.mxu1 }
 0x2dd   : > { %v11970_v15 = vpack.i.bf16 %v5693_v61, %v5692_v2  ;;  %v5694_v37 = vmax.f32 %v5687_v7, 0.0  ;;  %v5688_v51 = vadd.f32 %v5681_v41, %v5675_v48  ;;  %v5676_v28 = vadd.f32 %v5664_v16, %v5492_v23 }
 0x2de   : > { %v5628_v47 = vpop.f32.mrf.mxu0  ;;  %v11730_v26 = vpop.f32.mrf.mxu1 }
 0x2df   : > { %v13760_v58 = vadd.f32 %v5681_v41, %v5676_v28  ;;  %5712 = vrot.lane.b32.xlu0 %v5694_v37, %s12271_s23  ;;  %11971 = vrot.lane.b32.xlu1 %v11970_v15, %s12271_s23  ;;  %v5695_v24 = vmax.f32 %v5688_v51, 0.0 }
 0x2e0   : > { %v5667_v17 = vpop.f32.mrf.mxu1 }
 0x2e1   : > { %v5696_v59 = vmax.f32 %v13760_v58, 0.0  ;;  %v12184_v17 = vld [vmem:[%s15241_s3 + $0x8] sm:$0xff]  }
 0x2e2   : > { %v11731_v49 = vpop.f32.mrf.mxu1 }
 0x2e3   : > { %v11975_v6 = vpack.i.bf16 %v5696_v59, %v5695_v24 }
 0x2e5   : > { %11976 = vrot.lane.b32.xlu1 %v11975_v6, %s12271_s23  ;;  %s12292_s23 = smov 122  }
 0x34d   : > { %v11967_v55 = vpop.permute.xlu1 %11966 }
 0x34e   : > { %v11969_v25 = vunpack.i.h.bf16 %v11967_v55  ;;  %v11968_v44 = vunpack.i.l.bf16 %v11967_v55 }
 0x350   : > { %v5719_v20 = vsel %vm427_vm0, %v11968_v44, %v11969_v25 }
 0x351   : > { %v11972_v38 = vpop.permute.xlu1 %11971  ;;  %v5713_v21 = vpop.permute.xlu0 %5712  ;;  %v5732_v46 = vmax.f32 %v5690_v4, %v5719_v20 }
 0x352   : > { %v11974_v41 = vunpack.i.h.bf16 %v11972_v38  ;;  %v11973_v8 = vunpack.i.l.bf16 %v11972_v38 }
 0x354   : > { %v5722_v42 = vsel %vm427_vm0, %v11974_v41, %v5713_v21  ;;  %v5720_v12 = vsel %vm427_vm0, %v11969_v25, %v11973_v8  ;;  %v5721_v13 = vsel %vm427_vm0, %v11973_v8, %v11974_v41 }
 0x355   : > { %v5735_v35 = vmax.f32 %v5693_v61, %v5722_v42  ;;  %v5733_v32 = vmax.f32 %v5691_v9, %v5720_v12  ;;  %v5734_v54 = vmax.f32 %v5692_v2, %v5721_v13 }
 0x357   : > { %v11977_v22 = vpop.permute.xlu1 %11976  ;;  %v11985_v10 = vpack.i.bf16 %v5735_v35, %v5734_v54  ;;  %v11980_v52 = vpack.i.bf16 %v5733_v32, %v5732_v46 }
 0x358   : > { %v11979_v31 = vunpack.i.h.bf16 %v11977_v22  ;;  %v11978_v27 = vunpack.i.l.bf16 %v11977_v22 }
 0x359   : > { %11986 = vrot.lane.b32.xlu1 %v11985_v10, %s12275_s27  ;;  %11981 = vrot.lane.b32.xlu0 %v11980_v52, %s12275_s27 }
 0x35a   : > { %v5723_v3 = vsel %vm427_vm0, %v5713_v21, %v11978_v27  ;;  %v5724_v63 = vsel %vm427_vm0, %v11978_v27, %v11979_v31  ;;  %v13807_v16 = vmax.f32 %v5696_v59, %v11979_v31  ;;  %vm6307_vm0 = vcmask 998400  }
 0x35b   : > { %v5736_v18 = vmax.f32 %v5694_v37, %v5723_v3  ;;  %v13774_v56 = vmax.f32 %v5695_v24, %v5724_v63 }
 0x35d   : > { %v11990_v57 = vpack.i.bf16 %v13774_v56, %v5736_v18 }
 0x35f   : > { %11991 = vrot.lane.b32.xlu0 %v11990_v57, %s12275_s27 }
 0x3cb   : > { %v11987_v43 = vpop.permute.xlu1 %11986  ;;  %v11982_v60 = vpop.permute.xlu0 %11981 }
 0x3cc   : > { %v11989_v34 = vunpack.i.h.bf16 %v11987_v43  ;;  %v11988_v50 = vunpack.i.l.bf16 %v11987_v43  ;;  %v11984_v29 = vunpack.i.h.bf16 %v11982_v60  ;;  %v11983_v4 = vunpack.i.l.bf16 %v11982_v60 }
 0x3ce   : > { %v5763_v9 = vsel %vm1481_vm7, %v11988_v50, %v11989_v34  ;;  %v5762_v14 = vsel %vm1481_vm7, %v11984_v29, %v11988_v50  ;;  %v5761_v33 = vsel %vm1481_vm7, %v11983_v4, %v11984_v29 }
 0x3cf   : > { %v5775_v19 = vmax.f32 %v5733_v32, %v5762_v14  ;;  %v5774_v39 = vmax.f32 %v5732_v46, %v5761_v33  ;;  %v5776_v53 = vmax.f32 %v5734_v54, %v5763_v9 }
 0x3d1   : > { %v13781_v62 = vpack.c.bf16 %v5775_v19, %v5775_v19  ;;  %v13783_v11 = vpack.c.bf16 %v5774_v39, %v5774_v39  ;;  %v13785_v30 = vpop.permute.xlu0 %11991  ;;  %v13797_v2 = vpack.c.bf16 %v5776_v53, %v5776_v53 }
 0x3d2   : > { %v11994_v40 = vunpack.i.h.bf16 %v13785_v30  ;;  %v11993_v23 = vunpack.i.l.bf16 %v13785_v30 }
 0x3d3   : > { %5805 = vrot.lane.b32.xlu0 %v13781_v62, %s12272_s24  ;;  %5803 = vrot.lane.b32.xlu1 %v13783_v11, %s12272_s24  ;;  %v5971_v21 = vsel %vm438_vm1, %v13783_v11, 0  ;;  %v13938_v46 = vsel %vm438_vm1, %v13797_v2, 0 }
 0x3d4   : > { %v5764_v45 = vsel %vm1481_vm7, %v11989_v34, %v11993_v23  ;;  %v5765_v1 = vsel %vm1481_vm7, %v11993_v23, %v11994_v40  ;;  %v12186_v34 = vld [vmem:[%s15241_s3 + $0x10] sm:$0xff]  }
 0x3d5   : > { %v5777_v61 = vmax.f32 %v5735_v35, %v5764_v45  ;;  %v5778_v7 = vmax.f32 %v5736_v18, %v5765_v1  ;;  %v12185_v35 = vld [vmem:[%s15241_s3] sm:$0xff]   ;;  %v12187_v45 = vld [vmem:[%s15241_s3 + $0x18] sm:$0xff]  }
 0x3d7   : > { %v13799_v48 = vpack.c.bf16 %v5778_v7, %v5778_v7  ;;  %5807 = vrot.lane.b32.xlu1 %v13797_v2, %s12272_s24  ;;  %v13803_v36 = vpack.c.bf16 %v5777_v61, %v5777_v61 }
 0x3d9   : > { %5811 = vrot.lane.b32.xlu0 %v13799_v48, %s12272_s24  ;;  %v13954_v22 = vsel %vm438_vm1, %v13799_v48, 0 }
 0x3db   : > { %5809 = vrot.lane.b32.xlu1 %v13803_v36, %s12272_s24 }
 0x3dd   : > { %5758 = vrot.lane.b32.xlu0 %v13807_v16, %s12275_s27  ;;  %s12293_s27 = smov 120  }
 0x3df   : > { %6120 = vrot.lane.b32.xlu1 %v13783_v11, %s12274_s26 }
 0x3e1   : > { %6122 = vrot.lane.b32.xlu0 %v13781_v62, %s12274_s26 }
 0x3e3   : > { %6124 = vrot.lane.b32.xlu1 %v13797_v2, %s12274_s26 }
 0x3e5   : > { %6128 = vrot.lane.b32.xlu0 %v13799_v48, %s12274_s26 }
 0x3e7   : > { %6297 = vrot.lane.b32.xlu1 %v13783_v11, %s12292_s23 }
 0x3e9   : > { %6301 = vrot.lane.b32.xlu0 %v13797_v2, %s12292_s23 }
 0x3eb   : > { %6126 = vrot.lane.b32.xlu1 %v13803_v36, %s12274_s26 }
 0x3ed   : > { %6305 = vrot.lane.b32.xlu0 %v13799_v48, %s12292_s23 }
 0x3ef   : > { %6303 = vrot.lane.b32.xlu1 %v13803_v36, %s12292_s23 }
 0x3f1   : > { %6299 = vrot.lane.b32.xlu0 %v13781_v62, %s12292_s23 }
 0x3f3   : > { %6475 = vrot.lane.b32.xlu1 %v13783_v11, %s12293_s27 }
 0x3f5   : > { %6477 = vrot.lane.b32.xlu0 %v13781_v62, %s12293_s27 }
 0x3f7   : > { %6479 = vrot.lane.b32.xlu1 %v13797_v2, %s12293_s27 }
 0x3f9   : > { %6483 = vrot.lane.b32.xlu0 %v13799_v48, %s12293_s27 }
 0x3fb   : > { %6654 = vrot.lane.b32.xlu1 %v13783_v11, %s12282_s15 }
 0x3fd   : > { %6658 = vrot.lane.b32.xlu0 %v13797_v2, %s12282_s15 }
 0x3ff   : > { %6481 = vrot.lane.b32.xlu1 %v13803_v36, %s12293_s27 }
 0x401   : > { %6662 = vrot.lane.b32.xlu0 %v13799_v48, %s12282_s15 }
 0x403   : > { %6660 = vrot.lane.b32.xlu1 %v13803_v36, %s12282_s15 }
 0x405   : > { %6656 = vrot.lane.b32.xlu0 %v13781_v62, %s12282_s15 }
 0x407   : > { %6834 = vrot.lane.b32.xlu1 %v13783_v11, %s12284_s28 }
 0x409   : > { %6836 = vrot.lane.b32.xlu0 %v13781_v62, %s12284_s28 }
 0x40b   : > { %6838 = vrot.lane.b32.xlu1 %v13797_v2, %s12284_s28 }
 0x40f   : > { %6842 = vrot.lane.b32.xlu1 %v13799_v48, %s12284_s28 }
 0x413   : > { %7014 = vrot.lane.b32.xlu1 %v13783_v11, %s12286_s16 }
 0x417   : > { %6840 = vrot.lane.b32.xlu1 %v13803_v36, %s12284_s28 }
 0x41b   : > { %7020 = vrot.lane.b32.xlu1 %v13803_v36, %s12286_s16 }
 0x41f   : > { %7194 = vrot.lane.b32.xlu1 %v13783_v11, %s12294_s14 }
 0x423   : > { %7198 = vrot.lane.b32.xlu1 %v13797_v2, %s12294_s14 }
 0x427   : > { %7202 = vrot.lane.b32.xlu1 %v13799_v48, %s12294_s14 }
 0x42b   : > { %7200 = vrot.lane.b32.xlu1 %v13803_v36, %s12294_s14 }
 0x42f   : > { %7381 = vrot.lane.b32.xlu1 %v13803_v36, %s12295_s19 }
 0x433   : > { %7375 = vrot.lane.b32.xlu1 %v13783_v11, %s12295_s19 }
 0x445   : > { %v5806_v15 = vpop.permute.xlu0 %5805  ;;  %v5804_v37 = vpop.permute.xlu1 %5803 }
 0x446   : > { %v5813_v51 = vsel %vm826_vm4, %v5804_v37, %v5806_v15 }
 0x447   : > { %v5821_v26 = vsel %vm438_vm1, %v5813_v51, 0 }
 0x449   : > { %v5808_v28 = vpop.permute.xlu1 %5807 }
 0x44a   : > { %v13881_v47 = vsel %vm826_vm4, %v5806_v15, %v5808_v28 }
 0x44b   : > { %v13884_v58 = vpop.permute.xlu0 %5811  ;;  %11144 = vmatprep.subr.msk.bf16.mxu0 %vm438_vm1, %v13881_v47 }
 0x44c   : > { %5850 = vmatpush1.bf16.msra.mxu0 %v5821_v26  ;;  %v5833_v25 = vsel %vm438_vm1, %v13884_v58, 0 }
 0x44d   : > { %v5810_v24 = vpop.permute.xlu1 %5809  ;;  %11732 = vmatprep.subr.bf16.mxu0 %v15264_v5 }
 0x44e   : > { %v13893_v59 = vsel %vm826_vm4, %v5808_v28, %v5810_v24  ;;  %v13897_v49 = vsel %vm826_vm4, %v5810_v24, %v13884_v58 }
 0x44f   : > { %v13901_v6 = vsel %vm438_vm1, %v13893_v59, 0  ;;  %v5759_v55 = vpop.permute.xlu0 %5758  ;;  %11145 = vmatmul.mubr.msk.bf16.vlgmr.msra.gmra.mxu0 %vm434_vm2, %v12184_v17  ;;  %11146 = vmatprep.subr.msk.bf16.mxu1 %vm438_vm1, %v13897_v49 }
 0x450   : > { %v5766_v44 = vsel %vm1481_vm7, %v11994_v40, %v5759_v55  ;;  %5893 = vmatpush1.bf16.msra.mxu1 %v13901_v6  ;;  %11733 = vmatpush3.bf16.msra.mxu0 %v5833_v25  ;;  %v5780_v10 = vmax.f32 %v13807_v16, %v5759_v55  ;;  %v12188_v55 = vld [vmem:[%s15241_s3 + $0x20] sm:$0xff]   ;;  %vm7206_vm7 = vcmask 474112  }
 0x451   : > { %v5779_v38 = vmax.f32 %v13774_v56, %v5766_v44  ;;  %11150 = vmatprep.subr.msk.bf16.mxu1 %vm438_vm1, %v13781_v62  ;;  %11152 = vmatprep.subr.msk.bf16.mxu0 %vm438_vm1, %v13803_v36  ;;  %v6121_v20 = vpop.permute.xlu1 %6120 }
 0x452   : > { %11734 = vmatprep.mubr.msk.bf16.mxu0 %vm12281_vm3, %v15264_v5  ;;  %v13975_v18 = vpack.c.bf16 %v5780_v10, %v5780_v10  ;;  %v12189_v10 = vld [vmem:[%s15241_s3 + $0x28] sm:$0xff]  }
 0x453   : > { %v13919_v41 = vpack.c.bf16 %v5779_v38, %v5779_v38  ;;  %v6123_v8 = vpop.permute.xlu0 %6122  ;;  %11147 = vmatmul.mubr.msk.bf16.vlgmr.msra.gmra.mxu1 %vm434_vm2, %v12184_v17 }
 0x454   : > { %6000 = vmatpush1.bf16.msra.mxu1 %v5971_v21  ;;  %6017 = vmatprep.mubr.bf16.mxu1 %v15259_v0  ;;  %v6130_v52 = vsel %vm1260_vm6, %v6121_v20, %v6123_v8 }
 0x455   : > { %6664 = vrot.lane.b32.xlu0 %v13919_v41, %s12282_s15  ;;  %7385 = vrot.lane.b32.xlu1 %v13919_v41, %s12295_s19  ;;  %v6125_v42 = vpop.permute.xlu1 %6124  ;;  %v6138_v3 = vsel %vm438_vm1, %v6130_v52, 0 }
 0x456   : > { %v13930_v12 = vsel %vm1260_vm6, %v6123_v8, %v6125_v42  ;;  %11738 = vmatprep.subr.bf16.mxu1 %v15264_v5 }
 0x457   : > { %v13933_v13 = vpop.permute.xlu0 %6128  ;;  %11735 = vmatmul.mubr.msk.bf16.vlgmr.msra.gmra.mxu0 %vm434_vm2, %v12184_v17 }
 0x458   : > { %6043 = vmatpush1.bf16.msra.mxu0 %v13938_v46  ;;  %6060 = vmatprep.mubr.bf16.mxu0 %v15259_v0  ;;  %v6150_v9 = vsel %vm438_vm1, %v13933_v13, 0 }
 0x459   : > { %11158 = vmatprep.subr.msk.bf16.mxu0 %vm438_vm1, %v13930_v12  ;;  %6844 = vrot.lane.b32.xlu0 %v13919_v41, %s12284_s28  ;;  %v6298_v32 = vpop.permute.xlu1 %6297 }
 0x45a   : > { %7864 = vrot.lane.b32.xlu1 %v13919_v41, %s12274_s26 }
 0x45b   : > { %v6302_v54 = vpop.permute.xlu0 %6301  ;;  %11151 = vmatmul.mubr.msk.bf16.vlgmr.msra.gmra.mxu1 %vm434_vm2, %v12185_v35 }
 0x45c   : > { %11739 = vmatpush3.bf16.msra.mxu1 %v13954_v22  ;;  %11740 = vmatprep.mubr.msk.bf16.mxu1 %vm12281_vm3, %v15264_v5 }
 0x45d   : > { %7018 = vrot.lane.b32.xlu0 %v13797_v2, %s12286_s16  ;;  %v6127_v31 = vpop.permute.xlu1 %6126 }
 0x45e   : > { %8178 = vrot.lane.b32.xlu1 %v13919_v41, %s12293_s27  ;;  %v13967_v27 = vsel %vm1260_vm6, %v6127_v31, %v13933_v13  ;;  %v13978_v56 = vsel %vm1260_vm6, %v6125_v42, %v6127_v31 }
 0x45f   : > { %v13970_v63 = vpop.permute.xlu0 %6305  ;;  %11153 = vmatmul.mubr.msk.bf16.vlgmr.msra.gmra.mxu0 %vm434_vm2, %v12185_v35  ;;  %11160 = vmatprep.subr.msk.bf16.mxu1 %vm438_vm1, %v13967_v27  ;;  %v13988_v43 = vsel %vm438_vm1, %v13978_v56, 0 }
 0x460   : > { %6167 = vmatpush1.bf16.msra.mxu0 %v6138_v3  ;;  %6184 = vmatprep.mubr.bf16.mxu0 %v15259_v0  ;;  %v6328_v15 = vsel %vm438_vm1, %v13970_v63, 0 }
 0x461   : > { %7022 = vrot.lane.b32.xlu0 %v13799_v48, %s12286_s16  ;;  %v6304_v57 = vpop.permute.xlu1 %6303  ;;  %11744 = vmatprep.subr.bf16.mxu0 %v15264_v5 }
 0x462   : > { %8490 = vrot.lane.b32.xlu1 %v13975_v18, %s12284_s28  ;;  %v14010_v14 = vsel %vm6307_vm0, %v6304_v57, %v13970_v63  ;;  %v14026_v11 = vsel %vm6307_vm0, %v6302_v54, %v6304_v57  ;;  %v12190_v57 = vld [vmem:[%s15241_s3 + $0x30] sm:$0xff]  }
 0x463   : > { %v6300_v60 = vpop.permute.xlu0 %6299  ;;  %11741 = vmatmul.mubr.msk.bf16.vlgmr.msra.gmra.mxu1 %vm434_vm2, %v12185_v35  ;;  %15266 = vst [vmem:[#allocation2_spill] sm:$0xff] %v14010_v14  ;;  %v14036_v40 = vsel %vm438_vm1, %v14026_v11, 0 }
 0x464   : > { %v13995_v50 = vsel %vm6307_vm0, %v6300_v60, %v6302_v54  ;;  %6210 = vmatpush1.bf16.msra.mxu1 %v13988_v43  ;;  %6227 = vmatprep.mubr.bf16.mxu1 %v15259_v0  ;;  %v6308_v33 = vsel %vm6307_vm0, %v6298_v32, %v6300_v60  ;;  %15267 = vst [vmem:[#allocation3_spill] sm:$0xff] %v14036_v40  ;;  %v9878_v60 = vld [vmem:[%s15242_s4 + $0x8] sm:$0xff] }
 0x465   : > { %7016 = vrot.lane.b32.xlu0 %v13781_v62, %s12286_s16  ;;  %v6476_v29 = vpop.permute.xlu1 %6475  ;;  %11166 = vmatprep.subr.msk.bf16.mxu1 %vm438_vm1, %v13995_v50  ;;  %v6316_v39 = vsel %vm438_vm1, %v6308_v33, 0 }
 0x466   : > { %8798 = vrot.lane.b32.xlu1 %v13975_v18, %s12294_s14 }
 0x467   : > { %v6478_v4 = vpop.permute.xlu0 %6477  ;;  %11159 = vmatmul.mubr.msk.bf16.vlgmr.msra.gmra.mxu0 %vm434_vm2, %v12186_v34 }
 0x468   : > { %11745 = vmatpush3.bf16.msra.mxu0 %v6150_v9  ;;  %11746 = vmatprep.mubr.msk.bf16.mxu0 %vm12281_vm3, %v15264_v5  ;;  %v6486_v37 = vsel %vm6485_vm5, %v6476_v29, %v6478_v4 }
 0x469   : > { %11168 = vmatprep.subr.msk.bf16.mxu0 %vm438_vm1, %v14010_v14  ;;  %7196 = vrot.lane.b32.xlu0 %v13781_v62, %s12294_s14  ;;  %v6480_v19 = vpop.permute.xlu1 %6479  ;;  %v6494_v51 = vsel %vm438_vm1, %v6486_v37, 0 }
 0x46a   : > { %9257 = vrot.lane.b32.xlu1 %v13975_v18, %s12272_s24  ;;  %v14043_v1 = vsel %vm6485_vm5, %v6478_v4, %v6480_v19 }
 0x46b   : > { %v14022_v53 = vpop.permute.xlu0 %6483  ;;  %11161 = vmatmul.mubr.msk.bf16.vlgmr.msra.gmra.mxu1 %vm434_vm2, %v12186_v34 }
 0x46c   : > { %6345 = vmatpush1.bf16.msra.mxu1 %v6316_v39  ;;  %6362 = vmatprep.mubr.bf16.mxu1 %v15259_v0  ;;  %v6506_v38 = vsel %vm438_vm1, %v14022_v53, 0 }
 0x46d   : > { %7024 = vrot.lane.b32.xlu0 %v13919_v41, %s12286_s16  ;;  %v6655_v30 = vpop.permute.xlu1 %6654  ;;  %11750 = vmatprep.subr.bf16.mxu1 %v15264_v5 }
 0x46e   : > { %9571 = vrot.lane.b32.xlu1 %v13975_v18, %s12292_s23 }
 0x46f   : > { %v6659_v23 = vpop.permute.xlu0 %6658  ;;  %11747 = vmatmul.mubr.msk.bf16.vlgmr.msra.gmra.mxu0 %vm434_vm2, %v12186_v34 }
 0x470   : > { %6388 = vmatpush1.bf16.msra.mxu0 %v14036_v40  ;;  %6405 = vmatprep.mubr.bf16.mxu0 %v15259_v0 }
 0x471   : > { %11174 = vmatprep.subr.msk.bf16.mxu0 %vm438_vm1, %v14043_v1  ;;  %7204 = vrot.lane.b32.xlu0 %v13919_v41, %s12294_s14  ;;  %v6482_v61 = vpop.permute.xlu1 %6481 }
 0x472   : > { %v14053_v7 = vsel %vm6485_vm5, %v6482_v61, %v14022_v53  ;;  %v14070_v28 = vsel %vm6485_vm5, %v6480_v19, %v6482_v61 }
 0x473   : > { %v14055_v16 = vpop.permute.xlu0 %6662  ;;  %11167 = vmatmul.mubr.msk.bf16.vlgmr.msra.gmra.mxu1 %vm434_vm2, %v12187_v45  ;;  %v14078_v24 = vsel %vm438_vm1, %v14070_v28, 0 }
 0x474   : > { %11751 = vmatpush3.bf16.msra.mxu1 %v6328_v15  ;;  %11752 = vmatprep.mubr.msk.bf16.mxu1 %vm12281_vm3, %v15264_v5  ;;  %15268 = vst [vmem:[#allocation4_spill] sm:$0xff] %v14078_v24 }
 0x475   : > { %11176 = vmatprep.subr.msk.bf16.mxu1 %vm438_vm1, %v14053_v7  ;;  %7379 = vrot.lane.b32.xlu0 %v13797_v2, %s12295_s19  ;;  %v6661_v26 = vpop.permute.xlu1 %6660 }
 0x476   : > { %v14098_v20 = vsel %vm2581_vm12, %v6661_v26, %v14055_v16  ;;  %v14110_v42 = vsel %vm2581_vm12, %v6659_v23, %v6661_v26 }
 0x477   : > { %11169 = vmatmul.mubr.msk.bf16.vlgmr.msra.gmra.mxu0 %vm434_vm2, %v12187_v45  ;;  %v6657_v17 = vpop.permute.xlu0 %6656  ;;  %v6681_v32 = vsel %vm438_vm1, %v14110_v42, 0 }
 0x478   : > { %6523 = vmatpush1.bf16.msra.mxu0 %v6494_v51  ;;  %6540 = vmatprep.mubr.bf16.mxu0 %v15259_v0  ;;  %v14085_v25 = vsel %vm2581_vm12, %v6657_v17, %v6659_v23  ;;  %v6666_v8 = vsel %vm2581_vm12, %v6655_v30, %v6657_v17 }
 0x479   : > { %7383 = vrot.lane.b32.xlu0 %v13799_v48, %s12295_s19  ;;  %11756 = vmatprep.subr.bf16.mxu0 %v15264_v5  ;;  %v6835_v44 = vpop.permute.xlu1 %6834  ;;  %v6675_v21 = vsel %vm438_vm1, %v6666_v8, 0  ;;  %v12191_v8 = vld [vmem:[%s15241_s3 + $0x38] sm:$0xff]  }
 0x47b   : > { %11753 = vmatmul.mubr.msk.bf16.vlgmr.msra.gmra.mxu1 %vm434_vm2, %v12187_v45  ;;  %v6837_v54 = vpop.permute.xlu0 %6836 }
 0x47c   : > { %6566 = vmatpush1.bf16.msra.mxu1 %v14078_v24  ;;  %6583 = vmatprep.mubr.bf16.mxu1 %v15259_v0  ;;  %v6846_v31 = vsel %vm3021_vm14, %v6835_v44, %v6837_v54 }
 0x47d   : > { %11182 = vmatprep.subr.msk.bf16.mxu1 %vm438_vm1, %v14085_v25  ;;  %7377 = vrot.lane.b32.xlu0 %v13781_v62, %s12295_s19  ;;  %v6839_v35 = vpop.permute.xlu1 %6838  ;;  %v6855_v3 = vsel %vm438_vm1, %v6846_v31, 0 }
 0x47e   : > { %v14123_v52 = vsel %vm3021_vm14, %v6837_v54, %v6839_v35 }
 0x47f   : > { %11175 = vmatmul.mubr.msk.bf16.vlgmr.msra.gmra.mxu0 %vm434_vm2, %v12188_v55 }
 0x480   : > { %11757 = vmatpush3.bf16.msra.mxu0 %v6506_v38  ;;  %11758 = vmatprep.mubr.msk.bf16.mxu0 %vm12281_vm3, %v15264_v5 }
 0x481   : > { %11184 = vmatprep.subr.msk.bf16.mxu0 %vm438_vm1, %v14098_v20  ;;  %7707 = vrot.lane.b32.xlu0 %v13919_v41, %s12272_s24  ;;  %v6843_v34 = vpop.permute.xlu1 %6842 }
 0x483   : > { %11177 = vmatmul.mubr.msk.bf16.vlgmr.msra.gmra.mxu1 %vm434_vm2, %v12188_v55 }
 0x484   : > { %6704 = vmatpush1.bf16.msra.mxu1 %v6675_v21  ;;  %6721 = vmatprep.mubr.bf16.mxu1 %v15259_v0 }
 0x485   : > { %8021 = vrot.lane.b32.xlu0 %v13919_v41, %s12292_s23  ;;  %11762 = vmatprep.subr.bf16.mxu1 %v15264_v5  ;;  %v7015_v29 = vpop.permute.xlu1 %7014 }
 0x487   : > { %11759 = vmatmul.mubr.msk.bf16.vlgmr.msra.gmra.mxu0 %vm434_vm2, %v12188_v55 }
 0x488   : > { %6747 = vmatpush1.bf16.msra.mxu0 %v6681_v32  ;;  %6764 = vmatprep.mubr.bf16.mxu0 %v15259_v0 }
 0x489   : > { %11190 = vmatprep.subr.msk.bf16.mxu0 %vm438_vm1, %v14123_v52  ;;  %8336 = vrot.lane.b32.xlu0 %v13975_v18, %s12282_s15  ;;  %v6841_v4 = vpop.permute.xlu1 %6840 }
 0x48a   : > { %v14165_v30 = vsel %vm3021_vm14, %v6839_v35, %v6841_v4  ;;  %v14168_v23 = vsel %vm3021_vm14, %v6841_v4, %v6843_v34 }
 0x48b   : > { %11183 = vmatmul.mubr.msk.bf16.vlgmr.msra.gmra.mxu1 %vm434_vm2, %v12189_v10 }
 0x48c   : > { %11764 = vmatprep.mubr.msk.bf16.mxu1 %vm12281_vm3, %v15264_v5 }
 0x48d   : > { %8644 = vrot.lane.b32.xlu0 %v13975_v18, %s12286_s16  ;;  %v7021_v9 = vpop.permute.xlu1 %7020 }
 0x48f   : > { %11185 = vmatmul.mubr.msk.bf16.vlgmr.msra.gmra.mxu0 %vm434_vm2, %v12189_v10 }
 0x490   : > { %6884 = vmatpush1.bf16.msra.mxu0 %v6855_v3  ;;  %6901 = vmatprep.mubr.bf16.mxu0 %v15259_v0 }
 0x491   : > { %8952 = vrot.lane.b32.xlu0 %v13975_v18, %s12295_s19  ;;  %11768 = vmatprep.subr.bf16.mxu0 %v15264_v5  ;;  %v7195_v15 = vpop.permute.xlu1 %7194 }
 0x495   : > { %9414 = vrot.lane.b32.xlu0 %v13975_v18, %s12274_s26  ;;  %v7199_v17 = vpop.permute.xlu1 %7198 }
 0x497   : > { %11191 = vmatmul.mubr.msk.bf16.vlgmr.msra.gmra.mxu0 %vm434_vm2, %v12190_v57 }
 0x498   : > { %11770 = vmatprep.mubr.msk.bf16.mxu0 %vm12281_vm3, %v15264_v5 }
 0x499   : > { %9728 = vrot.lane.b32.xlu0 %v13975_v18, %s12293_s27  ;;  %v7203_v54 = vpop.permute.xlu1 %7202 }
 0x49d   : > { %9886 = vperm.xlu0 %11964, %v9878_v60  }
 0x4c7   : > { %v14155_v33 = vpop.permute.xlu0 %6664 }
 0x4c8   : > { %v14160_v19 = vsel %vm2581_vm12, %v14055_v16, %v14155_v33  ;;  %v6861_v16 = vsel %vm438_vm1, %v14165_v30, 0 }
 0x4c9   : > { %v6687_v39 = vsel %vm438_vm1, %v14160_v19, 0 }
 0x4ca   : > { %11763 = vmatpush3.bf16.msra.mxu1 %v6687_v39 }
 0x4cb   : > { %v14170_v45 = vpop.permute.xlu0 %6844  ;;  %11192 = vmatprep.subr.msk.bf16.mxu1 %vm438_vm1, %v14168_v23 }
 0x4cc   : > { %v14176_v61 = vsel %vm3021_vm14, %v6843_v34, %v14170_v45  ;;  %v12192_v34 = vld [vmem:[%s15241_s3 + $0x40] sm:$0xff]  }
 0x4cd   : > { %v6867_v37 = vsel %vm438_vm1, %v14176_v61, 0  ;;  %11765 = vmatmul.mubr.msk.bf16.vlgmr.msra.gmra.mxu1 %vm434_vm2, %v12189_v10 }
 0x4ce   : > { %6927 = vmatpush1.bf16.msra.mxu1 %v6861_v16  ;;  %11769 = vmatpush3.bf16.msra.mxu0 %v6867_v37 }
 0x4cf   : > { %v7019_v51 = vpop.permute.xlu0 %7018  ;;  %6944 = vmatprep.mubr.bf16.mxu1 %v15259_v0 }
 0x4d0   : > { %v14186_v26 = vsel %vm3461_vm8, %v7019_v51, %v7021_v9 }
 0x4d1   : > { %11771 = vmatmul.mubr.msk.bf16.vlgmr.msra.gmra.mxu0 %vm434_vm2, %v12190_v57  ;;  %v7041_v38 = vsel %vm438_vm1, %v14186_v26, 0 }
 0x4d2   : > { %7124 = vmatprep.mubr.bf16.mxu0 %v15259_v0 }
 0x4d3   : > { %v7023_v55 = vpop.permute.xlu0 %7022 }
 0x4d4   : > { %v14190_v44 = vsel %vm3461_vm8, %v7021_v9, %v7023_v55 }
 0x4d5   : > { %11193 = vmatmul.mubr.msk.bf16.vlgmr.msra.gmra.mxu1 %vm434_vm2, %v12190_v57  ;;  %11200 = vmatprep.subr.msk.bf16.mxu0 %vm438_vm1, %v14190_v44 }
 0x4d6   : > { %7107 = vmatpush1.bf16.msra.mxu0 %v7041_v38  ;;  %7081 = vmatprep.mubr.bf16.mxu1 %v15259_v0 }
 0x4d7   : > { %v7017_v21 = vpop.permute.xlu0 %7016 }
 0x4d8   : > { %v7026_v35 = vsel %vm3461_vm8, %v7015_v29, %v7017_v21  ;;  %v14203_v32 = vsel %vm3461_vm8, %v7017_v21, %v7019_v51  ;;  %v7201_v29 = vpop.permute.xlu1 %7200 }
 0x4d9   : > { %v7035_v10 = vsel %vm438_vm1, %v7026_v35, 0  ;;  %11198 = vmatprep.subr.msk.bf16.mxu1 %vm438_vm1, %v14203_v32  ;;  %11201 = vmatmul.mubr.msk.bf16.vlgmr.msra.gmra.mxu0 %vm434_vm2, %v12191_v8  ;;  %v14235_v16 = vsel %vm7206_vm7, %v7199_v17, %v7201_v29 }
 0x4da   : > { %7064 = vmatpush1.bf16.msra.mxu1 %v7035_v10  ;;  %7262 = vmatprep.mubr.bf16.mxu0 %v15259_v0 }
 0x4db   : > { %v7197_v31 = vpop.permute.xlu0 %7196  ;;  %11774 = vmatprep.subr.bf16.mxu1 %v15264_v5 }
 0x4dc   : > { %v7207_v3 = vsel %vm7206_vm7, %v7195_v15, %v7197_v31  ;;  %v14213_v57 = vsel %vm7206_vm7, %v7197_v31, %v7199_v17  ;;  %v14238_v15 = vsel %vm7206_vm7, %v7201_v29, %v7203_v54  ;;  %v7222_v17 = vsel %vm438_vm1, %v14235_v16, 0  ;;  %v7382_v38 = vpop.permute.xlu1 %7381 }
 0x4dd   : > { %v7216_v60 = vsel %vm438_vm1, %v7207_v3, 0  ;;  %11199 = vmatmul.mubr.msk.bf16.vlgmr.msra.gmra.mxu1 %vm434_vm2, %v12191_v8  ;;  %11206 = vmatprep.subr.msk.bf16.mxu0 %vm438_vm1, %v14213_v57  ;;  %v12193_v3 = vld [vmem:[%s15241_s3 + $0x48] sm:$0xff]  }
 0x4de   : > { %7245 = vmatpush1.bf16.msra.mxu0 %v7216_v60  ;;  %11776 = vmatprep.mubr.msk.bf16.mxu1 %vm12281_vm3, %v15264_v5 }
 0x4df   : > { %v14224_v4 = vpop.permute.xlu0 %7024  ;;  %11780 = vmatprep.subr.bf16.mxu0 %v15264_v5 }
 0x4e0   : > { %v14229_v9 = vsel %vm3461_vm8, %v7023_v55, %v14224_v4  ;;  %v7376_v31 = vpop.permute.xlu1 %7375 }
 0x4e1   : > { %v7047_v39 = vsel %vm438_vm1, %v14229_v9, 0  ;;  %11207 = vmatmul.mubr.msk.bf16.vlgmr.msra.gmra.mxu0 %vm434_vm2, %v12192_v34 }
 0x4e2   : > { %11775 = vmatpush3.bf16.msra.mxu1 %v7047_v39  ;;  %11782 = vmatprep.mubr.msk.bf16.mxu0 %vm12281_vm3, %v15264_v5 }
 0x4e3   : > { %v14242_v37 = vpop.permute.xlu0 %7204  ;;  %11208 = vmatprep.subr.msk.bf16.mxu1 %vm438_vm1, %v14238_v15 }
 0x4e4   : > { %v14248_v51 = vsel %vm7206_vm7, %v7203_v54, %v14242_v37 }
 0x4e5   : > { %v7228_v55 = vsel %vm438_vm1, %v14248_v51, 0  ;;  %11777 = vmatmul.mubr.msk.bf16.vlgmr.msra.gmra.mxu1 %vm434_vm2, %v12191_v8 }
 0x4e6   : > { %7288 = vmatpush1.bf16.msra.mxu1 %v7222_v17  ;;  %11781 = vmatpush3.bf16.msra.mxu0 %v7228_v55  ;;  %v5974_v55 = vsel %vm438_vm1, %v13781_v62, 0  ;;  %v12194_v62 = vld [vmem:[%s15241_s3 + $0x50] sm:$0xff]  }
 0x4e7   : > { %v7380_v21 = vpop.permute.xlu0 %7379  ;;  %7305 = vmatprep.mubr.bf16.mxu1 %v15259_v0 }
 0x4e8   : > { %v14258_v35 = vsel %vm7387_vm9, %v7380_v21, %v7382_v38 }
 0x4e9   : > { %11783 = vmatmul.mubr.msk.bf16.vlgmr.msra.gmra.mxu0 %vm434_vm2, %v12192_v34  ;;  %v7403_v8 = vsel %vm438_vm1, %v14258_v35, 0 }
 0x4ea   : > { %7486 = vmatprep.mubr.bf16.mxu0 %v15259_v0 }
 0x4eb   : > { %v7384_v54 = vpop.permute.xlu0 %7383 }
 0x4ec   : > { %v14262_v10 = vsel %vm7387_vm9, %v7382_v38, %v7384_v54 }
 0x4ed   : > { %11209 = vmatmul.mubr.msk.bf16.vlgmr.msra.gmra.mxu1 %vm434_vm2, %v12192_v34  ;;  %11216 = vmatprep.subr.msk.bf16.mxu0 %vm438_vm1, %v14262_v10  ;;  %v7386_v34 = vpop.permute.xlu1 %7385 }
 0x4ee   : > { %7469 = vmatpush1.bf16.msra.mxu0 %v7403_v8  ;;  %7443 = vmatprep.mubr.bf16.mxu1 %v15259_v0  ;;  %v14286_v38 = vsel %vm7387_vm9, %v7384_v54, %v7386_v34 }
 0x4ef   : > { %v7378_v60 = vpop.permute.xlu0 %7377  ;;  %11222 = vmatprep.subr.msk.bf16.mxu0 %vm438_vm1, %v13797_v2 }
 0x4f0   : > { %v7388_v29 = vsel %vm7387_vm9, %v7376_v31, %v7378_v60  ;;  %v14277_v39 = vsel %vm7387_vm9, %v7378_v60, %v7380_v21  ;;  %v7409_v21 = vsel %vm438_vm1, %v14286_v38, 0  ;;  %v7560_v31 = vsel %vm438_vm1, %v13919_v41, 0 }
 0x4f1   : > { %v7397_v17 = vsel %vm438_vm1, %v7388_v29, 0  ;;  %11214 = vmatprep.subr.msk.bf16.mxu1 %vm438_vm1, %v14277_v39  ;;  %11217 = vmatmul.mubr.msk.bf16.vlgmr.msra.gmra.mxu0 %vm434_vm2, %v12193_v3  ;;  %v5830_v29 = vsel %vm438_vm1, %v13897_v49, 0 }
 0x4f2   : > { %7426 = vmatpush1.bf16.msra.mxu1 %v7397_v17  ;;  %7577 = vmatpush1.bf16.msra.mxu0 %v5974_v55  ;;  %v12195_v55 = vld [vmem:[%s15241_s3 + $0x58] sm:$0xff]  }
 0x4f3   : > { %v14288_v2 = vpop.permute.xlu0 %7707  ;;  %11786 = vmatprep.subr.bf16.mxu1 %v15264_v5  ;;  %7594 = vmatprep.mubr.bf16.mxu0 %v15259_v0 }
 0x4f4   : > { %11792 = vmatprep.subr.bf16.mxu0 %v15264_v5  ;;  %v14311_v8 = vsel %vm826_vm4, %v13884_v58, %v14288_v2 }
 0x4f5   : > { %11215 = vmatmul.mubr.msk.bf16.vlgmr.msra.gmra.mxu1 %vm434_vm2, %v12193_v3 }
 0x4f6   : > { %11787 = vmatpush3.bf16.msra.mxu1 %v7409_v21  ;;  %11788 = vmatprep.mubr.msk.bf16.mxu1 %vm12281_vm3, %v15264_v5  ;;  %v12196_v21 = vld [vmem:[%s15241_s3 + $0x60] sm:$0xff]  }
 0x4f7   : > { %v14301_v54 = vpop.permute.xlu0 %8021  ;;  %11224 = vmatprep.subr.msk.bf16.mxu1 %vm438_vm1, %v13799_v48  ;;  %v5980_v48 = vsel %vm438_vm1, %v13803_v36, 0 }
 0x4f9   : > { %11223 = vmatmul.mubr.msk.bf16.vlgmr.msra.gmra.mxu0 %vm434_vm2, %v12194_v62 }
 0x4fa   : > { %11793 = vmatpush3.bf16.msra.mxu0 %v7560_v31  ;;  %11794 = vmatprep.mubr.msk.bf16.mxu0 %vm12281_vm3, %v15264_v5 }
 0x4fb   : > { %11232 = vmatprep.subr.msk.bf16.mxu0 %vm438_vm1, %v14311_v8  ;;  %v14317_v60 = vpop.permute.xlu0 %8336 }
 0x4fd   : > { %11789 = vmatmul.mubr.msk.bf16.vlgmr.msra.gmra.mxu1 %vm434_vm2, %v12193_v3 }
 0x4fe   : > { %7620 = vmatpush1.bf16.msra.mxu1 %v5980_v48  ;;  %7637 = vmatprep.mubr.bf16.mxu1 %v15259_v0 }
 0x4ff   : > { %11230 = vmatprep.subr.msk.bf16.mxu1 %vm438_vm1, %v13893_v59  ;;  %v14325_v58 = vpop.permute.xlu0 %8644  ;;  %v5824_v59 = vsel %vm438_vm1, %v13881_v47, 0  ;;  %v7717_v47 = vsel %vm438_vm1, %v14288_v2, 0 }
 0x501   : > { %11795 = vmatmul.mubr.msk.bf16.vlgmr.msra.gmra.mxu0 %vm434_vm2, %v12194_v62 }
 0x502   : > { %7777 = vmatpush1.bf16.msra.mxu0 %v5830_v29  ;;  %7794 = vmatprep.mubr.bf16.mxu0 %v15259_v0  ;;  %v14372_v29 = vsel %vm6307_vm0, %v13970_v63, %v14301_v54 }
 0x503   : > { %11238 = vmatprep.subr.msk.bf16.mxu0 %vm438_vm1, %v13978_v56  ;;  %v8953_v3 = vpop.permute.xlu0 %8952  ;;  %v6141_v56 = vsel %vm438_vm1, %v13930_v12, 0  ;;  %15271 = vst [vmem:[#allocation7_spill] sm:$0xff] %v14372_v29 }
 0x504   : > { %v14334_v17 = vsel %vm7387_vm9, %v7386_v34, %v8953_v3  ;;  %v14348_v34 = vpop.permute.xlu1 %7864 }
 0x505   : > { %11225 = vmatmul.mubr.msk.bf16.vlgmr.msra.gmra.mxu1 %vm434_vm2, %v12194_v62  ;;  %15269 = vst [vmem:[#allocation5_spill] sm:$0xff] %v14348_v34  ;;  %v14360_v12 = vsel %vm1260_vm6, %v13933_v13, %v14348_v34  ;;  %v7874_v48 = vsel %vm438_vm1, %v14348_v34, 0 }
 0x506   : > { %7734 = vmatpush1.bf16.msra.mxu1 %v5824_v59  ;;  %7751 = vmatprep.mubr.bf16.mxu1 %v15259_v0  ;;  %15270 = vst [vmem:[#allocation6_spill] sm:$0xff] %v14360_v12 }
 0x507   : > { %11798 = vmatprep.subr.bf16.mxu1 %v15264_v5 }
 0x508   : > { %v14407_v34 = vpop.permute.xlu1 %8178 }
 0x509   : > { %11233 = vmatmul.mubr.msk.bf16.vlgmr.msra.gmra.mxu0 %vm434_vm2, %v12195_v55 }
 0x50a   : > { %7891 = vmatpush1.bf16.msra.mxu0 %v6141_v56  ;;  %7908 = vmatprep.mubr.bf16.mxu0 %v15259_v0 }
 0x50b   : > { %11804 = vmatprep.subr.bf16.mxu0 %v15264_v5 }
 0x50d   : > { %11231 = vmatmul.mubr.msk.bf16.vlgmr.msra.gmra.mxu1 %vm434_vm2, %v12195_v55 }
 0x50e   : > { %11799 = vmatpush3.bf16.msra.mxu1 %v7717_v47  ;;  %11800 = vmatprep.mubr.msk.bf16.mxu1 %vm12281_vm3, %v15264_v5  ;;  %v6147_v47 = vsel %vm438_vm1, %v13967_v27, 0 }
 0x50f   : > { %11240 = vmatprep.subr.msk.bf16.mxu1 %vm438_vm1, %v14360_v12  ;;  %v5869_v62 = vpop.f32.mrf.mxu0 }
 0x511   : > { %v5871_v31 = vpop.f32.mrf.mxu0  ;;  %11239 = vmatmul.mubr.msk.bf16.vlgmr.msra.gmra.mxu0 %vm434_vm2, %v12196_v21 }
 0x512   : > { %11805 = vmatpush3.bf16.msra.mxu0 %v7874_v48  ;;  %11806 = vmatprep.mubr.msk.bf16.mxu0 %vm12281_vm3, %v15264_v5 }
 0x513   : > { %11248 = vmatprep.subr.msk.bf16.mxu0 %vm438_vm1, %v14372_v29  ;;  %v5873_v13 = vpop.f32.mrf.mxu0  ;;  %v5912_v3 = vpop.f32.mrf.mxu1 }
 0x515   : > { %v14378_v59 = vpop.f32.mrf.mxu0  ;;  %v5914_v56 = vpop.f32.mrf.mxu1  ;;  %11801 = vmatmul.mubr.msk.bf16.vlgmr.msra.gmra.mxu1 %vm434_vm2, %v12195_v55 }
 0x516   : > { %15272 = vst [vmem:[#allocation8_spill] sm:$0xff] %v14378_v59  ;;  %7934 = vmatpush1.bf16.msra.mxu1 %v6147_v47  ;;  %7951 = vmatprep.mubr.bf16.mxu1 %v15259_v0  ;;  %v6325_v59 = vsel %vm438_vm1, %v14010_v14, 0 }
 0x517   : > { %11246 = vmatprep.subr.msk.bf16.mxu1 %vm438_vm1, %v14026_v11  ;;  %v5916_v63 = vpop.f32.mrf.mxu1  ;;  %v5955_v48 = vpop.f32.mrf.mxu0  ;;  %v6319_v11 = vsel %vm438_vm1, %v13995_v50, 0  ;;  %v6497_v50 = vsel %vm438_vm1, %v14043_v1, 0 }
 0x519   : > { %v14386_v24 = vpop.f32.mrf.mxu1  ;;  %v11736_v40 = vpop.f32.mrf.mxu0  ;;  %11807 = vmatmul.mubr.msk.bf16.vlgmr.msra.gmra.mxu0 %vm434_vm2, %v12196_v21 }
 0x51a   : > { %15273 = vst [vmem:[#allocation9_spill] sm:$0xff] %v14386_v24  ;;  %8091 = vmatpush1.bf16.msra.mxu0 %v6325_v59  ;;  %8108 = vmatprep.mubr.bf16.mxu0 %v15259_v0  ;;  %v12197_v40 = vld [vmem:[%s15241_s3 + $0x68] sm:$0xff]  }
 0x51b   : > { %11254 = vmatprep.subr.msk.bf16.mxu0 %vm438_vm1, %v14070_v28  ;;  %v5958_v55 = vpop.f32.mrf.mxu0  ;;  %v6019_v47 = vpop.f32.mrf.mxu1 }
 0x51c   : > { %v6020_v29 = vadd.f32 %v6019_v47, %v5869_v62 }
 0x51d   : > { %v11737_v12 = vpop.f32.mrf.mxu0  ;;  %v6021_v24 = vpop.f32.mrf.mxu1  ;;  %11241 = vmatmul.mubr.msk.bf16.vlgmr.msra.gmra.mxu1 %vm434_vm2, %v12196_v21 }
 0x51e   : > { %v6022_v59 = vadd.f32 %v6021_v24, %v5871_v31  ;;  %8048 = vmatpush1.bf16.msra.mxu1 %v6319_v11  ;;  %8065 = vmatprep.mubr.bf16.mxu1 %v15259_v0 }
 0x51f   : > { %v6023_v14 = vpop.f32.mrf.mxu1  ;;  %v6062_v28 = vpop.f32.mrf.mxu0  ;;  %11810 = vmatprep.subr.bf16.mxu1 %v15264_v5 }
 0x520   : > { %v6024_v62 = vadd.f32 %v6023_v14, %v5873_v13  ;;  %v6063_v47 = vadd.f32 %v6062_v28, %v5912_v3  ;;  %v8031_v28 = vsel %vm438_vm1, %v14301_v54, 0 }
 0x521   : > { %v14404_v12 = vpop.f32.mrf.mxu1  ;;  %v6064_v21 = vpop.f32.mrf.mxu0  ;;  %11249 = vmatmul.mubr.msk.bf16.vlgmr.msra.gmra.mxu0 %vm434_vm2, %v12197_v40 }
 0x522   : > { %15274 = vst [vmem:[#allocation10_spill] sm:$0xff] %v14404_v12  ;;  %v6065_v24 = vadd.f32 %v6064_v21, %v5914_v56  ;;  %8205 = vmatpush1.bf16.msra.mxu0 %v6497_v50  ;;  %8222 = vmatprep.mubr.bf16.mxu0 %v15259_v0  ;;  %v12198_v56 = vld [vmem:[%s15241_s3 + $0x70] sm:$0xff]   ;;  %v14422_v50 = vsel %vm6485_vm5, %v14022_v53, %v14407_v34 }
 0x523   : > { %v6066_v31 = vpop.f32.mrf.mxu0  ;;  %v6105_v11 = vpop.f32.mrf.mxu1  ;;  %11816 = vmatprep.subr.bf16.mxu0 %v15264_v5 }
 0x524   : > { %v6067_v14 = vadd.f32 %v6066_v31, %v5916_v63  ;;  %v6106_v13 = vadd.f32 %v6105_v11, %v5955_v48 }
 0x525   : > { %v14411_v3 = vpop.f32.mrf.mxu0  ;;  %v11742_v1 = vpop.f32.mrf.mxu1  ;;  %11247 = vmatmul.mubr.msk.bf16.vlgmr.msra.gmra.mxu1 %vm434_vm2, %v12197_v40 }
 0x526   : > { %15275 = vst [vmem:[#allocation11_spill] sm:$0xff] %v14411_v3  ;;  %11811 = vmatpush3.bf16.msra.mxu1 %v8031_v28  ;;  %11812 = vmatprep.mubr.msk.bf16.mxu1 %vm12281_vm3, %v15264_v5  ;;  %v8188_v28 = vsel %vm438_vm1, %v14407_v34, 0 }
 0x527   : > { %11256 = vmatprep.subr.msk.bf16.mxu1 %vm438_vm1, %v14422_v50  ;;  %v6108_v63 = vpop.f32.mrf.mxu1  ;;  %v6186_v48 = vpop.f32.mrf.mxu0 }
 0x528   : > { %v6109_v21 = vadd.f32 %v6108_v63, %v5958_v55  ;;  %v6279_v31 = vadd.f32 %v6186_v48, %v6020_v29  ;;  %v6503_v48 = vsel %vm438_vm1, %v14053_v7, 0 }
 0x529   : > { %v11743_v11 = vpop.f32.mrf.mxu1  ;;  %v6188_v1 = vpop.f32.mrf.mxu0  ;;  %11255 = vmatmul.mubr.msk.bf16.vlgmr.msra.gmra.mxu0 %vm434_vm2, %v12198_v56 }
 0x52a   : > { %v6280_v0 = vadd.f32 %v6188_v1, %v6022_v59  ;;  %11817 = vmatpush3.bf16.msra.mxu0 %v8188_v28  ;;  %11818 = vmatprep.mubr.msk.bf16.mxu0 %vm12281_vm3, %v15264_v5  ;;  %v15276_v11 = vmov 0  }
 0x52b   : > { %11264 = vmatprep.subr.msk.bf16.mxu0 %vm438_vm1, %v14160_v19  ;;  %v6190_v53 = vpop.f32.mrf.mxu0  ;;  %v6229_v12 = vpop.f32.mrf.mxu1 }
 0x52c   : > { %v6284_v3 = vadd.f32 %v6190_v53, %v6024_v62  ;;  %v6281_v55 = vadd.f32 %v6229_v12, %v6063_v47  ;;  %v6684_v47 = vsel %vm438_vm1, %v14098_v20, 0 }
 0x52d   : > { %v14435_v29 = vpop.f32.mrf.mxu0  ;;  %v6231_v63 = vpop.f32.mrf.mxu1  ;;  %11813 = vmatmul.mubr.msk.bf16.vlgmr.msra.gmra.mxu1 %vm434_vm2, %v12197_v40 }
 0x52e   : > { %v6282_v59 = vadd.f32 %v6231_v63, %v6065_v24  ;;  %8248 = vmatpush1.bf16.msra.mxu1 %v6503_v48  ;;  %8265 = vmatprep.mubr.bf16.mxu1 %v15276_v11  ;;  %v12199_v48 = vld [vmem:[%s15241_s3 + $0x78] sm:$0xff]  }
 0x52f   : > { %11262 = vmatprep.subr.msk.bf16.mxu1 %vm438_vm1, %v14110_v42  ;;  %v6233_v19 = vpop.f32.mrf.mxu1  ;;  %v6272_v1 = vpop.f32.mrf.mxu0 }
 0x530   : > { %v6286_v28 = vadd.f32 %v6233_v19, %v6067_v14  ;;  %v6283_v62 = vadd.f32 %v6272_v1, %v6106_v13  ;;  %v6678_v14 = vsel %vm438_vm1, %v14085_v25, 0  ;;  %v6858_v25 = vsel %vm438_vm1, %v14123_v52, 0 }
 0x531   : > { %v14445_v12 = vpop.f32.mrf.mxu1  ;;  %v11748_v40 = vpop.f32.mrf.mxu0  ;;  %11819 = vmatmul.mubr.msk.bf16.vlgmr.msra.gmra.mxu0 %vm434_vm2, %v12198_v56 }
 0x532   : > { %8403 = vmatpush1.bf16.msra.mxu0 %v6684_v47  ;;  %8420 = vmatprep.mubr.bf16.mxu0 %v15276_v11  ;;  %v8491_v40 = vpop.permute.xlu1 %8490 }
 0x533   : > { %11270 = vmatprep.subr.msk.bf16.mxu0 %vm438_vm1, %v14165_v30  ;;  %v6275_v24 = vpop.f32.mrf.mxu0  ;;  %v6364_v42 = vpop.f32.mrf.mxu1 }
 0x534   : > { %v6288_v53 = vadd.f32 %v6275_v24, %v6109_v21  ;;  %v6457_v63 = vadd.f32 %v6364_v42, %v6279_v31 }
 0x535   : > { %v11749_v13 = vpop.f32.mrf.mxu0  ;;  %v6366_v20 = vpop.f32.mrf.mxu1  ;;  %11257 = vmatmul.mubr.msk.bf16.vlgmr.msra.gmra.mxu1 %vm434_vm2, %v12198_v56 }
 0x536   : > { %v6458_v19 = vadd.f32 %v6366_v20, %v6280_v0  ;;  %8360 = vmatpush1.bf16.msra.mxu1 %v6678_v14  ;;  %8377 = vmatprep.mubr.bf16.mxu1 %v15276_v11  ;;  %v8338_v0 = vsel %vm2581_vm12, %v14155_v33, %v14317_v60  ;;  %v12200_v33 = vld [vmem:[%s15241_s3 + $0x80] sm:$0xff]   ;;  %v8492_v60 = vsel %vm3021_vm14, %v14170_v45, %v8491_v40 }
 0x537   : > { %v6368_v30 = vpop.f32.mrf.mxu1  ;;  %v6407_v1 = vpop.f32.mrf.mxu0  ;;  %11822 = vmatprep.subr.bf16.mxu1 %v15264_v5  ;;  %v8343_v14 = vsel %vm438_vm1, %v8338_v0, 0 }
 0x538   : > { %v6462_v21 = vadd.f32 %v6368_v30, %v6284_v3  ;;  %v6459_v31 = vadd.f32 %v6407_v1, %v6281_v55  ;;  %v8497_v1 = vsel %vm438_vm1, %v8492_v60, 0 }
 0x539   : > { %v14461_v47 = vpop.f32.mrf.mxu1  ;;  %v6409_v56 = vpop.f32.mrf.mxu0  ;;  %11265 = vmatmul.mubr.msk.bf16.vlgmr.msra.gmra.mxu0 %vm434_vm2, %v12199_v48 }
 0x53a   : > { %v6460_v24 = vadd.f32 %v6409_v56, %v6282_v59  ;;  %8514 = vmatpush1.bf16.msra.mxu0 %v6858_v25  ;;  %8531 = vmatprep.mubr.bf16.mxu0 %v15276_v11 }
 0x53b   : > { %v6411_v42 = vpop.f32.mrf.mxu0  ;;  %v6450_v3 = vpop.f32.mrf.mxu1  ;;  %11828 = vmatprep.subr.bf16.mxu0 %v15264_v5 }
 0x53c   : > { %v6464_v55 = vadd.f32 %v6411_v42, %v6286_v28  ;;  %v6461_v52 = vadd.f32 %v6450_v3, %v6283_v62 }
 0x53d   : > { %v14470_v13 = vpop.f32.mrf.mxu0  ;;  %v11754_v20 = vpop.f32.mrf.mxu1  ;;  %11263 = vmatmul.mubr.msk.bf16.vlgmr.msra.gmra.mxu1 %vm434_vm2, %v12199_v48 }
 0x53e   : > { %11823 = vmatpush3.bf16.msra.mxu1 %v8343_v14  ;;  %11824 = vmatprep.mubr.msk.bf16.mxu1 %vm12281_vm3, %v15264_v5 }
 0x53f   : > { %11272 = vmatprep.subr.msk.bf16.mxu1 %vm438_vm1, %v14176_v61  ;;  %v6453_v59 = vpop.f32.mrf.mxu1  ;;  %v6542_v28 = vpop.f32.mrf.mxu0 }
 0x540   : > { %v6466_v62 = vadd.f32 %v6453_v59, %v6288_v53  ;;  %v6635_v30 = vadd.f32 %v6542_v28, %v6457_v63  ;;  %v6864_v53 = vsel %vm438_vm1, %v14168_v23, 0  ;;  %v7044_v23 = vsel %vm438_vm1, %v14190_v44, 0  ;;  %v12201_v28 = vld [vmem:[%s15241_s3 + $0x88] sm:$0xff]  }
 0x541   : > { %v11755_v25 = vpop.f32.mrf.mxu1  ;;  %v6544_v56 = vpop.f32.mrf.mxu0  ;;  %11271 = vmatmul.mubr.msk.bf16.vlgmr.msra.gmra.mxu0 %vm434_vm2, %v12200_v33 }
 0x542   : > { %v6636_v0 = vadd.f32 %v6544_v56, %v6458_v19  ;;  %11829 = vmatpush3.bf16.msra.mxu0 %v8497_v1  ;;  %11830 = vmatprep.mubr.msk.bf16.mxu0 %vm12281_vm3, %v15264_v5 }
 0x543   : > { %11280 = vmatprep.subr.msk.bf16.mxu0 %vm438_vm1, %v14229_v9  ;;  %v6546_v45 = vpop.f32.mrf.mxu0  ;;  %v6585_v61 = vpop.f32.mrf.mxu1 }
 0x544   : > { %v6640_v40 = vadd.f32 %v6546_v45, %v6462_v21  ;;  %v6637_v42 = vadd.f32 %v6585_v61, %v6459_v31 }
 0x545   : > { %v14490_v63 = vpop.f32.mrf.mxu0  ;;  %v6587_v3 = vpop.f32.mrf.mxu1  ;;  %11825 = vmatmul.mubr.msk.bf16.vlgmr.msra.gmra.mxu1 %vm434_vm2, %v12199_v48 }
 0x546   : > { %v6638_v19 = vadd.f32 %v6587_v3, %v6460_v24  ;;  %8557 = vmatpush1.bf16.msra.mxu1 %v6864_v53  ;;  %8574 = vmatprep.mubr.bf16.mxu1 %v15276_v11 }
 0x547   : > { %11278 = vmatprep.subr.msk.bf16.mxu1 %vm438_vm1, %v14186_v26  ;;  %v6589_v9 = vpop.f32.mrf.mxu1  ;;  %v6628_v14 = vpop.f32.mrf.mxu0 }
 0x548   : > { %v6642_v20 = vadd.f32 %v6589_v9, %v6464_v55  ;;  %v14496_v21 = vadd.f32 %v6628_v14, %v6461_v52  ;;  %v7038_v52 = vsel %vm438_vm1, %v14203_v32, 0  ;;  %v7219_v32 = vsel %vm438_vm1, %v14213_v57, 0 }
 0x549   : > { %v14500_v31 = vpop.f32.mrf.mxu1  ;;  %v11760_v60 = vpop.f32.mrf.mxu0  ;;  %11831 = vmatmul.mubr.msk.bf16.vlgmr.msra.gmra.mxu0 %vm434_vm2, %v12200_v33 }
 0x54a   : > { %8711 = vmatpush1.bf16.msra.mxu0 %v7044_v23  ;;  %8728 = vmatprep.mubr.bf16.mxu0 %v15276_v11  ;;  %v7406_v23 = vsel %vm438_vm1, %v14262_v10, 0  ;;  %v9877_v10 = vld [vmem:[%s15242_s4] sm:$0xff] }
 0x54b   : > { %11286 = vmatprep.subr.msk.bf16.mxu0 %vm438_vm1, %v14235_v16  ;;  %v6631_v26 = vpop.f32.mrf.mxu0  ;;  %v6723_v48 = vpop.f32.mrf.mxu1  ;;  %9881 = vperm.xlu1 %11995, %v9877_v10  }
 0x54c   : > { %v14506_v24 = vadd.f32 %v6631_v26, %v6466_v62  ;;  %v6816_v55 = vadd.f32 %v6723_v48, %v6635_v30 }
 0x54d   : > { %v11761_v44 = vpop.f32.mrf.mxu0  ;;  %v6725_v59 = vpop.f32.mrf.mxu1  ;;  %11273 = vmatmul.mubr.msk.bf16.vlgmr.msra.gmra.mxu1 %vm434_vm2, %v12200_v33  ;;  %v8646_v33 = vsel %vm3461_vm8, %v14224_v4, %v14325_v58  ;;  %v12202_v4 = vld [vmem:[%s15241_s3 + $0x90] sm:$0xff]  }
 0x54e   : > { %v6817_v1 = vadd.f32 %v6725_v59, %v6636_v0  ;;  %8668 = vmatpush1.bf16.msra.mxu1 %v7038_v52  ;;  %8685 = vmatprep.mubr.bf16.mxu1 %v15276_v11  ;;  %v8651_v57 = vsel %vm438_vm1, %v8646_v33, 0 }
 0x54f   : > { %v6727_v16 = vpop.f32.mrf.mxu1  ;;  %v6766_v25 = vpop.f32.mrf.mxu0  ;;  %11834 = vmatprep.subr.bf16.mxu1 %v15264_v5 }
 0x550   : > { %v6821_v62 = vadd.f32 %v6727_v16, %v6640_v40  ;;  %v14516_v30 = vadd.f32 %v6766_v25, %v6637_v42  ;;  %v8799_v40 = vpop.permute.xlu1 %8798  ;;  %v15280_v25 = vld [vmem:[#allocation7_spill] sm:$0xff] }
 0x551   : > { %v6768_v56 = vpop.f32.mrf.mxu0  ;;  %11281 = vmatmul.mubr.msk.bf16.vlgmr.msra.gmra.mxu0 %vm434_vm2, %v12201_v28  ;;  %v8800_v58 = vsel %vm7206_vm7, %v14242_v37, %v8799_v40  ;;  %v14638_v26 = vpop.f32.mrf.mxu1 }
 0x552   : > { %v14524_v0 = vadd.f32 %v6768_v56, %v6638_v19  ;;  %8822 = vmatpush1.bf16.msra.mxu0 %v7219_v32  ;;  %8839 = vmatprep.mubr.bf16.mxu0 %v15276_v11  ;;  %v8805_v19 = vsel %vm438_vm1, %v8800_v58, 0  ;;  %v15281_v58 = vld [vmem:[#allocation3_spill] sm:$0xff] }
 0x553   : > { %v6770_v45 = vpop.f32.mrf.mxu0  ;;  %11840 = vmatprep.subr.bf16.mxu0 %v15264_v5 }
 0x554   : > { %v14528_v61 = vadd.f32 %v6770_v45, %v6642_v20 }
 0x555   : > { %v14531_v42 = vpop.f32.mrf.mxu0  ;;  %11279 = vmatmul.mubr.msk.bf16.vlgmr.msra.gmra.mxu1 %vm434_vm2, %v12201_v28 }
 0x556   : > { %11835 = vmatpush3.bf16.msra.mxu1 %v8651_v57  ;;  %11836 = vmatprep.mubr.msk.bf16.mxu1 %vm12281_vm3, %v15264_v5  ;;  %v12207_v57 = vld [vmem:[%s15241_s3 + $0xb8] sm:$0xff]  }
 0x557   : > { %11288 = vmatprep.subr.msk.bf16.mxu1 %vm438_vm1, %v14248_v51  ;;  %v6903_v53 = vpop.f32.mrf.mxu0  ;;  %v7225_v51 = vsel %vm438_vm1, %v14238_v15, 0  ;;  %v7400_v15 = vsel %vm438_vm1, %v14277_v39, 0  ;;  %v12204_v39 = vld [vmem:[%s15241_s3 + $0xa0] sm:$0xff]  }
 0x558   : > { %v14543_v3 = vadd.f32 %v6903_v53, %v6816_v55  ;;  %v15278_v55 = vld [vmem:[#allocation6_spill] sm:$0xff] }
 0x559   : > { %v6905_v9 = vpop.f32.mrf.mxu0  ;;  %11287 = vmatmul.mubr.msk.bf16.vlgmr.msra.gmra.mxu0 %vm434_vm2, %v12202_v4  ;;  %v7871_v52 = vsel %vm438_vm1, %v15278_v55, 0  ;;  %v8185_v55 = vsel %vm438_vm1, %v14422_v50, 0 }
 0x55a   : > { %v14547_v14 = vadd.f32 %v6905_v9, %v6817_v1  ;;  %11841 = vmatpush3.bf16.msra.mxu0 %v8805_v19  ;;  %11842 = vmatprep.mubr.msk.bf16.mxu0 %vm12281_vm3, %v15264_v5 }
 0x55b   : > { %11296 = vmatprep.subr.msk.bf16.mxu0 %vm438_vm1, %v14286_v38  ;;  %v6907_v37 = vpop.f32.mrf.mxu0  ;;  %v9110_v38 = vsel %vm438_vm1, %v13975_v18, 0  ;;  %v15277_v18 = vld [vmem:[#allocation5_spill] sm:$0xff] }
 0x55c   : > { %v14553_v20 = vadd.f32 %v6907_v37, %v6821_v62  ;;  %v8028_v62 = vsel %vm438_vm1, %v15280_v25, 0 }
 0x55d   : > { %11837 = vmatmul.mubr.msk.bf16.vlgmr.msra.gmra.mxu1 %vm434_vm2, %v12201_v28  ;;  %v14646_v59 = vpop.f32.mrf.mxu0 }
 0x55e   : > { %8865 = vmatpush1.bf16.msra.mxu1 %v7225_v51  ;;  %8882 = vmatprep.mubr.bf16.mxu1 %v15276_v11 }
 0x55f   : > { %11294 = vmatprep.subr.msk.bf16.mxu1 %vm438_vm1, %v14258_v35  ;;  %v12203_v35 = vld [vmem:[%s15241_s3 + $0x98] sm:$0xff]  }
 0x561   : > { %11843 = vmatmul.mubr.msk.bf16.vlgmr.msra.gmra.mxu0 %vm434_vm2, %v12202_v4 }
 0x562   : > { %9019 = vmatpush1.bf16.msra.mxu0 %v7406_v23  ;;  %9036 = vmatprep.mubr.bf16.mxu0 %v15276_v11 }
 0x563   : > { %11302 = vmatprep.subr.msk.bf16.mxu0 %vm438_vm1, %v13803_v36  ;;  %v8959_v36 = vsel %vm438_vm1, %v14334_v17, 0 }
 0x565   : > { %11289 = vmatmul.mubr.msk.bf16.vlgmr.msra.gmra.mxu1 %vm434_vm2, %v12202_v4 }
 0x566   : > { %8976 = vmatpush1.bf16.msra.mxu1 %v7400_v15  ;;  %8993 = vmatprep.mubr.bf16.mxu1 %v15276_v11 }
 0x567   : > { %11846 = vmatprep.subr.bf16.mxu1 %v15264_v5 }
 0x569   : > { %11297 = vmatmul.mubr.msk.bf16.vlgmr.msra.gmra.mxu0 %vm434_vm2, %v12203_v35 }
 0x56a   : > { %9127 = vmatpush1.bf16.msra.mxu0 %v13938_v46  ;;  %9144 = vmatprep.mubr.bf16.mxu0 %v15276_v11  ;;  %v9258_v46 = vpop.permute.xlu1 %9257 }
 0x56b   : > { %11852 = vmatprep.subr.bf16.mxu0 %v15264_v5  ;;  %v9259_v17 = vsel %vm826_vm4, %v14288_v2, %v9258_v46 }
 0x56d   : > { %11295 = vmatmul.mubr.msk.bf16.vlgmr.msra.gmra.mxu1 %vm434_vm2, %v12203_v35 }
 0x56e   : > { %11847 = vmatpush3.bf16.msra.mxu1 %v8959_v36  ;;  %11848 = vmatprep.mubr.msk.bf16.mxu1 %vm12281_vm3, %v15264_v5 }
 0x56f   : > { %11304 = vmatprep.subr.msk.bf16.mxu1 %vm438_vm1, %v13919_v41  ;;  %v7714_v41 = vsel %vm438_vm1, %v14311_v8, 0 }
 0x571   : > { %11303 = vmatmul.mubr.msk.bf16.vlgmr.msra.gmra.mxu0 %vm434_vm2, %v12204_v39 }
 0x572   : > { %11853 = vmatpush3.bf16.msra.mxu0 %v9110_v38  ;;  %11854 = vmatprep.mubr.msk.bf16.mxu0 %vm12281_vm3, %v15264_v5 }
 0x573   : > { %11312 = vmatprep.subr.msk.bf16.mxu0 %vm438_vm1, %v9259_v17 }
 0x575   : > { %11849 = vmatmul.mubr.msk.bf16.vlgmr.msra.gmra.mxu1 %vm434_vm2, %v12203_v35 }
 0x576   : > { %9170 = vmatpush1.bf16.msra.mxu1 %v13954_v22  ;;  %9187 = vmatprep.mubr.bf16.mxu1 %v15276_v11  ;;  %v12205_v22 = vld [vmem:[%s15241_s3 + $0xa8] sm:$0xff]  }
 0x577   : > { %11310 = vmatprep.subr.msk.bf16.mxu1 %vm438_vm1, %v13897_v49  ;;  %v9415_v49 = vpop.permute.xlu0 %9414 }
 0x578   : > { %v9416_v2 = vsel %vm1260_vm6, %v15277_v18, %v9415_v49  ;;  %v9424_v8 = vsel %vm438_vm1, %v9415_v49, 0  ;;  %vm10868_vm6 = vcmask 1024  }
 0x579   : > { %11855 = vmatmul.mubr.msk.bf16.vlgmr.msra.gmra.mxu0 %vm434_vm2, %v12204_v39 }
 0x57a   : > { %9327 = vmatpush1.bf16.msra.mxu0 %v7714_v41  ;;  %9344 = vmatprep.mubr.bf16.mxu0 %v15276_v11 }
 0x57b   : > { %11318 = vmatprep.subr.msk.bf16.mxu0 %vm438_vm1, %v13967_v27  ;;  %v9267_v27 = vsel %vm438_vm1, %v9258_v46, 0  ;;  %v9729_v51 = vpop.permute.xlu0 %9728 }
 0x57c   : > { %v9730_v38 = vsel %vm6485_vm5, %v14407_v34, %v9729_v51 }
 0x57d   : > { %11305 = vmatmul.mubr.msk.bf16.vlgmr.msra.gmra.mxu1 %vm434_vm2, %v12204_v39 }
 0x57e   : > { %9284 = vmatpush1.bf16.msra.mxu1 %v13901_v6  ;;  %9301 = vmatprep.mubr.bf16.mxu1 %v15276_v11  ;;  %v12206_v6 = vld [vmem:[%s15241_s3 + $0xb0] sm:$0xff]  }
 0x57f   : > { %11858 = vmatprep.subr.bf16.mxu1 %v15264_v5 }
 0x581   : > { %11313 = vmatmul.mubr.msk.bf16.vlgmr.msra.gmra.mxu0 %vm434_vm2, %v12205_v22 }
 0x582   : > { %9441 = vmatpush1.bf16.msra.mxu0 %v13988_v43  ;;  %9458 = vmatprep.mubr.bf16.mxu0 %v15276_v11  ;;  %v9572_v43 = vpop.permute.xlu1 %9571 }
 0x583   : > { %11864 = vmatprep.subr.bf16.mxu0 %v15264_v5  ;;  %v9573_v60 = vsel %vm6307_vm0, %v14301_v54, %v9572_v43  ;;  %v15279_v54 = vld [vmem:[#allocation2_spill] sm:$0xff] }
 0x585   : > { %11311 = vmatmul.mubr.msk.bf16.vlgmr.msra.gmra.mxu1 %vm434_vm2, %v12205_v22 }
 0x586   : > { %11859 = vmatpush3.bf16.msra.mxu1 %v9267_v27  ;;  %11860 = vmatprep.mubr.msk.bf16.mxu1 %vm12281_vm3, %v15264_v5 }
 0x587   : > { %11320 = vmatprep.subr.msk.bf16.mxu1 %vm438_vm1, %v9416_v2 }
 0x589   : > { %11319 = vmatmul.mubr.msk.bf16.vlgmr.msra.gmra.mxu0 %vm434_vm2, %v12206_v6 }
 0x58a   : > { %11865 = vmatpush3.bf16.msra.mxu0 %v9424_v8  ;;  %11866 = vmatprep.mubr.msk.bf16.mxu0 %vm12281_vm3, %v15264_v5 }
 0x58b   : > { %11328 = vmatprep.subr.msk.bf16.mxu0 %vm438_vm1, %v9573_v60 }
 0x58d   : > { %v6809_v48 = vpop.f32.mrf.mxu1  ;;  %11861 = vmatmul.mubr.msk.bf16.vlgmr.msra.gmra.mxu1 %vm434_vm2, %v12205_v22 }
 0x58e   : > { %v6820_v44 = vadd.f32 %v6809_v48, %v14496_v21  ;;  %9484 = vmatpush1.bf16.msra.mxu1 %v7871_v52  ;;  %9501 = vmatprep.mubr.bf16.mxu1 %v15276_v11 }
 0x58f   : > { %11326 = vmatprep.subr.msk.bf16.mxu1 %vm438_vm1, %v15279_v54  ;;  %v11766_v28 = vpop.f32.mrf.mxu1 }
 0x591   : > { %v6812_v1 = vpop.f32.mrf.mxu1  ;;  %v6989_v16 = vpop.f32.mrf.mxu0  ;;  %11867 = vmatmul.mubr.msk.bf16.vlgmr.msra.gmra.mxu0 %vm434_vm2, %v12206_v6 }
 0x592   : > { %v6825_v32 = vadd.f32 %v6812_v1, %v14506_v24  ;;  %v7000_v56 = vadd.f32 %v6989_v16, %v6820_v44  ;;  %9641 = vmatpush1.bf16.msra.mxu0 %v8028_v62  ;;  %9658 = vmatprep.mubr.bf16.mxu0 %v15276_v11 }
 0x593   : > { %11334 = vmatprep.subr.msk.bf16.mxu0 %vm438_vm1, %v14053_v7  ;;  %v11767_v21 = vpop.f32.mrf.mxu1  ;;  %v11772_v33 = vpop.f32.mrf.mxu0 }
 0x595   : > { %v6946_v45 = vpop.f32.mrf.mxu1  ;;  %v6992_v40 = vpop.f32.mrf.mxu0  ;;  %11321 = vmatmul.mubr.msk.bf16.vlgmr.msra.gmra.mxu1 %vm434_vm2, %v12206_v6  ;;  %v9738_v6 = vsel %vm438_vm1, %v9729_v51, 0 }
 0x596   : > { %v6998_v4 = vadd.f32 %v6946_v45, %v14516_v30  ;;  %v7005_v24 = vadd.f32 %v6992_v40, %v6825_v32  ;;  %9598 = vmatpush1.bf16.msra.mxu1 %v15281_v58  ;;  %9615 = vmatprep.mubr.bf16.mxu1 %v15276_v11  ;;  %v15282_v30 = vld [vmem:[#allocation4_spill] sm:$0xff] }
 0x597   : > { %v6948_v53 = vpop.f32.mrf.mxu1  ;;  %v11773_v19 = vpop.f32.mrf.mxu0  ;;  %11870 = vmatprep.subr.bf16.mxu1 %v15264_v5 }
 0x598   : > { %v6999_v7 = vadd.f32 %v6948_v53, %v14524_v0  ;;  %v9581_v0 = vsel %vm438_vm1, %v9572_v43, 0 }
 0x599   : > { %v6950_v9 = vpop.f32.mrf.mxu1  ;;  %v7126_v37 = vpop.f32.mrf.mxu0  ;;  %11329 = vmatmul.mubr.msk.bf16.vlgmr.msra.gmra.mxu0 %vm434_vm2, %v12207_v57 }
 0x59a   : > { %v7003_v23 = vadd.f32 %v6950_v9, %v14528_v61  ;;  %v7178_v15 = vadd.f32 %v7126_v37, %v6998_v4  ;;  %9755 = vmatpush1.bf16.msra.mxu0 %v15282_v30  ;;  %9772 = vmatprep.mubr.bf16.mxu0 %v15276_v11  ;;  %v12208_v61 = vld [vmem:[%s15241_s3 + $0xc0] sm:$0xff]  }
 0x59b   : > { %v14670_v35 = vpop.f32.mrf.mxu1  ;;  %v7128_v10 = vpop.f32.mrf.mxu0  ;;  %11876 = vmatprep.subr.bf16.mxu0 %v15264_v5 }
 0x59c   : > { %v7179_v36 = vadd.f32 %v7128_v10, %v6999_v7 }
 0x59d   : > { %v7083_v39 = vpop.f32.mrf.mxu1  ;;  %v7130_v46 = vpop.f32.mrf.mxu0  ;;  %11327 = vmatmul.mubr.msk.bf16.vlgmr.msra.gmra.mxu1 %vm434_vm2, %v12207_v57 }
 0x59e   : > { %v7176_v17 = vadd.f32 %v7083_v39, %v14543_v3  ;;  %v7183_v41 = vadd.f32 %v7130_v46, %v7003_v23  ;;  %11871 = vmatpush3.bf16.msra.mxu1 %v9581_v0  ;;  %11872 = vmatprep.mubr.msk.bf16.mxu1 %vm12281_vm3, %v15264_v5 }
 0x59f   : > { %11336 = vmatprep.subr.msk.bf16.mxu1 %vm438_vm1, %v9730_v38  ;;  %v7085_v22 = vpop.f32.mrf.mxu1  ;;  %v14684_v49 = vpop.f32.mrf.mxu0 }
 0x5a0   : > { %v7177_v27 = vadd.f32 %v7085_v22, %v14547_v14 }
 0x5a1   : > { %v7087_v18 = vpop.f32.mrf.mxu1  ;;  %v7264_v2 = vpop.f32.mrf.mxu0  ;;  %11335 = vmatmul.mubr.msk.bf16.vlgmr.msra.gmra.mxu0 %vm434_vm2, %v12208_v61 }
 0x5a2   : > { %v7181_v34 = vadd.f32 %v7087_v18, %v14553_v20  ;;  %v7357_v3 = vadd.f32 %v7264_v2, %v7176_v17  ;;  %11877 = vmatpush3.bf16.msra.mxu0 %v9738_v6  ;;  %11878 = vmatprep.mubr.msk.bf16.mxu0 %vm12281_vm3, %v15264_v5 }
 0x5a3   : > { %v14692_v43 = vpop.f32.mrf.mxu1  ;;  %v7266_v8 = vpop.f32.mrf.mxu0  ;;  %10520 = vmatprep.subr.bf16.mxu0 %v15276_v11 }
 0x5a4   : > { %v7358_v60 = vadd.f32 %v7266_v8, %v7177_v27 }
 0x5a5   : > { %v7169_v14 = vpop.f32.mrf.mxu1  ;;  %v7268_v48 = vpop.f32.mrf.mxu0  ;;  %11873 = vmatmul.mubr.msk.bf16.vlgmr.msra.gmra.mxu1 %vm434_vm2, %v12207_v57 }
 0x5a6   : > { %v7180_v52 = vadd.f32 %v7169_v14, %v7000_v56  ;;  %v7362_v20 = vadd.f32 %v7268_v48, %v7181_v34  ;;  %9798 = vmatpush1.bf16.msra.mxu1 %v8185_v55  ;;  %9815 = vmatprep.mubr.bf16.mxu1 %v15276_v11 }
 0x5a7   : > { %v11778_v44 = vpop.f32.mrf.mxu1  ;;  %v14699_v54 = vpop.f32.mrf.mxu0 }
 0x5a9   : > { %v7172_v28 = vpop.f32.mrf.mxu1  ;;  %v7350_v1 = vpop.f32.mrf.mxu0  ;;  %11879 = vmatmul.mubr.msk.bf16.vlgmr.msra.gmra.mxu0 %vm434_vm2, %v12208_v61 }
 0x5aa   : > { %v7185_v16 = vadd.f32 %v7172_v28, %v7005_v24  ;;  %v7361_v25 = vadd.f32 %v7350_v1, %v7180_v52 }
 0x5ab   : > { %v11779_v62 = vpop.f32.mrf.mxu1  ;;  %v11784_v32 = vpop.f32.mrf.mxu0 }
 0x5ad   : > { %v7307_v21 = vpop.f32.mrf.mxu1  ;;  %v7353_v33 = vpop.f32.mrf.mxu0  ;;  %11337 = vmatmul.mubr.msk.bf16.vlgmr.msra.gmra.mxu1 %vm434_vm2, %v12208_v61  ;;  %vm10399_vm2 = vcmask 130048  }
 0x5ae   : > { %v7359_v50 = vadd.f32 %v7307_v21, %v7178_v15  ;;  %v7366_v56 = vadd.f32 %v7353_v33, %v7185_v16 }
 0x5af   : > { %v7309_v45 = vpop.f32.mrf.mxu1  ;;  %v11785_v40 = vpop.f32.mrf.mxu0 }
 0x5b0   : > { %v7360_v57 = vadd.f32 %v7309_v45, %v7179_v36 }
 0x5b1   : > { %v7311_v4 = vpop.f32.mrf.mxu1  ;;  %v7488_v58 = vpop.f32.mrf.mxu0 }
 0x5b2   : > { %v7364_v53 = vadd.f32 %v7311_v4, %v7183_v41  ;;  %v7540_v19 = vadd.f32 %v7488_v58, %v7359_v50 }
 0x5b3   : > { %v14703_v7 = vpop.f32.mrf.mxu1  ;;  %v7490_v9 = vpop.f32.mrf.mxu0 }
 0x5b4   : > { %v7541_v24 = vadd.f32 %v7490_v9, %v7360_v57 }
 0x5b5   : > { %v7445_v37 = vpop.f32.mrf.mxu1  ;;  %v7492_v51 = vpop.f32.mrf.mxu0 }
 0x5b6   : > { %v7538_v23 = vadd.f32 %v7445_v37, %v7357_v3  ;;  %v7545_v30 = vadd.f32 %v7492_v51, %v7364_v53 }
 0x5b7   : > { %v7447_v10 = vpop.f32.mrf.mxu1  ;;  %v14705_v0 = vpop.f32.mrf.mxu0 }
 0x5b8   : > { %v7539_v15 = vadd.f32 %v7447_v10, %v7358_v60 }
 0x5b9   : > { %v7449_v39 = vpop.f32.mrf.mxu1  ;;  %v7596_v46 = vpop.f32.mrf.mxu0 }
 0x5ba   : > { %v7543_v61 = vadd.f32 %v7449_v39, %v7362_v20  ;;  %v7689_v36 = vadd.f32 %v7596_v46, %v7538_v23 }
 0x5bb   : > { %v14707_v38 = vpop.f32.mrf.mxu1  ;;  %v7598_v17 = vpop.f32.mrf.mxu0 }
 0x5bc   : > { %v7690_v41 = vadd.f32 %v7598_v17, %v7539_v15 }
 0x5bd   : > { %v7531_v22 = vpop.f32.mrf.mxu1  ;;  %v7600_v27 = vpop.f32.mrf.mxu0 }
 0x5be   : > { %v7542_v6 = vadd.f32 %v7531_v22, %v7361_v25  ;;  %v7694_v18 = vadd.f32 %v7600_v27, %v7543_v61 }
 0x5bf   : > { %v11790_v2 = vpop.f32.mrf.mxu1  ;;  %v14709_v34 = vpop.f32.mrf.mxu0 }
 0x5c0   : > { %v15283_v2 = vld [vmem:[#allocation9_spill] sm:$0xff] }
 0x5c1   : > { %v7534_v3 = vpop.f32.mrf.mxu1  ;;  %v7682_v8 = vpop.f32.mrf.mxu0 }
 0x5c2   : > { %v7547_v14 = vadd.f32 %v7534_v3, %v7366_v56  ;;  %v7693_v48 = vadd.f32 %v7682_v8, %v7542_v6  ;;  %v15284_v3 = vld [vmem:[#allocation11_spill] sm:$0xff] }
 0x5c3   : > { %v11791_v60 = vpop.f32.mrf.mxu1  ;;  %v11796_v55 = vpop.f32.mrf.mxu0 }
 0x5c5   : > { %v7639_v52 = vpop.f32.mrf.mxu1  ;;  %v7685_v20 = vpop.f32.mrf.mxu0 }
 0x5c6   : > { %v7691_v44 = vadd.f32 %v7639_v52, %v7540_v19  ;;  %v7698_v28 = vadd.f32 %v7685_v20, %v7547_v14 }
 0x5c7   : > { %v7641_v1 = vpop.f32.mrf.mxu1  ;;  %v11797_v16 = vpop.f32.mrf.mxu0 }
 0x5c8   : > { %v7692_v62 = vadd.f32 %v7641_v1, %v7541_v24 }
 0x5c9   : > { %v7643_v32 = vpop.f32.mrf.mxu1  ;;  %v7796_v21 = vpop.f32.mrf.mxu0 }
 0x5ca   : > { %v7696_v25 = vadd.f32 %v7643_v32, %v7545_v30  ;;  %v7848_v33 = vadd.f32 %v7796_v21, %v7691_v44 }
 0x5cb   : > { %v14711_v50 = vpop.f32.mrf.mxu1  ;;  %v7798_v45 = vpop.f32.mrf.mxu0 }
 0x5cc   : > { %v7849_v40 = vadd.f32 %v7798_v45, %v7692_v62  ;;  %v15286_v45 = vld [vmem:[#allocation10_spill] sm:$0xff] }
 0x5cd   : > { %v7753_v57 = vpop.f32.mrf.mxu1  ;;  %v7800_v56 = vpop.f32.mrf.mxu0 }
 0x5ce   : > { %v7846_v4 = vadd.f32 %v7753_v57, %v7689_v36  ;;  %v7853_v58 = vadd.f32 %v7800_v56, %v7696_v25  ;;  %v15285_v25 = vld [vmem:[#allocation8_spill] sm:$0xff] }
 0x5cf   : > { %v7755_v53 = vpop.f32.mrf.mxu1  ;;  %v14713_v9 = vpop.f32.mrf.mxu0  ;;  %v6026_v57 = vadd.f32 %v15286_v45, %v15285_v25 }
 0x5d0   : > { %v7847_v19 = vadd.f32 %v7755_v53, %v7690_v41  ;;  %v6069_v41 = vadd.f32 %v15284_v3, %v15283_v2 }
 0x5d1   : > { %v7757_v37 = vpop.f32.mrf.mxu1  ;;  %v7910_v51 = vpop.f32.mrf.mxu0 }
 0x5d2   : > { %v7851_v23 = vadd.f32 %v7757_v37, %v7694_v18  ;;  %v8003_v24 = vadd.f32 %v7910_v51, %v7846_v4  ;;  %v6287_v20 = vadd.f32 %v14445_v12, %v6069_v41  ;;  %v6285_v12 = vadd.f32 %v14435_v29, %v6026_v57 }
 0x5d3   : > { %v14715_v10 = vpop.f32.mrf.mxu1  ;;  %v7912_v30 = vpop.f32.mrf.mxu0 }
 0x5d4   : > { %v8004_v15 = vadd.f32 %v7912_v30, %v7847_v19  ;;  %v6465_v56 = vadd.f32 %v14470_v13, %v6287_v20  ;;  %v6463_v13 = vadd.f32 %v14461_v47, %v6285_v12 }
 0x5d5   : > { %v7839_v39 = vpop.f32.mrf.mxu1  ;;  %v7914_v46 = vpop.f32.mrf.mxu0 }
 0x5d6   : > { %v7850_v61 = vadd.f32 %v7839_v39, %v7693_v48  ;;  %v8008_v17 = vadd.f32 %v7914_v46, %v7851_v23 }
 0x5d7   : > { %v11802_v22 = vpop.f32.mrf.mxu1  ;;  %v14717_v27 = vpop.f32.mrf.mxu0 }
 0x5d9   : > { %v7842_v36 = vpop.f32.mrf.mxu1  ;;  %v7996_v6 = vpop.f32.mrf.mxu0 }
 0x5da   : > { %v7855_v8 = vadd.f32 %v7842_v36, %v7698_v28  ;;  %v8007_v14 = vadd.f32 %v7996_v6, %v7850_v61 }
 0x5db   : > { %v11803_v18 = vpop.f32.mrf.mxu1  ;;  %v11808_v60 = vpop.f32.mrf.mxu0 }
 0x5dd   : > { %v7953_v55 = vpop.f32.mrf.mxu1  ;;  %v7999_v52 = vpop.f32.mrf.mxu0 }
 0x5de   : > { %v8005_v44 = vadd.f32 %v7953_v55, %v7848_v33  ;;  %v8012_v1 = vadd.f32 %v7999_v52, %v7855_v8  ;;  %v6643_v33 = vadd.f32 %v14500_v31, %v6465_v56 }
 0x5df   : > { %v7955_v48 = vpop.f32.mrf.mxu1  ;;  %v11809_v16 = vpop.f32.mrf.mxu0 }
 0x5e0   : > { %v8006_v62 = vadd.f32 %v7955_v48, %v7849_v40 }
 0x5e1   : > { %v7957_v32 = vpop.f32.mrf.mxu1  ;;  %v8110_v21 = vpop.f32.mrf.mxu0 }
 0x5e2   : > { %v8010_v28 = vadd.f32 %v7957_v32, %v7853_v58  ;;  %v8162_v4 = vadd.f32 %v8110_v21, %v8005_v44  ;;  %v6824_v58 = vadd.f32 %v14531_v42, %v6643_v33 }
 0x5e3   : > { %v7959_v53 = vpop.f32.mrf.mxu1  ;;  %v8112_v19 = vpop.f32.mrf.mxu0 }
 0x5e4   : > { %v8163_v37 = vadd.f32 %v8112_v19, %v8006_v62  ;;  %v7004_v8 = vadd.f32 %v14670_v35, %v6824_v58 }
 0x5e5   : > { %v8067_v51 = vpop.f32.mrf.mxu1  ;;  %v8114_v23 = vpop.f32.mrf.mxu0 }
 0x5e6   : > { %v8160_v30 = vadd.f32 %v8067_v51, %v8003_v24  ;;  %v8167_v40 = vadd.f32 %v8114_v23, %v8010_v28  ;;  %v6641_v24 = vadd.f32 %v14490_v63, %v6463_v13  ;;  %v7184_v60 = vadd.f32 %v14684_v49, %v7004_v8 }
 0x5e7   : > { %v8069_v39 = vpop.f32.mrf.mxu1  ;;  %v8116_v46 = vpop.f32.mrf.mxu0 }
 0x5e8   : > { %v8161_v61 = vadd.f32 %v8069_v39, %v8004_v15  ;;  %v6822_v47 = vadd.f32 %v14638_v26, %v6641_v24  ;;  %v7365_v42 = vadd.f32 %v14703_v7, %v7184_v60 }
 0x5e9   : > { %v8071_v22 = vpop.f32.mrf.mxu1  ;;  %v8224_v36 = vpop.f32.mrf.mxu0 }
 0x5ea   : > { %v8165_v6 = vadd.f32 %v8071_v22, %v8008_v17  ;;  %v8317_v2 = vadd.f32 %v8224_v36, %v8160_v30  ;;  %v7002_v48 = vadd.f32 %v14646_v59, %v6822_v47  ;;  %v7546_v35 = vadd.f32 %v14705_v0, %v7365_v42 }
 0x5eb   : > { %v8073_v3 = vpop.f32.mrf.mxu1  ;;  %v8226_v41 = vpop.f32.mrf.mxu0 }
 0x5ec   : > { %v8318_v29 = vadd.f32 %v8226_v41, %v8161_v61  ;;  %v7182_v49 = vadd.f32 %v14692_v43, %v7002_v48 }
 0x5ed   : > { %v8153_v18 = vpop.f32.mrf.mxu1  ;;  %v8228_v31 = vpop.f32.mrf.mxu0 }
 0x5ee   : > { %v8164_v15 = vadd.f32 %v8153_v18, %v8007_v14  ;;  %v8322_v55 = vadd.f32 %v8228_v31, %v8165_v6  ;;  %v7697_v14 = vadd.f32 %v14711_v50, %v7546_v35  ;;  %v7363_v26 = vadd.f32 %v14699_v54, %v7182_v49 }
 0x5ef   : > { %v11814_v52 = vpop.f32.mrf.mxu1  ;;  %v8230_v20 = vpop.f32.mrf.mxu0 }
 0x5f0   : > { %v7854_v7 = vadd.f32 %v14713_v9, %v7697_v14  ;;  %v7544_v0 = vadd.f32 %v14707_v38, %v7363_v26 }
 0x5f1   : > { %v8156_v17 = vpop.f32.mrf.mxu1  ;;  %v8310_v44 = vpop.f32.mrf.mxu0 }
 0x5f2   : > { %v8169_v16 = vadd.f32 %v8156_v17, %v8012_v1  ;;  %v8321_v62 = vadd.f32 %v8310_v44, %v8164_v15  ;;  %v8011_v1 = vadd.f32 %v7959_v53, %v7854_v7  ;;  %v7695_v43 = vadd.f32 %v14709_v34, %v7544_v0 }
 0x5f3   : > { %v11815_v32 = vpop.f32.mrf.mxu1  ;;  %v11820_v63 = vpop.f32.mrf.mxu0 }
 0x5f4   : > { %v8168_v23 = vadd.f32 %v8116_v46, %v8011_v1  ;;  %v7852_v54 = vadd.f32 %v14715_v10, %v7695_v43 }
 0x5f5   : > { %v8267_v21 = vpop.f32.mrf.mxu1  ;;  %v8313_v25 = vpop.f32.mrf.mxu0 }
 0x5f6   : > { %v8319_v45 = vadd.f32 %v8267_v21, %v8162_v4  ;;  %v8326_v57 = vadd.f32 %v8313_v25, %v8169_v16  ;;  %v8009_v22 = vadd.f32 %v14717_v27, %v7852_v54 }
 0x5f7   : > { %v8269_v56 = vpop.f32.mrf.mxu1  ;;  %v11821_v59 = vpop.f32.mrf.mxu0 }
 0x5f8   : > { %v8320_v28 = vadd.f32 %v8269_v56, %v8163_v37  ;;  %v8166_v13 = vadd.f32 %v8073_v3, %v8009_v22 }
 0x5f9   : > { %v8271_v19 = vpop.f32.mrf.mxu1  ;;  %v8422_v51 = vpop.f32.mrf.mxu0 }
 0x5fa   : > { %v8324_v50 = vadd.f32 %v8271_v19, %v8167_v40  ;;  %v8474_v12 = vadd.f32 %v8422_v51, %v8319_v45  ;;  %v8323_v6 = vadd.f32 %v8230_v20, %v8166_v13 }
 0x5fb   : > { %v8273_v33 = vpop.f32.mrf.mxu1  ;;  %v8424_v30 = vpop.f32.mrf.mxu0 }
 0x5fc   : > { %v8325_v9 = vadd.f32 %v8273_v33, %v8168_v23  ;;  %v8475_v4 = vadd.f32 %v8424_v30, %v8320_v28 }
 0x5fd   : > { %v8379_v39 = vpop.f32.mrf.mxu1  ;;  %v8426_v61 = vpop.f32.mrf.mxu0 }
 0x5fe   : > { %v8472_v38 = vadd.f32 %v8379_v39, %v8317_v2  ;;  %v8479_v53 = vadd.f32 %v8426_v61, %v8324_v50 }
 0x5ff   : > { %v8381_v37 = vpop.f32.mrf.mxu1  ;;  %v8428_v36 = vpop.f32.mrf.mxu0 }
 0x600   : > { %v8473_v58 = vadd.f32 %v8381_v37, %v8318_v29  ;;  %v8480_v34 = vadd.f32 %v8428_v36, %v8325_v9 }
 0x601   : > { %v8383_v46 = vpop.f32.mrf.mxu1  ;;  %v8533_v40 = vpop.f32.mrf.mxu0 }
 0x602   : > { %v8477_v41 = vadd.f32 %v8383_v46, %v8322_v55  ;;  %v8626_v8 = vadd.f32 %v8533_v40, %v8472_v38 }
 0x603   : > { %v8385_v18 = vpop.f32.mrf.mxu1  ;;  %v8535_v10 = vpop.f32.mrf.mxu0 }
 0x604   : > { %v8478_v31 = vadd.f32 %v8385_v18, %v8323_v6  ;;  %v8627_v24 = vadd.f32 %v8535_v10, %v8473_v58 }
 0x605   : > { %v8465_v60 = vpop.f32.mrf.mxu1  ;;  %v8537_v15 = vpop.f32.mrf.mxu0 }
 0x606   : > { %v8476_v52 = vadd.f32 %v8465_v60, %v8321_v62  ;;  %v8631_v27 = vadd.f32 %v8537_v15, %v8477_v41 }
 0x607   : > { %v11826_v2 = vpop.f32.mrf.mxu1  ;;  %v8539_v47 = vpop.f32.mrf.mxu0 }
 0x608   : > { %v8632_v42 = vadd.f32 %v8539_v47, %v8478_v31 }
 0x609   : > { %v8468_v17 = vpop.f32.mrf.mxu1  ;;  %v8619_v3 = vpop.f32.mrf.mxu0 }
 0x60a   : > { %v8481_v29 = vadd.f32 %v8468_v17, %v8326_v57  ;;  %v8630_v44 = vadd.f32 %v8619_v3, %v8476_v52 }
 0x60b   : > { %v11827_v48 = vpop.f32.mrf.mxu1  ;;  %v11832_v35 = vpop.f32.mrf.mxu0 }
 0x60d   : > { %v8576_v20 = vpop.f32.mrf.mxu1  ;;  %v8622_v55 = vpop.f32.mrf.mxu0 }
 0x60e   : > { %v8628_v16 = vadd.f32 %v8576_v20, %v8474_v12  ;;  %v14744_v32 = vadd.f32 %v8622_v55, %v8481_v29 }
 0x60f   : > { %v8578_v63 = vpop.f32.mrf.mxu1  ;;  %v11833_v49 = vpop.f32.mrf.mxu0 }
 0x610   : > { %v8629_v14 = vadd.f32 %v8578_v63, %v8475_v4 }
 0x611   : > { %v8580_v21 = vpop.f32.mrf.mxu1  ;;  %v8730_v62 = vpop.f32.mrf.mxu0 }
 0x612   : > { %v8633_v25 = vadd.f32 %v8580_v21, %v8479_v53  ;;  %v8782_v26 = vadd.f32 %v8730_v62, %v8628_v16 }
 0x613   : > { %v8582_v7 = vpop.f32.mrf.mxu1  ;;  %v8732_v45 = vpop.f32.mrf.mxu0 }
 0x614   : > { %v8634_v56 = vadd.f32 %v8582_v7, %v8480_v34  ;;  %v8783_v59 = vadd.f32 %v8732_v45, %v8629_v14 }
 0x615   : > { %v8687_v57 = vpop.f32.mrf.mxu1  ;;  %v8734_v0 = vpop.f32.mrf.mxu0 }
 0x616   : > { %v8780_v1 = vadd.f32 %v8687_v57, %v8626_v8  ;;  %v8787_v28 = vadd.f32 %v8734_v0, %v8633_v25 }
 0x617   : > { %v8689_v19 = vpop.f32.mrf.mxu1  ;;  %v8736_v51 = vpop.f32.mrf.mxu0 }
 0x618   : > { %v8781_v43 = vadd.f32 %v8689_v19, %v8627_v24  ;;  %v14746_v23 = vadd.f32 %v8736_v51, %v8634_v56 }
 0x619   : > { %v8691_v50 = vpop.f32.mrf.mxu1  ;;  %v8841_v12 = vpop.f32.mrf.mxu0 }
 0x61a   : > { %v8785_v33 = vadd.f32 %v8691_v50, %v8631_v27  ;;  %v8934_v30 = vadd.f32 %v8841_v12, %v8780_v1 }
 0x61b   : > { %v8693_v54 = vpop.f32.mrf.mxu1  ;;  %v8843_v9 = vpop.f32.mrf.mxu0 }
 0x61c   : > { %v8786_v4 = vadd.f32 %v8693_v54, %v8632_v42  ;;  %v14748_v39 = vadd.f32 %v8843_v9, %v8781_v43 }
 0x61d   : > { %v8773_v61 = vpop.f32.mrf.mxu1  ;;  %v8845_v22 = vpop.f32.mrf.mxu0 }
 0x61e   : > { %v8784_v38 = vadd.f32 %v8773_v61, %v8630_v44  ;;  %v8939_v53 = vadd.f32 %v8845_v22, %v8785_v33 }
 0x61f   : > { %v11838_v37 = vpop.f32.mrf.mxu1  ;;  %v8847_v36 = vpop.f32.mrf.mxu0 }
 0x620   : > { %v14750_v13 = vadd.f32 %v8847_v36, %v8786_v4 }
 0x621   : > { %v14752_v58 = vpop.f32.mrf.mxu1  ;;  %v8927_v34 = vpop.f32.mrf.mxu0 }
 0x622   : > { %v14754_v46 = vadd.f32 %v8927_v34, %v8784_v38 }
 0x623   : > { %v11839_v40 = vpop.f32.mrf.mxu1  ;;  %v11844_v6 = vpop.f32.mrf.mxu0 }
 0x625   : > { %v8884_v41 = vpop.f32.mrf.mxu1  ;;  %v14756_v8 = vpop.f32.mrf.mxu0 }
 0x626   : > { %v14758_v18 = vadd.f32 %v8884_v41, %v8782_v26 }
 0x627   : > { %v8886_v10 = vpop.f32.mrf.mxu1  ;;  %v11845_v31 = vpop.f32.mrf.mxu0 }
 0x628   : > { %v14760_v24 = vadd.f32 %v8886_v10, %v8783_v59 }
 0x629   : > { %v8888_v60 = vpop.f32.mrf.mxu1  ;;  %v14762_v15 = vpop.f32.mrf.mxu0 }
 0x62a   : > { %v8941_v52 = vadd.f32 %v8888_v60, %v8787_v28  ;;  %v9090_v11 = vadd.f32 %v14762_v15, %v14758_v18 }
 0x62b   : > { %v14764_v27 = vpop.f32.mrf.mxu1  ;;  %v14766_v2 = vpop.f32.mrf.mxu0 }
 0x62d   : > { %v8995_v47 = vpop.f32.mrf.mxu1  ;;  %v9042_v42 = vpop.f32.mrf.mxu0 }
 0x62e   : > { %v9088_v17 = vadd.f32 %v8995_v47, %v8934_v30  ;;  %v14768_v3 = vadd.f32 %v9042_v42, %v8941_v52 }
 0x62f   : > { %v8997_v29 = vpop.f32.mrf.mxu1  ;;  %v14770_v44 = vpop.f32.mrf.mxu0 }
 0x631   : > { %v8999_v48 = vpop.f32.mrf.mxu1  ;;  %v9146_v35 = vpop.f32.mrf.mxu0 }
 0x632   : > { %v14772_v20 = vadd.f32 %v8999_v48, %v8939_v53  ;;  %v14774_v55 = vadd.f32 %v9146_v35, %v9088_v17 }
 0x633   : > { %v14776_v16 = vpop.f32.mrf.mxu1  ;;  %v9148_v63 = vpop.f32.mrf.mxu0 }
 0x635   : > { %v9081_v49 = vpop.f32.mrf.mxu1  ;;  %v14778_v14 = vpop.f32.mrf.mxu0 }
 0x637   : > { %v11850_v21 = vpop.f32.mrf.mxu1  ;;  %v14780_v62 = vpop.f32.mrf.mxu0 }
 0x639   : > { %v9084_v25 = vpop.f32.mrf.mxu1  ;;  %v9232_v26 = vpop.f32.mrf.mxu0 }
 0x63b   : > { %v11851_v7 = vpop.f32.mrf.mxu1  ;;  %v11856_v45 = vpop.f32.mrf.mxu0 }
 0x63c   : > { %v8789_v7 = vadd.f32 %v14752_v58, %v14744_v32  ;;  %v9092_v45 = vadd.f32 %v9081_v49, %v14754_v46 }
 0x63d   : > { %v9189_v56 = vpop.f32.mrf.mxu1  ;;  %v9235_v59 = vpop.f32.mrf.mxu0 }
 0x63e   : > { %v9241_v49 = vadd.f32 %v9189_v56, %v9090_v11 }
 0x63f   : > { %v9191_v57 = vpop.f32.mrf.mxu1  ;;  %v11857_v0 = vpop.f32.mrf.mxu0 }
 0x641   : > { %v14782_v1 = vpop.f32.mrf.mxu1  ;;  %v9346_v28 = vpop.f32.mrf.mxu0 }
 0x643   : > { %v14784_v19 = vpop.f32.mrf.mxu1  ;;  %v14786_v51 = vpop.f32.mrf.mxu0 }
 0x645   : > { %v14788_v43 = vpop.f32.mrf.mxu1  ;;  %v14790_v50 = vpop.f32.mrf.mxu0 }
 0x647   : > { %v9305_v12 = vpop.f32.mrf.mxu1  ;;  %v14792_v33 = vpop.f32.mrf.mxu0 }
 0x649   : > { %v14794_v30 = vpop.f32.mrf.mxu1  ;;  %v14796_v54 = vpop.f32.mrf.mxu0 }
 0x64a   : > { %15287 = vst [vmem:[#allocation5_spill] sm:$0xff] %v14796_v54 }
 0x64b   : > { %v14798_v9 = vpop.f32.mrf.mxu1  ;;  %v9462_v4 = vpop.f32.mrf.mxu0 }
 0x64d   : > { %v9389_v61 = vpop.f32.mrf.mxu1  ;;  %v14800_v22 = vpop.f32.mrf.mxu0 }
 0x64e   : > { %15288 = vst [vmem:[#allocation6_spill] sm:$0xff] %v14800_v22 }
 0x64f   : > { %v11862_v38 = vpop.f32.mrf.mxu1  ;;  %v14802_v53 = vpop.f32.mrf.mxu0 }
 0x651   : > { %v9392_v37 = vpop.f32.mrf.mxu1  ;;  %v9546_v36 = vpop.f32.mrf.mxu0 }
 0x653   : > { %v11863_v34 = vpop.f32.mrf.mxu1  ;;  %v11868_v40 = vpop.f32.mrf.mxu0 }
 0x654   : > { %v8943_v34 = vadd.f32 %v14756_v8, %v8789_v7  ;;  %v9243_v40 = vadd.f32 %v9232_v26, %v9092_v45  ;;  %v9091_v8 = vadd.f32 %v14766_v2, %v14760_v24  ;;  %v9398_v45 = vadd.f32 %v9346_v28, %v9241_v49 }
 0x655   : > { %v9503_v6 = vpop.f32.mrf.mxu1  ;;  %v9549_v41 = vpop.f32.mrf.mxu0  ;;  %v9094_v24 = vadd.f32 %v14776_v16, %v14750_v13  ;;  %v9246_v2 = vadd.f32 %v14782_v1, %v14768_v3 }
 0x656   : > { %v9097_v54 = vadd.f32 %v9084_v25, %v8943_v34  ;;  %v9242_v15 = vadd.f32 %v9191_v57, %v9091_v8  ;;  %v9882_v57 = vpop.permute.xlu1 %9881  ;;  %v9887_v1 = vpop.permute.xlu0 %9886 }
 0x657   : > { %v9505_v10 = vpop.f32.mrf.mxu1  ;;  %v11869_v31 = vpop.f32.mrf.mxu0  ;;  %v9403_v13 = vadd.f32 %v14790_v50, %v9246_v2 }
 0x658   : > { %v9399_v28 = vadd.f32 %v14786_v51, %v9242_v15 }
 0x659   : > { %v14804_v60 = vpop.f32.mrf.mxu1  ;;  %v9660_v52 = vpop.f32.mrf.mxu0 }
 0x65a   : > { %v9556_v16 = vadd.f32 %v9505_v10, %v9399_v28 }
 0x65b   : > { %v14806_v47 = vpop.f32.mrf.mxu1  ;;  %v14808_v42 = vpop.f32.mrf.mxu0 }
 0x65d   : > { %v14810_v17 = vpop.f32.mrf.mxu1  ;;  %v14812_v48 = vpop.f32.mrf.mxu0 }
 0x65e   : > { %15289 = vst [vmem:[#allocation2_spill] sm:$0xff] %v14810_v17  ;;  %v9089_v17 = vadd.f32 %v8997_v29, %v14748_v39  ;;  %v8942_v39 = vadd.f32 %v14764_v27, %v14746_v23  ;;  %v9244_v23 = vadd.f32 %v14778_v14, %v14772_v20 }
 0x65f   : > { %v9619_v35 = vpop.f32.mrf.mxu1  ;;  %v14814_v21 = vpop.f32.mrf.mxu0 }
 0x660   : > { %15290 = vst [vmem:[#allocation7_spill] sm:$0xff] %v14814_v21  ;;  %v9400_v21 = vadd.f32 %v9389_v61, %v9243_v40  ;;  %v9240_v46 = vadd.f32 %v9148_v63, %v9089_v17  ;;  %v9555_v63 = vadd.f32 %v9503_v6, %v9398_v45  ;;  %v9401_v50 = vadd.f32 %v14794_v30, %v9244_v23  ;;  %v15297_v45 = vld [vmem:[#allocation5_spill] sm:$0xff] }
 0x661   : > { %v14819_v0 = vpop.f32.mrf.mxu1  ;;  %v14821_v38 = vpop.f32.mrf.mxu0 }
 0x662   : > { %15291 = vst [vmem:[#allocation3_spill] sm:$0xff] %v14819_v0  ;;  %15292 = vst [vmem:[#allocation4_spill] sm:$0xff] %v14821_v38  ;;  %v9248_v0 = vadd.f32 %v9235_v59, %v9097_v54  ;;  %v9557_v38 = vadd.f32 %v9546_v36, %v9400_v21  ;;  %v9096_v59 = vadd.f32 %v14770_v44, %v8942_v39 }
 0x663   : > { %v9776_v31 = vpop.f32.mrf.mxu0  ;;  %v14824_v5 = vpop.f32.mrf.mxu1  ;;  %v9712_v27 = vadd.f32 %v9660_v52, %v9555_v63  ;;  %v9560_v52 = vadd.f32 %v14804_v60, %v9403_v13 }
 0x664   : > { %15293 = vst [vmem:[#allocation9_spill] sm:$0xff] %v14824_v5  ;;  %v9397_v5 = vadd.f32 %v9305_v12, %v9240_v46  ;;  %v9405_v22 = vadd.f32 %v9392_v37, %v9248_v0  ;;  %v9247_v44 = vadd.f32 %v14784_v19, %v9096_v59 }
 0x665   : > { %v9703_v32 = vpop.f32.mrf.mxu1  ;;  %v14829_v58 = vpop.f32.mrf.mxu0 }
 0x666   : > { %v9714_v18 = vadd.f32 %v9703_v32, %v9557_v38  ;;  %v9554_v61 = vadd.f32 %v9462_v4, %v9397_v5  ;;  %v9562_v11 = vadd.f32 %v9549_v41, %v9405_v22  ;;  %v9245_v22 = vadd.f32 %v14780_v62, %v9094_v24 }
 0x667   : > { %v11874_v26 = vpop.f32.mrf.mxu1  ;;  %v9780_v7 = vpop.f32.mrf.mxu0  ;;  %v9404_v20 = vadd.f32 %v14792_v33, %v9247_v44  ;;  %v9713_v62 = vadd.f32 %v14808_v42, %v9556_v16  ;;  %v9717_v38 = vadd.f32 %v14812_v48, %v9560_v52  ;;  %v15295_v30 = vld [vmem:[#allocation7_spill] sm:$0xff] }
 0x668   : > { %v9711_v5 = vadd.f32 %v9619_v35, %v9554_v61  ;;  %v9402_v14 = vadd.f32 %v14798_v9, %v9245_v22  ;;  %v9396_v9 = vadd.f32 %v14788_v43, %v14774_v55  ;;  %v15299_v61 = vld [vmem:[#allocation2_spill] sm:$0xff] }
 0x669   : > { %v9706_v29 = vpop.f32.mrf.mxu1  ;;  %v9860_v25 = vpop.f32.mrf.mxu0  ;;  %v9561_v0 = vadd.f32 %v14806_v47, %v9404_v20  ;;  %v15298_v39 = vld [vmem:[#allocation3_spill] sm:$0xff]  ;;  %v15300_v2 = vld [vmem:[#allocation4_spill] sm:$0xff] }
 0x66a   : > { %v9871_v56 = vadd.f32 %v9860_v25, %v9714_v18  ;;  %v9719_v4 = vadd.f32 %v9706_v29, %v9562_v11  ;;  %v9868_v51 = vadd.f32 %v9776_v31, %v9711_v5  ;;  %v9559_v21 = vadd.f32 %v14802_v53, %v9402_v14  ;;  %v15294_v31 = vld [vmem:[#allocation6_spill] sm:$0xff] }
 0x66b   : > { %v11875_v12 = vpop.f32.mrf.mxu1  ;;  %v11880_v54 = vpop.f32.mrf.mxu0  ;;  %v9558_v32 = vadd.f32 %v15294_v31, %v9401_v50  ;;  %v9718_v46 = vadd.f32 %v15295_v30, %v9561_v0  ;;  %v15296_v49 = vld [vmem:[#allocation9_spill] sm:$0xff]  ;;  %v9553_v47 = vadd.f32 %v15297_v45, %v9396_v9 }
 0x66c   : > { %v9893_v36 = vadd.f32 %v9882_v57, %v9871_v56  ;;  %v9890_v42 = vadd.f32 %v9882_v57, %v9868_v51  ;;  %v9716_v8 = vadd.f32 %v15296_v49, %v9559_v21 }
 0x66d   : > { %v9817_v37 = vpop.f32.mrf.mxu1  ;;  %v9863_v3 = vpop.f32.mrf.mxu0  ;;  %v9715_v15 = vadd.f32 %v15298_v39, %v9558_v32  ;;  %v9710_v63 = vadd.f32 %v15299_v61, %v9553_v47 }
 0x66e   : > { %v9869_v6 = vadd.f32 %v9817_v37, %v9712_v27  ;;  %v9876_v41 = vadd.f32 %v9863_v3, %v9719_v4  ;;  %v9903_v60 = vmax.f32 %v9893_v36, 0.0  ;;  %v9873_v29 = vadd.f32 %v9780_v7, %v9716_v8 }
 0x66f   : > { %v9819_v17 = vpop.f32.mrf.mxu1  ;;  %v11881_v19 = vpop.f32.mrf.mxu0  ;;  %v9900_v25 = vmax.f32 %v9890_v42, 0.0  ;;  %v9872_v11 = vadd.f32 %v14829_v58, %v9715_v15  ;;  %v9867_v28 = vadd.f32 %v15300_v2, %v9710_v63 }
 0x670   : > { %v14851_v10 = vadd.f32 %v9882_v57, %v9869_v6  ;;  %v9898_v35 = vadd.f32 %v9887_v1, %v9876_v41  ;;  %v9870_v33 = vadd.f32 %v9819_v17, %v9713_v62  ;;  %v9895_v12 = vadd.f32 %v9887_v1, %v9873_v29 }
 0x671   : > { %v9821_v34 = vpop.f32.mrf.mxu1  ;;  %v9894_v7 = vadd.f32 %v9887_v1, %v9872_v11  ;;  %v9889_v4 = vadd.f32 %v9882_v57, %v9867_v28 }
 0x672   : > { %v9908_v40 = vmax.f32 %v9898_v35, 0.0  ;;  %v9874_v26 = vadd.f32 %v9821_v34, %v9717_v38  ;;  %v9901_v48 = vmax.f32 %v14851_v10, 0.0  ;;  %v9892_v55 = vadd.f32 %v9882_v57, %v9870_v33 }
 0x673   : > { %v9823_v53 = vpop.f32.mrf.mxu1  ;;  %v9905_v22 = vmax.f32 %v9895_v12, 0.0  ;;  %v9904_v44 = vmax.f32 %v9894_v7, 0.0  ;;  %v9899_v58 = vmax.f32 %v9889_v4, 0.0 }
 0x674   : > { %v11996_v18 = vpack.i.bf16 %v9908_v40, %v9903_v60  ;;  %v9875_v43 = vadd.f32 %v9823_v53, %v9718_v46  ;;  %v9896_v56 = vadd.f32 %v9887_v1, %v9874_v26  ;;  %v12006_v24 = vpack.i.bf16 %v9901_v48, %v9900_v25 }
 0x675   : > { %v9902_v54 = vmax.f32 %v9892_v55, 0.0  ;;  %v12021_v16 = vpack.i.bf16 %v9904_v44, %v9899_v58 }
 0x676   : > { %11997 = vrot.lane.b32.xlu1 %v11996_v18, %s12272_s24  ;;  %v9897_v59 = vadd.f32 %v9887_v1, %v9875_v43  ;;  %v9906_v27 = vmax.f32 %v9896_v56, 0.0 }
 0x678   : > { %v9907_v23 = vmax.f32 %v9897_v59, 0.0  ;;  %v12011_v13 = vpack.i.bf16 %v9906_v27, %v9905_v22 }
 0x67a   : > { %12007 = vrot.lane.b32.xlu1 %v12006_v24, %s12272_s24  ;;  %v12001_v5 = vpack.i.bf16 %v9907_v23, %v9902_v54 }
 0x67c   : > { %12002 = vrot.lane.b32.xlu0 %v12001_v5, %s12272_s24 }
 0x680   : > { %12012 = vrot.lane.b32.xlu0 %v12011_v13, %s12272_s24 }
 0x684   : > { %12022 = vrot.lane.b32.xlu0 %v12021_v16, %s12272_s24  ;;  %s12296_s24 = smov 4  }
 0x6e8   : > { %v11998_v37 = vpop.permute.xlu1 %11997 }
 0x6e9   : > { %v12000_v3 = vunpack.i.h.bf16 %v11998_v37  ;;  %v11999_v51 = vunpack.i.l.bf16 %v11998_v37 }
 0x6eb   : > { %v9967_v36 = vmax.f32 %v9908_v40, %v12000_v3  ;;  %v9962_v6 = vmax.f32 %v9903_v60, %v11999_v51 }
 0x6ec   : > { %v12008_v1 = vpop.permute.xlu1 %12007 }
 0x6ed   : > { %v12016_v41 = vpack.i.bf16 %v9967_v36, %v9962_v6  ;;  %v12010_v20 = vunpack.i.h.bf16 %v12008_v1  ;;  %v12009_v57 = vunpack.i.l.bf16 %v12008_v1 }
 0x6ee   : > { %v12003_v14 = vpop.permute.xlu0 %12002 }
 0x6ef   : > { %12017 = vrot.lane.b32.xlu1 %v12016_v41, %s12282_s15  ;;  %v9941_v52 = vsel %vm826_vm4, %v12009_v57, %v12010_v20  ;;  %v12005_v62 = vunpack.i.h.bf16 %v12003_v14  ;;  %v12004_v17 = vunpack.i.l.bf16 %v12003_v14 }
 0x6f0   : > { %v9959_v35 = vmax.f32 %v9900_v25, %v9941_v52 }
 0x6f1   : > { %v9947_v19 = vsel %vm826_vm4, %v12005_v62, %v12000_v3  ;;  %v9942_v50 = vsel %vm826_vm4, %v12010_v20, %v12004_v17  ;;  %v9943_v10 = vsel %vm826_vm4, %v12004_v17, %v11999_v51 }
 0x6f2   : > { %v9966_v21 = vmax.f32 %v9907_v23, %v9947_v19  ;;  %v9960_v0 = vmax.f32 %v9901_v48, %v9942_v50  ;;  %v9961_v38 = vmax.f32 %v9902_v54, %v9943_v10  ;;  %v12013_v33 = vpop.permute.xlu0 %12012 }
 0x6f3   : > { %v12015_v34 = vunpack.i.h.bf16 %v12013_v33  ;;  %v12014_v9 = vunpack.i.l.bf16 %v12013_v33 }
 0x6f4   : > { %v12026_v60 = vpack.i.bf16 %v9966_v21, %v9961_v38  ;;  %v12031_v42 = vpack.i.bf16 %v9960_v0, %v9959_v35 }
 0x6f5   : > { %v9946_v40 = vsel %vm826_vm4, %v12015_v34, %v12005_v62  ;;  %v9945_v31 = vsel %vm826_vm4, %v12014_v9, %v12015_v34 }
 0x6f6   : > { %v9965_v32 = vmax.f32 %v9906_v27, %v9946_v40  ;;  %v9964_v30 = vmax.f32 %v9905_v22, %v9945_v31  ;;  %12027 = vrot.lane.b32.xlu1 %v12026_v60, %s12282_s15  ;;  %12032 = vrot.lane.b32.xlu0 %v12031_v42, %s12282_s15  ;;  %v12023_v49 = vpop.permute.xlu0 %12022 }
 0x6f7   : > { %v12025_v8 = vunpack.i.h.bf16 %v12023_v49  ;;  %v12024_v26 = vunpack.i.l.bf16 %v12023_v49 }
 0x6f8   : > { %v12036_v46 = vpack.i.bf16 %v9965_v32, %v9964_v30 }
 0x6f9   : > { %v9944_v48 = vsel %vm826_vm4, %v12025_v8, %v12014_v9  ;;  %v9940_v18 = vsel %vm826_vm4, %v12024_v26, %v12009_v57  ;;  %vm10866_vm4 = vcmask 7168  }
 0x6fa   : > { %12037 = vrot.lane.b32.xlu1 %v12036_v46, %s12282_s15  ;;  %v9963_v55 = vmax.f32 %v9904_v44, %v9944_v48  ;;  %v9958_v43 = vmax.f32 %v9899_v58, %v9940_v18 }
 0x6fc   : > { %v12051_v24 = vpack.i.bf16 %v9963_v55, %v9958_v43 }
 0x761   : > { %v12018_v53 = vpop.permute.xlu1 %12017 }
 0x762   : > { %v12020_v45 = vunpack.i.h.bf16 %v12018_v53  ;;  %v12019_v47 = vunpack.i.l.bf16 %v12018_v53 }
 0x764   : > { %v10026_v39 = vmax.f32 %v9967_v36, %v12020_v45  ;;  %v10021_v15 = vmax.f32 %v9962_v6, %v12019_v47 }
 0x766   : > { %v12046_v29 = vpack.i.bf16 %v10026_v39, %v10021_v15 }
 0x768   : > { %12047 = vrot.lane.b32.xlu1 %v12046_v29, %s12274_s26  ;;  %12042 = vrot.lane.b32.xlu0 %v12046_v29, %s12293_s27  ;;  %v12028_v25 = vpop.permute.xlu1 %12027  ;;  %v12033_v61 = vpop.permute.xlu0 %12032 }
 0x769   : > { %v12030_v63 = vunpack.i.h.bf16 %v12028_v25  ;;  %v12029_v11 = vunpack.i.l.bf16 %v12028_v25  ;;  %v12035_v56 = vunpack.i.h.bf16 %v12033_v61  ;;  %v12034_v59 = vunpack.i.l.bf16 %v12033_v61 }
 0x76b   : > { %v10002_v2 = vsel %vm2581_vm12, %v12029_v11, %v12019_v47  ;;  %v10006_v28 = vsel %vm2581_vm12, %v12030_v63, %v12020_v45  ;;  %v10001_v7 = vsel %vm2581_vm12, %v12035_v56, %v12029_v11  ;;  %v10000_v4 = vsel %vm2581_vm12, %v12034_v59, %v12035_v56 }
 0x76c   : > { %12057 = vrot.lane.b32.xlu1 %v12046_v29, %s12296_s24  ;;  %v10020_v12 = vmax.f32 %v9961_v38, %v10002_v2  ;;  %v10025_v54 = vmax.f32 %v9966_v21, %v10006_v28  ;;  %v12038_v23 = vpop.permute.xlu1 %12037  ;;  %12052 = vrot.lane.b32.xlu0 %v12051_v24, %s12282_s15  ;;  %v14898_v3 = vmax.f32 %v9960_v0, %v10001_v7  ;;  %s12297_s15 = smov 116  }
 0x76d   : > { %v12040_v27 = vunpack.i.h.bf16 %v12038_v23  ;;  %v12039_v5 = vunpack.i.l.bf16 %v12038_v23  ;;  %v14900_v51 = vmax.f32 %v9959_v35, %v10000_v4 }
 0x76e   : > { %v12066_v22 = vpack.i.bf16 %v10025_v54, %v10020_v12  ;;  %v10198_v44 = vpack.c.bf16 %v10025_v54, %v10020_v12 }
 0x76f   : > { %v10004_v13 = vsel %vm2581_vm12, %v12039_v5, %v12040_v27  ;;  %v10005_v58 = vsel %vm2581_vm12, %v12040_v27, %v12030_v63  ;;  %v15301_v27 = vmov 0  }
 0x770   : > { %v14893_v16 = vmax.f32 %v9964_v30, %v10004_v13  ;;  %v14895_v37 = vmax.f32 %v9965_v32, %v10005_v58  ;;  %12067 = vrot.lane.b32.xlu1 %v12066_v22, %s12293_s27  ;;  %11497 = vmatprep.subr.bf16.mxu1 %v10198_v44 }
 0x771   : > { %12062 = vrot.lane.b32.xlu0 %v12066_v22, %s12297_s15 }
 0x772   : > { %v12101_v36 = vpack.i.bf16 %v14895_v37, %v14898_v3  ;;  %v14907_v6 = vpack.i.bf16 %v14893_v16, %v14900_v51  ;;  %v10188_v1 = vpack.c.bf16 %v14893_v16, %v14900_v51  ;;  %v10193_v41 = vpack.c.bf16 %v14895_v37, %v14898_v3 }
 0x774   : > { %12077 = vrot.lane.b32.xlu1 %v12046_v29, %s12297_s15  ;;  %v12211_v29 = vld [vmem:[%s15243_s5 + $0x4] ss:$16 sps:$4 sm:$0xff]  }
 0x775   : > { %12072 = vrot.lane.b32.xlu0 %v12066_v22, %s12274_s26  ;;  %10456 = vmatprep.mubr.bf16.mxu1 %v12211_v29 }
 0x778   : > { %12087 = vrot.lane.b32.xlu1 %v14907_v6, %s12274_s26 }
 0x779   : > { %12082 = vrot.lane.b32.xlu0 %v14907_v6, %s12293_s27 }
 0x77d   : > { %12092 = vrot.lane.b32.xlu0 %v12101_v36, %s12298_s22 }
 0x781   : > { %12107 = vrot.lane.b32.xlu0 %v12101_v36, %s12293_s27 }
 0x7da   : > { %v12048_v20 = vpop.permute.xlu1 %12047  ;;  %v12043_v57 = vpop.permute.xlu0 %12042 }
 0x7db   : > { %v12050_v14 = vunpack.i.h.bf16 %v12048_v20  ;;  %v12049_v52 = vunpack.i.l.bf16 %v12048_v20  ;;  %12097 = vrot.lane.b32.xlu1 %v12043_v57, %s12274_s26  ;;  %12122 = vrot.lane.b32.xlu0 %v12048_v20, %s12274_s26 }
 0x7dd   : > { %v14921_v62 = vpack.c.bf16 %v12050_v14, %v12049_v52 }
 0x7de   : > { %v12058_v17 = vpop.permute.xlu1 %12057  ;;  %v12053_v19 = vpop.permute.xlu0 %12052 }
 0x7df   : > { %v12055_v50 = vunpack.i.h.bf16 %v12053_v19  ;;  %v12054_v10 = vunpack.i.l.bf16 %v12053_v19  ;;  %12102 = vrot.lane.b32.xlu1 %v12101_v36, %s12297_s15 }
 0x7e1   : > { %v10003_v35 = vsel %vm2581_vm12, %v12055_v50, %v12039_v5  ;;  %v9999_v21 = vsel %vm2581_vm12, %v12054_v10, %v12034_v59 }
 0x7e2   : > { %v14927_v0 = vmax.f32 %v9963_v55, %v10003_v35  ;;  %v14929_v38 = vmax.f32 %v9958_v43, %v9999_v21  ;;  %v12068_v33 = vpop.permute.xlu1 %12067  ;;  %v12214_v43 = vld [vmem:[%s15243_s5 + $0xc] ss:$16 sps:$4 sm:$0xff]  }
 0x7e3   : > { %v12063_v34 = vpop.permute.xlu0 %12062  ;;  %11371 = vmatprep.mubr.msk.bf16.mxu0 %vm10399_vm2, %v12214_v43 }
 0x7e4   : > { %v12126_v9 = vpack.i.bf16 %v14927_v0, %v14929_v38  ;;  %v10183_v60 = vpack.c.bf16 %v14927_v0, %v14929_v38  ;;  %v15302_v0 = vmov 0.0   ;;  %v12215_v38 = vld [vmem:[%s15243_s5 + $0x20] ss:$16 sps:$4 sm:$0xff]  }
 0x7e6   : > { %v12078_v42 = vpop.permute.xlu1 %12077  ;;  %12127 = vrot.lane.b32.xlu0 %v12126_v9, %s12297_s15  ;;  %12112 = vrot.lane.b32.xlu1 %v12126_v9, %s12298_s22 }
 0x7e7   : > { %v12073_v40 = vpop.permute.xlu0 %12072 }
 0x7e8   : > { %v12075_v31 = vunpack.i.h.bf16 %v12073_v40  ;;  %v12074_v32 = vunpack.i.l.bf16 %v12073_v40 }
 0x7ea   : > { %v14938_v30 = vpack.c.bf16 %v12075_v31, %v12074_v32  ;;  %12132 = vrot.lane.b32.xlu0 %v12058_v17, %s12274_s26  ;;  %12117 = vrot.lane.b32.xlu1 %v12101_v36, %s12274_s26  ;;  %v12088_v49 = vpop.permute.xlu1 %12087 }
 0x7eb   : > { %v12083_v46 = vpop.permute.xlu0 %12082  ;;  %v12090_v45 = vunpack.i.h.bf16 %v12088_v49  ;;  %v12089_v47 = vunpack.i.l.bf16 %v12088_v49 }
 0x7ec   : > { %v12085_v8 = vunpack.i.h.bf16 %v12083_v46  ;;  %v12084_v26 = vunpack.i.l.bf16 %v12083_v46 }
 0x7ed   : > { %v10189_v55 = vpack.c.bf16 %v12090_v45, %v12089_v47 }
 0x7ee   : > { %v10190_v53 = vpack.c.bf16 %v12085_v8, %v12084_v26  ;;  %12137 = vrot.lane.b32.xlu0 %v12126_v9, %s12293_s27  ;;  %12147 = vrot.lane.b32.xlu1 %v12063_v34, %s12274_s26 }
 0x7ef   : > { %v12093_v48 = vpop.permute.xlu0 %12092 }
 0x7f0   : > { %v12095_v18 = vunpack.i.h.bf16 %v12093_v48  ;;  %v12094_v39 = vunpack.i.l.bf16 %v12093_v48  ;;  %11498 = vmatpush3.bf16.msra.mxu1 %v10190_v53 }
 0x7f2   : > { %v10197_v15 = vpack.c.bf16 %v12095_v18, %v12094_v39  ;;  %12142 = vrot.lane.b32.xlu0 %v14907_v6, %s12298_s22  ;;  %12152 = vrot.lane.b32.xlu1 %v12068_v33, %s12274_s26 }
 0x7f3   : > { %v12108_v25 = vpop.permute.xlu0 %12107 }
 0x7f4   : > { %11499 = vmatprep.subr.bf16.mxu1 %v10197_v15  ;;  %v12110_v12 = vunpack.i.h.bf16 %v12108_v25  ;;  %v12109_v54 = vunpack.i.l.bf16 %v12108_v25 }
 0x7f5   : > { %11500 = vmatpush3.bf16.msra.mxu1 %v10189_v55 }
 0x7f6   : > { %12162 = vrot.lane.b32.xlu0 %v12073_v40, %s12274_s26  ;;  %12157 = vrot.lane.b32.xlu1 %v12126_v9, %s12274_s26  ;;  %v10195_v13 = vpack.c.bf16 %v12110_v12, %v12109_v54  ;;  %v12224_v12 = vld [vmem:[%s15243_s5 + $0x4c] ss:$16 sps:$4 sm:$0xff]   ;;  %v12221_v54 = vld [vmem:[%s15243_s5 + $0x40] ss:$16 sps:$4 sm:$0xff]  }
 0x7fa   : > { %12172 = vrot.lane.b32.xlu0 %v12078_v42, %s12274_s26  ;;  %12167 = vrot.lane.b32.xlu1 %v14907_v6, %s12297_s15 }
 0x84d   : > { %v12098_v61 = vpop.permute.xlu1 %12097  ;;  %v12123_v63 = vpop.permute.xlu0 %12122 }
 0x84e   : > { %v12100_v11 = vunpack.i.h.bf16 %v12098_v61  ;;  %v12099_v56 = vunpack.i.l.bf16 %v12098_v61  ;;  %v12125_v24 = vunpack.i.h.bf16 %v12123_v63  ;;  %v12124_v2 = vunpack.i.l.bf16 %v12123_v63 }
 0x850   : > { %v10206_v59 = vpack.c.bf16 %v12100_v11, %v12099_v56  ;;  %v10205_v5 = vpack.c.bf16 %v12125_v24, %v12124_v2  ;;  %v12209_v56 = vld [vmem:[%s15243_s5] ss:$16 sps:$4 sm:$0xff]   ;;  %v12212_v2 = vld [vmem:[%s15243_s5 + $0x8] ss:$16 sps:$4 sm:$0xff]  }
 0x851   : > { %v12103_v28 = vpop.permute.xlu1 %12102 }
 0x852   : > { %v12105_v23 = vunpack.i.h.bf16 %v12103_v28  ;;  %v12104_v7 = vunpack.i.l.bf16 %v12103_v28  ;;  %10521 = vmatpush1.bf16.msra.mxu0 %v10206_v59  ;;  %v12217_v59 = vld [vmem:[%s15243_s5 + $0x24] ss:$16 sps:$4 sm:$0xff]   ;;  %v12220_v28 = vld [vmem:[%s15243_s5 + $0x28] ss:$16 sps:$4 sm:$0xff]  }
 0x853   : > { %10522 = vmatprep.subr.bf16.mxu0 %v15301_v27 }
 0x854   : > { %v10196_v4 = vpack.c.bf16 %v12105_v23, %v12104_v7  ;;  %v12229_v23 = vld [vmem:[%s15243_s5 + $0x64] ss:$16 sps:$4 sm:$0xff]   ;;  %v12226_v7 = vld [vmem:[%s15243_s5 + $0x48] ss:$16 sps:$4 sm:$0xff]  }
 0x856   : > { %11501 = vmatprep.subr.bf16.mxu1 %v10196_v4  ;;  %10523 = vmatpush1.bf16.msra.mxu0 %v10205_v5  ;;  %v12227_v5 = vld [vmem:[%s15243_s5 + $0x60] ss:$16 sps:$4 sm:$0xff]   ;;  %v12235_v4 = vld [vmem:[%s15243_s5 + $0x84] ss:$16 sps:$4 sm:$0xff]  }
 0x857   : > { %11502 = vmatpush3.bf16.msra.mxu1 %v10188_v1  ;;  %10524 = vmatprep.subr.bf16.mxu0 %v15301_v27 }
 0x858   : > { %v12128_v22 = vpop.permute.xlu0 %12127  ;;  %v12113_v44 = vpop.permute.xlu1 %12112  ;;  %11503 = vmatprep.subr.bf16.mxu1 %v10195_v13  ;;  %v12233_v13 = vld [vmem:[%s15243_s5 + $0x80] ss:$16 sps:$4 sm:$0xff]  }
 0x859   : > { %v12115_v58 = vunpack.i.h.bf16 %v12113_v44  ;;  %v12114_v36 = vunpack.i.l.bf16 %v12113_v44  ;;  %v12130_v20 = vunpack.i.h.bf16 %v12128_v22  ;;  %v12129_v57 = vunpack.i.l.bf16 %v12128_v22  ;;  %v12232_v22 = vld [vmem:[%s15243_s5 + $0x68] ss:$16 sps:$4 sm:$0xff]   ;;  %v12236_v44 = vld [vmem:[%s15243_s5 + $0x8c] ss:$16 sps:$4 sm:$0xff]  }
 0x85a   : > { %10525 = vmatpush1.bf16.msra.mxu0 %v14921_v62 }
 0x85b   : > { %v10187_v6 = vpack.c.bf16 %v12115_v58, %v12114_v36  ;;  %10526 = vmatprep.subr.bf16.mxu0 %v15301_v27  ;;  %v10186_v51 = vpack.c.bf16 %v12130_v20, %v12129_v57  ;;  %v12241_v58 = vld [vmem:[%s15243_s5 + $0xa4] ss:$16 sps:$4 sm:$0xff]   ;;  %v12238_v36 = vld [vmem:[%s15243_s5 + $0x88] ss:$16 sps:$4 sm:$0xff]   ;;  %v12239_v20 = vld [vmem:[%s15243_s5 + $0xa0] ss:$16 sps:$4 sm:$0xff]  }
 0x85c   : > { %v12133_v14 = vpop.permute.xlu0 %12132  ;;  %v12118_v52 = vpop.permute.xlu1 %12117  ;;  %v12247_v57 = vld [vmem:[%s15243_s5 + $0xc4] ss:$16 sps:$4 sm:$0xff]  }
 0x85d   : > { %v12135_v17 = vunpack.i.h.bf16 %v12133_v14  ;;  %v12134_v19 = vunpack.i.l.bf16 %v12133_v14  ;;  %v12120_v50 = vunpack.i.h.bf16 %v12118_v52  ;;  %v12119_v10 = vunpack.i.l.bf16 %v12118_v52  ;;  %11504 = vmatpush3.bf16.msra.mxu1 %v10187_v6  ;;  %v12242_v6 = vld [vmem:[%s15243_s5 + $0xac] ss:$16 sps:$4 sm:$0xff]   ;;  %v12244_v14 = vld [vmem:[%s15243_s5 + $0xa8] ss:$16 sps:$4 sm:$0xff]  }
 0x85e   : > { %v12248_v52 = vld [vmem:[%s15243_s5 + $0xcc] ss:$16 sps:$4 sm:$0xff]  }
 0x85f   : > { %v10203_v35 = vpack.c.bf16 %v12135_v17, %v12134_v19  ;;  %v10194_v16 = vpack.c.bf16 %v12120_v50, %v12119_v10  ;;  %v10236_v17 = vld [vmem:[%s15243_s5 + $0xe0] sm:$0xff]  ;;  %v10237_v10 = vld [vmem:[%s15243_s5 + $0xe8] sm:$0xff] }
 0x860   : > { %v12138_v1 = vpop.permute.xlu0 %12137  ;;  %v12148_v21 = vpop.permute.xlu1 %12147  ;;  %v12245_v19 = vld [vmem:[%s15243_s5 + $0xc0] ss:$16 sps:$4 sm:$0xff]   ;;  %v11368_v50 = vcombine.high %v10236_v17, %v10236_v17 }
 0x861   : > { %v12140_v33 = vunpack.i.h.bf16 %v12138_v1  ;;  %v12139_v34 = vunpack.i.l.bf16 %v12138_v1  ;;  %v12150_v9 = vunpack.i.h.bf16 %v12148_v21  ;;  %v12149_v42 = vunpack.i.l.bf16 %v12148_v21  ;;  %11505 = vmatprep.subr.bf16.mxu1 %v10194_v16  ;;  %10527 = vmatpush1.bf16.msra.mxu0 %v10203_v35  ;;  %v12250_v35 = vld [vmem:[%s15243_s5 + $0xc8] ss:$16 sps:$4 sm:$0xff]   ;;  %v12255_v21 = vld [vmem:[%s15245_s7] sm:$0xff]  }
 0x862   : > { %11506 = vmatpush3.bf16.msra.mxu1 %v10186_v51  ;;  %10528 = vmatprep.subr.bf16.mxu0 %v15301_v27  ;;  %v11370_v16 = vcombine.high %v10237_v10, %v10237_v10  ;;  %v11367_v51 = vcombine.low %v10236_v17, %v10236_v17  ;;  %v11369_v1 = vcombine.low %v10237_v10, %v10237_v10 }
 0x863   : > { %v10202_v40 = vpack.c.bf16 %v12150_v9, %v12149_v42  ;;  %11507 = vmatprep.subr.bf16.mxu1 %v10193_v41  ;;  %v10185_v62 = vpack.c.bf16 %v12140_v33, %v12139_v34  ;;  %v10238_v9 = vld [vmem:[%s15244_s6] sm:$0xff] }
 0x864   : > { %v12143_v31 = vpop.permute.xlu0 %12142  ;;  %v12153_v32 = vpop.permute.xlu1 %12152 }
 0x865   : > { %v12145_v46 = vunpack.i.h.bf16 %v12143_v31  ;;  %v12144_v49 = vunpack.i.l.bf16 %v12143_v31  ;;  %v12155_v8 = vunpack.i.h.bf16 %v12153_v32  ;;  %v12154_v26 = vunpack.i.l.bf16 %v12153_v32  ;;  %10529 = vmatpush1.bf16.msra.mxu0 %v10202_v40 }
 0x866   : > { %11508 = vmatpush3.bf16.msra.mxu1 %v10185_v62  ;;  %10530 = vmatprep.subr.bf16.mxu0 %v15301_v27 }
 0x867   : > { %v10192_v53 = vpack.c.bf16 %v12145_v46, %v12144_v49  ;;  %v10201_v45 = vpack.c.bf16 %v12155_v8, %v12154_v26  ;;  %v10239_v49 = vld [vmem:[%s15244_s6 + $0x8] sm:$0xff] }
 0x868   : > { %v12163_v47 = vpop.permute.xlu0 %12162  ;;  %v12158_v48 = vpop.permute.xlu1 %12157 }
 0x869   : > { %v12165_v18 = vunpack.i.h.bf16 %v12163_v47  ;;  %v12164_v39 = vunpack.i.l.bf16 %v12163_v47  ;;  %v12160_v15 = vunpack.i.h.bf16 %v12158_v48  ;;  %v12159_v37 = vunpack.i.l.bf16 %v12158_v48  ;;  %11509 = vmatprep.subr.bf16.mxu1 %v10192_v53  ;;  %10531 = vmatpush1.bf16.msra.mxu0 %v10201_v45 }
 0x86a   : > { %10532 = vmatprep.subr.bf16.mxu0 %v15301_v27 }
 0x86b   : > { %v10200_v3 = vpack.c.bf16 %v12165_v18, %v12164_v39  ;;  %v10184_v41 = vpack.c.bf16 %v12160_v15, %v12159_v37  ;;  %v10240_v39 = vld [vmem:[%s15244_s6 + $0x10] sm:$0xff] }
 0x86c   : > { %v12173_v29 = vpop.permute.xlu0 %12172  ;;  %v12168_v55 = vpop.permute.xlu1 %12167 }
 0x86d   : > { %v12170_v43 = vunpack.i.h.bf16 %v12168_v55  ;;  %v12169_v25 = vunpack.i.l.bf16 %v12168_v55  ;;  %11510 = vmatpush3.bf16.msra.mxu1 %v10184_v41  ;;  %10533 = vmatpush1.bf16.msra.mxu0 %v10200_v3  ;;  %v12175_v61 = vunpack.i.h.bf16 %v12173_v29  ;;  %v12174_v63 = vunpack.i.l.bf16 %v12173_v29 }
 0x86e   : > { %10534 = vmatprep.subr.bf16.mxu0 %v15301_v27 }
 0x86f   : > { %v10191_v11 = vpack.c.bf16 %v12170_v43, %v12169_v25  ;;  %v10207_v24 = vpack.c.bf16 %v12175_v61, %v12174_v63  ;;  %v10241_v63 = vld [vmem:[%s15244_s6 + $0x18] sm:$0xff] }
 0x871   : > { %11511 = vmatprep.subr.bf16.mxu1 %v10191_v11  ;;  %10535 = vmatpush1.bf16.msra.mxu0 %v14938_v30  ;;  %v12218_v30 = vld [vmem:[%s15243_s5 + $0x2c] ss:$16 sps:$4 sm:$0xff]  }
 0x872   : > { %11512 = vmatpush3.bf16.msra.mxu1 %v10183_v60  ;;  %10550 = vmatprep.subr.bf16.mxu0 %v15301_v27  ;;  %v12223_v60 = vld [vmem:[%s15243_s5 + $0x44] ss:$16 sps:$4 sm:$0xff]   ;;  %v12230_v27 = vld [vmem:[%s15243_s5 + $0x6c] ss:$16 sps:$4 sm:$0xff]  }
 0x875   : > { %10457 = vmatmul.mubr.bf16.vlgmr.msra.gmra.mxu1 %v12209_v56  ;;  %10551 = vmatpush2.bf16.msra.mxu0 %v10207_v24 }
 0x876   : > { %10464 = vmatprep.mubr.bf16.mxu1 %v12217_v59  ;;  %11910 = vmatprep.subr.bf16.mxu0 %v15302_v0 }
 0x878   : > { %10553 = vmatmul.mubr.bf16.vlgmr.msra.gmra.mxu0 %v12212_v2 }
 0x879   : > { %11372 = vmatprep.mubr.msk.bf16.mxu0 %vm10399_vm2, %v12218_v30 }
 0x87d   : > { %10465 = vmatmul.mubr.bf16.gmra.mxu1 %v12215_v38 }
 0x87e   : > { %10472 = vmatprep.mubr.bf16.mxu1 %v12223_v60 }
 0x880   : > { %10561 = vmatmul.mubr.bf16.gmra.mxu0 %v12220_v28 }
 0x881   : > { %11373 = vmatprep.mubr.msk.bf16.mxu0 %vm10399_vm2, %v12224_v12 }
 0x885   : > { %10473 = vmatmul.mubr.bf16.gmra.mxu1 %v12221_v54 }
 0x886   : > { %10480 = vmatprep.mubr.bf16.mxu1 %v12229_v23 }
 0x888   : > { %10569 = vmatmul.mubr.bf16.gmra.mxu0 %v12226_v7 }
 0x889   : > { %11374 = vmatprep.mubr.msk.bf16.mxu0 %vm10399_vm2, %v12230_v27 }
 0x88d   : > { %10481 = vmatmul.mubr.bf16.gmra.mxu1 %v12227_v5 }
 0x88e   : > { %10488 = vmatprep.mubr.bf16.mxu1 %v12235_v4 }
 0x890   : > { %10577 = vmatmul.mubr.bf16.gmra.mxu0 %v12232_v22 }
 0x891   : > { %11375 = vmatprep.mubr.msk.bf16.mxu0 %vm10399_vm2, %v12236_v44 }
 0x895   : > { %10489 = vmatmul.mubr.bf16.gmra.mxu1 %v12233_v13 }
 0x896   : > { %10496 = vmatprep.mubr.bf16.mxu1 %v12241_v58 }
 0x898   : > { %10585 = vmatmul.mubr.bf16.gmra.mxu0 %v12238_v36 }
 0x899   : > { %11376 = vmatprep.mubr.msk.bf16.mxu0 %vm10399_vm2, %v12242_v6 }
 0x89d   : > { %10497 = vmatmul.mubr.bf16.gmra.mxu1 %v12239_v20 }
 0x89e   : > { %10504 = vmatprep.mubr.bf16.mxu1 %v12247_v57 }
 0x8a0   : > { %10593 = vmatmul.mubr.bf16.gmra.mxu0 %v12244_v14 }
 0x8a1   : > { %11377 = vmatprep.mubr.msk.bf16.mxu0 %vm10399_vm2, %v12248_v52 }
 0x8a5   : > { %10505 = vmatmul.mubr.bf16.gmra.mxu1 %v12245_v19 }
 0x8a6   : > { %10512 = vmatprep.mubr.bf16.mxu1 %v11368_v50 }
 0x8a8   : > { %10601 = vmatmul.mubr.bf16.gmra.mxu0 %v12250_v35 }
 0x8a9   : > { %11378 = vmatprep.mubr.msk.bf16.mxu0 %vm10399_vm2, %v11370_v16 }
 0x8ad   : > { %10513 = vmatmul.mubr.bf16.gmra.mxu1 %v11367_v51 }
 0x8ae   : > { %11898 = vmatprep.mubr.msk.bf16.mxu1 %vm6485_vm5, %v12255_v21 }
 0x8b0   : > { %10609 = vmatmul.mubr.bf16.gmra.mxu0 %v11369_v1 }
 0x8b1   : > { %11922 = vmatprep.mubr.msk.bf16.mxu0 %vm12281_vm3, %v15302_v0  ;;  %vm10817_vm3 = vcmask 687104  }
 0x935   : > { %v11513_v33 = vpop.f32.mrf.mxu1 }
 0x937   : > { %v11514_v34 = vpop.f32.mrf.mxu1 }
 0x938   : > { %v11515_v42 = vadd.f32 %v11514_v34, %v11513_v33  ;;  %v10554_v40 = vpop.f32.mrf.mxu0 }
 0x939   : > { %v11516_v62 = vpop.f32.mrf.mxu1 }
 0x93a   : > { %v10459_v31 = vadd.f32 %v11515_v42, %v10238_v9  ;;  %v10556_v32 = vpop.f32.mrf.mxu0 }
 0x93b   : > { %v11517_v46 = vpop.f32.mrf.mxu1 }
 0x93c   : > { %v10555_v8 = vadd.f32 %v10554_v40, %v10459_v31  ;;  %v11518_v26 = vadd.f32 %v11517_v46, %v11516_v62  ;;  %v10557_v53 = vpop.f32.mrf.mxu0 }
 0x93d   : > { %v11519_v45 = vpop.f32.mrf.mxu1 }
 0x93e   : > { %v10462_v47 = vadd.f32 %v11518_v26, %v10239_v49  ;;  %v10559_v48 = vpop.f32.mrf.mxu0  ;;  %v10616_v29 = vmax.f32 %v10555_v8, 0.0 }
 0x93f   : > { %v11520_v18 = vpop.f32.mrf.mxu1 }
 0x940   : > { %v10558_v15 = vadd.f32 %v10557_v53, %v10462_v47  ;;  %v11521_v37 = vadd.f32 %v11520_v18, %v11519_v45  ;;  %v10562_v3 = vpop.f32.mrf.mxu0  ;;  %v10251_v45 = vld [vmem:[%s15244_s6 + $0x68] sm:$0xff] }
 0x941   : > { %v11522_v41 = vpop.f32.mrf.mxu1 }
 0x942   : > { %v10617_v55 = vmax.f32 %v10558_v15, 0.0  ;;  %v10467_v43 = vadd.f32 %v11521_v37, %v10240_v39  ;;  %v10564_v25 = vpop.f32.mrf.mxu0  ;;  %v10250_v39 = vld [vmem:[%s15244_s6 + $0x60] sm:$0xff] }
 0x943   : > { %v11523_v61 = vpop.f32.mrf.mxu1 }
 0x944   : > { %v15088_v11 = vpack.c.bf16 %v10617_v55, %v10616_v29  ;;  %v10563_v56 = vadd.f32 %v10562_v3, %v10467_v43  ;;  %v11524_v59 = vadd.f32 %v11523_v61, %v11522_v41  ;;  %v10565_v24 = vpop.f32.mrf.mxu0  ;;  %v10249_v29 = vld [vmem:[%s15244_s6 + $0x58] sm:$0xff]  ;;  %v10252_v43 = vld [vmem:[%s15244_s6 + $0x70] sm:$0xff] }
 0x945   : > { %v15090_v2 = vpop.f32.mrf.mxu1 }
 0x946   : > { %v10470_v30 = vadd.f32 %v11524_v59, %v10241_v63  ;;  %v10567_v38 = vpop.f32.mrf.mxu0  ;;  %v10618_v23 = vmax.f32 %v10563_v56, 0.0  ;;  %v10248_v59 = vld [vmem:[%s15244_s6 + $0x50] sm:$0xff] }
 0x947   : > { %v15092_v60 = vpop.f32.mrf.mxu1 }
 0x948   : > { %v10566_v28 = vadd.f32 %v10565_v24, %v10470_v30  ;;  %v15094_v12 = vpop.f32.mrf.mxu0 }
 0x949   : > { %v15096_v54 = vpop.f32.mrf.mxu1 }
 0x94a   : > { %v10619_v7 = vmax.f32 %v10566_v28, 0.0  ;;  %v10572_v27 = vpop.f32.mrf.mxu0 }
 0x94b   : > { %v15098_v5 = vpop.f32.mrf.mxu1  ;;  %v10247_v27 = vld [vmem:[%s15244_s6 + $0x48] sm:$0xff] }
 0x94c   : > { %v15100_v4 = vpack.c.bf16 %v10619_v7, %v10618_v23  ;;  %v15102_v22 = vpop.f32.mrf.mxu0 }
 0x94d   : > { %v15104_v44 = vpop.f32.mrf.mxu1 }
 0x94e   : > { %v10575_v13 = vpop.f32.mrf.mxu0 }
 0x94f   : > { %v15106_v58 = vpop.f32.mrf.mxu1 }
 0x950   : > { %v15108_v36 = vpop.f32.mrf.mxu0 }
 0x951   : > { %v11534_v6 = vpop.f32.mrf.mxu1 }
 0x952   : > { %v10580_v20 = vpop.f32.mrf.mxu0 }
 0x953   : > { %v11535_v57 = vpop.f32.mrf.mxu1 }
 0x954   : > { %v15110_v14 = vpop.f32.mrf.mxu0 }
 0x955   : > { %v11537_v52 = vpop.f32.mrf.mxu1 }
 0x956   : > { %v10583_v17 = vpop.f32.mrf.mxu0 }
 0x957   : > { %v11538_v19 = vpop.f32.mrf.mxu1 }
 0x958   : > { %v15112_v50 = vpop.f32.mrf.mxu0  ;;  %v11539_v20 = vadd.f32 %v11538_v19, %v11537_v52  ;;  %v11533_v52 = vadd.f32 %v15106_v58, %v15104_v44  ;;  %v10243_v44 = vld [vmem:[%s15244_s6 + $0x28] sm:$0xff] }
 0x959   : > { %v11540_v10 = vpop.f32.mrf.mxu1 }
 0x95a   : > { %v10588_v35 = vpop.f32.mrf.mxu0 }
 0x95b   : > { %v11541_v16 = vpop.f32.mrf.mxu1 }
 0x95c   : > { %v10589_v51 = vpop.f32.mrf.mxu0  ;;  %v11542_v30 = vadd.f32 %v11541_v16, %v11540_v10  ;;  %v10245_v10 = vld [vmem:[%s15244_s6 + $0x38] sm:$0xff] }
 0x95d   : > { %v11543_v1 = vpop.f32.mrf.mxu1 }
 0x95e   : > { %v10591_v21 = vpop.f32.mrf.mxu0  ;;  %v10494_v16 = vadd.f32 %v11542_v30, %v10247_v27 }
 0x95f   : > { %v11544_v33 = vpop.f32.mrf.mxu1 }
 0x960   : > { %v10594_v34 = vpop.f32.mrf.mxu0  ;;  %v11545_v25 = vadd.f32 %v11544_v33, %v11543_v1  ;;  %v11536_v33 = vadd.f32 %v11535_v57, %v11534_v6  ;;  %v11530_v57 = vadd.f32 %v15098_v5, %v15096_v54  ;;  %v11527_v54 = vadd.f32 %v15092_v60, %v15090_v2 }
 0x961   : > { %v11546_v9 = vpop.f32.mrf.mxu1 }
 0x962   : > { %v10596_v42 = vpop.f32.mrf.mxu0  ;;  %v10499_v17 = vadd.f32 %v11545_v25, %v10248_v59 }
 0x963   : > { %v11547_v40 = vpop.f32.mrf.mxu1 }
 0x964   : > { %v10597_v62 = vpop.f32.mrf.mxu0  ;;  %v11548_v37 = vadd.f32 %v11547_v40, %v11546_v9  ;;  %v10246_v9 = vld [vmem:[%s15244_s6 + $0x40] sm:$0xff] }
 0x965   : > { %v11549_v31 = vpop.f32.mrf.mxu1  ;;  %v10491_v19 = vadd.f32 %v11539_v20, %v10246_v9 }
 0x966   : > { %v10599_v32 = vpop.f32.mrf.mxu0  ;;  %v10502_v38 = vadd.f32 %v11548_v37, %v10249_v29 }
 0x967   : > { %v11550_v46 = vpop.f32.mrf.mxu1  ;;  %v10587_v58 = vadd.f32 %v15112_v50, %v10491_v19 }
 0x968   : > { %v10602_v49 = vpop.f32.mrf.mxu0  ;;  %v11551_v47 = vadd.f32 %v11550_v46, %v11549_v31  ;;  %v10598_v42 = vadd.f32 %v10597_v62, %v10502_v38  ;;  %v10595_v46 = vadd.f32 %v10594_v34, %v10499_v17  ;;  %v10658_v17 = vld [vmem:[%s15246_s8 + $0x40] sm:$0xff] }
 0x969   : > { %v11552_v8 = vpop.f32.mrf.mxu1 }
 0x96a   : > { %v10604_v26 = vpop.f32.mrf.mxu0  ;;  %v10507_v61 = vadd.f32 %v11551_v47, %v10250_v39  ;;  %v10627_v62 = vmax.f32 %v10598_v42, 0.0  ;;  %v10626_v34 = vmax.f32 %v10595_v46, 0.0 }
 0x96b   : > { %v11553_v53 = vpop.f32.mrf.mxu1  ;;  %v10486_v26 = vadd.f32 %v11536_v33, %v10245_v10  ;;  %v10659_v33 = vld [vmem:[%s15246_s8 + $0x48] sm:$0xff] }
 0x96c   : > { %v11554_v48 = vadd.f32 %v11553_v53, %v11552_v8  ;;  %v10605_v18 = vpop.f32.mrf.mxu0  ;;  %v10603_v35 = vadd.f32 %v10602_v49, %v10507_v61  ;;  %v10244_v8 = vld [vmem:[%s15244_s6 + $0x30] sm:$0xff]  ;;  %v10590_v53 = vadd.f32 %v10589_v51, %v10494_v16  ;;  %v10242_v51 = vld [vmem:[%s15244_s6 + $0x20] sm:$0xff] }
 0x96d   : > { %v11555_v15 = vpop.f32.mrf.mxu1  ;;  %v10483_v5 = vadd.f32 %v11533_v52, %v10244_v8  ;;  %v10475_v37 = vadd.f32 %v11527_v54, %v10242_v51  ;;  %v10656_v16 = vld [vmem:[%s15246_s8 + $0x30] sm:$0xff]  ;;  %v10655_v52 = vld [vmem:[%s15246_s8 + $0x28] sm:$0xff] }
 0x96e   : > { %v10510_v3 = vadd.f32 %v11554_v48, %v10251_v45  ;;  %v10607_v41 = vpop.f32.mrf.mxu0  ;;  %v10628_v49 = vmax.f32 %v10603_v35, 0.0  ;;  %v10478_v48 = vadd.f32 %v11530_v57, %v10243_v44  ;;  %v10625_v39 = vmax.f32 %v10590_v53, 0.0  ;;  %v10653_v53 = vld [vmem:[%s15246_s8 + $0x18] sm:$0xff] }
 0x96f   : > { %v11556_v55 = vpop.f32.mrf.mxu1  ;;  %v10624_v41 = vmax.f32 %v10587_v58, 0.0  ;;  %v10571_v29 = vadd.f32 %v15094_v12, %v10475_v37  ;;  %v12256_v12 = vld [vmem:[%s15245_s7 + $0x8] sm:$0xff]  }
 0x970   : > { %v11557_v63 = vadd.f32 %v11556_v55, %v11555_v15  ;;  %v10610_v56 = vpop.f32.mrf.mxu0  ;;  %v10606_v28 = vadd.f32 %v10605_v18, %v10510_v3  ;;  %v10582_v18 = vadd.f32 %v15110_v14, %v10486_v26  ;;  %v10636_v15 = vpack.c.bf16 %v10627_v62, %v10626_v34  ;;  %v10651_v58 = vld [vmem:[%s15246_s8 + $0x8] sm:$0xff] }
 0x971   : > { %v11558_v24 = vpop.f32.mrf.mxu1  ;;  %v10579_v3 = vadd.f32 %v15108_v36, %v10483_v5  ;;  %v10574_v2 = vadd.f32 %v15102_v22, %v10478_v48  ;;  %v10635_v50 = vpack.c.bf16 %v10625_v39, %v10624_v41  ;;  %v10620_v14 = vmax.f32 %v10571_v29, 0.0  ;;  %v12257_v22 = vld [vmem:[%s15245_s7 + $0x10] sm:$0xff]   ;;  %v12259_v36 = vld [vmem:[%s15245_s7 + $0x20] sm:$0xff]  }
 0x972   : > { %v10515_v23 = vadd.f32 %v11557_v63, %v10252_v43  ;;  %v10612_v7 = vpop.f32.mrf.mxu0  ;;  %v10629_v40 = vmax.f32 %v10606_v28, 0.0  ;;  %v10623_v60 = vmax.f32 %v10582_v18, 0.0  ;;  %v10650_v48 = vld [vmem:[%s15246_s8] sm:$0xff] }
 0x973   : > { %v11559_v13 = vpop.f32.mrf.mxu1  ;;  %v10622_v55 = vmax.f32 %v10579_v3, 0.0  ;;  %v10621_v43 = vmax.f32 %v10574_v2, 0.0  ;;  %v10660_v7 = vld [vmem:[%s15246_s8 + $0x50] sm:$0xf]  ;;  %v12261_v29 = vld [vmem:[%s15247_s9] sm:$0x1f]  }
 0x974   : > { %v10611_v1 = vadd.f32 %v10610_v56, %v10515_v23  ;;  %v10613_v21 = vpop.f32.mrf.mxu0  ;;  %v10637_v45 = vpack.c.bf16 %v10629_v40, %v10628_v49 }
 0x975   : > { %v10634_v25 = vpack.c.bf16 %v10623_v60, %v10622_v55  ;;  %v10633_v61 = vpack.c.bf16 %v10621_v43, %v10620_v14  ;;  %v10810_v55 = vld [vmem:[%s15248_s10] sm:$0xff]  ;;  %v10811_v14 = vld [vmem:[%s15248_s10 + $0x8] sm:$0x3] }
 0x976   : > { %v10630_v31 = vmax.f32 %v10611_v1, 0.0  ;;  %v10614_v32 = vpop.f32.mrf.mxu0  ;;  %v10657_v1 = vld [vmem:[%s15246_s8 + $0x38] sm:$0xff] }
 0x978   : > { %v10638_v6 = vpack.c.bf16 %v10630_v31, %v10630_v31 }
 0x97a   : > { %11926 = vmatprep.subr.msk.bf16.mxu1 %vm438_vm1, %v10638_v6  ;;  %v10709_v47 = vsel %vm438_vm1, %v10638_v6, 0  ;;  %vm10821_vm1 = vcmask 1041408   ;;  %v10654_v6 = vld [vmem:[%s15246_s8 + $0x20] sm:$0xff] }
 0x97b   : > { %11883 = vmatpush3.bf16.msra.mxu1 %v10709_v47  ;;  %v10652_v47 = vld [vmem:[%s15246_s8 + $0x10] sm:$0xff] }
 0x97c   : > { %11884 = vmatprep.subr.bf16.mxu1 %v10637_v45 }
 0x97f   : > { %11885 = vmatpush3.bf16.msra.mxu1 %v10637_v45 }
 0x980   : > { %11886 = vmatprep.subr.bf16.mxu1 %v10636_v15 }
 0x983   : > { %11887 = vmatpush3.bf16.msra.mxu1 %v10636_v15 }
 0x984   : > { %11888 = vmatprep.subr.bf16.mxu1 %v10635_v50 }
 0x987   : > { %11889 = vmatpush3.bf16.msra.mxu1 %v10635_v50 }
 0x988   : > { %11890 = vmatprep.subr.bf16.mxu1 %v10634_v25 }
 0x98b   : > { %11891 = vmatpush3.bf16.msra.mxu1 %v10634_v25 }
 0x98c   : > { %11892 = vmatprep.subr.bf16.mxu1 %v10633_v61 }
 0x98f   : > { %11893 = vmatpush3.bf16.msra.mxu1 %v10633_v61 }
 0x990   : > { %11894 = vmatprep.subr.bf16.mxu1 %v15100_v4 }
 0x993   : > { %11895 = vmatpush3.bf16.msra.mxu1 %v15100_v4  ;;  %v12258_v4 = vld [vmem:[%s15245_s7 + $0x18] sm:$0xff]  }
 0x994   : > { %11896 = vmatprep.subr.bf16.mxu1 %v15088_v11 }
 0x997   : > { %11897 = vmatpush3.bf16.msra.mxu1 %v15088_v11  ;;  %v12260_v11 = vld [vmem:[%s15245_s7 + $0x28] ss:$0 sps:$4 sm:$0x33]  }
 0x99a   : > { %11899 = vmatmul.mubr.msk.bf16.vlgmr.msra.gmra.mxu1 %vm6485_vm5, %v12256_v12 }
 0x99b   : > { %11902 = vmatprep.mubr.msk.bf16.mxu1 %vm6485_vm5, %v12257_v22 }
 0x9a2   : > { %11903 = vmatmul.mubr.msk.bf16.gmra.mxu1 %vm6485_vm5, %v12258_v4 }
 0x9a3   : > { %11906 = vmatprep.mubr.msk.bf16.mxu1 %vm6485_vm5, %v12259_v36 }
 0x9aa   : > { %11907 = vmatmul.mubr.msk.bf16.gmra.mxu1 %vm6485_vm5, %v12260_v11 }
 0xa5a   : > { %v11900_v63 = vpop.f32.mrf.mxu1 }
 0xa5b   : > { %v10754_v34 = vadd.f32 %v11900_v63, %v10652_v47 }
 0xa5c   : > { %v10745_v56 = vpop.f32.mrf.mxu1 }
 0xa5d   : > { %v10793_v37 = vmax.f32 %v10754_v34, 0.0  ;;  %v10746_v3 = vadd.f32 %v10745_v56, %v10650_v48 }
 0xa5e   : > { %v11901_v59 = vpop.f32.mrf.mxu1 }
 0xa5f   : > { %v10757_v44 = vadd.f32 %v11901_v59, %v10653_v53  ;;  %v10791_v60 = vmax.f32 %v10746_v3, 0.0 }
 0xa60   : > { %v10748_v24 = vpop.f32.mrf.mxu1 }
 0xa61   : > { %v10794_v18 = vmax.f32 %v10757_v44, 0.0  ;;  %v10749_v39 = vadd.f32 %v10748_v24, %v10651_v58 }
 0xa62   : > { %v11904_v30 = vpop.f32.mrf.mxu1 }
 0xa63   : > { %v10770_v19 = vadd.f32 %v11904_v30, %v10656_v16  ;;  %v10803_v41 = vpack.c.bf16 %v10794_v18, %v10793_v37  ;;  %v10792_v2 = vmax.f32 %v10749_v39, 0.0 }
 0xa64   : > { %v10761_v38 = vpop.f32.mrf.mxu1 }
 0xa65   : > { %v10797_v62 = vmax.f32 %v10770_v19, 0.0  ;;  %v10762_v45 = vadd.f32 %v10761_v38, %v10654_v6  ;;  %v10802_v50 = vpack.c.bf16 %v10792_v2, %v10791_v60 }
 0xa66   : > { %v11905_v28 = vpop.f32.mrf.mxu1 }
 0xa67   : > { %v10773_v40 = vadd.f32 %v11905_v28, %v10657_v1  ;;  %v10795_v51 = vmax.f32 %v10762_v45, 0.0 }
 0xa68   : > { %v10764_v23 = vpop.f32.mrf.mxu1 }
 0xa69   : > { %v10798_v57 = vmax.f32 %v10773_v40, 0.0  ;;  %v10765_v8 = vadd.f32 %v10764_v23, %v10655_v52 }
 0xa6a   : > { %v11908_v27 = vpop.f32.mrf.mxu1 }
 0xa6b   : > { %v10786_v13 = vadd.f32 %v11908_v27, %v10660_v7  ;;  %v10805_v54 = vpack.c.bf16 %v10798_v57, %v10797_v62  ;;  %v10796_v5 = vmax.f32 %v10765_v8, 0.0 }
 0xa6c   : > { %v10777_v20 = vpop.f32.mrf.mxu1 }
 0xa6d   : > { %v10801_v35 = vmax.f32 %v10786_v13, 0.0  ;;  %v10778_v10 = vadd.f32 %v10777_v20, %v10658_v17  ;;  %v10804_v15 = vpack.c.bf16 %v10796_v5, %v10795_v51 }
 0xa6e   : > { %v11909_v21 = vpop.f32.mrf.mxu1 }
 0xa6f   : > { %v10807_v9 = vpack.c.bf16 %v10801_v35, %v10801_v35  ;;  %v10799_v46 = vmax.f32 %v10778_v10, 0.0 }
 0xa70   : > { %v10780_v42 = vpop.f32.mrf.mxu1 }
 0xa71   : > { %v10781_v31 = vadd.f32 %v10780_v42, %v10659_v33  ;;  %v10823_v32 = vsel %vm10821_vm1, %v10807_v9, 0 }
 0xa72   : > { %11911 = vmatpush3.bf16.msra.mxu0 %v10823_v32 }
 0xa73   : > { %v10800_v49 = vmax.f32 %v10781_v31, 0.0  ;;  %11912 = vmatprep.subr.bf16.mxu0 %v15302_v0 }
 0xa75   : > { %v10806_v26 = vpack.c.bf16 %v10800_v49, %v10799_v46 }
 0xa77   : > { %11913 = vmatpush3.bf16.msra.mxu0 %v10806_v26 }
 0xa78   : > { %11914 = vmatprep.subr.bf16.mxu0 %v15302_v0 }
 0xa7b   : > { %11915 = vmatpush3.bf16.msra.mxu0 %v10805_v54 }
 0xa7c   : > { %11916 = vmatprep.subr.bf16.mxu0 %v15302_v0 }
 0xa7f   : > { %11917 = vmatpush3.bf16.msra.mxu0 %v10804_v15 }
 0xa80   : > { %11918 = vmatprep.subr.bf16.mxu0 %v15302_v0 }
 0xa83   : > { %11919 = vmatpush3.bf16.msra.mxu0 %v10803_v41 }
 0xa84   : > { %11920 = vmatprep.subr.bf16.mxu0 %v15302_v0 }
 0xa87   : > { %11921 = vmatpush3.bf16.msra.mxu0 %v10802_v50 }
 0xa8a   : > { %11923 = vmatmul.mubr.msk.bf16.vlgmr.msra.gmra.mxu0 %vm10817_vm3, %v12261_v29 }
 0xb4a   : > { %v10859_v43 = vpop.f32.mrf.mxu0 }
 0xb4b   : > { %v10860_v0 = vadd.f32 %v10859_v43, %v10810_v55 }
 0xb4c   : > { %v11924_v25 = vpop.f32.mrf.mxu0 }
 0xb4d   : > { %10867 = vst.msk [vmem:[%s386_s21] sm:$0xff] %vm10866_vm4, %v10860_v0 }
 0xb4e   : > { %v10862_v61 = vpop.f32.mrf.mxu0 }
 0xb4f   : > { %v10863_v12 = vadd.f32 %v10862_v61, %v10811_v14 }
 0xb50   : > { %v11925_v22 = vpop.f32.mrf.mxu0 }
 0xb51   : > { %10869 = vst.msk [vmem:[%s386_s21 + $0x8] sm:$0x3] %vm10868_vm6, %v10863_v12 }
 0xb52 PF: > { %s21_s17 = sadd.s32 1, %s12268_s17  }
 0xb53   : > { %p18_p4 = scmp.ge.s32.totalorder %s21_s17, 4  }
 0xb55   :  { %20 = sbr.rel (!%p18_p4) target bundleno = 1 (0x1), region = 142 }

</bundles_post_ra>
